<compile_context>
chip_gen: v6e
topology: v6e:2x2x1
jax: 0.10.0
libtpu: 0.0.40
codegen_flags: <defaults>
</compile_context>

<pallas_src>
import math
import numpy as np

import jax
import jax.numpy as jnp
from jax import lax
from jax.experimental import pallas as pl
from jax.experimental.pallas import tpu as pltpu

# ---------------- configuration (small, consistent with the module) ---------
B = 2            # batch
T = 20           # sequence length
FIN = 12         # input_dim
D = 64           # d_model
NHEAD = 4
HD = D // NHEAD  # head dim
FF = 128         # dim_feedforward
NLOW = 2
NHIGH = 2
L = NLOW + NHIGH
POOL = 10        # pool_output_size
NCLS = 21        # num_classes
CH = 128         # classifier hidden
OUT_PAD = 128    # lane-padded logits width
EPS = 1e-5
NEG = -1e9       # cross-sample attention mask value

RL = B * T       # flattened rows, low stage  (40)
RH = B * POOL    # flattened rows, high stage (20)


def _align(n, a):
    return -(-n // a) * a


# ---------------- packed-slab layout (static offsets) ------------------------
# bf16 slab, 128 lanes wide, 16-row aligned items
QKW_OFF = 0                                  # (L, D, 2D)  rows QKW_OFF + l*D
L1W_OFF = QKW_OFF + L * D                    # (L, D, FF)
C1W_OFF = L1W_OFF + L * D                    # (D, CH)
C2W_OFF = C1W_OFF + D                        # (CH, OUT_PAD)
W128_ROWS = C2W_OFF + CH

# bf16 slab, 64 lanes wide, 16-row aligned items
WIN_OFF = 0                                  # (FIN, D)
VOUT_OFF = _align(WIN_OFF + FIN, 16)         # (L, NHEAD, D, D) folded V@out
L2W_OFF = VOUT_OFF + L * NHEAD * D           # (L, FF, D)
GATEW_OFF = L2W_OFF + L * FF                 # (D, D)
POOL_OFF = GATEW_OFF + D                     # (RH, RL) block-diag avg pool
W64_ROWS = POOL_OFF + _align(RH, 16)

# f32 slab, 128 lanes wide, 8-row aligned items; per-layer rows strided by 8
PE_OFF = 0                                   # (RL, D) pos-enc + input bias
QKB_OFF = PE_OFF + _align(RL, 8)             # (1, 2D) per layer at +8*l
ATTNB_OFF = QKB_OFF + 8 * L                  # (1, D)  out_b + b_v @ W_out
LN1W_OFF = ATTNB_OFF + 8 * L
LN1B_OFF = LN1W_OFF + 8 * L
L1B_OFF = LN1B_OFF + 8 * L                   # (1, FF)
L2B_OFF = L1B_OFF + 8 * L
LN2W_OFF = L2B_OFF + 8 * L
LN2B_OFF = LN2W_OFF + 8 * L
GATEB_OFF = LN2B_OFF + 8 * L
C1B_OFF = GATEB_OFF + 8
C2B_OFF = C1B_OFF + 8
MASKLO_OFF = C2B_OFF + 8                     # (RL, RL)
MASKHI_OFF = MASKLO_OFF + _align(RL, 8)      # (RH, RH)
MEAN_OFF = MASKHI_OFF + _align(RH, 8)        # (B, RH)
F32_ROWS = MEAN_OFF + _align(B, 8)


# ---------------- shared in-kernel math --------------------------------------
def _layer_norm(x, w, b):
    # var = E[x^2] - mu^2: the two cross-lane reductions are independent.
    mu = jnp.mean(x, axis=-1, keepdims=True)
    ms = jnp.mean(x * x, axis=-1, keepdims=True)
    return (x - mu) * lax.rsqrt(ms - mu * mu + EPS) * w + b


def _mm(a, w_bf16):
    """f32 activations x bf16 weights -> f32 accumulation on the MXU."""
    return jnp.dot(a.astype(jnp.bfloat16), w_bf16,
                   preferred_element_type=jnp.float32)


# ---------------- fused encoder layer (inside the kernel) --------------------
def _encoder_layer(h, mask, l, w128, w64, f):
    """h: (R, D) f32 flattened over (batch, seq); mask: (R, R) block-diag."""
    h_bf = h.astype(jnp.bfloat16)

    # QK projection only (V is folded into the output projection); the
    # 1/sqrt(HD) scale is folded into the Q weights/bias on the host.
    qk_w = w128[QKW_OFF + l * D:QKW_OFF + (l + 1) * D, :]            # (D, 2D)
    qk_b = f[QKB_OFF + 8 * l:QKB_OFF + 8 * l + 1, :]                 # (1, 2D)
    qk = jnp.dot(h_bf, qk_w, preferred_element_type=jnp.float32) + qk_b

    # attention, accumulated per head:  sum_h p_h @ (h @ (Wv_h @ Wout_h))
    attn = f[ATTNB_OFF + 8 * l:ATTNB_OFF + 8 * l + 1, :D]            # folded bias
    for hh in range(NHEAD):
        lo = hh * HD
        qh = qk[:, lo:lo + HD].astype(jnp.bfloat16)                  # (R, HD)
        kh = qk[:, D + lo:D + lo + HD].astype(jnp.bfloat16)          # (R, HD)
        # scores = qh @ kh.T without materializing the transpose
        s = lax.dot_general(qh, kh, (((1,), (1,)), ((), ())),
                            preferred_element_type=jnp.float32)      # (R, R)
        s = s + mask                                                 # kill cross-sample
        s = s - jnp.max(s, axis=-1, keepdims=True)                   # kept (cheap, safe)
        p = jnp.exp(s)
        p = p * pl.reciprocal(jnp.sum(p, axis=-1, keepdims=True), approx=True)
        vo = w64[VOUT_OFF + (l * NHEAD + hh) * D:
                 VOUT_OFF + (l * NHEAD + hh + 1) * D, :]             # (D, D)
        vh = jnp.dot(h_bf, vo, preferred_element_type=jnp.float32)   # (R, D)
        attn = attn + jnp.dot(p.astype(jnp.bfloat16), vh.astype(jnp.bfloat16),
                              preferred_element_type=jnp.float32)    # (R, D)

    h = _layer_norm(h + attn,
                    f[LN1W_OFF + 8 * l:LN1W_OFF + 8 * l + 1, :D],
                    f[LN1B_OFF + 8 * l:LN1B_OFF + 8 * l + 1, :D])

    # feed-forward
    l1_w = w128[L1W_OFF + l * D:L1W_OFF + (l + 1) * D, :]            # (D, FF)
    l1_b = f[L1B_OFF + 8 * l:L1B_OFF + 8 * l + 1, :]                 # (1, FF)
    ffa = jnp.maximum(_mm(h, l1_w) + l1_b, 0.0)
    l2_w = w64[L2W_OFF + l * FF:L2W_OFF + (l + 1) * FF, :]           # (FF, D)
    l2_b = f[L2B_OFF + 8 * l:L2B_OFF + 8 * l + 1, :D]
    ffo = _mm(ffa, l2_w) + l2_b
    return _layer_norm(h + ffo,
                       f[LN2W_OFF + 8 * l:LN2W_OFF + 8 * l + 1, :D],
                       f[LN2B_OFF + 8 * l:LN2B_OFF + 8 * l + 1, :D])


# ---------------- Pallas kernel ----------------------------------------------
def _kernel(x_ref, w128, w64, f, o_ref):
    # input projection; input-proj bias folded into (batch-tiled) pos-encoding
    w_in = w64[WIN_OFF:WIN_OFF + FIN, :]                             # (FIN, D)
    pe = f[PE_OFF:PE_OFF + RL, :D]                                   # (RL, D)
    h = _mm(x_ref[...], w_in) + pe                                   # (RL, D)

    mask_lo = f[MASKLO_OFF:MASKLO_OFF + RL, :RL]                     # (RL, RL)
    for l in range(NLOW):
        h = _encoder_layer(h, mask_lo, l, w128, w64, f)

    # AdaptiveAvgPool1d over T as a block-diag averaging matmul (bf16 exact)
    pool = w64[POOL_OFF:POOL_OFF + RH, :RL]                          # (RH, RL)
    pooled = jnp.dot(pool, h.astype(jnp.bfloat16),
                     preferred_element_type=jnp.float32)             # (RH, D)

    # self-gating
    gate_w = w64[GATEW_OFF:GATEW_OFF + D, :]
    gate_b = f[GATEB_OFF:GATEB_OFF + 1, :D]
    g = jax.nn.sigmoid(_mm(pooled, gate_w) + gate_b)
    h = pooled * g

    mask_hi = f[MASKHI_OFF:MASKHI_OFF + RH, :RH]                     # (RH, RH)
    for l in range(NLOW, L):
        h = _encoder_layer(h, mask_hi, l, w128, w64, f)

    # per-sample mean over POOL positions (kept f32: 1/POOL not bf16 exact)
    mean = f[MEAN_OFF:MEAN_OFF + B, :RH]                             # (B, RH)
    rep = jnp.dot(mean, h, preferred_element_type=jnp.float32)       # (B, D)

    # classifier (logits lane-padded to 128 -> unmasked store)
    c1_w = w128[C1W_OFF:C1W_OFF + D, :]
    c1_b = f[C1B_OFF:C1B_OFF + 1, :]
    hid = jnp.maximum(_mm(rep, c1_w) + c1_b, 0.0)                    # (B, CH)
    c2_w = w128[C2W_OFF:C2W_OFF + CH, :]
    c2_b = f[C2B_OFF:C2B_OFF + 1, :]
    o_ref[...] = _mm(hid, c2_w) + c2_b                               # (B, OUT_PAD)


def run_model(x, kparams):
    w128, w64, fslab = kparams
    x_flat = x.reshape(RL, FIN)
    vmem = pl.BlockSpec(memory_space=pltpu.MemorySpace.VMEM)
    out = pl.pallas_call(
        _kernel,
        out_shape=jax.ShapeDtypeStruct((B, OUT_PAD), jnp.float32),
        in_specs=[vmem, vmem, vmem, vmem],
        out_specs=vmem,
    )(x_flat, w128, w64, fslab)
    return out[:, :NCLS]                                             # (B, NCLS)


# ---------------- host-side constant builders --------------------------------
def _pos_encoding():
    pe = np.zeros((T, D), np.float32)
    pos = np.arange(T, dtype=np.float32)[:, None]
    div = np.exp(np.arange(0, D, 2, dtype=np.float32) * (-np.log(10000.0) / D))
    pe[:, 0::2] = np.sin(pos * div)
    pe[:, 1::2] = np.cos(pos * div)
    return pe


def _pool_matrix():
    pm = np.zeros((POOL, T), np.float32)
    for i in range(POOL):
        s = (i * T) // POOL
        e = -((-(i + 1) * T) // POOL)
        pm[i, s:e] = 1.0 / (e - s)
    return pm


def _block_diag_mask(S):
    m = np.full((B * S, B * S), NEG, np.float32)
    for b in range(B):
        m[b * S:(b + 1) * S, b * S:(b + 1) * S] = 0.0
    return m


# ---------------- parameter construction (natural / unfolded, f32) -----------
def make_params():
    key = jax.random.PRNGKey(0)
    keys = iter(jax.random.split(key, 64))

    def rnd(shape, scale=0.05):
        return (scale * jax.random.normal(next(keys), shape)).astype(jnp.float32)

    w_in = rnd((FIN, D))
    b_in = rnd((1, D), 0.01)
    pe = jnp.asarray(_pos_encoding())

    qkv_w = rnd((L, D, 3 * D))
    qkv_b = rnd((L, 1, 3 * D), 0.01)
    out_w = rnd((L, D, D))
    out_b = rnd((L, 1, D), 0.01)
    ln1_w = jnp.ones((L, 1, D), jnp.float32)
    ln1_b = jnp.zeros((L, 1, D), jnp.float32)
    lin1_w = rnd((L, D, FF))
    lin1_b = rnd((L, 1, FF), 0.01)
    lin2_w = rnd((L, FF, D))
    lin2_b = rnd((L, 1, D), 0.01)
    ln2_w = jnp.ones((L, 1, D), jnp.float32)
    ln2_b = jnp.zeros((L, 1, D), jnp.float32)

    pool_m = jnp.asarray(_pool_matrix())

    gate_w = rnd((D, D))
    gate_b = rnd((1, D), 0.01)

    c1_w = rnd((D, CH))
    c1_b = rnd((1, CH), 0.01)
    c2_w = rnd((CH, NCLS))
    c2_b = rnd((1, NCLS), 0.01)

    return [w_in, b_in, pe, qkv_w, qkv_b, out_w, out_b,
            ln1_w, ln1_b, lin1_w, lin1_b, lin2_w, lin2_b, ln2_w, ln2_b,
            pool_m, gate_w, gate_b, c1_w, c1_b, c2_w, c2_b]


# ---------------- kernel parameter preparation (fold / pack into 3 slabs) ----
def prepare_kernel_params(p):
    (w_in, b_in, pe, qkv_w, qkv_b, out_w, out_b, ln1w, ln1b,
     l1w, l1b, l2w, l2b, ln2w, ln2b, pool_m, gate_w, gate_b,
     c1w, c1b, c2w, c2b) = [np.asarray(a, np.float32) for a in p]

    scale = 1.0 / math.sqrt(HD)

    # fold 1/sqrt(HD) into the Q third; keep only the QK in-projection
    qk_w = np.concatenate([qkv_w[:, :, :D] * scale, qkv_w[:, :, D:2 * D]], -1)
    qk_b = np.concatenate([qkv_b[:, :, :D] * scale, qkv_b[:, :, D:2 * D]], -1)

    # fold W_v into W_out per head: W_vout[l,h] = W_v[:,h] @ W_out[h,:]
    v_w = qkv_w[:, :, 2 * D:]                                        # (L, D, D)
    v_b = qkv_b[:, 0, 2 * D:]                                        # (L, D)
    v_w_h = v_w.reshape(L, D, NHEAD, HD).transpose(0, 2, 1, 3)       # (L,NH,D,HD)
    out_w_h = out_w.reshape(L, NHEAD, HD, D)                         # (L,NH,HD,D)
    vout_w = np.einsum('lnik,lnkj->lnij', v_w_h, out_w_h)            # (L,NH,D,D)
    # V/out biases folded into one additive bias (softmax rows sum to 1)
    attn_b = out_b[:, 0, :] + np.einsum('ld,lde->le', v_b, out_w)    # (L, D)

    # fold input-proj bias into the positional encoding, tile over batch
    pe_flat = np.tile(pe + b_in, (B, 1))                             # (RL, D)

    # block-diagonal masks / pool / mean matrices
    mask_lo = _block_diag_mask(T)                                    # (RL, RL)
    mask_hi = _block_diag_mask(POOL)                                 # (RH, RH)
    pool_big = np.kron(np.eye(B, dtype=np.float32), pool_m)          # (RH, RL)
    mean_mat = np.kron(np.eye(B, dtype=np.float32),
                       np.full((1, POOL), 1.0 / POOL, np.float32))   # (B, RH)

    # ---- slab 1: bf16, 128 lanes -------------------------------------------
    w128s = np.zeros((W128_ROWS, 128), np.float32)
    for l in range(L):
        w128s[QKW_OFF + l * D:QKW_OFF + (l + 1) * D, :] = qk_w[l]
        w128s[L1W_OFF + l * D:L1W_OFF + (l + 1) * D, :] = l1w[l]
    w128s[C1W_OFF:C1W_OFF + D, :] = c1w
    w128s[C2W_OFF:C2W_OFF + CH, :NCLS] = c2w                         # lane-pad

    # ---- slab 2: bf16, 64 lanes --------------------------------------------
    w64s = np.zeros((W64_ROWS, 64), np.float32)
    w64s[WIN_OFF:WIN_OFF + FIN, :] = w_in
    for l in range(L):
        for hh in range(NHEAD):
            r = VOUT_OFF + (l * NHEAD + hh) * D
            w64s[r:r + D, :] = vout_w[l, hh]
        w64s[L2W_OFF + l * FF:L2W_OFF + (l + 1) * FF, :] = l2w[l]
    w64s[GATEW_OFF:GATEW_OFF + D, :] = gate_w
    w64s[POOL_OFF:POOL_OFF + RH, :RL] = pool_big                     # 0.5 exact in bf16

    # ---- slab 3: f32, 128 lanes --------------------------------------------
    f32s = np.zeros((F32_ROWS, 128), np.float32)
    f32s[PE_OFF:PE_OFF + RL, :D] = pe_flat
    for l in range(L):
        f32s[QKB_OFF + 8 * l, :2 * D] = qk_b[l, 0]
        f32s[ATTNB_OFF + 8 * l, :D] = attn_b[l]
        f32s[LN1W_OFF + 8 * l, :D] = ln1w[l, 0]
        f32s[LN1B_OFF + 8 * l, :D] = ln1b[l, 0]
        f32s[L1B_OFF + 8 * l, :FF] = l1b[l, 0]
        f32s[L2B_OFF + 8 * l, :D] = l2b[l, 0]
        f32s[LN2W_OFF + 8 * l, :D] = ln2w[l, 0]
        f32s[LN2B_OFF + 8 * l, :D] = ln2b[l, 0]
    f32s[GATEB_OFF, :D] = gate_b[0]
    f32s[C1B_OFF, :CH] = c1b[0]
    f32s[C2B_OFF, :NCLS] = c2b[0]
    f32s[MASKLO_OFF:MASKLO_OFF + RL, :RL] = mask_lo
    f32s[MASKHI_OFF:MASKHI_OFF + RH, :RH] = mask_hi
    f32s[MEAN_OFF:MEAN_OFF + B, :RH] = mean_mat

    return [jnp.asarray(w128s, jnp.bfloat16),
            jnp.asarray(w64s, jnp.bfloat16),
            jnp.asarray(f32s, jnp.float32)]


# ---------------- plain-JAX f32 reference (PyTorch semantics) ----------------
def _ln_ref(x, w, b):
    mu = jnp.mean(x, axis=-1, keepdims=True)
    var = jnp.mean((x - mu) ** 2, axis=-1, keepdims=True)
    return (x - mu) * lax.rsqrt(var + EPS) * w + b


def reference(x, p):
    (w_in, b_in, pe, qkv_w, qkv_b, out_w, out_b, ln1w, ln1b,
     l1w, l1b, l2w, l2b, ln2w, ln2b, pool_m, gate_w, gate_b,
     c1w, c1b, c2w, c2b) = p
    scale = 1.0 / math.sqrt(HD)

    h = jnp.einsum('btf,fd->btd', x, w_in) + b_in + pe[None]

    def enc(h, l):
        Bb, S, _ = h.shape
        qkv = jnp.einsum('bsd,de->bse', h, qkv_w[l]) + qkv_b[l]
        q = qkv[..., :D].reshape(Bb, S, NHEAD, HD)
        k = qkv[..., D:2 * D].reshape(Bb, S, NHEAD, HD)
        v = qkv[..., 2 * D:].reshape(Bb, S, NHEAD, HD)
        s = jnp.einsum('bqhd,bkhd->bhqk', q, k) * scale
        pattn = jax.nn.softmax(s, axis=-1)
        a = jnp.einsum('bhqk,bkhd->bqhd', pattn, v).reshape(Bb, S, D)
        a = jnp.einsum('bsd,de->bse', a, out_w[l]) + out_b[l]
        h = _ln_ref(h + a, ln1w[l], ln1b[l])
        ff = jnp.maximum(jnp.einsum('bsd,df->bsf', h, l1w[l]) + l1b[l], 0.0)
        ff = jnp.einsum('bsf,fd->bsd', ff, l2w[l]) + l2b[l]
        return _ln_ref(h + ff, ln2w[l], ln2b[l])

    for l in range(NLOW):
        h = enc(h, l)
    pooled = jnp.einsum('pt,btd->bpd', pool_m, h)
    g = jax.nn.sigmoid(jnp.einsum('bpd,de->bpe', pooled, gate_w) + gate_b)
    h = pooled * g
    for l in range(NLOW, L):
        h = enc(h, l)
    rep = h.mean(axis=1)
    hid = jnp.maximum(rep @ c1w + c1b, 0.0)
    return hid @ c2w + c2b                                           # (B, NCLS)


if __name__ == "__main__":
    key = jax.random.PRNGKey(0)
    x = jax.random.normal(key, (B, T, FIN), dtype=jnp.float32)

    nat_params = make_params()
    kparams = prepare_kernel_params(nat_params)

    out = jax.block_until_ready(jax.jit(run_model)(x, kparams))
    ref = jax.block_until_ready(jax.jit(reference)(x, nat_params))

    assert out.shape == (B, NCLS)
    max_err = float(jnp.max(jnp.abs(out - ref)))
    assert jnp.allclose(out, ref, atol=1e-2, rtol=5e-2), (max_err, out, ref)

    print("KERNEL_OK")
</pallas_src>

<mosaic_0001>
module attributes {stable_mosaic.version = 11 : i64} {
  func.func @_kernel(%arg0: memref<40x12xf32, #tpu.memory_space<vmem>>, %arg1: memref<704x128xbf16, #tpu.memory_space<vmem>>, %arg2: memref<1648x64xbf16, #tpu.memory_space<vmem>>, %arg3: memref<392x128xf32, #tpu.memory_space<vmem>>, %arg4: memref<2x128xf32, #tpu.memory_space<vmem>>) attributes {dimension_semantics = [], scalar_prefetch = 0 : i64, scratch_operands = 0 : i64, tpu.core_type = #tpu.core_type<tc>} {
    %c0 = arith.constant 0 : index
    %c0_0 = arith.constant 0 : index
    %0 = vector.load %arg2[%c0, %c0_0] : memref<1648x64xbf16, #tpu.memory_space<vmem>>, vector<12x64xbf16>
    %c0_1 = arith.constant 0 : index
    %c0_2 = arith.constant 0 : index
    %1 = vector.load %arg3[%c0_1, %c0_2] : memref<392x128xf32, #tpu.memory_space<vmem>>, vector<40x64xf32>
    %c0_3 = arith.constant 0 : index
    %c0_4 = arith.constant 0 : index
    %2 = vector.load %arg0[%c0_3, %c0_4] : memref<40x12xf32, #tpu.memory_space<vmem>>, vector<40x12xf32>
    %3 = arith.truncf %2 : vector<40x12xf32> to vector<40x12xbf16>
    %cst = arith.constant dense<0.000000e+00> : vector<40x64xf32>
    %4 = tpu.matmul %3, %0, %cst {dimension_numbers = #tpu.dot_dimension_numbers<[1], [0], [0], [1], [0, 0, 1, 1], [], []>} : vector<40x12xbf16>, vector<12x64xbf16>, vector<40x64xf32> -> vector<40x64xf32>
    %5 = arith.addf %4, %1 : vector<40x64xf32>
    %c320 = arith.constant 320 : index
    %c0_5 = arith.constant 0 : index
    %6 = vector.load %arg3[%c320, %c0_5] : memref<392x128xf32, #tpu.memory_space<vmem>>, vector<40x40xf32>
    %7 = arith.truncf %5 : vector<40x64xf32> to vector<40x64xbf16>
    %c0_6 = arith.constant 0 : index
    %c0_7 = arith.constant 0 : index
    %8 = vector.load %arg1[%c0_6, %c0_7] : memref<704x128xbf16, #tpu.memory_space<vmem>>, vector<64x128xbf16>
    %c40 = arith.constant 40 : index
    %c0_8 = arith.constant 0 : index
    %9 = vector.load %arg3[%c40, %c0_8] : memref<392x128xf32, #tpu.memory_space<vmem>>, vector<1x128xf32>
    %cst_9 = arith.constant dense<0.000000e+00> : vector<40x128xf32>
    %10 = tpu.matmul %7, %8, %cst_9 {dimension_numbers = #tpu.dot_dimension_numbers<[1], [0], [0], [1], [0, 0, 1, 1], [], []>} : vector<40x64xbf16>, vector<64x128xbf16>, vector<40x128xf32> -> vector<40x128xf32>
    %11 = vector.broadcast %9 : vector<1x128xf32> to vector<40x128xf32>
    %12 = arith.addf %10, %11 : vector<40x128xf32>
    %c72 = arith.constant 72 : index
    %c0_10 = arith.constant 0 : index
    %13 = vector.load %arg3[%c72, %c0_10] : memref<392x128xf32, #tpu.memory_space<vmem>>, vector<1x64xf32>
    %14 = vector.extract_strided_slice %12 {offsets = [0, 0], sizes = [40, 16], strides = [1, 1]} : vector<40x128xf32> to vector<40x16xf32>
    %15 = arith.truncf %14 : vector<40x16xf32> to vector<40x16xbf16>
    %16 = vector.extract_strided_slice %12 {offsets = [0, 64], sizes = [40, 16], strides = [1, 1]} : vector<40x128xf32> to vector<40x16xf32>
    %17 = arith.truncf %16 : vector<40x16xf32> to vector<40x16xbf16>
    %cst_11 = arith.constant dense<0.000000e+00> : vector<40x40xf32>
    %18 = tpu.matmul %15, %17, %cst_11 {dimension_numbers = #tpu.dot_dimension_numbers<[1], [1], [0], [0], [0, 0, 1, 0], [], []>} : vector<40x16xbf16>, vector<40x16xbf16>, vector<40x40xf32> -> vector<40x40xf32>
    %19 = arith.addf %18, %6 : vector<40x40xf32>
    %cst_12 = arith.constant dense<0xFF800000> : vector<40xf32>
    %20 = vector.multi_reduction <maximumf>, %19, %cst_12 [1] : vector<40x40xf32> to vector<40xf32>
    %21 = vector.shape_cast %20 : vector<40xf32> to vector<40x1xf32>
    %22 = vector.broadcast %21 : vector<40x1xf32> to vector<40x40xf32>
    %23 = arith.subf %19, %22 : vector<40x40xf32>
    %24 = math.exp %23 : vector<40x40xf32>
    %cst_13 = arith.constant dense<0.000000e+00> : vector<40xf32>
    %25 = vector.multi_reduction <add>, %24, %cst_13 [1] : vector<40x40xf32> to vector<40xf32>
    %26 = vector.shape_cast %25 : vector<40xf32> to vector<40x1xf32>
    %27 = tpu.reciprocal %26 {approx = true} : vector<40x1xf32> -> vector<40x1xf32>
    %28 = vector.broadcast %27 : vector<40x1xf32> to vector<40x40xf32>
    %29 = arith.mulf %24, %28 : vector<40x40xf32>
    %c16 = arith.constant 16 : index
    %c0_14 = arith.constant 0 : index
    %30 = vector.load %arg2[%c16, %c0_14] : memref<1648x64xbf16, #tpu.memory_space<vmem>>, vector<64x64xbf16>
    %cst_15 = arith.constant dense<0.000000e+00> : vector<40x64xf32>
    %31 = tpu.matmul %7, %30, %cst_15 {dimension_numbers = #tpu.dot_dimension_numbers<[1], [0], [0], [1], [0, 0, 1, 1], [], []>} : vector<40x64xbf16>, vector<64x64xbf16>, vector<40x64xf32> -> vector<40x64xf32>
    %32 = arith.truncf %29 : vector<40x40xf32> to vector<40x40xbf16>
    %33 = arith.truncf %31 : vector<40x64xf32> to vector<40x64xbf16>
    %cst_16 = arith.constant dense<0.000000e+00> : vector<40x64xf32>
    %34 = tpu.matmul %32, %33, %cst_16 {dimension_numbers = #tpu.dot_dimension_numbers<[1], [0], [0], [1], [0, 0, 1, 1], [], []>} : vector<40x40xbf16>, vector<40x64xbf16>, vector<40x64xf32> -> vector<40x64xf32>
    %35 = vector.broadcast %13 : vector<1x64xf32> to vector<40x64xf32>
    %36 = arith.addf %35, %34 : vector<40x64xf32>
    %37 = vector.extract_strided_slice %12 {offsets = [0, 16], sizes = [40, 16], strides = [1, 1]} : vector<40x128xf32> to vector<40x16xf32>
    %38 = arith.truncf %37 : vector<40x16xf32> to vector<40x16xbf16>
    %39 = vector.extract_strided_slice %12 {offsets = [0, 80], sizes = [40, 16], strides = [1, 1]} : vector<40x128xf32> to vector<40x16xf32>
    %40 = arith.truncf %39 : vector<40x16xf32> to vector<40x16xbf16>
    %cst_17 = arith.constant dense<0.000000e+00> : vector<40x40xf32>
    %41 = tpu.matmul %38, %40, %cst_17 {dimension_numbers = #tpu.dot_dimension_numbers<[1], [1], [0], [0], [0, 0, 1, 0], [], []>} : vector<40x16xbf16>, vector<40x16xbf16>, vector<40x40xf32> -> vector<40x40xf32>
    %42 = arith.addf %41, %6 : vector<40x40xf32>
    %cst_18 = arith.constant dense<0xFF800000> : vector<40xf32>
    %43 = vector.multi_reduction <maximumf>, %42, %cst_18 [1] : vector<40x40xf32> to vector<40xf32>
    %44 = vector.shape_cast %43 : vector<40xf32> to vector<40x1xf32>
    %45 = vector.broadcast %44 : vector<40x1xf32> to vector<40x40xf32>
    %46 = arith.subf %42, %45 : vector<40x40xf32>
    %47 = math.exp %46 : vector<40x40xf32>
    %cst_19 = arith.constant dense<0.000000e+00> : vector<40xf32>
    %48 = vector.multi_reduction <add>, %47, %cst_19 [1] : vector<40x40xf32> to vector<40xf32>
    %49 = vector.shape_cast %48 : vector<40xf32> to vector<40x1xf32>
    %50 = tpu.reciprocal %49 {approx = true} : vector<40x1xf32> -> vector<40x1xf32>
    %51 = vector.broadcast %50 : vector<40x1xf32> to vector<40x40xf32>
    %52 = arith.mulf %47, %51 : vector<40x40xf32>
    %c80 = arith.constant 80 : index
    %c0_20 = arith.constant 0 : index
    %53 = vector.load %arg2[%c80, %c0_20] : memref<1648x64xbf16, #tpu.memory_space<vmem>>, vector<64x64xbf16>
    %cst_21 = arith.constant dense<0.000000e+00> : vector<40x64xf32>
    %54 = tpu.matmul %7, %53, %cst_21 {dimension_numbers = #tpu.dot_dimension_numbers<[1], [0], [0], [1], [0, 0, 1, 1], [], []>} : vector<40x64xbf16>, vector<64x64xbf16>, vector<40x64xf32> -> vector<40x64xf32>
    %55 = arith.truncf %52 : vector<40x40xf32> to vector<40x40xbf16>
    %56 = arith.truncf %54 : vector<40x64xf32> to vector<40x64xbf16>
    %cst_22 = arith.constant dense<0.000000e+00> : vector<40x64xf32>
    %57 = tpu.matmul %55, %56, %cst_22 {dimension_numbers = #tpu.dot_dimension_numbers<[1], [0], [0], [1], [0, 0, 1, 1], [], []>} : vector<40x40xbf16>, vector<40x64xbf16>, vector<40x64xf32> -> vector<40x64xf32>
    %58 = arith.addf %36, %57 : vector<40x64xf32>
    %59 = vector.extract_strided_slice %12 {offsets = [0, 32], sizes = [40, 16], strides = [1, 1]} : vector<40x128xf32> to vector<40x16xf32>
    %60 = arith.truncf %59 : vector<40x16xf32> to vector<40x16xbf16>
    %61 = vector.extract_strided_slice %12 {offsets = [0, 96], sizes = [40, 16], strides = [1, 1]} : vector<40x128xf32> to vector<40x16xf32>
    %62 = arith.truncf %61 : vector<40x16xf32> to vector<40x16xbf16>
    %cst_23 = arith.constant dense<0.000000e+00> : vector<40x40xf32>
    %63 = tpu.matmul %60, %62, %cst_23 {dimension_numbers = #tpu.dot_dimension_numbers<[1], [1], [0], [0], [0, 0, 1, 0], [], []>} : vector<40x16xbf16>, vector<40x16xbf16>, vector<40x40xf32> -> vector<40x40xf32>
    %64 = arith.addf %63, %6 : vector<40x40xf32>
    %cst_24 = arith.constant dense<0xFF800000> : vector<40xf32>
    %65 = vector.multi_reduction <maximumf>, %64, %cst_24 [1] : vector<40x40xf32> to vector<40xf32>
    %66 = vector.shape_cast %65 : vector<40xf32> to vector<40x1xf32>
    %67 = vector.broadcast %66 : vector<40x1xf32> to vector<40x40xf32>
    %68 = arith.subf %64, %67 : vector<40x40xf32>
    %69 = math.exp %68 : vector<40x40xf32>
    %cst_25 = arith.constant dense<0.000000e+00> : vector<40xf32>
    %70 = vector.multi_reduction <add>, %69, %cst_25 [1] : vector<40x40xf32> to vector<40xf32>
    %71 = vector.shape_cast %70 : vector<40xf32> to vector<40x1xf32>
    %72 = tpu.reciprocal %71 {approx = true} : vector<40x1xf32> -> vector<40x1xf32>
    %73 = vector.broadcast %72 : vector<40x1xf32> to vector<40x40xf32>
    %74 = arith.mulf %69, %73 : vector<40x40xf32>
    %c144 = arith.constant 144 : index
    %c0_26 = arith.constant 0 : index
    %75 = vector.load %arg2[%c144, %c0_26] : memref<1648x64xbf16, #tpu.memory_space<vmem>>, vector<64x64xbf16>
    %cst_27 = arith.constant dense<0.000000e+00> : vector<40x64xf32>
    %76 = tpu.matmul %7, %75, %cst_27 {dimension_numbers = #tpu.dot_dimension_numbers<[1], [0], [0], [1], [0, 0, 1, 1], [], []>} : vector<40x64xbf16>, vector<64x64xbf16>, vector<40x64xf32> -> vector<40x64xf32>
    %77 = arith.truncf %74 : vector<40x40xf32> to vector<40x40xbf16>
    %78 = arith.truncf %76 : vector<40x64xf32> to vector<40x64xbf16>
    %cst_28 = arith.constant dense<0.000000e+00> : vector<40x64xf32>
    %79 = tpu.matmul %77, %78, %cst_28 {dimension_numbers = #tpu.dot_dimension_numbers<[1], [0], [0], [1], [0, 0, 1, 1], [], []>} : vector<40x40xbf16>, vector<40x64xbf16>, vector<40x64xf32> -> vector<40x64xf32>
    %80 = arith.addf %58, %79 : vector<40x64xf32>
    %81 = vector.extract_strided_slice %12 {offsets = [0, 48], sizes = [40, 16], strides = [1, 1]} : vector<40x128xf32> to vector<40x16xf32>
    %82 = arith.truncf %81 : vector<40x16xf32> to vector<40x16xbf16>
    %83 = vector.extract_strided_slice %12 {offsets = [0, 112], sizes = [40, 16], strides = [1, 1]} : vector<40x128xf32> to vector<40x16xf32>
    %84 = arith.truncf %83 : vector<40x16xf32> to vector<40x16xbf16>
    %cst_29 = arith.constant dense<0.000000e+00> : vector<40x40xf32>
    %85 = tpu.matmul %82, %84, %cst_29 {dimension_numbers = #tpu.dot_dimension_numbers<[1], [1], [0], [0], [0, 0, 1, 0], [], []>} : vector<40x16xbf16>, vector<40x16xbf16>, vector<40x40xf32> -> vector<40x40xf32>
    %86 = arith.addf %85, %6 : vector<40x40xf32>
    %cst_30 = arith.constant dense<0xFF800000> : vector<40xf32>
    %87 = vector.multi_reduction <maximumf>, %86, %cst_30 [1] : vector<40x40xf32> to vector<40xf32>
    %88 = vector.shape_cast %87 : vector<40xf32> to vector<40x1xf32>
    %89 = vector.broadcast %88 : vector<40x1xf32> to vector<40x40xf32>
    %90 = arith.subf %86, %89 : vector<40x40xf32>
    %91 = math.exp %90 : vector<40x40xf32>
    %cst_31 = arith.constant dense<0.000000e+00> : vector<40xf32>
    %92 = vector.multi_reduction <add>, %91, %cst_31 [1] : vector<40x40xf32> to vector<40xf32>
    %93 = vector.shape_cast %92 : vector<40xf32> to vector<40x1xf32>
    %94 = tpu.reciprocal %93 {approx = true} : vector<40x1xf32> -> vector<40x1xf32>
    %95 = vector.broadcast %94 : vector<40x1xf32> to vector<40x40xf32>
    %96 = arith.mulf %91, %95 : vector<40x40xf32>
    %c208 = arith.constant 208 : index
    %c0_32 = arith.constant 0 : index
    %97 = vector.load %arg2[%c208, %c0_32] : memref<1648x64xbf16, #tpu.memory_space<vmem>>, vector<64x64xbf16>
    %cst_33 = arith.constant dense<0.000000e+00> : vector<40x64xf32>
    %98 = tpu.matmul %7, %97, %cst_33 {dimension_numbers = #tpu.dot_dimension_numbers<[1], [0], [0], [1], [0, 0, 1, 1], [], []>} : vector<40x64xbf16>, vector<64x64xbf16>, vector<40x64xf32> -> vector<40x64xf32>
    %99 = arith.truncf %96 : vector<40x40xf32> to vector<40x40xbf16>
    %100 = arith.truncf %98 : vector<40x64xf32> to vector<40x64xbf16>
    %cst_34 = arith.constant dense<0.000000e+00> : vector<40x64xf32>
    %101 = tpu.matmul %99, %100, %cst_34 {dimension_numbers = #tpu.dot_dimension_numbers<[1], [0], [0], [1], [0, 0, 1, 1], [], []>} : vector<40x40xbf16>, vector<40x64xbf16>, vector<40x64xf32> -> vector<40x64xf32>
    %102 = arith.addf %80, %101 : vector<40x64xf32>
    %103 = arith.addf %5, %102 : vector<40x64xf32>
    %c104 = arith.constant 104 : index
    %c0_35 = arith.constant 0 : index
    %104 = vector.load %arg3[%c104, %c0_35] : memref<392x128xf32, #tpu.memory_space<vmem>>, vector<1x64xf32>
    %c136 = arith.constant 136 : index
    %c0_36 = arith.constant 0 : index
    %105 = vector.load %arg3[%c136, %c0_36] : memref<392x128xf32, #tpu.memory_space<vmem>>, vector<1x64xf32>
    %cst_37 = arith.constant dense<0.000000e+00> : vector<40xf32>
    %106 = vector.multi_reduction <add>, %103, %cst_37 [1] : vector<40x64xf32> to vector<40xf32>
    %107 = vector.shape_cast %106 : vector<40xf32> to vector<40x1xf32>
    %cst_38 = arith.constant 6.400000e+01 : f32
    %108 = vector.broadcast %cst_38 : f32 to vector<40x1xf32>
    %109 = arith.divf %107, %108 : vector<40x1xf32>
    %110 = arith.mulf %103, %103 : vector<40x64xf32>
    %cst_39 = arith.constant dense<0.000000e+00> : vector<40xf32>
    %111 = vector.multi_reduction <add>, %110, %cst_39 [1] : vector<40x64xf32> to vector<40xf32>
    %112 = vector.shape_cast %111 : vector<40xf32> to vector<40x1xf32>
    %cst_40 = arith.constant 6.400000e+01 : f32
    %113 = vector.broadcast %cst_40 : f32 to vector<40x1xf32>
    %114 = arith.divf %112, %113 : vector<40x1xf32>
    %115 = vector.broadcast %109 : vector<40x1xf32> to vector<40x64xf32>
    %116 = arith.subf %103, %115 : vector<40x64xf32>
    %117 = arith.mulf %109, %109 : vector<40x1xf32>
    %118 = arith.subf %114, %117 : vector<40x1xf32>
    %cst_41 = arith.constant 9.99999974E-6 : f32
    %119 = vector.broadcast %cst_41 : f32 to vector<40x1xf32>
    %120 = arith.addf %118, %119 : vector<40x1xf32>
    %121 = math.rsqrt %120 : vector<40x1xf32>
    %122 = vector.broadcast %121 : vector<40x1xf32> to vector<40x64xf32>
    %123 = arith.mulf %116, %122 : vector<40x64xf32>
    %124 = vector.broadcast %104 : vector<1x64xf32> to vector<40x64xf32>
    %125 = arith.mulf %123, %124 : vector<40x64xf32>
    %126 = vector.broadcast %105 : vector<1x64xf32> to vector<40x64xf32>
    %127 = arith.addf %125, %126 : vector<40x64xf32>
    %c256 = arith.constant 256 : index
    %c0_42 = arith.constant 0 : index
    %128 = vector.load %arg1[%c256, %c0_42] : memref<704x128xbf16, #tpu.memory_space<vmem>>, vector<64x128xbf16>
    %c168 = arith.constant 168 : index
    %c0_43 = arith.constant 0 : index
    %129 = vector.load %arg3[%c168, %c0_43] : memref<392x128xf32, #tpu.memory_space<vmem>>, vector<1x128xf32>
    %130 = arith.truncf %127 : vector<40x64xf32> to vector<40x64xbf16>
    %cst_44 = arith.constant dense<0.000000e+00> : vector<40x128xf32>
    %131 = tpu.matmul %130, %128, %cst_44 {dimension_numbers = #tpu.dot_dimension_numbers<[1], [0], [0], [1], [0, 0, 1, 1], [], []>} : vector<40x64xbf16>, vector<64x128xbf16>, vector<40x128xf32> -> vector<40x128xf32>
    %132 = vector.broadcast %129 : vector<1x128xf32> to vector<40x128xf32>
    %133 = arith.addf %131, %132 : vector<40x128xf32>
    %cst_45 = arith.constant 0.000000e+00 : f32
    %134 = vector.broadcast %cst_45 : f32 to vector<40x128xf32>
    %135 = arith.maximumf %133, %134 : vector<40x128xf32>
    %c1040 = arith.constant 1040 : index
    %c0_46 = arith.constant 0 : index
    %136 = vector.load %arg2[%c1040, %c0_46] : memref<1648x64xbf16, #tpu.memory_space<vmem>>, vector<128x64xbf16>
    %c200 = arith.constant 200 : index
    %c0_47 = arith.constant 0 : index
    %137 = vector.load %arg3[%c200, %c0_47] : memref<392x128xf32, #tpu.memory_space<vmem>>, vector<1x64xf32>
    %138 = arith.truncf %135 : vector<40x128xf32> to vector<40x128xbf16>
    %cst_48 = arith.constant dense<0.000000e+00> : vector<40x64xf32>
    %139 = tpu.matmul %138, %136, %cst_48 {dimension_numbers = #tpu.dot_dimension_numbers<[1], [0], [0], [1], [0, 0, 1, 1], [], []>} : vector<40x128xbf16>, vector<128x64xbf16>, vector<40x64xf32> -> vector<40x64xf32>
    %140 = vector.broadcast %137 : vector<1x64xf32> to vector<40x64xf32>
    %141 = arith.addf %139, %140 : vector<40x64xf32>
    %142 = arith.addf %127, %141 : vector<40x64xf32>
    %c232 = arith.constant 232 : index
    %c0_49 = arith.constant 0 : index
    %143 = vector.load %arg3[%c232, %c0_49] : memref<392x128xf32, #tpu.memory_space<vmem>>, vector<1x64xf32>
    %c264 = arith.constant 264 : index
    %c0_50 = arith.constant 0 : index
    %144 = vector.load %arg3[%c264, %c0_50] : memref<392x128xf32, #tpu.memory_space<vmem>>, vector<1x64xf32>
    %cst_51 = arith.constant dense<0.000000e+00> : vector<40xf32>
    %145 = vector.multi_reduction <add>, %142, %cst_51 [1] : vector<40x64xf32> to vector<40xf32>
    %146 = vector.shape_cast %145 : vector<40xf32> to vector<40x1xf32>
    %cst_52 = arith.constant 6.400000e+01 : f32
    %147 = vector.broadcast %cst_52 : f32 to vector<40x1xf32>
    %148 = arith.divf %146, %147 : vector<40x1xf32>
    %149 = arith.mulf %142, %142 : vector<40x64xf32>
    %cst_53 = arith.constant dense<0.000000e+00> : vector<40xf32>
    %150 = vector.multi_reduction <add>, %149, %cst_53 [1] : vector<40x64xf32> to vector<40xf32>
    %151 = vector.shape_cast %150 : vector<40xf32> to vector<40x1xf32>
    %cst_54 = arith.constant 6.400000e+01 : f32
    %152 = vector.broadcast %cst_54 : f32 to vector<40x1xf32>
    %153 = arith.divf %151, %152 : vector<40x1xf32>
    %154 = vector.broadcast %148 : vector<40x1xf32> to vector<40x64xf32>
    %155 = arith.subf %142, %154 : vector<40x64xf32>
    %156 = arith.mulf %148, %148 : vector<40x1xf32>
    %157 = arith.subf %153, %156 : vector<40x1xf32>
    %cst_55 = arith.constant 9.99999974E-6 : f32
    %158 = vector.broadcast %cst_55 : f32 to vector<40x1xf32>
    %159 = arith.addf %157, %158 : vector<40x1xf32>
    %160 = math.rsqrt %159 : vector<40x1xf32>
    %161 = vector.broadcast %160 : vector<40x1xf32> to vector<40x64xf32>
    %162 = arith.mulf %155, %161 : vector<40x64xf32>
    %163 = vector.broadcast %143 : vector<1x64xf32> to vector<40x64xf32>
    %164 = arith.mulf %162, %163 : vector<40x64xf32>
    %165 = vector.broadcast %144 : vector<1x64xf32> to vector<40x64xf32>
    %166 = arith.addf %164, %165 : vector<40x64xf32>
    %167 = arith.truncf %166 : vector<40x64xf32> to vector<40x64xbf16>
    %c64 = arith.constant 64 : index
    %c0_56 = arith.constant 0 : index
    %168 = vector.load %arg1[%c64, %c0_56] : memref<704x128xbf16, #tpu.memory_space<vmem>>, vector<64x128xbf16>
    %c48 = arith.constant 48 : index
    %c0_57 = arith.constant 0 : index
    %169 = vector.load %arg3[%c48, %c0_57] : memref<392x128xf32, #tpu.memory_space<vmem>>, vector<1x128xf32>
    %cst_58 = arith.constant dense<0.000000e+00> : vector<40x128xf32>
    %170 = tpu.matmul %167, %168, %cst_58 {dimension_numbers = #tpu.dot_dimension_numbers<[1], [0], [0], [1], [0, 0, 1, 1], [], []>} : vector<40x64xbf16>, vector<64x128xbf16>, vector<40x128xf32> -> vector<40x128xf32>
    %171 = vector.broadcast %169 : vector<1x128xf32> to vector<40x128xf32>
    %172 = arith.addf %170, %171 : vector<40x128xf32>
    %c80_59 = arith.constant 80 : index
    %c0_60 = arith.constant 0 : index
    %173 = vector.load %arg3[%c80_59, %c0_60] : memref<392x128xf32, #tpu.memory_space<vmem>>, vector<1x64xf32>
    %174 = vector.extract_strided_slice %172 {offsets = [0, 0], sizes = [40, 16], strides = [1, 1]} : vector<40x128xf32> to vector<40x16xf32>
    %175 = arith.truncf %174 : vector<40x16xf32> to vector<40x16xbf16>
    %176 = vector.extract_strided_slice %172 {offsets = [0, 64], sizes = [40, 16], strides = [1, 1]} : vector<40x128xf32> to vector<40x16xf32>
    %177 = arith.truncf %176 : vector<40x16xf32> to vector<40x16xbf16>
    %cst_61 = arith.constant dense<0.000000e+00> : vector<40x40xf32>
    %178 = tpu.matmul %175, %177, %cst_61 {dimension_numbers = #tpu.dot_dimension_numbers<[1], [1], [0], [0], [0, 0, 1, 0], [], []>} : vector<40x16xbf16>, vector<40x16xbf16>, vector<40x40xf32> -> vector<40x40xf32>
    %179 = arith.addf %178, %6 : vector<40x40xf32>
    %cst_62 = arith.constant dense<0xFF800000> : vector<40xf32>
    %180 = vector.multi_reduction <maximumf>, %179, %cst_62 [1] : vector<40x40xf32> to vector<40xf32>
    %181 = vector.shape_cast %180 : vector<40xf32> to vector<40x1xf32>
    %182 = vector.broadcast %181 : vector<40x1xf32> to vector<40x40xf32>
    %183 = arith.subf %179, %182 : vector<40x40xf32>
    %184 = math.exp %183 : vector<40x40xf32>
    %cst_63 = arith.constant dense<0.000000e+00> : vector<40xf32>
    %185 = vector.multi_reduction <add>, %184, %cst_63 [1] : vector<40x40xf32> to vector<40xf32>
    %186 = vector.shape_cast %185 : vector<40xf32> to vector<40x1xf32>
    %187 = tpu.reciprocal %186 {approx = true} : vector<40x1xf32> -> vector<40x1xf32>
    %188 = vector.broadcast %187 : vector<40x1xf32> to vector<40x40xf32>
    %189 = arith.mulf %184, %188 : vector<40x40xf32>
    %c272 = arith.constant 272 : index
    %c0_64 = arith.constant 0 : index
    %190 = vector.load %arg2[%c272, %c0_64] : memref<1648x64xbf16, #tpu.memory_space<vmem>>, vector<64x64xbf16>
    %cst_65 = arith.constant dense<0.000000e+00> : vector<40x64xf32>
    %191 = tpu.matmul %167, %190, %cst_65 {dimension_numbers = #tpu.dot_dimension_numbers<[1], [0], [0], [1], [0, 0, 1, 1], [], []>} : vector<40x64xbf16>, vector<64x64xbf16>, vector<40x64xf32> -> vector<40x64xf32>
    %192 = arith.truncf %189 : vector<40x40xf32> to vector<40x40xbf16>
    %193 = arith.truncf %191 : vector<40x64xf32> to vector<40x64xbf16>
    %cst_66 = arith.constant dense<0.000000e+00> : vector<40x64xf32>
    %194 = tpu.matmul %192, %193, %cst_66 {dimension_numbers = #tpu.dot_dimension_numbers<[1], [0], [0], [1], [0, 0, 1, 1], [], []>} : vector<40x40xbf16>, vector<40x64xbf16>, vector<40x64xf32> -> vector<40x64xf32>
    %195 = vector.broadcast %173 : vector<1x64xf32> to vector<40x64xf32>
    %196 = arith.addf %195, %194 : vector<40x64xf32>
    %197 = vector.extract_strided_slice %172 {offsets = [0, 16], sizes = [40, 16], strides = [1, 1]} : vector<40x128xf32> to vector<40x16xf32>
    %198 = arith.truncf %197 : vector<40x16xf32> to vector<40x16xbf16>
    %199 = vector.extract_strided_slice %172 {offsets = [0, 80], sizes = [40, 16], strides = [1, 1]} : vector<40x128xf32> to vector<40x16xf32>
    %200 = arith.truncf %199 : vector<40x16xf32> to vector<40x16xbf16>
    %cst_67 = arith.constant dense<0.000000e+00> : vector<40x40xf32>
    %201 = tpu.matmul %198, %200, %cst_67 {dimension_numbers = #tpu.dot_dimension_numbers<[1], [1], [0], [0], [0, 0, 1, 0], [], []>} : vector<40x16xbf16>, vector<40x16xbf16>, vector<40x40xf32> -> vector<40x40xf32>
    %202 = arith.addf %201, %6 : vector<40x40xf32>
    %cst_68 = arith.constant dense<0xFF800000> : vector<40xf32>
    %203 = vector.multi_reduction <maximumf>, %202, %cst_68 [1] : vector<40x40xf32> to vector<40xf32>
    %204 = vector.shape_cast %203 : vector<40xf32> to vector<40x1xf32>
    %205 = vector.broadcast %204 : vector<40x1xf32> to vector<40x40xf32>
    %206 = arith.subf %202, %205 : vector<40x40xf32>
    %207 = math.exp %206 : vector<40x40xf32>
    %cst_69 = arith.constant dense<0.000000e+00> : vector<40xf32>
    %208 = vector.multi_reduction <add>, %207, %cst_69 [1] : vector<40x40xf32> to vector<40xf32>
    %209 = vector.shape_cast %208 : vector<40xf32> to vector<40x1xf32>
    %210 = tpu.reciprocal %209 {approx = true} : vector<40x1xf32> -> vector<40x1xf32>
    %211 = vector.broadcast %210 : vector<40x1xf32> to vector<40x40xf32>
    %212 = arith.mulf %207, %211 : vector<40x40xf32>
    %c336 = arith.constant 336 : index
    %c0_70 = arith.constant 0 : index
    %213 = vector.load %arg2[%c336, %c0_70] : memref<1648x64xbf16, #tpu.memory_space<vmem>>, vector<64x64xbf16>
    %cst_71 = arith.constant dense<0.000000e+00> : vector<40x64xf32>
    %214 = tpu.matmul %167, %213, %cst_71 {dimension_numbers = #tpu.dot_dimension_numbers<[1], [0], [0], [1], [0, 0, 1, 1], [], []>} : vector<40x64xbf16>, vector<64x64xbf16>, vector<40x64xf32> -> vector<40x64xf32>
    %215 = arith.truncf %212 : vector<40x40xf32> to vector<40x40xbf16>
    %216 = arith.truncf %214 : vector<40x64xf32> to vector<40x64xbf16>
    %cst_72 = arith.constant dense<0.000000e+00> : vector<40x64xf32>
    %217 = tpu.matmul %215, %216, %cst_72 {dimension_numbers = #tpu.dot_dimension_numbers<[1], [0], [0], [1], [0, 0, 1, 1], [], []>} : vector<40x40xbf16>, vector<40x64xbf16>, vector<40x64xf32> -> vector<40x64xf32>
    %218 = arith.addf %196, %217 : vector<40x64xf32>
    %219 = vector.extract_strided_slice %172 {offsets = [0, 32], sizes = [40, 16], strides = [1, 1]} : vector<40x128xf32> to vector<40x16xf32>
    %220 = arith.truncf %219 : vector<40x16xf32> to vector<40x16xbf16>
    %221 = vector.extract_strided_slice %172 {offsets = [0, 96], sizes = [40, 16], strides = [1, 1]} : vector<40x128xf32> to vector<40x16xf32>
    %222 = arith.truncf %221 : vector<40x16xf32> to vector<40x16xbf16>
    %cst_73 = arith.constant dense<0.000000e+00> : vector<40x40xf32>
    %223 = tpu.matmul %220, %222, %cst_73 {dimension_numbers = #tpu.dot_dimension_numbers<[1], [1], [0], [0], [0, 0, 1, 0], [], []>} : vector<40x16xbf16>, vector<40x16xbf16>, vector<40x40xf32> -> vector<40x40xf32>
    %224 = arith.addf %223, %6 : vector<40x40xf32>
    %cst_74 = arith.constant dense<0xFF800000> : vector<40xf32>
    %225 = vector.multi_reduction <maximumf>, %224, %cst_74 [1] : vector<40x40xf32> to vector<40xf32>
    %226 = vector.shape_cast %225 : vector<40xf32> to vector<40x1xf32>
    %227 = vector.broadcast %226 : vector<40x1xf32> to vector<40x40xf32>
    %228 = arith.subf %224, %227 : vector<40x40xf32>
    %229 = math.exp %228 : vector<40x40xf32>
    %cst_75 = arith.constant dense<0.000000e+00> : vector<40xf32>
    %230 = vector.multi_reduction <add>, %229, %cst_75 [1] : vector<40x40xf32> to vector<40xf32>
    %231 = vector.shape_cast %230 : vector<40xf32> to vector<40x1xf32>
    %232 = tpu.reciprocal %231 {approx = true} : vector<40x1xf32> -> vector<40x1xf32>
    %233 = vector.broadcast %232 : vector<40x1xf32> to vector<40x40xf32>
    %234 = arith.mulf %229, %233 : vector<40x40xf32>
    %c400 = arith.constant 400 : index
    %c0_76 = arith.constant 0 : index
    %235 = vector.load %arg2[%c400, %c0_76] : memref<1648x64xbf16, #tpu.memory_space<vmem>>, vector<64x64xbf16>
    %cst_77 = arith.constant dense<0.000000e+00> : vector<40x64xf32>
    %236 = tpu.matmul %167, %235, %cst_77 {dimension_numbers = #tpu.dot_dimension_numbers<[1], [0], [0], [1], [0, 0, 1, 1], [], []>} : vector<40x64xbf16>, vector<64x64xbf16>, vector<40x64xf32> -> vector<40x64xf32>
    %237 = arith.truncf %234 : vector<40x40xf32> to vector<40x40xbf16>
    %238 = arith.truncf %236 : vector<40x64xf32> to vector<40x64xbf16>
    %cst_78 = arith.constant dense<0.000000e+00> : vector<40x64xf32>
    %239 = tpu.matmul %237, %238, %cst_78 {dimension_numbers = #tpu.dot_dimension_numbers<[1], [0], [0], [1], [0, 0, 1, 1], [], []>} : vector<40x40xbf16>, vector<40x64xbf16>, vector<40x64xf32> -> vector<40x64xf32>
    %240 = arith.addf %218, %239 : vector<40x64xf32>
    %241 = vector.extract_strided_slice %172 {offsets = [0, 48], sizes = [40, 16], strides = [1, 1]} : vector<40x128xf32> to vector<40x16xf32>
    %242 = arith.truncf %241 : vector<40x16xf32> to vector<40x16xbf16>
    %243 = vector.extract_strided_slice %172 {offsets = [0, 112], sizes = [40, 16], strides = [1, 1]} : vector<40x128xf32> to vector<40x16xf32>
    %244 = arith.truncf %243 : vector<40x16xf32> to vector<40x16xbf16>
    %cst_79 = arith.constant dense<0.000000e+00> : vector<40x40xf32>
    %245 = tpu.matmul %242, %244, %cst_79 {dimension_numbers = #tpu.dot_dimension_numbers<[1], [1], [0], [0], [0, 0, 1, 0], [], []>} : vector<40x16xbf16>, vector<40x16xbf16>, vector<40x40xf32> -> vector<40x40xf32>
    %246 = arith.addf %245, %6 : vector<40x40xf32>
    %cst_80 = arith.constant dense<0xFF800000> : vector<40xf32>
    %247 = vector.multi_reduction <maximumf>, %246, %cst_80 [1] : vector<40x40xf32> to vector<40xf32>
    %248 = vector.shape_cast %247 : vector<40xf32> to vector<40x1xf32>
    %249 = vector.broadcast %248 : vector<40x1xf32> to vector<40x40xf32>
    %250 = arith.subf %246, %249 : vector<40x40xf32>
    %251 = math.exp %250 : vector<40x40xf32>
    %cst_81 = arith.constant dense<0.000000e+00> : vector<40xf32>
    %252 = vector.multi_reduction <add>, %251, %cst_81 [1] : vector<40x40xf32> to vector<40xf32>
    %253 = vector.shape_cast %252 : vector<40xf32> to vector<40x1xf32>
    %254 = tpu.reciprocal %253 {approx = true} : vector<40x1xf32> -> vector<40x1xf32>
    %255 = vector.broadcast %254 : vector<40x1xf32> to vector<40x40xf32>
    %256 = arith.mulf %251, %255 : vector<40x40xf32>
    %c464 = arith.constant 464 : index
    %c0_82 = arith.constant 0 : index
    %257 = vector.load %arg2[%c464, %c0_82] : memref<1648x64xbf16, #tpu.memory_space<vmem>>, vector<64x64xbf16>
    %cst_83 = arith.constant dense<0.000000e+00> : vector<40x64xf32>
    %258 = tpu.matmul %167, %257, %cst_83 {dimension_numbers = #tpu.dot_dimension_numbers<[1], [0], [0], [1], [0, 0, 1, 1], [], []>} : vector<40x64xbf16>, vector<64x64xbf16>, vector<40x64xf32> -> vector<40x64xf32>
    %259 = arith.truncf %256 : vector<40x40xf32> to vector<40x40xbf16>
    %260 = arith.truncf %258 : vector<40x64xf32> to vector<40x64xbf16>
    %cst_84 = arith.constant dense<0.000000e+00> : vector<40x64xf32>
    %261 = tpu.matmul %259, %260, %cst_84 {dimension_numbers = #tpu.dot_dimension_numbers<[1], [0], [0], [1], [0, 0, 1, 1], [], []>} : vector<40x40xbf16>, vector<40x64xbf16>, vector<40x64xf32> -> vector<40x64xf32>
    %262 = arith.addf %240, %261 : vector<40x64xf32>
    %263 = arith.addf %166, %262 : vector<40x64xf32>
    %c112 = arith.constant 112 : index
    %c0_85 = arith.constant 0 : index
    %264 = vector.load %arg3[%c112, %c0_85] : memref<392x128xf32, #tpu.memory_space<vmem>>, vector<1x64xf32>
    %c144_86 = arith.constant 144 : index
    %c0_87 = arith.constant 0 : index
    %265 = vector.load %arg3[%c144_86, %c0_87] : memref<392x128xf32, #tpu.memory_space<vmem>>, vector<1x64xf32>
    %cst_88 = arith.constant dense<0.000000e+00> : vector<40xf32>
    %266 = vector.multi_reduction <add>, %263, %cst_88 [1] : vector<40x64xf32> to vector<40xf32>
    %267 = vector.shape_cast %266 : vector<40xf32> to vector<40x1xf32>
    %cst_89 = arith.constant 6.400000e+01 : f32
    %268 = vector.broadcast %cst_89 : f32 to vector<40x1xf32>
    %269 = arith.divf %267, %268 : vector<40x1xf32>
    %270 = arith.mulf %263, %263 : vector<40x64xf32>
    %cst_90 = arith.constant dense<0.000000e+00> : vector<40xf32>
    %271 = vector.multi_reduction <add>, %270, %cst_90 [1] : vector<40x64xf32> to vector<40xf32>
    %272 = vector.shape_cast %271 : vector<40xf32> to vector<40x1xf32>
    %cst_91 = arith.constant 6.400000e+01 : f32
    %273 = vector.broadcast %cst_91 : f32 to vector<40x1xf32>
    %274 = arith.divf %272, %273 : vector<40x1xf32>
    %275 = vector.broadcast %269 : vector<40x1xf32> to vector<40x64xf32>
    %276 = arith.subf %263, %275 : vector<40x64xf32>
    %277 = arith.mulf %269, %269 : vector<40x1xf32>
    %278 = arith.subf %274, %277 : vector<40x1xf32>
    %cst_92 = arith.constant 9.99999974E-6 : f32
    %279 = vector.broadcast %cst_92 : f32 to vector<40x1xf32>
    %280 = arith.addf %278, %279 : vector<40x1xf32>
    %281 = math.rsqrt %280 : vector<40x1xf32>
    %282 = vector.broadcast %281 : vector<40x1xf32> to vector<40x64xf32>
    %283 = arith.mulf %276, %282 : vector<40x64xf32>
    %284 = vector.broadcast %264 : vector<1x64xf32> to vector<40x64xf32>
    %285 = arith.mulf %283, %284 : vector<40x64xf32>
    %286 = vector.broadcast %265 : vector<1x64xf32> to vector<40x64xf32>
    %287 = arith.addf %285, %286 : vector<40x64xf32>
    %c320_93 = arith.constant 320 : index
    %c0_94 = arith.constant 0 : index
    %288 = vector.load %arg1[%c320_93, %c0_94] : memref<704x128xbf16, #tpu.memory_space<vmem>>, vector<64x128xbf16>
    %c176 = arith.constant 176 : index
    %c0_95 = arith.constant 0 : index
    %289 = vector.load %arg3[%c176, %c0_95] : memref<392x128xf32, #tpu.memory_space<vmem>>, vector<1x128xf32>
    %290 = arith.truncf %287 : vector<40x64xf32> to vector<40x64xbf16>
    %cst_96 = arith.constant dense<0.000000e+00> : vector<40x128xf32>
    %291 = tpu.matmul %290, %288, %cst_96 {dimension_numbers = #tpu.dot_dimension_numbers<[1], [0], [0], [1], [0, 0, 1, 1], [], []>} : vector<40x64xbf16>, vector<64x128xbf16>, vector<40x128xf32> -> vector<40x128xf32>
    %292 = vector.broadcast %289 : vector<1x128xf32> to vector<40x128xf32>
    %293 = arith.addf %291, %292 : vector<40x128xf32>
    %cst_97 = arith.constant 0.000000e+00 : f32
    %294 = vector.broadcast %cst_97 : f32 to vector<40x128xf32>
    %295 = arith.maximumf %293, %294 : vector<40x128xf32>
    %c1168 = arith.constant 1168 : index
    %c0_98 = arith.constant 0 : index
    %296 = vector.load %arg2[%c1168, %c0_98] : memref<1648x64xbf16, #tpu.memory_space<vmem>>, vector<128x64xbf16>
    %c208_99 = arith.constant 208 : index
    %c0_100 = arith.constant 0 : index
    %297 = vector.load %arg3[%c208_99, %c0_100] : memref<392x128xf32, #tpu.memory_space<vmem>>, vector<1x64xf32>
    %298 = arith.truncf %295 : vector<40x128xf32> to vector<40x128xbf16>
    %cst_101 = arith.constant dense<0.000000e+00> : vector<40x64xf32>
    %299 = tpu.matmul %298, %296, %cst_101 {dimension_numbers = #tpu.dot_dimension_numbers<[1], [0], [0], [1], [0, 0, 1, 1], [], []>} : vector<40x128xbf16>, vector<128x64xbf16>, vector<40x64xf32> -> vector<40x64xf32>
    %300 = vector.broadcast %297 : vector<1x64xf32> to vector<40x64xf32>
    %301 = arith.addf %299, %300 : vector<40x64xf32>
    %302 = arith.addf %287, %301 : vector<40x64xf32>
    %c240 = arith.constant 240 : index
    %c0_102 = arith.constant 0 : index
    %303 = vector.load %arg3[%c240, %c0_102] : memref<392x128xf32, #tpu.memory_space<vmem>>, vector<1x64xf32>
    %c272_103 = arith.constant 272 : index
    %c0_104 = arith.constant 0 : index
    %304 = vector.load %arg3[%c272_103, %c0_104] : memref<392x128xf32, #tpu.memory_space<vmem>>, vector<1x64xf32>
    %cst_105 = arith.constant dense<0.000000e+00> : vector<40xf32>
    %305 = vector.multi_reduction <add>, %302, %cst_105 [1] : vector<40x64xf32> to vector<40xf32>
    %306 = vector.shape_cast %305 : vector<40xf32> to vector<40x1xf32>
    %cst_106 = arith.constant 6.400000e+01 : f32
    %307 = vector.broadcast %cst_106 : f32 to vector<40x1xf32>
    %308 = arith.divf %306, %307 : vector<40x1xf32>
    %309 = arith.mulf %302, %302 : vector<40x64xf32>
    %cst_107 = arith.constant dense<0.000000e+00> : vector<40xf32>
    %310 = vector.multi_reduction <add>, %309, %cst_107 [1] : vector<40x64xf32> to vector<40xf32>
    %311 = vector.shape_cast %310 : vector<40xf32> to vector<40x1xf32>
    %cst_108 = arith.constant 6.400000e+01 : f32
    %312 = vector.broadcast %cst_108 : f32 to vector<40x1xf32>
    %313 = arith.divf %311, %312 : vector<40x1xf32>
    %314 = vector.broadcast %308 : vector<40x1xf32> to vector<40x64xf32>
    %315 = arith.subf %302, %314 : vector<40x64xf32>
    %316 = arith.mulf %308, %308 : vector<40x1xf32>
    %317 = arith.subf %313, %316 : vector<40x1xf32>
    %cst_109 = arith.constant 9.99999974E-6 : f32
    %318 = vector.broadcast %cst_109 : f32 to vector<40x1xf32>
    %319 = arith.addf %317, %318 : vector<40x1xf32>
    %320 = math.rsqrt %319 : vector<40x1xf32>
    %321 = vector.broadcast %320 : vector<40x1xf32> to vector<40x64xf32>
    %322 = arith.mulf %315, %321 : vector<40x64xf32>
    %323 = vector.broadcast %303 : vector<1x64xf32> to vector<40x64xf32>
    %324 = arith.mulf %322, %323 : vector<40x64xf32>
    %325 = vector.broadcast %304 : vector<1x64xf32> to vector<40x64xf32>
    %326 = arith.addf %324, %325 : vector<40x64xf32>
    %c1616 = arith.constant 1616 : index
    %c0_110 = arith.constant 0 : index
    %327 = vector.load %arg2[%c1616, %c0_110] : memref<1648x64xbf16, #tpu.memory_space<vmem>>, vector<20x40xbf16>
    %328 = arith.truncf %326 : vector<40x64xf32> to vector<40x64xbf16>
    %cst_111 = arith.constant dense<0.000000e+00> : vector<20x64xf32>
    %329 = tpu.matmul %327, %328, %cst_111 {dimension_numbers = #tpu.dot_dimension_numbers<[1], [0], [0], [1], [0, 0, 1, 1], [], []>} : vector<20x40xbf16>, vector<40x64xbf16>, vector<20x64xf32> -> vector<20x64xf32>
    %c1552 = arith.constant 1552 : index
    %c0_112 = arith.constant 0 : index
    %330 = vector.load %arg2[%c1552, %c0_112] : memref<1648x64xbf16, #tpu.memory_space<vmem>>, vector<64x64xbf16>
    %c296 = arith.constant 296 : index
    %c0_113 = arith.constant 0 : index
    %331 = vector.load %arg3[%c296, %c0_113] : memref<392x128xf32, #tpu.memory_space<vmem>>, vector<1x64xf32>
    %332 = arith.truncf %329 : vector<20x64xf32> to vector<20x64xbf16>
    %cst_114 = arith.constant dense<0.000000e+00> : vector<20x64xf32>
    %333 = tpu.matmul %332, %330, %cst_114 {dimension_numbers = #tpu.dot_dimension_numbers<[1], [0], [0], [1], [0, 0, 1, 1], [], []>} : vector<20x64xbf16>, vector<64x64xbf16>, vector<20x64xf32> -> vector<20x64xf32>
    %334 = vector.broadcast %331 : vector<1x64xf32> to vector<20x64xf32>
    %335 = arith.addf %333, %334 : vector<20x64xf32>
    %336 = arith.negf %335 : vector<20x64xf32>
    %337 = math.exp %336 : vector<20x64xf32>
    %cst_115 = arith.constant 1.000000e+00 : f32
    %338 = vector.broadcast %cst_115 : f32 to vector<20x64xf32>
    %339 = arith.addf %338, %337 : vector<20x64xf32>
    %340 = arith.divf %338, %339 : vector<20x64xf32>
    %341 = arith.mulf %329, %340 : vector<20x64xf32>
    %c360 = arith.constant 360 : index
    %c0_116 = arith.constant 0 : index
    %342 = vector.load %arg3[%c360, %c0_116] : memref<392x128xf32, #tpu.memory_space<vmem>>, vector<20x20xf32>
    %343 = arith.truncf %341 : vector<20x64xf32> to vector<20x64xbf16>
    %c128 = arith.constant 128 : index
    %c0_117 = arith.constant 0 : index
    %344 = vector.load %arg1[%c128, %c0_117] : memref<704x128xbf16, #tpu.memory_space<vmem>>, vector<64x128xbf16>
    %c56 = arith.constant 56 : index
    %c0_118 = arith.constant 0 : index
    %345 = vector.load %arg3[%c56, %c0_118] : memref<392x128xf32, #tpu.memory_space<vmem>>, vector<1x128xf32>
    %cst_119 = arith.constant dense<0.000000e+00> : vector<20x128xf32>
    %346 = tpu.matmul %343, %344, %cst_119 {dimension_numbers = #tpu.dot_dimension_numbers<[1], [0], [0], [1], [0, 0, 1, 1], [], []>} : vector<20x64xbf16>, vector<64x128xbf16>, vector<20x128xf32> -> vector<20x128xf32>
    %347 = vector.broadcast %345 : vector<1x128xf32> to vector<20x128xf32>
    %348 = arith.addf %346, %347 : vector<20x128xf32>
    %c88 = arith.constant 88 : index
    %c0_120 = arith.constant 0 : index
    %349 = vector.load %arg3[%c88, %c0_120] : memref<392x128xf32, #tpu.memory_space<vmem>>, vector<1x64xf32>
    %350 = vector.extract_strided_slice %348 {offsets = [0, 0], sizes = [20, 16], strides = [1, 1]} : vector<20x128xf32> to vector<20x16xf32>
    %351 = arith.truncf %350 : vector<20x16xf32> to vector<20x16xbf16>
    %352 = vector.extract_strided_slice %348 {offsets = [0, 64], sizes = [20, 16], strides = [1, 1]} : vector<20x128xf32> to vector<20x16xf32>
    %353 = arith.truncf %352 : vector<20x16xf32> to vector<20x16xbf16>
    %cst_121 = arith.constant dense<0.000000e+00> : vector<20x20xf32>
    %354 = tpu.matmul %351, %353, %cst_121 {dimension_numbers = #tpu.dot_dimension_numbers<[1], [1], [0], [0], [0, 0, 1, 0], [], []>} : vector<20x16xbf16>, vector<20x16xbf16>, vector<20x20xf32> -> vector<20x20xf32>
    %355 = arith.addf %354, %342 : vector<20x20xf32>
    %cst_122 = arith.constant dense<0xFF800000> : vector<20xf32>
    %356 = vector.multi_reduction <maximumf>, %355, %cst_122 [1] : vector<20x20xf32> to vector<20xf32>
    %357 = vector.shape_cast %356 : vector<20xf32> to vector<20x1xf32>
    %358 = vector.broadcast %357 : vector<20x1xf32> to vector<20x20xf32>
    %359 = arith.subf %355, %358 : vector<20x20xf32>
    %360 = math.exp %359 : vector<20x20xf32>
    %cst_123 = arith.constant dense<0.000000e+00> : vector<20xf32>
    %361 = vector.multi_reduction <add>, %360, %cst_123 [1] : vector<20x20xf32> to vector<20xf32>
    %362 = vector.shape_cast %361 : vector<20xf32> to vector<20x1xf32>
    %363 = tpu.reciprocal %362 {approx = true} : vector<20x1xf32> -> vector<20x1xf32>
    %364 = vector.broadcast %363 : vector<20x1xf32> to vector<20x20xf32>
    %365 = arith.mulf %360, %364 : vector<20x20xf32>
    %c528 = arith.constant 528 : index
    %c0_124 = arith.constant 0 : index
    %366 = vector.load %arg2[%c528, %c0_124] : memref<1648x64xbf16, #tpu.memory_space<vmem>>, vector<64x64xbf16>
    %cst_125 = arith.constant dense<0.000000e+00> : vector<20x64xf32>
    %367 = tpu.matmul %343, %366, %cst_125 {dimension_numbers = #tpu.dot_dimension_numbers<[1], [0], [0], [1], [0, 0, 1, 1], [], []>} : vector<20x64xbf16>, vector<64x64xbf16>, vector<20x64xf32> -> vector<20x64xf32>
    %368 = arith.truncf %365 : vector<20x20xf32> to vector<20x20xbf16>
    %369 = arith.truncf %367 : vector<20x64xf32> to vector<20x64xbf16>
    %cst_126 = arith.constant dense<0.000000e+00> : vector<20x64xf32>
    %370 = tpu.matmul %368, %369, %cst_126 {dimension_numbers = #tpu.dot_dimension_numbers<[1], [0], [0], [1], [0, 0, 1, 1], [], []>} : vector<20x20xbf16>, vector<20x64xbf16>, vector<20x64xf32> -> vector<20x64xf32>
    %371 = vector.broadcast %349 : vector<1x64xf32> to vector<20x64xf32>
    %372 = arith.addf %371, %370 : vector<20x64xf32>
    %373 = vector.extract_strided_slice %348 {offsets = [0, 16], sizes = [20, 16], strides = [1, 1]} : vector<20x128xf32> to vector<20x16xf32>
    %374 = arith.truncf %373 : vector<20x16xf32> to vector<20x16xbf16>
    %375 = vector.extract_strided_slice %348 {offsets = [0, 80], sizes = [20, 16], strides = [1, 1]} : vector<20x128xf32> to vector<20x16xf32>
    %376 = arith.truncf %375 : vector<20x16xf32> to vector<20x16xbf16>
    %cst_127 = arith.constant dense<0.000000e+00> : vector<20x20xf32>
    %377 = tpu.matmul %374, %376, %cst_127 {dimension_numbers = #tpu.dot_dimension_numbers<[1], [1], [0], [0], [0, 0, 1, 0], [], []>} : vector<20x16xbf16>, vector<20x16xbf16>, vector<20x20xf32> -> vector<20x20xf32>
    %378 = arith.addf %377, %342 : vector<20x20xf32>
    %cst_128 = arith.constant dense<0xFF800000> : vector<20xf32>
    %379 = vector.multi_reduction <maximumf>, %378, %cst_128 [1] : vector<20x20xf32> to vector<20xf32>
    %380 = vector.shape_cast %379 : vector<20xf32> to vector<20x1xf32>
    %381 = vector.broadcast %380 : vector<20x1xf32> to vector<20x20xf32>
    %382 = arith.subf %378, %381 : vector<20x20xf32>
    %383 = math.exp %382 : vector<20x20xf32>
    %cst_129 = arith.constant dense<0.000000e+00> : vector<20xf32>
    %384 = vector.multi_reduction <add>, %383, %cst_129 [1] : vector<20x20xf32> to vector<20xf32>
    %385 = vector.shape_cast %384 : vector<20xf32> to vector<20x1xf32>
    %386 = tpu.reciprocal %385 {approx = true} : vector<20x1xf32> -> vector<20x1xf32>
    %387 = vector.broadcast %386 : vector<20x1xf32> to vector<20x20xf32>
    %388 = arith.mulf %383, %387 : vector<20x20xf32>
    %c592 = arith.constant 592 : index
    %c0_130 = arith.constant 0 : index
    %389 = vector.load %arg2[%c592, %c0_130] : memref<1648x64xbf16, #tpu.memory_space<vmem>>, vector<64x64xbf16>
    %cst_131 = arith.constant dense<0.000000e+00> : vector<20x64xf32>
    %390 = tpu.matmul %343, %389, %cst_131 {dimension_numbers = #tpu.dot_dimension_numbers<[1], [0], [0], [1], [0, 0, 1, 1], [], []>} : vector<20x64xbf16>, vector<64x64xbf16>, vector<20x64xf32> -> vector<20x64xf32>
    %391 = arith.truncf %388 : vector<20x20xf32> to vector<20x20xbf16>
    %392 = arith.truncf %390 : vector<20x64xf32> to vector<20x64xbf16>
    %cst_132 = arith.constant dense<0.000000e+00> : vector<20x64xf32>
    %393 = tpu.matmul %391, %392, %cst_132 {dimension_numbers = #tpu.dot_dimension_numbers<[1], [0], [0], [1], [0, 0, 1, 1], [], []>} : vector<20x20xbf16>, vector<20x64xbf16>, vector<20x64xf32> -> vector<20x64xf32>
    %394 = arith.addf %372, %393 : vector<20x64xf32>
    %395 = vector.extract_strided_slice %348 {offsets = [0, 32], sizes = [20, 16], strides = [1, 1]} : vector<20x128xf32> to vector<20x16xf32>
    %396 = arith.truncf %395 : vector<20x16xf32> to vector<20x16xbf16>
    %397 = vector.extract_strided_slice %348 {offsets = [0, 96], sizes = [20, 16], strides = [1, 1]} : vector<20x128xf32> to vector<20x16xf32>
    %398 = arith.truncf %397 : vector<20x16xf32> to vector<20x16xbf16>
    %cst_133 = arith.constant dense<0.000000e+00> : vector<20x20xf32>
    %399 = tpu.matmul %396, %398, %cst_133 {dimension_numbers = #tpu.dot_dimension_numbers<[1], [1], [0], [0], [0, 0, 1, 0], [], []>} : vector<20x16xbf16>, vector<20x16xbf16>, vector<20x20xf32> -> vector<20x20xf32>
    %400 = arith.addf %399, %342 : vector<20x20xf32>
    %cst_134 = arith.constant dense<0xFF800000> : vector<20xf32>
    %401 = vector.multi_reduction <maximumf>, %400, %cst_134 [1] : vector<20x20xf32> to vector<20xf32>
    %402 = vector.shape_cast %401 : vector<20xf32> to vector<20x1xf32>
    %403 = vector.broadcast %402 : vector<20x1xf32> to vector<20x20xf32>
    %404 = arith.subf %400, %403 : vector<20x20xf32>
    %405 = math.exp %404 : vector<20x20xf32>
    %cst_135 = arith.constant dense<0.000000e+00> : vector<20xf32>
    %406 = vector.multi_reduction <add>, %405, %cst_135 [1] : vector<20x20xf32> to vector<20xf32>
    %407 = vector.shape_cast %406 : vector<20xf32> to vector<20x1xf32>
    %408 = tpu.reciprocal %407 {approx = true} : vector<20x1xf32> -> vector<20x1xf32>
    %409 = vector.broadcast %408 : vector<20x1xf32> to vector<20x20xf32>
    %410 = arith.mulf %405, %409 : vector<20x20xf32>
    %c656 = arith.constant 656 : index
    %c0_136 = arith.constant 0 : index
    %411 = vector.load %arg2[%c656, %c0_136] : memref<1648x64xbf16, #tpu.memory_space<vmem>>, vector<64x64xbf16>
    %cst_137 = arith.constant dense<0.000000e+00> : vector<20x64xf32>
    %412 = tpu.matmul %343, %411, %cst_137 {dimension_numbers = #tpu.dot_dimension_numbers<[1], [0], [0], [1], [0, 0, 1, 1], [], []>} : vector<20x64xbf16>, vector<64x64xbf16>, vector<20x64xf32> -> vector<20x64xf32>
    %413 = arith.truncf %410 : vector<20x20xf32> to vector<20x20xbf16>
    %414 = arith.truncf %412 : vector<20x64xf32> to vector<20x64xbf16>
    %cst_138 = arith.constant dense<0.000000e+00> : vector<20x64xf32>
    %415 = tpu.matmul %413, %414, %cst_138 {dimension_numbers = #tpu.dot_dimension_numbers<[1], [0], [0], [1], [0, 0, 1, 1], [], []>} : vector<20x20xbf16>, vector<20x64xbf16>, vector<20x64xf32> -> vector<20x64xf32>
    %416 = arith.addf %394, %415 : vector<20x64xf32>
    %417 = vector.extract_strided_slice %348 {offsets = [0, 48], sizes = [20, 16], strides = [1, 1]} : vector<20x128xf32> to vector<20x16xf32>
    %418 = arith.truncf %417 : vector<20x16xf32> to vector<20x16xbf16>
    %419 = vector.extract_strided_slice %348 {offsets = [0, 112], sizes = [20, 16], strides = [1, 1]} : vector<20x128xf32> to vector<20x16xf32>
    %420 = arith.truncf %419 : vector<20x16xf32> to vector<20x16xbf16>
    %cst_139 = arith.constant dense<0.000000e+00> : vector<20x20xf32>
    %421 = tpu.matmul %418, %420, %cst_139 {dimension_numbers = #tpu.dot_dimension_numbers<[1], [1], [0], [0], [0, 0, 1, 0], [], []>} : vector<20x16xbf16>, vector<20x16xbf16>, vector<20x20xf32> -> vector<20x20xf32>
    %422 = arith.addf %421, %342 : vector<20x20xf32>
    %cst_140 = arith.constant dense<0xFF800000> : vector<20xf32>
    %423 = vector.multi_reduction <maximumf>, %422, %cst_140 [1] : vector<20x20xf32> to vector<20xf32>
    %424 = vector.shape_cast %423 : vector<20xf32> to vector<20x1xf32>
    %425 = vector.broadcast %424 : vector<20x1xf32> to vector<20x20xf32>
    %426 = arith.subf %422, %425 : vector<20x20xf32>
    %427 = math.exp %426 : vector<20x20xf32>
    %cst_141 = arith.constant dense<0.000000e+00> : vector<20xf32>
    %428 = vector.multi_reduction <add>, %427, %cst_141 [1] : vector<20x20xf32> to vector<20xf32>
    %429 = vector.shape_cast %428 : vector<20xf32> to vector<20x1xf32>
    %430 = tpu.reciprocal %429 {approx = true} : vector<20x1xf32> -> vector<20x1xf32>
    %431 = vector.broadcast %430 : vector<20x1xf32> to vector<20x20xf32>
    %432 = arith.mulf %427, %431 : vector<20x20xf32>
    %c720 = arith.constant 720 : index
    %c0_142 = arith.constant 0 : index
    %433 = vector.load %arg2[%c720, %c0_142] : memref<1648x64xbf16, #tpu.memory_space<vmem>>, vector<64x64xbf16>
    %cst_143 = arith.constant dense<0.000000e+00> : vector<20x64xf32>
    %434 = tpu.matmul %343, %433, %cst_143 {dimension_numbers = #tpu.dot_dimension_numbers<[1], [0], [0], [1], [0, 0, 1, 1], [], []>} : vector<20x64xbf16>, vector<64x64xbf16>, vector<20x64xf32> -> vector<20x64xf32>
    %435 = arith.truncf %432 : vector<20x20xf32> to vector<20x20xbf16>
    %436 = arith.truncf %434 : vector<20x64xf32> to vector<20x64xbf16>
    %cst_144 = arith.constant dense<0.000000e+00> : vector<20x64xf32>
    %437 = tpu.matmul %435, %436, %cst_144 {dimension_numbers = #tpu.dot_dimension_numbers<[1], [0], [0], [1], [0, 0, 1, 1], [], []>} : vector<20x20xbf16>, vector<20x64xbf16>, vector<20x64xf32> -> vector<20x64xf32>
    %438 = arith.addf %416, %437 : vector<20x64xf32>
    %439 = arith.addf %341, %438 : vector<20x64xf32>
    %c120 = arith.constant 120 : index
    %c0_145 = arith.constant 0 : index
    %440 = vector.load %arg3[%c120, %c0_145] : memref<392x128xf32, #tpu.memory_space<vmem>>, vector<1x64xf32>
    %c152 = arith.constant 152 : index
    %c0_146 = arith.constant 0 : index
    %441 = vector.load %arg3[%c152, %c0_146] : memref<392x128xf32, #tpu.memory_space<vmem>>, vector<1x64xf32>
    %cst_147 = arith.constant dense<0.000000e+00> : vector<20xf32>
    %442 = vector.multi_reduction <add>, %439, %cst_147 [1] : vector<20x64xf32> to vector<20xf32>
    %443 = vector.shape_cast %442 : vector<20xf32> to vector<20x1xf32>
    %cst_148 = arith.constant 6.400000e+01 : f32
    %444 = vector.broadcast %cst_148 : f32 to vector<20x1xf32>
    %445 = arith.divf %443, %444 : vector<20x1xf32>
    %446 = arith.mulf %439, %439 : vector<20x64xf32>
    %cst_149 = arith.constant dense<0.000000e+00> : vector<20xf32>
    %447 = vector.multi_reduction <add>, %446, %cst_149 [1] : vector<20x64xf32> to vector<20xf32>
    %448 = vector.shape_cast %447 : vector<20xf32> to vector<20x1xf32>
    %cst_150 = arith.constant 6.400000e+01 : f32
    %449 = vector.broadcast %cst_150 : f32 to vector<20x1xf32>
    %450 = arith.divf %448, %449 : vector<20x1xf32>
    %451 = vector.broadcast %445 : vector<20x1xf32> to vector<20x64xf32>
    %452 = arith.subf %439, %451 : vector<20x64xf32>
    %453 = arith.mulf %445, %445 : vector<20x1xf32>
    %454 = arith.subf %450, %453 : vector<20x1xf32>
    %cst_151 = arith.constant 9.99999974E-6 : f32
    %455 = vector.broadcast %cst_151 : f32 to vector<20x1xf32>
    %456 = arith.addf %454, %455 : vector<20x1xf32>
    %457 = math.rsqrt %456 : vector<20x1xf32>
    %458 = vector.broadcast %457 : vector<20x1xf32> to vector<20x64xf32>
    %459 = arith.mulf %452, %458 : vector<20x64xf32>
    %460 = vector.broadcast %440 : vector<1x64xf32> to vector<20x64xf32>
    %461 = arith.mulf %459, %460 : vector<20x64xf32>
    %462 = vector.broadcast %441 : vector<1x64xf32> to vector<20x64xf32>
    %463 = arith.addf %461, %462 : vector<20x64xf32>
    %c384 = arith.constant 384 : index
    %c0_152 = arith.constant 0 : index
    %464 = vector.load %arg1[%c384, %c0_152] : memref<704x128xbf16, #tpu.memory_space<vmem>>, vector<64x128xbf16>
    %c184 = arith.constant 184 : index
    %c0_153 = arith.constant 0 : index
    %465 = vector.load %arg3[%c184, %c0_153] : memref<392x128xf32, #tpu.memory_space<vmem>>, vector<1x128xf32>
    %466 = arith.truncf %463 : vector<20x64xf32> to vector<20x64xbf16>
    %cst_154 = arith.constant dense<0.000000e+00> : vector<20x128xf32>
    %467 = tpu.matmul %466, %464, %cst_154 {dimension_numbers = #tpu.dot_dimension_numbers<[1], [0], [0], [1], [0, 0, 1, 1], [], []>} : vector<20x64xbf16>, vector<64x128xbf16>, vector<20x128xf32> -> vector<20x128xf32>
    %468 = vector.broadcast %465 : vector<1x128xf32> to vector<20x128xf32>
    %469 = arith.addf %467, %468 : vector<20x128xf32>
    %cst_155 = arith.constant 0.000000e+00 : f32
    %470 = vector.broadcast %cst_155 : f32 to vector<20x128xf32>
    %471 = arith.maximumf %469, %470 : vector<20x128xf32>
    %c1296 = arith.constant 1296 : index
    %c0_156 = arith.constant 0 : index
    %472 = vector.load %arg2[%c1296, %c0_156] : memref<1648x64xbf16, #tpu.memory_space<vmem>>, vector<128x64xbf16>
    %c216 = arith.constant 216 : index
    %c0_157 = arith.constant 0 : index
    %473 = vector.load %arg3[%c216, %c0_157] : memref<392x128xf32, #tpu.memory_space<vmem>>, vector<1x64xf32>
    %474 = arith.truncf %471 : vector<20x128xf32> to vector<20x128xbf16>
    %cst_158 = arith.constant dense<0.000000e+00> : vector<20x64xf32>
    %475 = tpu.matmul %474, %472, %cst_158 {dimension_numbers = #tpu.dot_dimension_numbers<[1], [0], [0], [1], [0, 0, 1, 1], [], []>} : vector<20x128xbf16>, vector<128x64xbf16>, vector<20x64xf32> -> vector<20x64xf32>
    %476 = vector.broadcast %473 : vector<1x64xf32> to vector<20x64xf32>
    %477 = arith.addf %475, %476 : vector<20x64xf32>
    %478 = arith.addf %463, %477 : vector<20x64xf32>
    %c248 = arith.constant 248 : index
    %c0_159 = arith.constant 0 : index
    %479 = vector.load %arg3[%c248, %c0_159] : memref<392x128xf32, #tpu.memory_space<vmem>>, vector<1x64xf32>
    %c280 = arith.constant 280 : index
    %c0_160 = arith.constant 0 : index
    %480 = vector.load %arg3[%c280, %c0_160] : memref<392x128xf32, #tpu.memory_space<vmem>>, vector<1x64xf32>
    %cst_161 = arith.constant dense<0.000000e+00> : vector<20xf32>
    %481 = vector.multi_reduction <add>, %478, %cst_161 [1] : vector<20x64xf32> to vector<20xf32>
    %482 = vector.shape_cast %481 : vector<20xf32> to vector<20x1xf32>
    %cst_162 = arith.constant 6.400000e+01 : f32
    %483 = vector.broadcast %cst_162 : f32 to vector<20x1xf32>
    %484 = arith.divf %482, %483 : vector<20x1xf32>
    %485 = arith.mulf %478, %478 : vector<20x64xf32>
    %cst_163 = arith.constant dense<0.000000e+00> : vector<20xf32>
    %486 = vector.multi_reduction <add>, %485, %cst_163 [1] : vector<20x64xf32> to vector<20xf32>
    %487 = vector.shape_cast %486 : vector<20xf32> to vector<20x1xf32>
    %cst_164 = arith.constant 6.400000e+01 : f32
    %488 = vector.broadcast %cst_164 : f32 to vector<20x1xf32>
    %489 = arith.divf %487, %488 : vector<20x1xf32>
    %490 = vector.broadcast %484 : vector<20x1xf32> to vector<20x64xf32>
    %491 = arith.subf %478, %490 : vector<20x64xf32>
    %492 = arith.mulf %484, %484 : vector<20x1xf32>
    %493 = arith.subf %489, %492 : vector<20x1xf32>
    %cst_165 = arith.constant 9.99999974E-6 : f32
    %494 = vector.broadcast %cst_165 : f32 to vector<20x1xf32>
    %495 = arith.addf %493, %494 : vector<20x1xf32>
    %496 = math.rsqrt %495 : vector<20x1xf32>
    %497 = vector.broadcast %496 : vector<20x1xf32> to vector<20x64xf32>
    %498 = arith.mulf %491, %497 : vector<20x64xf32>
    %499 = vector.broadcast %479 : vector<1x64xf32> to vector<20x64xf32>
    %500 = arith.mulf %498, %499 : vector<20x64xf32>
    %501 = vector.broadcast %480 : vector<1x64xf32> to vector<20x64xf32>
    %502 = arith.addf %500, %501 : vector<20x64xf32>
    %503 = arith.truncf %502 : vector<20x64xf32> to vector<20x64xbf16>
    %c192 = arith.constant 192 : index
    %c0_166 = arith.constant 0 : index
    %504 = vector.load %arg1[%c192, %c0_166] : memref<704x128xbf16, #tpu.memory_space<vmem>>, vector<64x128xbf16>
    %c64_167 = arith.constant 64 : index
    %c0_168 = arith.constant 0 : index
    %505 = vector.load %arg3[%c64_167, %c0_168] : memref<392x128xf32, #tpu.memory_space<vmem>>, vector<1x128xf32>
    %cst_169 = arith.constant dense<0.000000e+00> : vector<20x128xf32>
    %506 = tpu.matmul %503, %504, %cst_169 {dimension_numbers = #tpu.dot_dimension_numbers<[1], [0], [0], [1], [0, 0, 1, 1], [], []>} : vector<20x64xbf16>, vector<64x128xbf16>, vector<20x128xf32> -> vector<20x128xf32>
    %507 = vector.broadcast %505 : vector<1x128xf32> to vector<20x128xf32>
    %508 = arith.addf %506, %507 : vector<20x128xf32>
    %c96 = arith.constant 96 : index
    %c0_170 = arith.constant 0 : index
    %509 = vector.load %arg3[%c96, %c0_170] : memref<392x128xf32, #tpu.memory_space<vmem>>, vector<1x64xf32>
    %510 = vector.extract_strided_slice %508 {offsets = [0, 0], sizes = [20, 16], strides = [1, 1]} : vector<20x128xf32> to vector<20x16xf32>
    %511 = arith.truncf %510 : vector<20x16xf32> to vector<20x16xbf16>
    %512 = vector.extract_strided_slice %508 {offsets = [0, 64], sizes = [20, 16], strides = [1, 1]} : vector<20x128xf32> to vector<20x16xf32>
    %513 = arith.truncf %512 : vector<20x16xf32> to vector<20x16xbf16>
    %cst_171 = arith.constant dense<0.000000e+00> : vector<20x20xf32>
    %514 = tpu.matmul %511, %513, %cst_171 {dimension_numbers = #tpu.dot_dimension_numbers<[1], [1], [0], [0], [0, 0, 1, 0], [], []>} : vector<20x16xbf16>, vector<20x16xbf16>, vector<20x20xf32> -> vector<20x20xf32>
    %515 = arith.addf %514, %342 : vector<20x20xf32>
    %cst_172 = arith.constant dense<0xFF800000> : vector<20xf32>
    %516 = vector.multi_reduction <maximumf>, %515, %cst_172 [1] : vector<20x20xf32> to vector<20xf32>
    %517 = vector.shape_cast %516 : vector<20xf32> to vector<20x1xf32>
    %518 = vector.broadcast %517 : vector<20x1xf32> to vector<20x20xf32>
    %519 = arith.subf %515, %518 : vector<20x20xf32>
    %520 = math.exp %519 : vector<20x20xf32>
    %cst_173 = arith.constant dense<0.000000e+00> : vector<20xf32>
    %521 = vector.multi_reduction <add>, %520, %cst_173 [1] : vector<20x20xf32> to vector<20xf32>
    %522 = vector.shape_cast %521 : vector<20xf32> to vector<20x1xf32>
    %523 = tpu.reciprocal %522 {approx = true} : vector<20x1xf32> -> vector<20x1xf32>
    %524 = vector.broadcast %523 : vector<20x1xf32> to vector<20x20xf32>
    %525 = arith.mulf %520, %524 : vector<20x20xf32>
    %c784 = arith.constant 784 : index
    %c0_174 = arith.constant 0 : index
    %526 = vector.load %arg2[%c784, %c0_174] : memref<1648x64xbf16, #tpu.memory_space<vmem>>, vector<64x64xbf16>
    %cst_175 = arith.constant dense<0.000000e+00> : vector<20x64xf32>
    %527 = tpu.matmul %503, %526, %cst_175 {dimension_numbers = #tpu.dot_dimension_numbers<[1], [0], [0], [1], [0, 0, 1, 1], [], []>} : vector<20x64xbf16>, vector<64x64xbf16>, vector<20x64xf32> -> vector<20x64xf32>
    %528 = arith.truncf %525 : vector<20x20xf32> to vector<20x20xbf16>
    %529 = arith.truncf %527 : vector<20x64xf32> to vector<20x64xbf16>
    %cst_176 = arith.constant dense<0.000000e+00> : vector<20x64xf32>
    %530 = tpu.matmul %528, %529, %cst_176 {dimension_numbers = #tpu.dot_dimension_numbers<[1], [0], [0], [1], [0, 0, 1, 1], [], []>} : vector<20x20xbf16>, vector<20x64xbf16>, vector<20x64xf32> -> vector<20x64xf32>
    %531 = vector.broadcast %509 : vector<1x64xf32> to vector<20x64xf32>
    %532 = arith.addf %531, %530 : vector<20x64xf32>
    %533 = vector.extract_strided_slice %508 {offsets = [0, 16], sizes = [20, 16], strides = [1, 1]} : vector<20x128xf32> to vector<20x16xf32>
    %534 = arith.truncf %533 : vector<20x16xf32> to vector<20x16xbf16>
    %535 = vector.extract_strided_slice %508 {offsets = [0, 80], sizes = [20, 16], strides = [1, 1]} : vector<20x128xf32> to vector<20x16xf32>
    %536 = arith.truncf %535 : vector<20x16xf32> to vector<20x16xbf16>
    %cst_177 = arith.constant dense<0.000000e+00> : vector<20x20xf32>
    %537 = tpu.matmul %534, %536, %cst_177 {dimension_numbers = #tpu.dot_dimension_numbers<[1], [1], [0], [0], [0, 0, 1, 0], [], []>} : vector<20x16xbf16>, vector<20x16xbf16>, vector<20x20xf32> -> vector<20x20xf32>
    %538 = arith.addf %537, %342 : vector<20x20xf32>
    %cst_178 = arith.constant dense<0xFF800000> : vector<20xf32>
    %539 = vector.multi_reduction <maximumf>, %538, %cst_178 [1] : vector<20x20xf32> to vector<20xf32>
    %540 = vector.shape_cast %539 : vector<20xf32> to vector<20x1xf32>
    %541 = vector.broadcast %540 : vector<20x1xf32> to vector<20x20xf32>
    %542 = arith.subf %538, %541 : vector<20x20xf32>
    %543 = math.exp %542 : vector<20x20xf32>
    %cst_179 = arith.constant dense<0.000000e+00> : vector<20xf32>
    %544 = vector.multi_reduction <add>, %543, %cst_179 [1] : vector<20x20xf32> to vector<20xf32>
    %545 = vector.shape_cast %544 : vector<20xf32> to vector<20x1xf32>
    %546 = tpu.reciprocal %545 {approx = true} : vector<20x1xf32> -> vector<20x1xf32>
    %547 = vector.broadcast %546 : vector<20x1xf32> to vector<20x20xf32>
    %548 = arith.mulf %543, %547 : vector<20x20xf32>
    %c848 = arith.constant 848 : index
    %c0_180 = arith.constant 0 : index
    %549 = vector.load %arg2[%c848, %c0_180] : memref<1648x64xbf16, #tpu.memory_space<vmem>>, vector<64x64xbf16>
    %cst_181 = arith.constant dense<0.000000e+00> : vector<20x64xf32>
    %550 = tpu.matmul %503, %549, %cst_181 {dimension_numbers = #tpu.dot_dimension_numbers<[1], [0], [0], [1], [0, 0, 1, 1], [], []>} : vector<20x64xbf16>, vector<64x64xbf16>, vector<20x64xf32> -> vector<20x64xf32>
    %551 = arith.truncf %548 : vector<20x20xf32> to vector<20x20xbf16>
    %552 = arith.truncf %550 : vector<20x64xf32> to vector<20x64xbf16>
    %cst_182 = arith.constant dense<0.000000e+00> : vector<20x64xf32>
    %553 = tpu.matmul %551, %552, %cst_182 {dimension_numbers = #tpu.dot_dimension_numbers<[1], [0], [0], [1], [0, 0, 1, 1], [], []>} : vector<20x20xbf16>, vector<20x64xbf16>, vector<20x64xf32> -> vector<20x64xf32>
    %554 = arith.addf %532, %553 : vector<20x64xf32>
    %555 = vector.extract_strided_slice %508 {offsets = [0, 32], sizes = [20, 16], strides = [1, 1]} : vector<20x128xf32> to vector<20x16xf32>
    %556 = arith.truncf %555 : vector<20x16xf32> to vector<20x16xbf16>
    %557 = vector.extract_strided_slice %508 {offsets = [0, 96], sizes = [20, 16], strides = [1, 1]} : vector<20x128xf32> to vector<20x16xf32>
    %558 = arith.truncf %557 : vector<20x16xf32> to vector<20x16xbf16>
    %cst_183 = arith.constant dense<0.000000e+00> : vector<20x20xf32>
    %559 = tpu.matmul %556, %558, %cst_183 {dimension_numbers = #tpu.dot_dimension_numbers<[1], [1], [0], [0], [0, 0, 1, 0], [], []>} : vector<20x16xbf16>, vector<20x16xbf16>, vector<20x20xf32> -> vector<20x20xf32>
    %560 = arith.addf %559, %342 : vector<20x20xf32>
    %cst_184 = arith.constant dense<0xFF800000> : vector<20xf32>
    %561 = vector.multi_reduction <maximumf>, %560, %cst_184 [1] : vector<20x20xf32> to vector<20xf32>
    %562 = vector.shape_cast %561 : vector<20xf32> to vector<20x1xf32>
    %563 = vector.broadcast %562 : vector<20x1xf32> to vector<20x20xf32>
    %564 = arith.subf %560, %563 : vector<20x20xf32>
    %565 = math.exp %564 : vector<20x20xf32>
    %cst_185 = arith.constant dense<0.000000e+00> : vector<20xf32>
    %566 = vector.multi_reduction <add>, %565, %cst_185 [1] : vector<20x20xf32> to vector<20xf32>
    %567 = vector.shape_cast %566 : vector<20xf32> to vector<20x1xf32>
    %568 = tpu.reciprocal %567 {approx = true} : vector<20x1xf32> -> vector<20x1xf32>
    %569 = vector.broadcast %568 : vector<20x1xf32> to vector<20x20xf32>
    %570 = arith.mulf %565, %569 : vector<20x20xf32>
    %c912 = arith.constant 912 : index
    %c0_186 = arith.constant 0 : index
    %571 = vector.load %arg2[%c912, %c0_186] : memref<1648x64xbf16, #tpu.memory_space<vmem>>, vector<64x64xbf16>
    %cst_187 = arith.constant dense<0.000000e+00> : vector<20x64xf32>
    %572 = tpu.matmul %503, %571, %cst_187 {dimension_numbers = #tpu.dot_dimension_numbers<[1], [0], [0], [1], [0, 0, 1, 1], [], []>} : vector<20x64xbf16>, vector<64x64xbf16>, vector<20x64xf32> -> vector<20x64xf32>
    %573 = arith.truncf %570 : vector<20x20xf32> to vector<20x20xbf16>
    %574 = arith.truncf %572 : vector<20x64xf32> to vector<20x64xbf16>
    %cst_188 = arith.constant dense<0.000000e+00> : vector<20x64xf32>
    %575 = tpu.matmul %573, %574, %cst_188 {dimension_numbers = #tpu.dot_dimension_numbers<[1], [0], [0], [1], [0, 0, 1, 1], [], []>} : vector<20x20xbf16>, vector<20x64xbf16>, vector<20x64xf32> -> vector<20x64xf32>
    %576 = arith.addf %554, %575 : vector<20x64xf32>
    %577 = vector.extract_strided_slice %508 {offsets = [0, 48], sizes = [20, 16], strides = [1, 1]} : vector<20x128xf32> to vector<20x16xf32>
    %578 = arith.truncf %577 : vector<20x16xf32> to vector<20x16xbf16>
    %579 = vector.extract_strided_slice %508 {offsets = [0, 112], sizes = [20, 16], strides = [1, 1]} : vector<20x128xf32> to vector<20x16xf32>
    %580 = arith.truncf %579 : vector<20x16xf32> to vector<20x16xbf16>
    %cst_189 = arith.constant dense<0.000000e+00> : vector<20x20xf32>
    %581 = tpu.matmul %578, %580, %cst_189 {dimension_numbers = #tpu.dot_dimension_numbers<[1], [1], [0], [0], [0, 0, 1, 0], [], []>} : vector<20x16xbf16>, vector<20x16xbf16>, vector<20x20xf32> -> vector<20x20xf32>
    %582 = arith.addf %581, %342 : vector<20x20xf32>
    %cst_190 = arith.constant dense<0xFF800000> : vector<20xf32>
    %583 = vector.multi_reduction <maximumf>, %582, %cst_190 [1] : vector<20x20xf32> to vector<20xf32>
    %584 = vector.shape_cast %583 : vector<20xf32> to vector<20x1xf32>
    %585 = vector.broadcast %584 : vector<20x1xf32> to vector<20x20xf32>
    %586 = arith.subf %582, %585 : vector<20x20xf32>
    %587 = math.exp %586 : vector<20x20xf32>
    %cst_191 = arith.constant dense<0.000000e+00> : vector<20xf32>
    %588 = vector.multi_reduction <add>, %587, %cst_191 [1] : vector<20x20xf32> to vector<20xf32>
    %589 = vector.shape_cast %588 : vector<20xf32> to vector<20x1xf32>
    %590 = tpu.reciprocal %589 {approx = true} : vector<20x1xf32> -> vector<20x1xf32>
    %591 = vector.broadcast %590 : vector<20x1xf32> to vector<20x20xf32>
    %592 = arith.mulf %587, %591 : vector<20x20xf32>
    %c976 = arith.constant 976 : index
    %c0_192 = arith.constant 0 : index
    %593 = vector.load %arg2[%c976, %c0_192] : memref<1648x64xbf16, #tpu.memory_space<vmem>>, vector<64x64xbf16>
    %cst_193 = arith.constant dense<0.000000e+00> : vector<20x64xf32>
    %594 = tpu.matmul %503, %593, %cst_193 {dimension_numbers = #tpu.dot_dimension_numbers<[1], [0], [0], [1], [0, 0, 1, 1], [], []>} : vector<20x64xbf16>, vector<64x64xbf16>, vector<20x64xf32> -> vector<20x64xf32>
    %595 = arith.truncf %592 : vector<20x20xf32> to vector<20x20xbf16>
    %596 = arith.truncf %594 : vector<20x64xf32> to vector<20x64xbf16>
    %cst_194 = arith.constant dense<0.000000e+00> : vector<20x64xf32>
    %597 = tpu.matmul %595, %596, %cst_194 {dimension_numbers = #tpu.dot_dimension_numbers<[1], [0], [0], [1], [0, 0, 1, 1], [], []>} : vector<20x20xbf16>, vector<20x64xbf16>, vector<20x64xf32> -> vector<20x64xf32>
    %598 = arith.addf %576, %597 : vector<20x64xf32>
    %599 = arith.addf %502, %598 : vector<20x64xf32>
    %c128_195 = arith.constant 128 : index
    %c0_196 = arith.constant 0 : index
    %600 = vector.load %arg3[%c128_195, %c0_196] : memref<392x128xf32, #tpu.memory_space<vmem>>, vector<1x64xf32>
    %c160 = arith.constant 160 : index
    %c0_197 = arith.constant 0 : index
    %601 = vector.load %arg3[%c160, %c0_197] : memref<392x128xf32, #tpu.memory_space<vmem>>, vector<1x64xf32>
    %cst_198 = arith.constant dense<0.000000e+00> : vector<20xf32>
    %602 = vector.multi_reduction <add>, %599, %cst_198 [1] : vector<20x64xf32> to vector<20xf32>
    %603 = vector.shape_cast %602 : vector<20xf32> to vector<20x1xf32>
    %cst_199 = arith.constant 6.400000e+01 : f32
    %604 = vector.broadcast %cst_199 : f32 to vector<20x1xf32>
    %605 = arith.divf %603, %604 : vector<20x1xf32>
    %606 = arith.mulf %599, %599 : vector<20x64xf32>
    %cst_200 = arith.constant dense<0.000000e+00> : vector<20xf32>
    %607 = vector.multi_reduction <add>, %606, %cst_200 [1] : vector<20x64xf32> to vector<20xf32>
    %608 = vector.shape_cast %607 : vector<20xf32> to vector<20x1xf32>
    %cst_201 = arith.constant 6.400000e+01 : f32
    %609 = vector.broadcast %cst_201 : f32 to vector<20x1xf32>
    %610 = arith.divf %608, %609 : vector<20x1xf32>
    %611 = vector.broadcast %605 : vector<20x1xf32> to vector<20x64xf32>
    %612 = arith.subf %599, %611 : vector<20x64xf32>
    %613 = arith.mulf %605, %605 : vector<20x1xf32>
    %614 = arith.subf %610, %613 : vector<20x1xf32>
    %cst_202 = arith.constant 9.99999974E-6 : f32
    %615 = vector.broadcast %cst_202 : f32 to vector<20x1xf32>
    %616 = arith.addf %614, %615 : vector<20x1xf32>
    %617 = math.rsqrt %616 : vector<20x1xf32>
    %618 = vector.broadcast %617 : vector<20x1xf32> to vector<20x64xf32>
    %619 = arith.mulf %612, %618 : vector<20x64xf32>
    %620 = vector.broadcast %600 : vector<1x64xf32> to vector<20x64xf32>
    %621 = arith.mulf %619, %620 : vector<20x64xf32>
    %622 = vector.broadcast %601 : vector<1x64xf32> to vector<20x64xf32>
    %623 = arith.addf %621, %622 : vector<20x64xf32>
    %c448 = arith.constant 448 : index
    %c0_203 = arith.constant 0 : index
    %624 = vector.load %arg1[%c448, %c0_203] : memref<704x128xbf16, #tpu.memory_space<vmem>>, vector<64x128xbf16>
    %c192_204 = arith.constant 192 : index
    %c0_205 = arith.constant 0 : index
    %625 = vector.load %arg3[%c192_204, %c0_205] : memref<392x128xf32, #tpu.memory_space<vmem>>, vector<1x128xf32>
    %626 = arith.truncf %623 : vector<20x64xf32> to vector<20x64xbf16>
    %cst_206 = arith.constant dense<0.000000e+00> : vector<20x128xf32>
    %627 = tpu.matmul %626, %624, %cst_206 {dimension_numbers = #tpu.dot_dimension_numbers<[1], [0], [0], [1], [0, 0, 1, 1], [], []>} : vector<20x64xbf16>, vector<64x128xbf16>, vector<20x128xf32> -> vector<20x128xf32>
    %628 = vector.broadcast %625 : vector<1x128xf32> to vector<20x128xf32>
    %629 = arith.addf %627, %628 : vector<20x128xf32>
    %cst_207 = arith.constant 0.000000e+00 : f32
    %630 = vector.broadcast %cst_207 : f32 to vector<20x128xf32>
    %631 = arith.maximumf %629, %630 : vector<20x128xf32>
    %c1424 = arith.constant 1424 : index
    %c0_208 = arith.constant 0 : index
    %632 = vector.load %arg2[%c1424, %c0_208] : memref<1648x64xbf16, #tpu.memory_space<vmem>>, vector<128x64xbf16>
    %c224 = arith.constant 224 : index
    %c0_209 = arith.constant 0 : index
    %633 = vector.load %arg3[%c224, %c0_209] : memref<392x128xf32, #tpu.memory_space<vmem>>, vector<1x64xf32>
    %634 = arith.truncf %631 : vector<20x128xf32> to vector<20x128xbf16>
    %cst_210 = arith.constant dense<0.000000e+00> : vector<20x64xf32>
    %635 = tpu.matmul %634, %632, %cst_210 {dimension_numbers = #tpu.dot_dimension_numbers<[1], [0], [0], [1], [0, 0, 1, 1], [], []>} : vector<20x128xbf16>, vector<128x64xbf16>, vector<20x64xf32> -> vector<20x64xf32>
    %636 = vector.broadcast %633 : vector<1x64xf32> to vector<20x64xf32>
    %637 = arith.addf %635, %636 : vector<20x64xf32>
    %638 = arith.addf %623, %637 : vector<20x64xf32>
    %c256_211 = arith.constant 256 : index
    %c0_212 = arith.constant 0 : index
    %639 = vector.load %arg3[%c256_211, %c0_212] : memref<392x128xf32, #tpu.memory_space<vmem>>, vector<1x64xf32>
    %c288 = arith.constant 288 : index
    %c0_213 = arith.constant 0 : index
    %640 = vector.load %arg3[%c288, %c0_213] : memref<392x128xf32, #tpu.memory_space<vmem>>, vector<1x64xf32>
    %cst_214 = arith.constant dense<0.000000e+00> : vector<20xf32>
    %641 = vector.multi_reduction <add>, %638, %cst_214 [1] : vector<20x64xf32> to vector<20xf32>
    %642 = vector.shape_cast %641 : vector<20xf32> to vector<20x1xf32>
    %cst_215 = arith.constant 6.400000e+01 : f32
    %643 = vector.broadcast %cst_215 : f32 to vector<20x1xf32>
    %644 = arith.divf %642, %643 : vector<20x1xf32>
    %645 = arith.mulf %638, %638 : vector<20x64xf32>
    %cst_216 = arith.constant dense<0.000000e+00> : vector<20xf32>
    %646 = vector.multi_reduction <add>, %645, %cst_216 [1] : vector<20x64xf32> to vector<20xf32>
    %647 = vector.shape_cast %646 : vector<20xf32> to vector<20x1xf32>
    %cst_217 = arith.constant 6.400000e+01 : f32
    %648 = vector.broadcast %cst_217 : f32 to vector<20x1xf32>
    %649 = arith.divf %647, %648 : vector<20x1xf32>
    %650 = vector.broadcast %644 : vector<20x1xf32> to vector<20x64xf32>
    %651 = arith.subf %638, %650 : vector<20x64xf32>
    %652 = arith.mulf %644, %644 : vector<20x1xf32>
    %653 = arith.subf %649, %652 : vector<20x1xf32>
    %cst_218 = arith.constant 9.99999974E-6 : f32
    %654 = vector.broadcast %cst_218 : f32 to vector<20x1xf32>
    %655 = arith.addf %653, %654 : vector<20x1xf32>
    %656 = math.rsqrt %655 : vector<20x1xf32>
    %657 = vector.broadcast %656 : vector<20x1xf32> to vector<20x64xf32>
    %658 = arith.mulf %651, %657 : vector<20x64xf32>
    %659 = vector.broadcast %639 : vector<1x64xf32> to vector<20x64xf32>
    %660 = arith.mulf %658, %659 : vector<20x64xf32>
    %661 = vector.broadcast %640 : vector<1x64xf32> to vector<20x64xf32>
    %662 = arith.addf %660, %661 : vector<20x64xf32>
    %c384_219 = arith.constant 384 : index
    %c0_220 = arith.constant 0 : index
    %663 = vector.load %arg3[%c384_219, %c0_220] : memref<392x128xf32, #tpu.memory_space<vmem>>, vector<2x20xf32>
    %cst_221 = arith.constant dense<0.000000e+00> : vector<2x64xf32>
    %664 = tpu.matmul %663, %662, %cst_221 {dimension_numbers = #tpu.dot_dimension_numbers<[1], [0], [0], [1], [0, 0, 1, 1], [], []>} : vector<2x20xf32>, vector<20x64xf32>, vector<2x64xf32> -> vector<2x64xf32>
    %c512 = arith.constant 512 : index
    %c0_222 = arith.constant 0 : index
    %665 = vector.load %arg1[%c512, %c0_222] : memref<704x128xbf16, #tpu.memory_space<vmem>>, vector<64x128xbf16>
    %c304 = arith.constant 304 : index
    %c0_223 = arith.constant 0 : index
    %666 = vector.load %arg3[%c304, %c0_223] : memref<392x128xf32, #tpu.memory_space<vmem>>, vector<1x128xf32>
    %667 = arith.truncf %664 : vector<2x64xf32> to vector<2x64xbf16>
    %cst_224 = arith.constant dense<0.000000e+00> : vector<2x128xf32>
    %668 = tpu.matmul %667, %665, %cst_224 {dimension_numbers = #tpu.dot_dimension_numbers<[1], [0], [0], [1], [0, 0, 1, 1], [], []>} : vector<2x64xbf16>, vector<64x128xbf16>, vector<2x128xf32> -> vector<2x128xf32>
    %669 = vector.broadcast %666 : vector<1x128xf32> to vector<2x128xf32>
    %670 = arith.addf %668, %669 : vector<2x128xf32>
    %cst_225 = arith.constant 0.000000e+00 : f32
    %671 = vector.broadcast %cst_225 : f32 to vector<2x128xf32>
    %672 = arith.maximumf %670, %671 : vector<2x128xf32>
    %c576 = arith.constant 576 : index
    %c0_226 = arith.constant 0 : index
    %673 = vector.load %arg1[%c576, %c0_226] : memref<704x128xbf16, #tpu.memory_space<vmem>>, vector<128x128xbf16>
    %c312 = arith.constant 312 : index
    %c0_227 = arith.constant 0 : index
    %674 = vector.load %arg3[%c312, %c0_227] : memref<392x128xf32, #tpu.memory_space<vmem>>, vector<1x128xf32>
    %675 = arith.truncf %672 : vector<2x128xf32> to vector<2x128xbf16>
    %cst_228 = arith.constant dense<0.000000e+00> : vector<2x128xf32>
    %676 = tpu.matmul %675, %673, %cst_228 {dimension_numbers = #tpu.dot_dimension_numbers<[1], [0], [0], [1], [0, 0, 1, 1], [], []>} : vector<2x128xbf16>, vector<128x128xbf16>, vector<2x128xf32> -> vector<2x128xf32>
    %677 = vector.broadcast %674 : vector<1x128xf32> to vector<2x128xf32>
    %678 = arith.addf %676, %677 : vector<2x128xf32>
    %c0_229 = arith.constant 0 : index
    %c0_230 = arith.constant 0 : index
    %679 = vector.load %arg4[%c0_229, %c0_230] : memref<2x128xf32, #tpu.memory_space<vmem>>, vector<2x128xf32>
    tpu.vector_store %arg4[%c0_229, %c0_230], %678 {strides = array<i32>} : memref<2x128xf32, #tpu.memory_space<vmem>>, vector<2x128xf32>,
    return
  }
}

</mosaic_0001>

<bundles_post_ra>
// kernel: run_model.1
= control target key start
LH: loop header
LB: loop body
LE: loop exit
PB: predicated region body
PF: predicated region fallthrough
CT: control target
= control target key end

     0   :  { %vm49_vm0 = vcmask 1045504   ;;  %v9240_v0 = vmov 0.0   ;;  %vm9241_vm1 = vmmov 0   ;;  %vm39_vm2 = vcmask 97280   ;;  %s11611_s0 = inlined_call_operand.vmem [shape: f32[40,12], index: 0, kind: input, shape index: {}]   ;;  %s11612_s1 = inlined_call_operand.vmem [shape: bf16[704,128], index: 1, kind: input, shape index: {}]   ;;  %s11613_s2 = inlined_call_operand.vmem [shape: bf16[1648,64], index: 2, kind: input, shape index: {}]   ;;  %s11614_s3 = inlined_call_operand.vmem [shape: f32[392,128], index: 3, kind: input, shape index: {}]   ;;  %s11615_s4 = inlined_call_operand.hbm [shape: f32[2,128], index: 4, kind: output, shape index: {}]  }
   0x1   :  { %7723 = vmatprep.subr.bf16.mxu0 %v9240_v0  ;;  %v8731_v1 = vld [vmem:[%s11613_s2] sm:$0x3f]   ;;  %v27_v3 = vld [vmem:[%s11611_s0 + $0x8] sm:$0xff]  ;;  %7737 = vmatprep.subr.bf16.mxu1 %v9240_v0  ;;  %v8732_v6 = vld [vmem:[%s11612_s1 + $0x18] sm:$0xff]  }
   0x2   :  { %v26_v2 = vld [vmem:[%s11611_s0] sm:$0xff]  ;;  %7725 = vmatprep.mubr.msk.bf16.mxu0 %vm9241_vm1, %v9240_v0  ;;  %7745 = vmatprep.mubr.msk.bf16.mxu1 %vm9241_vm1, %v9240_v0  ;;  %v51_v4 = vsel %vm49_vm0, %v8731_v1, 0  ;;  %v8733_v7 = vld [vmem:[%s11612_s1 + $0x10] sm:$0xff]   ;;  %v29_v9 = vld [vmem:[%s11611_s0 + $0x18] sm:$0xff] }
   0x3   :  { %v31_v5 = vpack.c.bf16 %v27_v3, %v26_v2  ;;  %7724 = vmatpush3.bf16.msra.mxu0 %v51_v4  ;;  %7738 = vmatpush3.bf16.msra.mxu1 %v8732_v6  ;;  %v28_v8 = vld [vmem:[%s11611_s0 + $0x10] sm:$0xff]  ;;  %v30_v11 = vld [vmem:[%s11611_s0 + $0x20] sm:$0xff]  ;;  %v8734_v13 = vld [vmem:[%s11612_s1 + $0x8] sm:$0xff]  }
   0x4   :  { %7757 = vmatprep.subr.bf16.mxu0 %v9240_v0  ;;  %7739 = vmatprep.subr.bf16.mxu1 %v9240_v0  ;;  %v32_v10 = vpack.c.bf16 %v29_v9, %v28_v8  ;;  %v33_v12 = vpack.c.bf16 %v30_v11, %v30_v11  ;;  %v8735_v14 = vld [vmem:[%s11612_s1] sm:$0xff]  }
   0x6   :  { %7726 = vmatmul.mubr.msk.bf16.vlgmr.msra.gmra.mxu0 %vm39_vm2, %v31_v5 }
   0x7   :  { %7729 = vmatprep.mubr.msk.bf16.mxu0 %vm9241_vm1, %v9240_v0  ;;  %7740 = vmatpush3.bf16.msra.mxu1 %v8733_v7 }
   0x8   :  { %7741 = vmatprep.subr.bf16.mxu1 %v9240_v0 }
   0xb   :  { %7742 = vmatpush3.bf16.msra.mxu1 %v8734_v13 }
   0xc   :  { %7743 = vmatprep.subr.bf16.mxu1 %v9240_v0 }
   0xe   :  { %7730 = vmatmul.mubr.msk.bf16.gmra.mxu0 %vm39_vm2, %v32_v10 }
   0xf   :  { %7733 = vmatprep.mubr.msk.bf16.mxu0 %vm9241_vm1, %v9240_v0  ;;  %7744 = vmatpush3.bf16.msra.mxu1 %v8735_v14 }
  0x10   :  { %7775 = vmatprep.subr.bf16.mxu1 %v9240_v0 }
  0x16   :  { %7734 = vmatmul.mubr.msk.bf16.gmra.mxu0 %vm39_vm2, %v33_v12 }
  0x17   :  { %7763 = vmatprep.mubr.msk.bf16.mxu0 %vm9241_vm1, %v9240_v0 }
  0x18   :  { %9 = vsyncpa [#allocation3], 0  ;;  %v21_v16 = vld [vmem:[%s11614_s3] sm:$0xff]  ;;  %v22_v18 = vld [vmem:[%s11614_s3 + $0x8] sm:$0xff]  ;;  %vm154_vm3 = vcmask 523264   ;;  %s9242_s28 = smov 64  }
  0x19   :  { %v8736_v23 = vld [vmem:[%s11613_s2 + $0x20] sm:$0xff]   ;;  %v23_v26 = vld [vmem:[%s11614_s3 + $0x10] sm:$0xff]  ;;  %v24_v28 = vld [vmem:[%s11614_s3 + $0x18] sm:$0xff]  ;;  %s9243_s29 = smov 48   ;;  %s9244_s30 = smov 112   ;;  %vm233_vm4 = vcmask 130048  }
  0x1a   :  { %v8737_v29 = vld [vmem:[%s11613_s2 + $0x18] sm:$0xff]   ;;  %v25_v34 = vld [vmem:[%s11614_s3 + $0x20] sm:$0xff]  ;;  %v8738_v35 = vld [vmem:[%s11613_s2 + $0x10] sm:$0xff]   ;;  %vm467_vm5 = vcmask 1043456   ;;  %vm308_vm6 = vcmask 326656   ;;  %s9245_s14 = smov 96  }
  0x1b   :  { %v8739_v40 = vld [vmem:[%s11613_s2 + $0x8] sm:$0xff]   ;;  %s9246_s15 = smov 32   ;;  %s9247_s24 = smov 80   ;;  %vm4154_vm7 = vcmask 1041408   ;;  %vm4029_vm8 = vcmask 162816   ;;  %vm4036_vm9 = vcmask 158720  }
  0x1c   :  { %v7001_v45 = vld [vmem:[%s11614_s3 + $0x28] ss:$0 sm:$0xff]  ;;  %s9248_s25 = smov 16   ;;  %vm4959_vm10 = vcmask 519168  }
  0xc6   :  { %v87_v15 = vpop.f32.mrf.mxu0 }
  0xc7   :  { %v9331_v20 = vadd.f32 %v87_v15, %v21_v16 }
  0xc8   :  { %v7727_v17 = vpop.f32.mrf.mxu0 }
  0xca   :  { %v90_v19 = vpop.f32.mrf.mxu0 }
  0xcb   :  { %v9333_v21 = vadd.f32 %v90_v19, %v22_v18 }
  0xcc   :  { %v7728_v22 = vpop.f32.mrf.mxu0 }
  0xcd   :  { %v9340_v24 = vpack.c.bf16 %v9333_v21, %v9331_v20 }
  0xce   :  { %v95_v25 = vpop.f32.mrf.mxu0 }
  0xcf   :  { %7746 = vmatmul.mubr.msk.bf16.vlgmr.msra.gmra.mxu1 %vm154_vm3, %v9340_v24  ;;  %v9356_v31 = vadd.f32 %v95_v25, %v23_v26 }
  0xd0   :  { %v7731_v27 = vpop.f32.mrf.mxu0  ;;  %7749 = vmatprep.mubr.msk.bf16.mxu1 %vm9241_vm1, %v9240_v0  ;;  %7776 = vmatpush3.bf16.msra.mxu1 %v8736_v23 }
  0xd1   :  { %7777 = vmatprep.subr.bf16.mxu1 %v9240_v0 }
  0xd2   :  { %v98_v30 = vpop.f32.mrf.mxu0 }
  0xd3   :  { %v9358_v32 = vadd.f32 %v98_v30, %v24_v28 }
  0xd4   :  { %v7732_v33 = vpop.f32.mrf.mxu0  ;;  %7778 = vmatpush3.bf16.msra.mxu1 %v8737_v29 }
  0xd5   :  { %v9368_v36 = vpack.c.bf16 %v9358_v32, %v9356_v31  ;;  %7779 = vmatprep.subr.bf16.mxu1 %v9240_v0 }
  0xd6   :  { %v103_v37 = vpop.f32.mrf.mxu0 }
  0xd7   :  { %v9371_v38 = vadd.f32 %v103_v37, %v25_v34  ;;  %7750 = vmatmul.mubr.msk.bf16.gmra.mxu1 %vm154_vm3, %v9368_v36 }
  0xd8   :  { %v7735_v39 = vpop.f32.mrf.mxu0  ;;  %7753 = vmatprep.mubr.msk.bf16.mxu1 %vm9241_vm1, %v9240_v0  ;;  %7780 = vmatpush3.bf16.msra.mxu1 %v8738_v35 }
  0xd9   :  { %7781 = vmatprep.subr.bf16.mxu1 %v9240_v0  ;;  %v9383_v42 = vpack.c.bf16 %v9371_v38, %v9371_v38  ;;  %v9464_v39 = vld [vmem:[%s11614_s3 + $0x140] sm:$0xff] }
  0xda   :  { %v106_v41 = vpop.f32.mrf.mxu0 }
  0xdc   :  { %v7736_v43 = vpop.f32.mrf.mxu0  ;;  %7782 = vmatpush3.bf16.msra.mxu1 %v8739_v40 }
  0xdd   :  { %7813 = vmatprep.subr.bf16.mxu1 %v9240_v0 }
  0xdf   :  { %7754 = vmatmul.mubr.msk.bf16.gmra.mxu1 %vm154_vm3, %v9383_v42 }
  0xe0   :  { %7783 = vmatprep.mubr.msk.bf16.mxu1 %vm9241_vm1, %v9240_v0 }
  0xe7   :  { %7784 = vmatmul.mubr.msk.bf16.vlgmr.msra.gmra.mxu1 %vm154_vm3, %v9340_v24 }
  0xe8   :  { %7787 = vmatprep.mubr.msk.bf16.mxu1 %vm9241_vm1, %v9240_v0 }
  0xef   :  { %7788 = vmatmul.mubr.msk.bf16.gmra.mxu1 %vm154_vm3, %v9368_v36 }
  0xf0   :  { %7791 = vmatprep.mubr.msk.bf16.mxu1 %vm9241_vm1, %v9240_v0 }
  0xf7   :  { %7792 = vmatmul.mubr.msk.bf16.gmra.mxu1 %vm154_vm3, %v9383_v42 }
  0xf8   :  { %7819 = vmatprep.mubr.msk.bf16.mxu1 %vm9241_vm1, %v9240_v0 }
 0x18f   :  { %v198_v44 = vpop.f32.mrf.mxu1 }
 0x190   :  { %v199_v48 = vadd.f32 %v7001_v45, %v198_v44 }
 0x191   :  { %v7747_v46 = vpop.f32.mrf.mxu1 }
 0x192   :  { %v9472_v46 = vld [vmem:[%s11614_s3 + $0x148] sm:$0xff] }
 0x193   :  { %v201_v47 = vpop.f32.mrf.mxu1 }
 0x194   :  { %v202_v49 = vadd.f32 %v7001_v45, %v201_v47 }
 0x195   :  { %v7748_v50 = vpop.f32.mrf.mxu1 }
 0x196   :  { %v9405_v51 = vpack.c.bf16 %v202_v49, %v199_v48 }
 0x197   :  { %v206_v52 = vpop.f32.mrf.mxu1 }
 0x198   :  { %227 = vrot.lane.b32.xlu1 %v9405_v51, %s9242_s28  ;;  %v207_v55 = vadd.f32 %v7001_v45, %v206_v52 }
 0x199   :  { %v7751_v53 = vpop.f32.mrf.mxu1 }
 0x19b   :  { %v209_v54 = vpop.f32.mrf.mxu1 }
 0x19c   :  { %v210_v56 = vadd.f32 %v7001_v45, %v209_v54  ;;  %542 = vrot.lane.b32.xlu1 %v9405_v51, %s9243_s29  ;;  %v9481_v54 = vld [vmem:[%s11614_s3 + $0x150] sm:$0xff] }
 0x19d   :  { %v7752_v57 = vpop.f32.mrf.mxu1 }
 0x19e   :  { %v9411_v58 = vpack.c.bf16 %v210_v56, %v207_v55 }
 0x19f   :  { %v214_v59 = vpop.f32.mrf.mxu1 }
 0x1a0   :  { %v215_v60 = vadd.f32 %v7001_v45, %v214_v59  ;;  %538 = vrot.lane.b32.xlu1 %v9411_v58, %s9244_s30 }
 0x1a1   :  { %v7755_v61 = vpop.f32.mrf.mxu1 }
 0x1a2   :  { %v9415_v62 = vpack.c.bf16 %v215_v60, %v215_v60 }
 0x1a3   :  { %v217_v63 = vpop.f32.mrf.mxu1 }
 0x1a4   :  { %546 = vrot.lane.b32.xlu1 %v9415_v62, %s9243_s29  ;;  %231 = vrot.lane.b32.xlu0 %v9415_v62, %s9242_s28  ;;  %v9490_v63 = vld [vmem:[%s11614_s3 + $0x158] sm:$0xff] }
 0x1a5   :  { %v7756_v1 = vpop.f32.mrf.mxu1 }
 0x1a7   :  { %v430_v2 = vpop.f32.mrf.mxu1 }
 0x1a8   :  { %229 = vrot.lane.b32.xlu0 %v9411_v58, %s9242_s28 }
 0x1a9   :  { %v7785_v3 = vpop.f32.mrf.mxu1 }
 0x1ab   :  { %v433_v4 = vpop.f32.mrf.mxu1 }
 0x1ac   :  { %v455_v5 = vpack.c.bf16 %v433_v4, %v430_v2  ;;  %544 = vrot.lane.b32.xlu0 %v9411_v58, %s9243_s29 }
 0x1ad   :  { %v7786_v6 = vpop.f32.mrf.mxu1 }
 0x1af   :  { %v438_v7 = vpop.f32.mrf.mxu1 }
 0x1b0   :  { %536 = vrot.lane.b32.xlu0 %v9405_v51, %s9244_s30 }
 0x1b1   :  { %v7789_v8 = vpop.f32.mrf.mxu1 }
 0x1b3   :  { %v441_v9 = vpop.f32.mrf.mxu1 }
 0x1b4   :  { %v456_v10 = vpack.c.bf16 %v441_v9, %v438_v7  ;;  %v9499_v7 = vld [vmem:[%s11614_s3 + $0x160] sm:$0xff] }
 0x1b5   :  { %v7790_v11 = vpop.f32.mrf.mxu1 }
 0x1b7   :  { %v446_v12 = vpop.f32.mrf.mxu1 }
 0x1b8   :  { %v457_v34 = vpack.c.bf16 %v446_v12, %v446_v12 }
 0x1b9   :  { %v7793_v13 = vpop.f32.mrf.mxu1 }
 0x1ba   :  { %v469_v37 = vsel %vm467_vm5, %v457_v34, 0 }
 0x1bb   :  { %v449_v14 = vpop.f32.mrf.mxu1 }
 0x1bd   :  { %v7794_v15 = vpop.f32.mrf.mxu1 }
 0x20a   :  { %v228_v16 = vpop.permute.xlu1 %227 }
 0x20b   :  { %v244_v30 = vsel %vm233_vm4, %v228_v16, 0 }
 0x20e   :  { %v543_v17 = vpop.permute.xlu1 %542 }
 0x20f   :  { %v558_v33 = vsel %vm233_vm4, %v543_v17, 0 }
 0x212   :  { %v539_v18 = vpop.permute.xlu1 %538 }
 0x216   :  { %v547_v19 = vpop.permute.xlu1 %546  ;;  %v232_v22 = vpop.permute.xlu0 %231 }
 0x217   :  { %v564_v23 = vsel %vm233_vm4, %v547_v19, 0  ;;  %v250_v25 = vsel %vm233_vm4, %v232_v22, 0 }
 0x218   :  { %7758 = vmatpush3.bf16.xpose.msra.mxu0 %v250_v25  ;;  %7814 = vmatpush3.bf16.xpose.msra.mxu1 %v564_v23 }
 0x219   :  { %7759 = vmatprep.subr.bf16.mxu0 %v9240_v0  ;;  %7815 = vmatprep.subr.bf16.mxu1 %v9240_v0 }
 0x21a   :  { %v230_v26 = vpop.permute.xlu0 %229 }
 0x21b   :  { %v247_v28 = vsel %vm233_vm4, %v230_v26, 0 }
 0x21e   :  { %v545_v27 = vpop.permute.xlu0 %544 }
 0x21f   :  { %v561_v29 = vsel %vm233_vm4, %v545_v27, 0 }
 0x220   :  { %7760 = vmatpush3.bf16.xpose.msra.mxu0 %v247_v28  ;;  %7816 = vmatpush3.bf16.xpose.msra.mxu1 %v561_v29 }
 0x221   :  { %7761 = vmatprep.subr.bf16.mxu0 %v9240_v0  ;;  %7817 = vmatprep.subr.bf16.mxu1 %v9240_v0 }
 0x222   :  { %v537_v35 = vpop.permute.xlu0 %536 }
 0x228   :  { %7762 = vmatpush3.bf16.xpose.msra.mxu0 %v244_v30  ;;  %7818 = vmatpush3.bf16.xpose.msra.mxu1 %v558_v33 }
 0x229   :  { %7795 = vmatprep.subr.bf16.mxu0 %v9240_v0  ;;  %7851 = vmatprep.subr.bf16.mxu1 %v9240_v0 }
 0x22f   :  { %7764 = vmatmul.mubr.msk.bf16.vlgmr.msra.gmra.mxu0 %vm233_vm4, %v9405_v51  ;;  %7820 = vmatmul.mubr.msk.bf16.vlgmr.msra.gmra.mxu1 %vm233_vm4, %v537_v35 }
 0x230   :  { %7796 = vmatpush3.bf16.msra.mxu0 %v469_v37  ;;  %7767 = vmatprep.mubr.msk.bf16.mxu0 %vm9241_vm1, %v9240_v0 }
 0x231   :  { %7797 = vmatprep.subr.bf16.mxu0 %v9240_v0  ;;  %7823 = vmatprep.mubr.msk.bf16.mxu1 %vm9241_vm1, %v9240_v0 }
 0x234   :  { %7798 = vmatpush3.bf16.msra.mxu0 %v456_v10 }
 0x235   :  { %7799 = vmatprep.subr.bf16.mxu0 %v9240_v0 }
 0x237   :  { %7768 = vmatmul.mubr.msk.bf16.gmra.mxu0 %vm233_vm4, %v9411_v58  ;;  %7824 = vmatmul.mubr.msk.bf16.gmra.mxu1 %vm233_vm4, %v539_v18 }
 0x238   :  { %7800 = vmatpush3.bf16.msra.mxu0 %v455_v5  ;;  %7771 = vmatprep.mubr.msk.bf16.mxu0 %vm9241_vm1, %v9240_v0 }
 0x239   :  { %7827 = vmatprep.mubr.msk.bf16.mxu1 %vm9241_vm1, %v9240_v0  ;;  %7831 = vmatprep.subr.bf16.mxu0 %v9240_v0 }
 0x23f   :  { %7772 = vmatmul.mubr.msk.bf16.gmra.mxu0 %vm233_vm4, %v9415_v62 }
 0x240   :  { %7801 = vmatprep.mubr.msk.bf16.mxu0 %vm9241_vm1, %v9240_v0 }
 0x2ef   :  { %v286_v40 = vpop.f32.mrf.mxu0  ;;  %v9466_v41 = vpop.f32.mrf.mxu1 }
 0x2f0   :  { %v287_v43 = vadd.f32 %v286_v40, %v9464_v39 }
 0x2f1   :  { %v7765_v44 = vpop.f32.mrf.mxu0  ;;  %v7821_v45 = vpop.f32.mrf.mxu1 }
 0x2f2   :  { %v309_v47 = vsel %vm308_vm6, %v287_v43, -inf }
 0x2f3   :  { %v9475_v48 = vpop.f32.mrf.mxu1  ;;  %310 = vmax.xlane.f32.xlu0 %v309_v47  ;;  %v289_v49 = vpop.f32.mrf.mxu0 }
 0x2f4   :  { %v290_v50 = vadd.f32 %v289_v49, %v9472_v46 }
 0x2f5   :  { %v7766_v52 = vpop.f32.mrf.mxu0  ;;  %v7822_v53 = vpop.f32.mrf.mxu1 }
 0x2f6   :  { %v312_v55 = vsel %vm308_vm6, %v290_v50, -inf }
 0x2f7   :  { %v9484_v56 = vpop.f32.mrf.mxu1  ;;  %313 = vmax.xlane.f32.xlu1 %v312_v55  ;;  %v294_v57 = vpop.f32.mrf.mxu0  ;;  %v9526_v55 = vadd.f32 %v9475_v48, %v9472_v46 }
 0x2f8   :  { %v295_v59 = vadd.f32 %v294_v57, %v9481_v54 }
 0x2f9   :  { %v7769_v60 = vpop.f32.mrf.mxu0  ;;  %v7825_v61 = vpop.f32.mrf.mxu1  ;;  %v625_v57 = vsel %vm308_vm6, %v9526_v55, -inf }
 0x2fa   :  { %v315_v1 = vsel %vm308_vm6, %v295_v59, -inf  ;;  %v9536_v60 = vadd.f32 %v9484_v56, %v9481_v54 }
 0x2fb   :  { %v9493_v2 = vpop.f32.mrf.mxu1  ;;  %316 = vmax.xlane.f32.xlu0 %v315_v1  ;;  %v297_v3 = vpop.f32.mrf.mxu0 }
 0x2fc   :  { %v298_v4 = vadd.f32 %v297_v3, %v9490_v63  ;;  %v9542_v48 = vadd.f32 %v9493_v2, %v9490_v63  ;;  %v628_v1 = vsel %vm308_vm6, %v9536_v60, -inf }
 0x2fd   :  { %v7770_v5 = vpop.f32.mrf.mxu0  ;;  %v7826_v6 = vpop.f32.mrf.mxu1 }
 0x2fe   :  { %v318_v8 = vsel %vm308_vm6, %v298_v4, -inf }
 0x2ff   :  { %319 = vmax.xlane.f32.xlu0 %v318_v8  ;;  %v302_v9 = vpop.f32.mrf.mxu0 }
 0x300   :  { %v303_v10 = vadd.f32 %v302_v9, %v9499_v7 }
 0x301   :  { %v7773_v11 = vpop.f32.mrf.mxu0 }
 0x302   :  { %v321_v12 = vsel %vm308_vm6, %v303_v10, -inf  ;;  %v8740_v11 = vld [vmem:[%s11613_s2 + $0x40] sm:$0xff]  }
 0x303   :  { %322 = vmax.xlane.f32.xlu0 %v321_v12  ;;  %v305_v13 = vpop.f32.mrf.mxu0 }
 0x305   :  { %v7774_v14 = vpop.f32.mrf.mxu0 }
 0x306   :  { %v8741_v14 = vld [vmem:[%s11613_s2 + $0x38] sm:$0xff]  }
 0x308   :  { %540 = vrot.lane.b32.xlu1 %v9415_v62, %s9244_s30 }
 0x37c   :  { %v311_v15 = vpop.xlane.xlu0 %310 }
 0x37d   :  { %v324_v16 = vsub.f32 %v287_v43, %v311_v15 }
 0x37f   :  { %v329_v17 = vmul.f32 1.442695, %v324_v16 }
 0x380   :  { %v314_v18 = vpop.xlane.xlu1 %313 }
 0x381   :  { %8878 = vpow2.f32 %v329_v17  ;;  %v325_v19 = vsub.f32 %v290_v50, %v314_v18  ;;  %v8742_v18 = vld [vmem:[%s11613_s2 + $0x30] sm:$0xff]  }
 0x383   :  { %v331_v22 = vmul.f32 1.442695, %v325_v19 }
 0x384   :  { %v541_v23 = vpop.permute.xlu1 %540  ;;  %v317_v25 = vpop.xlane.xlu0 %316 }
 0x385   :  { %8880 = vpow2.f32 %v331_v22  ;;  %v326_v26 = vsub.f32 %v295_v59, %v317_v25  ;;  %7828 = vmatmul.mubr.msk.bf16.gmra.mxu1 %vm233_vm4, %v541_v23  ;;  %v9532_v59 = vadd.f32 %v9466_v41, %v9464_v39  ;;  %v631_v41 = vsel %vm308_vm6, %v9542_v48, -inf  ;;  %v8743_v23 = vld [vmem:[%s11613_s2 + $0x28] sm:$0xff]  }
 0x386   :  { %7857 = vmatprep.mubr.msk.bf16.mxu1 %vm9241_vm1, %v9240_v0 }
 0x387   :  { %v333_v27 = vmul.f32 1.442695, %v326_v26  ;;  %v622_v61 = vsel %vm308_vm6, %v9532_v59, -inf }
 0x388   :  { %v320_v28 = vpop.xlane.xlu0 %319 }
 0x389   :  { %8882 = vpow2.f32 %v333_v27  ;;  %v327_v29 = vsub.f32 %v298_v4, %v320_v28 }
 0x38b   :  { %v335_v30 = vmul.f32 1.442695, %v327_v29 }
 0x38c   :  { %v323_v33 = vpop.xlane.xlu0 %322 }
 0x38d   :  { %8884 = vpow2.f32 %v335_v30  ;;  %v328_v34 = vsub.f32 %v303_v10, %v323_v33 }
 0x38e   :  { %v8879_v35 = vpop.eup %8878 }
 0x38f   :  { %v337_v37 = vmul.f32 1.442695, %v328_v34  ;;  %v339_v40 = vsel %vm308_vm6, %v8879_v35, 0.0 }
 0x390   :  { %340 = vadd.xlane.f32.xlu0 %v339_v40 }
 0x391   :  { %8886 = vpow2.f32 %v337_v37 }
 0x392   :  { %v8881_v43 = vpop.eup %8880 }
 0x393   :  { %v342_v44 = vsel %vm308_vm6, %v8881_v43, 0.0 }
 0x394   :  { %343 = vadd.xlane.f32.xlu0 %v342_v44 }
 0x396   :  { %v8883_v45 = vpop.eup %8882 }
 0x397   :  { %v345_v47 = vsel %vm308_vm6, %v8883_v45, 0.0 }
 0x398   :  { %346 = vadd.xlane.f32.xlu0 %v345_v47 }
 0x39a   :  { %v8885_v49 = vpop.eup %8884 }
 0x39b   :  { %v348_v50 = vsel %vm308_vm6, %v8885_v49, 0.0 }
 0x39c   :  { %349 = vadd.xlane.f32.xlu1 %v348_v50 }
 0x39e   :  { %v8887_v52 = vpop.eup %8886 }
 0x39f   :  { %v351_v53 = vsel %vm308_vm6, %v8887_v52, 0.0 }
 0x3a0   :  { %352 = vadd.xlane.f32.xlu0 %v351_v53 }
 0x3ad   :  { %846 = vrot.lane.b32.xlu1 %v9411_v58, %s9245_s14 }
 0x3b6   :  { %854 = vrot.lane.b32.xlu0 %v9415_v62, %s9246_s15 }
 0x3ba   :  { %852 = vrot.lane.b32.xlu0 %v9411_v58, %s9246_s15 }
 0x3be   :  { %850 = vrot.lane.b32.xlu0 %v9405_v51, %s9246_s15 }
 0x3c2   :  { %844 = vrot.lane.b32.xlu0 %v9405_v51, %s9245_s14 }
 0x3d1   :  { %626 = vmax.xlane.f32.xlu1 %v625_v57 }
 0x3e1   :  { %623 = vmax.xlane.f32.xlu0 %v622_v61 }
 0x3e5   :  { %629 = vmax.xlane.f32.xlu0 %v628_v1 }
 0x3e9   :  { %632 = vmax.xlane.f32.xlu0 %v631_v41 }
 0x3ff   :  { %848 = vrot.lane.b32.xlu0 %v9415_v62, %s9245_s14 }
 0x419   :  { %v341_v56 = vpop.xlane.xlu0 %340 }
 0x41a   :  { %8888 = vrcp.f32 %v341_v56 }
 0x41d   :  { %v344_v3 = vpop.xlane.xlu0 %343 }
 0x41e   :  { %8890 = vrcp.f32 %v344_v3 }
 0x421   :  { %v347_v4 = vpop.xlane.xlu0 %346 }
 0x422   :  { %8892 = vrcp.f32 %v347_v4 }
 0x425   :  { %v350_v5 = vpop.xlane.xlu1 %349 }
 0x426   :  { %8894 = vrcp.f32 %v350_v5 }
 0x427   :  { %v8889_v2 = vpop.eup %8888 }
 0x428   :  { %v359_v9 = vmul.f32 %v8889_v2, %v8879_v35 }
 0x429   :  { %v353_v6 = vpop.xlane.xlu0 %352 }
 0x42a   :  { %8896 = vrcp.f32 %v353_v6 }
 0x42b   :  { %v8891_v8 = vpop.eup %8890 }
 0x42c   :  { %v360_v10 = vmul.f32 %v8891_v8, %v8881_v43 }
 0x42d   :  { %v855_v27 = vpop.permute.xlu0 %854 }
 0x42e   :  { %v452_v12 = vpack.c.bf16 %v360_v10, %v359_v9  ;;  %v872_v33 = vsel %vm233_vm4, %v855_v27, 0 }
 0x42f   :  { %v8893_v13 = vpop.eup %8892 }
 0x430   :  { %7802 = vmatmul.mubr.msk.bf16.vlgmr.msra.gmra.mxu0 %vm308_vm6, %v452_v12  ;;  %v361_v16 = vmul.f32 %v8893_v13, %v8883_v45 }
 0x431   :  { %7805 = vmatprep.mubr.msk.bf16.mxu0 %vm9241_vm1, %v9240_v0  ;;  %7832 = vmatpush3.bf16.msra.mxu0 %v8740_v11  ;;  %v853_v40 = vpop.permute.xlu0 %852 }
 0x432   :  { %7833 = vmatprep.subr.bf16.mxu0 %v9240_v0  ;;  %v869_v43 = vsel %vm233_vm4, %v853_v40, 0 }
 0x433   :  { %v8895_v15 = vpop.eup %8894 }
 0x434   :  { %v362_v17 = vmul.f32 %v8895_v15, %v8885_v49  ;;  %v847_v49 = vpop.permute.xlu1 %846 }
 0x435   :  { %7834 = vmatpush3.bf16.msra.mxu0 %v8741_v14  ;;  %v851_v44 = vpop.permute.xlu0 %850 }
 0x436   :  { %v453_v19 = vpack.c.bf16 %v362_v17, %v361_v16  ;;  %7835 = vmatprep.subr.bf16.mxu0 %v9240_v0  ;;  %v866_v45 = vsel %vm233_vm4, %v851_v44, 0 }
 0x437   :  { %v8897_v22 = vpop.eup %8896 }
 0x438   :  { %7806 = vmatmul.mubr.msk.bf16.gmra.mxu0 %vm308_vm6, %v453_v19  ;;  %v363_v25 = vmul.f32 %v8897_v22, %v8887_v52 }
 0x439   :  { %7809 = vmatprep.mubr.msk.bf16.mxu0 %vm9241_vm1, %v9240_v0  ;;  %7836 = vmatpush3.bf16.msra.mxu0 %v8742_v18  ;;  %v845_v47 = vpop.permute.xlu0 %844 }
 0x43a   :  { %7837 = vmatprep.subr.bf16.mxu0 %v9240_v0  ;;  %v454_v26 = vpack.c.bf16 %v363_v25, %v363_v25 }
 0x43d   :  { %7838 = vmatpush3.bf16.msra.mxu0 %v8743_v23 }
 0x43e   :  { %7869 = vmatprep.subr.bf16.mxu0 %v9240_v0 }
 0x440   :  { %7810 = vmatmul.mubr.msk.bf16.gmra.mxu0 %vm308_vm6, %v454_v26 }
 0x441   :  { %7839 = vmatprep.mubr.msk.bf16.mxu0 %vm9241_vm1, %v9240_v0 }
 0x445   :  { %v616_v28 = vpop.f32.mrf.mxu1 }
 0x446   :  { %v9576_v29 = vadd.f32 %v616_v28, %v9499_v7 }
 0x447   :  { %v7829_v30 = vpop.f32.mrf.mxu1 }
 0x448   :  { %7840 = vmatmul.mubr.msk.bf16.vlgmr.msra.gmra.mxu0 %vm154_vm3, %v9340_v24  ;;  %v634_v34 = vsel %vm308_vm6, %v9576_v29, -inf }
 0x449   :  { %7870 = vmatpush3.bf16.xpose.msra.mxu0 %v872_v33  ;;  %v619_v35 = vpop.f32.mrf.mxu1  ;;  %635 = vmax.xlane.f32.xlu1 %v634_v34 }
 0x44a   :  { %7843 = vmatprep.mubr.msk.bf16.mxu0 %vm9241_vm1, %v9240_v0  ;;  %7871 = vmatprep.subr.bf16.mxu0 %v9240_v0 }
 0x44b   :  { %v7830_v37 = vpop.f32.mrf.mxu1 }
 0x450   :  { %7844 = vmatmul.mubr.msk.bf16.gmra.mxu0 %vm154_vm3, %v9368_v36 }
 0x451   :  { %7872 = vmatpush3.bf16.xpose.msra.mxu0 %v869_v43  ;;  %7847 = vmatprep.mubr.msk.bf16.mxu0 %vm9241_vm1, %v9240_v0 }
 0x452   :  { %7873 = vmatprep.subr.bf16.mxu0 %v9240_v0 }
 0x458   :  { %7848 = vmatmul.mubr.msk.bf16.gmra.mxu0 %vm154_vm3, %v9383_v42 }
 0x459   :  { %7874 = vmatpush3.bf16.xpose.msra.mxu0 %v866_v45  ;;  %7875 = vmatprep.mubr.msk.bf16.mxu0 %vm9241_vm1, %v9240_v0 }
 0x45a   :  { %7907 = vmatprep.subr.bf16.mxu0 %v9240_v0  ;;  %v627_v50 = vpop.xlane.xlu1 %626 }
 0x45b   :  { %v638_v52 = vsub.f32 %v9526_v55, %v627_v50 }
 0x45d   :  { %v644_v61 = vmul.f32 1.442695, %v638_v52 }
 0x460   :  { %7876 = vmatmul.mubr.msk.bf16.vlgmr.msra.gmra.mxu0 %vm233_vm4, %v845_v47 }
 0x461   :  { %7879 = vmatprep.mubr.msk.bf16.mxu0 %vm9241_vm1, %v9240_v0 }
 0x468   :  { %7880 = vmatmul.mubr.msk.bf16.gmra.mxu0 %vm233_vm4, %v847_v49 }
 0x469   :  { %7883 = vmatprep.mubr.msk.bf16.mxu0 %vm9241_vm1, %v9240_v0 }
 0x46a   :  { %v624_v53 = vpop.xlane.xlu0 %623 }
 0x46b   :  { %v637_v57 = vsub.f32 %v9532_v59, %v624_v53 }
 0x46d   :  { %v642_v1 = vmul.f32 1.442695, %v637_v57 }
 0x46e   :  { %v630_v41 = vpop.xlane.xlu0 %629 }
 0x46f   :  { %8898 = vpow2.f32 %v642_v1  ;;  %v639_v56 = vsub.f32 %v9536_v60, %v630_v41 }
 0x470   :  { %8900 = vpow2.f32 %v644_v61 }
 0x471   :  { %v646_v3 = vmul.f32 1.442695, %v639_v56 }
 0x472   :  { %v633_v4 = vpop.xlane.xlu0 %632 }
 0x473   :  { %8902 = vpow2.f32 %v646_v3  ;;  %v640_v5 = vsub.f32 %v9542_v48, %v633_v4 }
 0x475   :  { %v648_v2 = vmul.f32 1.442695, %v640_v5 }
 0x476   :  { %v849_v55 = vpop.permute.xlu0 %848 }
 0x477   :  { %8904 = vpow2.f32 %v648_v2  ;;  %7884 = vmatmul.mubr.msk.bf16.gmra.mxu0 %vm233_vm4, %v849_v55 }
 0x478   :  { %7913 = vmatprep.mubr.msk.bf16.mxu0 %vm9241_vm1, %v9240_v0 }
 0x47c   :  { %v9611_v59 = vpop.eup %8898 }
 0x47d   :  { %v652_v6 = vsel %vm308_vm6, %v9611_v59, 0.0  ;;  %v9615_v60 = vpop.eup %8900 }
 0x47e   :  { %653 = vadd.xlane.f32.xlu1 %v652_v6  ;;  %v655_v48 = vsel %vm308_vm6, %v9615_v60, 0.0 }
 0x480   :  { %v9617_v8 = vpop.eup %8902 }
 0x481   :  { %v658_v9 = vsel %vm308_vm6, %v9617_v8, 0.0 }
 0x482   :  { %656 = vadd.xlane.f32.xlu1 %v655_v48  ;;  %659 = vadd.xlane.f32.xlu0 %v658_v9 }
 0x484   :  { %v9623_v10 = vpop.eup %8904 }
 0x485   :  { %v661_v11 = vsel %vm308_vm6, %v9623_v10, 0.0 }
 0x486   :  { %662 = vadd.xlane.f32.xlu1 %v661_v11 }
 0x498   :  { %1152 = vrot.lane.b32.xlu0 %v9405_v51, %s9247_s24 }
 0x4d2   :  { %v636_v12 = vpop.xlane.xlu1 %635 }
 0x4d3   :  { %v641_v13 = vsub.f32 %v9576_v29, %v636_v12 }
 0x4d5   :  { %v650_v14 = vmul.f32 1.442695, %v641_v13 }
 0x4d7   :  { %8906 = vpow2.f32 %v650_v14 }
 0x4e4   :  { %v9630_v15 = vpop.eup %8906 }
 0x4e5   :  { %v664_v16 = vsel %vm308_vm6, %v9630_v15, 0.0 }
 0x4e6   :  { %665 = vadd.xlane.f32.xlu1 %v664_v16 }
 0x4f0   :  { %v9634_v17 = vpop.f32.mrf.mxu0 }
 0x4f2   :  { %v7803_v18 = vpop.f32.mrf.mxu0 }
 0x4f4   :  { %v9636_v19 = vpop.f32.mrf.mxu0 }
 0x4f6   :  { %v7804_v22 = vpop.f32.mrf.mxu0 }
 0x4f7   :  { %1162 = vrot.lane.b32.xlu1 %v9415_v62, %s9248_s25 }
 0x4f8   :  { %v9640_v23 = vpop.f32.mrf.mxu0 }
 0x4fa   :  { %v7807_v25 = vpop.f32.mrf.mxu0 }
 0x4fb   :  { %1160 = vrot.lane.b32.xlu1 %v9411_v58, %s9248_s25 }
 0x4fc   :  { %v9644_v26 = vpop.f32.mrf.mxu0 }
 0x4fe   :  { %v7808_v27 = vpop.f32.mrf.mxu0 }
 0x4ff   :  { %1158 = vrot.lane.b32.xlu1 %v9405_v51, %s9248_s25 }
 0x500   :  { %v9648_v28 = vpop.f32.mrf.mxu0 }
 0x502   :  { %v7811_v29 = vpop.f32.mrf.mxu0 }
 0x503   :  { %1154 = vrot.lane.b32.xlu1 %v9411_v58, %s9247_s24 }
 0x504   :  { %v524_v30 = vpop.f32.mrf.mxu0 }
 0x505   :  { %v8745_v30 = vld [vmem:[%s11613_s2 + $0x58] sm:$0xff]  }
 0x506   :  { %v7812_v33 = vpop.f32.mrf.mxu0 }
 0x507   :  { %v654_v34 = vpop.xlane.xlu1 %653 }
 0x508   :  { %v743_v35 = vpop.f32.mrf.mxu0 }
 0x50a   :  { %v7841_v37 = vpop.f32.mrf.mxu0 }
 0x50b   :  { %v657_v43 = vpop.xlane.xlu1 %656  ;;  %v660_v52 = vpop.xlane.xlu0 %659 }
 0x50c   :  { %v746_v40 = vpop.f32.mrf.mxu0  ;;  %8908 = vrcp.f32 %v657_v43 }
 0x50d   :  { %8910 = vrcp.f32 %v654_v34  ;;  %v768_v55 = vpack.c.bf16 %v746_v40, %v743_v35 }
 0x50e   :  { %v7842_v44 = vpop.f32.mrf.mxu0 }
 0x50f   :  { %v663_v51 = vpop.xlane.xlu1 %662 }
 0x510   :  { %v751_v45 = vpop.f32.mrf.mxu0  ;;  %8912 = vrcp.f32 %v663_v51 }
 0x511   :  { %8914 = vrcp.f32 %v660_v52 }
 0x512   :  { %v7845_v47 = vpop.f32.mrf.mxu0 }
 0x514   :  { %v754_v49 = vpop.f32.mrf.mxu0 }
 0x515   :  { %v769_v56 = vpack.c.bf16 %v754_v49, %v751_v45 }
 0x516   :  { %v7846_v50 = vpop.f32.mrf.mxu0 }
 0x518   :  { %v759_v53 = vpop.f32.mrf.mxu0 }
 0x519   :  { %v770_v57 = vpack.c.bf16 %v759_v53, %v759_v53  ;;  %v8909_v41 = vpop.eup %8908 }
 0x51a   :  { %v7849_v58 = vpop.f32.mrf.mxu0  ;;  %v8911_v4 = vpop.eup %8910  ;;  %v673_v2 = vmul.f32 %v8909_v41, %v9615_v60  ;;  %v8744_v60 = vld [vmem:[%s11613_s2 + $0x60] sm:$0xff]  }
 0x51b   :  { %v781_v61 = vsel %vm467_vm5, %v770_v57, 0  ;;  %v672_v9 = vmul.f32 %v8911_v4, %v9611_v59 }
 0x51c   :  { %v762_v1 = vpop.f32.mrf.mxu0  ;;  %7852 = vmatpush3.bf16.msra.mxu1 %v781_v61 }
 0x51d   :  { %7853 = vmatprep.subr.bf16.mxu1 %v9240_v0  ;;  %v765_v13 = vpack.c.bf16 %v673_v2, %v672_v9  ;;  %v8913_v14 = vpop.eup %8912 }
 0x51e   :  { %v7850_v3 = vpop.f32.mrf.mxu0  ;;  %v8915_v22 = vpop.eup %8914  ;;  %v675_v29 = vmul.f32 %v8913_v14, %v9623_v10  ;;  %v8746_v10 = vld [vmem:[%s11613_s2 + $0x50] sm:$0xff]  }
 0x51f   :  { %v674_v35 = vmul.f32 %v8915_v22, %v9617_v8  ;;  %v8747_v8 = vld [vmem:[%s11613_s2 + $0x48] sm:$0xff]  }
 0x520   :  { %7854 = vmatpush3.bf16.msra.mxu1 %v769_v56  ;;  %v908_v5 = vpop.f32.mrf.mxu0 }
 0x521   :  { %7855 = vmatprep.subr.bf16.mxu1 %v9240_v0  ;;  %v9657_v6 = vadd.f32 %v908_v5, %v9464_v39  ;;  %v766_v43 = vpack.c.bf16 %v675_v29, %v674_v35  ;;  %v1153_v5 = vpop.permute.xlu0 %1152 }
 0x522   :  { %v7877_v48 = vpop.f32.mrf.mxu0 }
 0x523   :  { %v930_v18 = vsel %vm308_vm6, %v9657_v6, -inf }
 0x524   :  { %7856 = vmatpush3.bf16.msra.mxu1 %v768_v55  ;;  %v911_v11 = vpop.f32.mrf.mxu0 }
 0x525   :  { %v9661_v12 = vadd.f32 %v911_v11, %v9472_v46  ;;  %7887 = vmatprep.subr.bf16.mxu1 %v9240_v0 }
 0x526   :  { %v7878_v16 = vpop.f32.mrf.mxu0 }
 0x527   :  { %7858 = vmatmul.mubr.msk.bf16.vlgmr.msra.gmra.mxu1 %vm308_vm6, %v765_v13  ;;  %931 = vmax.xlane.f32.xlu1 %v930_v18  ;;  %v933_v59 = vsel %vm308_vm6, %v9661_v12, -inf }
 0x528   :  { %934 = vmax.xlane.f32.xlu0 %v933_v59  ;;  %v916_v25 = vpop.f32.mrf.mxu0  ;;  %7861 = vmatprep.mubr.msk.bf16.mxu1 %vm9241_vm1, %v9240_v0 }
 0x529   :  { %v9675_v27 = vadd.f32 %v916_v25, %v9481_v54  ;;  %7888 = vmatpush3.bf16.msra.mxu1 %v8744_v60 }
 0x52a   :  { %v7881_v33 = vpop.f32.mrf.mxu0  ;;  %7889 = vmatprep.subr.bf16.mxu1 %v9240_v0 }
 0x52b   :  { %v936_v34 = vsel %vm308_vm6, %v9675_v27, -inf }
 0x52c   :  { %937 = vmax.xlane.f32.xlu1 %v936_v34  ;;  %v919_v37 = vpop.f32.mrf.mxu0 }
 0x52d   :  { %v9686_v40 = vadd.f32 %v919_v37, %v9490_v63  ;;  %7890 = vmatpush3.bf16.msra.mxu1 %v8745_v30 }
 0x52e   :  { %v7882_v44 = vpop.f32.mrf.mxu0  ;;  %7891 = vmatprep.subr.bf16.mxu1 %v9240_v0 }
 0x52f   :  { %7862 = vmatmul.mubr.msk.bf16.gmra.mxu1 %vm308_vm6, %v766_v43  ;;  %v939_v45 = vsel %vm308_vm6, %v9686_v40, -inf }
 0x530   :  { %940 = vmax.xlane.f32.xlu1 %v939_v45  ;;  %7865 = vmatprep.mubr.msk.bf16.mxu1 %vm9241_vm1, %v9240_v0 }
 0x531   :  { %7892 = vmatpush3.bf16.msra.mxu1 %v8746_v10 }
 0x532   :  { %7893 = vmatprep.subr.bf16.mxu1 %v9240_v0 }
 0x535   :  { %7894 = vmatpush3.bf16.msra.mxu1 %v8747_v8  ;;  %v7022_v8 = vld [vmem:[%s11614_s3 + $0x48] ss:$0 sm:$0xff] }
 0x536   :  { %7925 = vmatprep.subr.bf16.mxu1 %v9240_v0 }
 0x537   :  { %v924_v47 = vpop.f32.mrf.mxu0 }
 0x538   :  { %v9703_v49 = vadd.f32 %v924_v47, %v9499_v7  ;;  %v531_v47 = vadd.f32 %v7022_v8, %v9634_v17 }
 0x539   :  { %v7885_v51 = vpop.f32.mrf.mxu0 }
 0x53a   :  { %v942_v50 = vsel %vm308_vm6, %v9703_v49, -inf }
 0x53b   :  { %943 = vmax.xlane.f32.xlu1 %v942_v50  ;;  %v927_v52 = vpop.f32.mrf.mxu0 }
 0x53c   :  { %v532_v52 = vadd.f32 %v7022_v8, %v9636_v19 }
 0x53d   :  { %v7886_v53 = vpop.f32.mrf.mxu0 }
 0x53e   :  { %1156 = vrot.lane.b32.xlu0 %v9415_v62, %s9247_s24 }
 0x56f   :  { %v666_v57 = vpop.xlane.xlu1 %665 }
 0x570   :  { %8916 = vrcp.f32 %v666_v57 }
 0x573   :  { %v1163_v41 = vpop.permute.xlu1 %1162 }
 0x574   :  { %v1180_v56 = vsel %vm233_vm4, %v1163_v41, 0 }
 0x577   :  { %v1161_v62 = vpop.permute.xlu1 %1160 }
 0x57b   :  { %v1159_v3 = vpop.permute.xlu1 %1158 }
 0x57c   :  { %v1174_v4 = vsel %vm233_vm4, %v1159_v3, 0 }
 0x57d   :  { %v8917_v58 = vpop.eup %8916 }
 0x57e   :  { %v676_v61 = vmul.f32 %v8917_v58, %v9630_v15  ;;  %v1177_v15 = vsel %vm233_vm4, %v1161_v62, 0  ;;  %v534_v62 = vadd.f32 %v7022_v8, %v9644_v26 }
 0x57f   :  { %v1155_v2 = vpop.permute.xlu1 %1154 }
 0x580   :  { %v767_v1 = vpack.c.bf16 %v676_v61, %v676_v61  ;;  %v533_v61 = vadd.f32 %v7022_v8, %v9640_v23 }
 0x582   :  { %7866 = vmatmul.mubr.msk.bf16.gmra.mxu1 %vm308_vm6, %v767_v1 }
 0x583   :  { %7895 = vmatprep.mubr.msk.bf16.mxu1 %vm9241_vm1, %v9240_v0 }
 0x58a   :  { %7896 = vmatmul.mubr.msk.bf16.vlgmr.msra.gmra.mxu1 %vm154_vm3, %v9340_v24 }
 0x58b   :  { %7926 = vmatpush3.bf16.xpose.msra.mxu1 %v1180_v56  ;;  %7899 = vmatprep.mubr.msk.bf16.mxu1 %vm9241_vm1, %v9240_v0 }
 0x58c   :  { %7927 = vmatprep.subr.bf16.mxu1 %v9240_v0 }
 0x592   :  { %7900 = vmatmul.mubr.msk.bf16.gmra.mxu1 %vm154_vm3, %v9368_v36 }
 0x593   :  { %7928 = vmatpush3.bf16.xpose.msra.mxu1 %v1177_v15  ;;  %7903 = vmatprep.mubr.msk.bf16.mxu1 %vm9241_vm1, %v9240_v0 }
 0x594   :  { %7929 = vmatprep.subr.bf16.mxu1 %v9240_v0 }
 0x59a   :  { %7904 = vmatmul.mubr.msk.bf16.gmra.mxu1 %vm154_vm3, %v9383_v42 }
 0x59b   :  { %7930 = vmatpush3.bf16.xpose.msra.mxu1 %v1174_v4  ;;  %7931 = vmatprep.mubr.msk.bf16.mxu1 %vm9241_vm1, %v9240_v0  ;;  %v535_v4 = vadd.f32 %v7022_v8, %v9648_v28 }
 0x59c   :  { %7963 = vmatprep.subr.bf16.mxu1 %v9240_v0 }
 0x5a2   :  { %7932 = vmatmul.mubr.msk.bf16.vlgmr.msra.gmra.mxu1 %vm233_vm4, %v1153_v5 }
 0x5a3   :  { %7935 = vmatprep.mubr.msk.bf16.mxu1 %vm9241_vm1, %v9240_v0 }
 0x5aa   :  { %7936 = vmatmul.mubr.msk.bf16.gmra.mxu1 %vm233_vm4, %v1155_v2 }
 0x5ab   :  { %7939 = vmatprep.mubr.msk.bf16.mxu1 %vm9241_vm1, %v9240_v0 }
 0x5b0   :  { %v932_v55 = vpop.xlane.xlu1 %931 }
 0x5b1   :  { %v945_v48 = vsub.f32 %v9657_v6, %v932_v55  ;;  %v935_v9 = vpop.xlane.xlu0 %934 }
 0x5b2   :  { %v946_v11 = vsub.f32 %v9661_v12, %v935_v9 }
 0x5b3   :  { %v950_v13 = vmul.f32 1.442695, %v945_v48 }
 0x5b4   :  { %v952_v60 = vmul.f32 1.442695, %v946_v11 }
 0x5b5   :  { %8918 = vpow2.f32 %v950_v13  ;;  %v1157_v14 = vpop.permute.xlu0 %1156  ;;  %v938_v16 = vpop.xlane.xlu1 %937 }
 0x5b6   :  { %v947_v18 = vsub.f32 %v9675_v27, %v938_v16  ;;  %7940 = vmatmul.mubr.msk.bf16.gmra.mxu1 %vm233_vm4, %v1157_v14  ;;  %8920 = vpow2.f32 %v952_v60 }
 0x5b7   :  { %7969 = vmatprep.mubr.msk.bf16.mxu1 %vm9241_vm1, %v9240_v0 }
 0x5b8   :  { %v954_v59 = vmul.f32 1.442695, %v947_v18 }
 0x5b9   :  { %v941_v22 = vpop.xlane.xlu1 %940 }
 0x5ba   :  { %v948_v6 = vsub.f32 %v9686_v40, %v941_v22  ;;  %8922 = vpow2.f32 %v954_v59 }
 0x5bc   :  { %v956_v25 = vmul.f32 1.442695, %v948_v6 }
 0x5be   :  { %8924 = vpow2.f32 %v956_v25 }
 0x5c2   :  { %v9744_v12 = vpop.eup %8918 }
 0x5c3   :  { %v960_v29 = vsel %vm308_vm6, %v9744_v12, 0.0  ;;  %v9748_v30 = vpop.eup %8920 }
 0x5c4   :  { %961 = vadd.xlane.f32.xlu1 %v960_v29  ;;  %v944_v27 = vpop.xlane.xlu1 %943  ;;  %v963_v35 = vsel %vm308_vm6, %v9748_v30, 0.0 }
 0x5c5   :  { %v949_v33 = vsub.f32 %v9703_v49, %v944_v27 }
 0x5c7   :  { %v958_v34 = vmul.f32 1.442695, %v949_v33  ;;  %v9753_v37 = vpop.eup %8922 }
 0x5c8   :  { %964 = vadd.xlane.f32.xlu1 %v963_v35  ;;  %v966_v40 = vsel %vm308_vm6, %v9753_v37, 0.0 }
 0x5c9   :  { %8926 = vpow2.f32 %v958_v34 }
 0x5cb   :  { %v9757_v43 = vpop.eup %8924 }
 0x5cc   :  { %967 = vadd.xlane.f32.xlu1 %v966_v40  ;;  %v969_v10 = vsel %vm308_vm6, %v9757_v43, 0.0 }
 0x5d0   :  { %970 = vadd.xlane.f32.xlu1 %v969_v10 }
 0x5d6   :  { %v9761_v44 = vpop.eup %8926 }
 0x5d7   :  { %v972_v45 = vsel %vm308_vm6, %v9761_v44, 0.0 }
 0x5d8   :  { %973 = vadd.xlane.f32.xlu1 %v972_v45 }
 0x5e7   :  { %v817_v49 = vpop.f32.mrf.mxu1 }
 0x5e8   :  { %v9769_v51 = vadd.f32 %v817_v49, %v531_v47 }
 0x5e9   :  { %v7859_v50 = vpop.f32.mrf.mxu1 }
 0x5eb   :  { %v820_v53 = vpop.f32.mrf.mxu1 }
 0x5ec   :  { %v9772_v57 = vadd.f32 %v820_v53, %v532_v52 }
 0x5ed   :  { %v7860_v58 = vpop.f32.mrf.mxu1 }
 0x5ef   :  { %v825_v1 = vpop.f32.mrf.mxu1 }
 0x5f0   :  { %v9775_v41 = vadd.f32 %v825_v1, %v533_v61 }
 0x5f1   :  { %v7863_v56 = vpop.f32.mrf.mxu1 }
 0x5f3   :  { %v828_v15 = vpop.f32.mrf.mxu1 }
 0x5f4   :  { %v9778_v17 = vadd.f32 %v828_v15, %v534_v62 }
 0x5f5   :  { %v7864_v3 = vpop.f32.mrf.mxu1 }
 0x642   :  { %v833_v5 = vpop.f32.mrf.mxu1 }
 0x643   :  { %v9781_v19 = vadd.f32 %v833_v5, %v535_v4  ;;  %v8749_v5 = vld [vmem:[%s11613_s2 + $0x78] sm:$0xff]  }
 0x644   :  { %v7867_v2 = vpop.f32.mrf.mxu1 }
 0x646   :  { %v836_v55 = vpop.f32.mrf.mxu1 }
 0x648   :  { %v7868_v48 = vpop.f32.mrf.mxu1 }
 0x64a   :  { %v1051_v9 = vpop.f32.mrf.mxu1 }
 0x64c   :  { %v7897_v23 = vpop.f32.mrf.mxu1 }
 0x64d   :  { %v962_v11 = vpop.xlane.xlu1 %961 }
 0x64e   :  { %v1054_v13 = vpop.f32.mrf.mxu1 }
 0x64f   :  { %v1076_v50 = vpack.c.bf16 %v1054_v13, %v1051_v9 }
 0x650   :  { %v7898_v60 = vpop.f32.mrf.mxu1 }
 0x651   :  { %v965_v14 = vpop.xlane.xlu1 %964 }
 0x652   :  { %v1059_v16 = vpop.f32.mrf.mxu1  ;;  %8928 = vrcp.f32 %v965_v14 }
 0x653   :  { %8930 = vrcp.f32 %v962_v11 }
 0x654   :  { %v7901_v26 = vpop.f32.mrf.mxu1 }
 0x655   :  { %v968_v18 = vpop.xlane.xlu1 %967 }
 0x656   :  { %v1062_v59 = vpop.f32.mrf.mxu1 }
 0x657   :  { %v1077_v35 = vpack.c.bf16 %v1062_v59, %v1059_v16 }
 0x658   :  { %v7902_v22 = vpop.f32.mrf.mxu1 }
 0x659   :  { %v971_v28 = vpop.xlane.xlu1 %970 }
 0x65a   :  { %v1067_v6 = vpop.f32.mrf.mxu1  ;;  %8932 = vrcp.f32 %v971_v28 }
 0x65b   :  { %v1078_v25 = vpack.c.bf16 %v1067_v6, %v1067_v6  ;;  %8934 = vrcp.f32 %v968_v18 }
 0x65c   :  { %v7905_v29 = vpop.f32.mrf.mxu1 }
 0x65d   :  { %v1089_v27 = vsel %vm467_vm5, %v1078_v25, 0 }
 0x65e   :  { %v1070_v33 = vpop.f32.mrf.mxu1  ;;  %7908 = vmatpush3.bf16.msra.mxu0 %v1089_v27 }
 0x65f   :  { %7909 = vmatprep.subr.bf16.mxu0 %v9240_v0  ;;  %v8929_v34 = vpop.eup %8928 }
 0x660   :  { %v7906_v40 = vpop.f32.mrf.mxu1  ;;  %v8931_v45 = vpop.eup %8930  ;;  %v981_v47 = vmul.f32 %v8929_v34, %v9748_v30 }
 0x661   :  { %v974_v10 = vpop.xlane.xlu1 %973  ;;  %v980_v53 = vmul.f32 %v8931_v45, %v9744_v12 }
 0x662   :  { %7910 = vmatpush3.bf16.msra.mxu0 %v1077_v35  ;;  %v1216_v8 = vpop.f32.mrf.mxu1  ;;  %8936 = vrcp.f32 %v974_v10 }
 0x663   :  { %v9787_v49 = vadd.f32 %v1216_v8, %v9464_v39  ;;  %7911 = vmatprep.subr.bf16.mxu0 %v9240_v0  ;;  %v1073_v56 = vpack.c.bf16 %v981_v47, %v980_v53  ;;  %v8748_v39 = vld [vmem:[%s11613_s2 + $0x80] sm:$0xff]  }
 0x664   :  { %v7933_v52 = vpop.f32.mrf.mxu1 }
 0x665   :  { %v1238_v58 = vsel %vm308_vm6, %v9787_v49, -inf }
 0x666   :  { %7912 = vmatpush3.bf16.msra.mxu0 %v1076_v50  ;;  %v1219_v61 = vpop.f32.mrf.mxu1  ;;  %1239 = vmax.xlane.f32.xlu1 %v1238_v58 }
 0x667   :  { %v1220_v1 = vadd.f32 %v1219_v61, %v9472_v46  ;;  %7943 = vmatprep.subr.bf16.mxu0 %v9240_v0  ;;  %v8933_v30 = vpop.eup %8932 }
 0x668   :  { %v7934_v62 = vpop.f32.mrf.mxu1  ;;  %v8935_v15 = vpop.eup %8934  ;;  %v983_v4 = vmul.f32 %v8933_v30, %v9757_v43 }
 0x669   :  { %7914 = vmatmul.mubr.msk.bf16.vlgmr.msra.gmra.mxu0 %vm308_vm6, %v1073_v56  ;;  %v1241_v12 = vsel %vm308_vm6, %v1220_v1, -inf  ;;  %v982_v48 = vmul.f32 %v8935_v15, %v9753_v37  ;;  %v8751_v37 = vld [vmem:[%s11613_s2 + $0x68] sm:$0xff]  }
 0x66a   :  { %v1224_v3 = vpop.f32.mrf.mxu1  ;;  %1242 = vmax.xlane.f32.xlu0 %v1241_v12  ;;  %7917 = vmatprep.mubr.msk.bf16.mxu0 %vm9241_vm1, %v9240_v0 }
 0x66b   :  { %v1225_v46 = vadd.f32 %v1224_v3, %v9481_v54  ;;  %7944 = vmatpush3.bf16.msra.mxu0 %v8748_v39  ;;  %v1074_v11 = vpack.c.bf16 %v983_v4, %v982_v48  ;;  %v8750_v54 = vld [vmem:[%s11613_s2 + $0x70] sm:$0xff]  }
 0x66c   :  { %v7937_v2 = vpop.f32.mrf.mxu1  ;;  %7945 = vmatprep.subr.bf16.mxu0 %v9240_v0 }
 0x66d   :  { %v1244_v55 = vsel %vm308_vm6, %v1225_v46, -inf }
 0x66e   :  { %v1227_v9 = vpop.f32.mrf.mxu1  ;;  %1245 = vmax.xlane.f32.xlu1 %v1244_v55 }
 0x66f   :  { %v1228_v23 = vadd.f32 %v1227_v9, %v9490_v63  ;;  %7946 = vmatpush3.bf16.msra.mxu0 %v8749_v5  ;;  %v8937_v43 = vpop.eup %8936 }
 0x670   :  { %v7938_v13 = vpop.f32.mrf.mxu1  ;;  %7947 = vmatprep.subr.bf16.mxu0 %v9240_v0  ;;  %v984_v63 = vmul.f32 %v8937_v43, %v9761_v44 }
 0x671   :  { %7918 = vmatmul.mubr.msk.bf16.gmra.mxu0 %vm308_vm6, %v1074_v11  ;;  %v1247_v60 = vsel %vm308_vm6, %v1228_v23, -inf }
 0x672   :  { %1248 = vmax.xlane.f32.xlu1 %v1247_v60  ;;  %7921 = vmatprep.mubr.msk.bf16.mxu0 %vm9241_vm1, %v9240_v0  ;;  %v1075_v26 = vpack.c.bf16 %v984_v63, %v984_v63 }
 0x673   :  { %7948 = vmatpush3.bf16.msra.mxu0 %v8750_v54 }
 0x674   :  { %7949 = vmatprep.subr.bf16.mxu0 %v9240_v0 }
 0x676   :  { %v1232_v14 = vpop.f32.mrf.mxu1 }
 0x677   :  { %v1233_v16 = vadd.f32 %v1232_v14, %v9499_v7  ;;  %7950 = vmatpush3.bf16.msra.mxu0 %v8751_v37 }
 0x678   :  { %v7941_v18 = vpop.f32.mrf.mxu1  ;;  %7981 = vmatprep.subr.bf16.mxu0 %v9240_v0 }
 0x679   :  { %7922 = vmatmul.mubr.msk.bf16.gmra.mxu0 %vm308_vm6, %v1075_v26  ;;  %v1250_v59 = vsel %vm308_vm6, %v1233_v16, -inf }
 0x67a   :  { %v1235_v44 = vpop.f32.mrf.mxu1  ;;  %1251 = vmax.xlane.f32.xlu1 %v1250_v59  ;;  %7951 = vmatprep.mubr.msk.bf16.mxu0 %vm9241_vm1, %v9240_v0 }
 0x67c   :  { %v7942_v22 = vpop.f32.mrf.mxu1 }
 0x681   :  { %7952 = vmatmul.mubr.msk.bf16.vlgmr.msra.gmra.mxu0 %vm154_vm3, %v9340_v24 }
 0x682   :  { %7955 = vmatprep.mubr.msk.bf16.mxu0 %vm9241_vm1, %v9240_v0 }
 0x689   :  { %7956 = vmatmul.mubr.msk.bf16.gmra.mxu0 %vm154_vm3, %v9368_v36 }
 0x68a   :  { %7959 = vmatprep.mubr.msk.bf16.mxu0 %vm9241_vm1, %v9240_v0 }
 0x691   :  { %7960 = vmatmul.mubr.msk.bf16.gmra.mxu0 %vm154_vm3, %v9383_v42 }
 0x692   :  { %7989 = vmatprep.mubr.msk.bf16.mxu0 %vm9241_vm1, %v9240_v0 }
 0x6ef   :  { %v1240_v7 = vpop.xlane.xlu1 %1239 }
 0x6f0   :  { %v1253_v28 = vsub.f32 %v9787_v49, %v1240_v7 }
 0x6f2   :  { %v1258_v6 = vmul.f32 1.442695, %v1253_v28 }
 0x6f3   :  { %v1243_v24 = vpop.xlane.xlu0 %1242 }
 0x6f4   :  { %8938 = vpow2.f32 %v1258_v6  ;;  %v1254_v25 = vsub.f32 %v1220_v1, %v1243_v24 }
 0x6f6   :  { %v1260_v29 = vmul.f32 1.442695, %v1254_v25 }
 0x6f7   :  { %v1246_v27 = vpop.xlane.xlu1 %1245 }
 0x6f8   :  { %8940 = vpow2.f32 %v1260_v29  ;;  %v1255_v36 = vsub.f32 %v1225_v46, %v1246_v27 }
 0x6fa   :  { %v1262_v33 = vmul.f32 1.442695, %v1255_v36 }
 0x6fb   :  { %v1249_v34 = vpop.xlane.xlu1 %1248 }
 0x6fc   :  { %8942 = vpow2.f32 %v1262_v33  ;;  %v1256_v35 = vsub.f32 %v1228_v23, %v1249_v34 }
 0x6fe   :  { %v1264_v40 = vmul.f32 1.442695, %v1256_v35 }
 0x700   :  { %8944 = vpow2.f32 %v1264_v40 }
 0x701   :  { %v9843_v42 = vpop.eup %8938 }
 0x702   :  { %v1268_v10 = vsel %vm308_vm6, %v9843_v42, 0.0 }
 0x703   :  { %1269 = vadd.xlane.f32.xlu1 %v1268_v10  ;;  %v1252_v45 = vpop.xlane.xlu1 %1251 }
 0x704   :  { %v1257_v8 = vsub.f32 %v1233_v16, %v1252_v45 }
 0x705   :  { %v9847_v47 = vpop.eup %8940 }
 0x706   :  { %v1266_v49 = vmul.f32 1.442695, %v1257_v8  ;;  %v1271_v50 = vsel %vm308_vm6, %v9847_v47, 0.0 }
 0x707   :  { %1272 = vadd.xlane.f32.xlu1 %v1271_v50 }
 0x708   :  { %8946 = vpow2.f32 %v1266_v49 }
 0x709   :  { %v9851_v52 = vpop.eup %8942 }
 0x70a   :  { %v1274_v53 = vsel %vm308_vm6, %v9851_v52, 0.0 }
 0x70b   :  { %1275 = vadd.xlane.f32.xlu1 %v1274_v53 }
 0x70d   :  { %v9855_v58 = vpop.eup %8944 }
 0x70e   :  { %v1277_v61 = vsel %vm308_vm6, %v9855_v58, 0.0 }
 0x70f   :  { %1278 = vadd.xlane.f32.xlu1 %v1277_v61 }
 0x715   :  { %v9859_v1 = vpop.eup %8946 }
 0x716   :  { %v1280_v56 = vsel %vm308_vm6, %v9859_v1, 0.0 }
 0x717   :  { %1281 = vadd.xlane.f32.xlu0 %v1280_v56 }
 0x729   :  { %v1125_v39 = vpop.f32.mrf.mxu0 }
 0x72a   :  { %v9864_v30 = vadd.f32 %v1125_v39, %v9769_v51 }
 0x72b   :  { %v7915_v62 = vpop.f32.mrf.mxu0 }
 0x72d   :  { %v1128_v12 = vpop.f32.mrf.mxu0 }
 0x72e   :  { %v9867_v15 = vadd.f32 %v1128_v12, %v9772_v57 }
 0x72f   :  { %v7916_v3 = vpop.f32.mrf.mxu0 }
 0x731   :  { %v1133_v46 = vpop.f32.mrf.mxu0 }
 0x732   :  { %v9870_v4 = vadd.f32 %v1133_v46, %v9775_v41 }
 0x733   :  { %v7919_v5 = vpop.f32.mrf.mxu0 }
 0x735   :  { %v1136_v2 = vpop.f32.mrf.mxu0 }
 0x736   :  { %v9873_v55 = vadd.f32 %v1136_v2, %v9778_v17 }
 0x737   :  { %v7920_v48 = vpop.f32.mrf.mxu0 }
 0x739   :  { %v1141_v9 = vpop.f32.mrf.mxu0 }
 0x73a   :  { %v9876_v51 = vadd.f32 %v1141_v9, %v9781_v19 }
 0x73b   :  { %v7923_v23 = vpop.f32.mrf.mxu0 }
 0x73d   :  { %v1144_v11 = vpop.f32.mrf.mxu0 }
 0x73f   :  { %v7924_v54 = vpop.f32.mrf.mxu0 }
 0x741   :  { %v1359_v57 = vpop.f32.mrf.mxu0 }
 0x743   :  { %v7953_v43 = vpop.f32.mrf.mxu0 }
 0x745   :  { %v1362_v13 = vpop.f32.mrf.mxu0 }
 0x746   :  { %v1384_v22 = vpack.c.bf16 %v1362_v13, %v1359_v57 }
 0x747   :  { %v7954_v60 = vpop.f32.mrf.mxu0 }
 0x749   :  { %v1367_v63 = vpop.f32.mrf.mxu0 }
 0x74b   :  { %v7957_v41 = vpop.f32.mrf.mxu0 }
 0x74d   :  { %v1370_v37 = vpop.f32.mrf.mxu0 }
 0x74e   :  { %v1385_v19 = vpack.c.bf16 %v1370_v37, %v1367_v63 }
 0x74f   :  { %v7958_v14 = vpop.f32.mrf.mxu0 }
 0x751   :  { %v1375_v16 = vpop.f32.mrf.mxu0 }
 0x752   :  { %v1386_v26 = vpack.c.bf16 %v1375_v16, %v1375_v16 }
 0x753   :  { %v7961_v17 = vpop.f32.mrf.mxu0 }
 0x754   :  { %v1397_v18 = vsel %vm467_vm5, %v1386_v26, 0  ;;  %v8753_v26 = vld [vmem:[%s11612_s1 + $0x90] sm:$0xff]   ;;  %v8754_v17 = vld [vmem:[%s11612_s1 + $0x88] sm:$0xff]  }
 0x755   :  { %v1378_v59 = vpop.f32.mrf.mxu0  ;;  %7964 = vmatpush3.bf16.msra.mxu1 %v1397_v18  ;;  %v8755_v18 = vld [vmem:[%s11612_s1 + $0x80] sm:$0xff]  }
 0x756   :  { %7965 = vmatprep.subr.bf16.mxu1 %v9240_v0  ;;  %v8756_v59 = vld [vmem:[%s11613_s2 + $0x240] sm:$0xff]  }
 0x757   :  { %v7962_v44 = vpop.f32.mrf.mxu0 }
 0x758   :  { %v8758_v44 = vld [vmem:[%s11613_s2 + $0x230] sm:$0xff]  }
 0x759   :  { %7966 = vmatpush3.bf16.msra.mxu1 %v1385_v19  ;;  %v8757_v19 = vld [vmem:[%s11613_s2 + $0x238] sm:$0xff]  }
 0x75a   :  { %7967 = vmatprep.subr.bf16.mxu1 %v9240_v0 }
 0x75d   :  { %7968 = vmatpush3.bf16.msra.mxu1 %v1384_v22  ;;  %v8759_v22 = vld [vmem:[%s11613_s2 + $0x228] sm:$0xff]  }
 0x75e   :  { %8001 = vmatprep.subr.bf16.mxu1 %v9240_v0 }
 0x78c   :  { %v1270_v7 = vpop.xlane.xlu1 %1269 }
 0x78d   :  { %8948 = vrcp.f32 %v1270_v7  ;;  %v8760_v7 = vld [vmem:[%s11613_s2 + $0x220] sm:$0xff]  }
 0x790   :  { %v1273_v28 = vpop.xlane.xlu1 %1272 }
 0x791   :  { %8950 = vrcp.f32 %v1273_v28 }
 0x794   :  { %v1276_v6 = vpop.xlane.xlu1 %1275 }
 0x795   :  { %8952 = vrcp.f32 %v1276_v6 }
 0x798   :  { %v1279_v24 = vpop.xlane.xlu1 %1278 }
 0x799   :  { %8954 = vrcp.f32 %v1279_v24 }
 0x79a   :  { %v8949_v25 = vpop.eup %8948 }
 0x79b   :  { %v1288_v27 = vmul.f32 %v8949_v25, %v9843_v42 }
 0x79e   :  { %v8951_v29 = vpop.eup %8950 }
 0x79f   :  { %v1289_v36 = vmul.f32 %v8951_v29, %v9847_v47 }
 0x7a0   :  { %v1282_v33 = vpop.xlane.xlu0 %1281 }
 0x7a1   :  { %8956 = vrcp.f32 %v1282_v33  ;;  %v1381_v34 = vpack.c.bf16 %v1289_v36, %v1288_v27 }
 0x7a2   :  { %v8953_v35 = vpop.eup %8952 }
 0x7a3   :  { %7970 = vmatmul.mubr.msk.bf16.vlgmr.msra.gmra.mxu1 %vm308_vm6, %v1381_v34  ;;  %v1290_v10 = vmul.f32 %v8953_v35, %v9851_v52 }
 0x7a4   :  { %7973 = vmatprep.mubr.msk.bf16.mxu1 %vm9241_vm1, %v9240_v0  ;;  %8002 = vmatpush3.bf16.msra.mxu1 %v8756_v59 }
 0x7a5   :  { %8003 = vmatprep.subr.bf16.mxu1 %v9240_v0 }
 0x7a6   :  { %v8955_v40 = vpop.eup %8954 }
 0x7a7   :  { %v1291_v45 = vmul.f32 %v8955_v40, %v9855_v58 }
 0x7a8   :  { %8004 = vmatpush3.bf16.msra.mxu1 %v8757_v19 }
 0x7a9   :  { %v1382_v8 = vpack.c.bf16 %v1291_v45, %v1290_v10  ;;  %8005 = vmatprep.subr.bf16.mxu1 %v9240_v0 }
 0x7ab   :  { %7974 = vmatmul.mubr.msk.bf16.gmra.mxu1 %vm308_vm6, %v1382_v8 }
 0x7ac   :  { %7977 = vmatprep.mubr.msk.bf16.mxu1 %vm9241_vm1, %v9240_v0  ;;  %8006 = vmatpush3.bf16.msra.mxu1 %v8758_v44 }
 0x7ad   :  { %8007 = vmatprep.subr.bf16.mxu1 %v9240_v0 }
 0x7ae   :  { %v8957_v42 = vpop.eup %8956 }
 0x7af   :  { %v1292_v47 = vmul.f32 %v8957_v42, %v9859_v1 }
 0x7b0   :  { %8008 = vmatpush3.bf16.msra.mxu1 %v8759_v22 }
 0x7b1   :  { %v1383_v49 = vpack.c.bf16 %v1292_v47, %v1292_v47  ;;  %8009 = vmatprep.subr.bf16.mxu1 %v9240_v0 }
 0x7b3   :  { %7978 = vmatmul.mubr.msk.bf16.gmra.mxu1 %vm308_vm6, %v1383_v49 }
 0x7b4   :  { %8017 = vmatprep.mubr.msk.bf16.mxu1 %vm9241_vm1, %v9240_v0  ;;  %8010 = vmatpush3.bf16.msra.mxu1 %v8760_v7 }
 0x7b5   :  { %8011 = vmatprep.subr.bf16.mxu1 %v9240_v0 }
 0x863   :  { %v1433_v50 = vpop.f32.mrf.mxu1 }
 0x864   :  { %v1455_v52 = vadd.f32 %v1433_v50, %v9864_v30 }
 0x865   :  { %v7971_v53 = vpop.f32.mrf.mxu1 }
 0x866   :  { %v9898_v58 = vadd.f32 %v1455_v52, %v9331_v20 }
 0x867   :  { %v1436_v61 = vpop.f32.mrf.mxu1 }
 0x868   :  { %v1456_v56 = vadd.f32 %v1436_v61, %v9867_v15  ;;  %v1467_v39 = vsel %vm154_vm3, %v9898_v58, 0.0  ;;  %v1488_v1 = vmul.f32 %v9898_v58, %v9898_v58 }
 0x869   :  { %1468 = vadd.xlane.f32.xlu1 %v1467_v39  ;;  %v7972_v62 = vpop.f32.mrf.mxu1 }
 0x86a   :  { %v9906_v12 = vadd.f32 %v1456_v56, %v9333_v21  ;;  %v1493_v20 = vsel %vm154_vm3, %v1488_v1, 0.0 }
 0x86b   :  { %v1441_v3 = vpop.f32.mrf.mxu1 }
 0x86c   :  { %v1457_v30 = vadd.f32 %v1441_v3, %v9870_v4  ;;  %v1470_v46 = vsel %vm154_vm3, %v9906_v12, 0.0  ;;  %v1489_v15 = vmul.f32 %v9906_v12, %v9906_v12 }
 0x86d   :  { %1494 = vadd.xlane.f32.xlu1 %v1493_v20  ;;  %1471 = vadd.xlane.f32.xlu0 %v1470_v46  ;;  %v7975_v5 = vpop.f32.mrf.mxu1 }
 0x86e   :  { %v9915_v2 = vadd.f32 %v1457_v30, %v9356_v31  ;;  %v1496_v9 = vsel %vm154_vm3, %v1489_v15, 0.0 }
 0x86f   :  { %v1444_v48 = vpop.f32.mrf.mxu1 }
 0x870   :  { %v1458_v21 = vadd.f32 %v1444_v48, %v9873_v55  ;;  %v1473_v4 = vsel %vm154_vm3, %v9915_v2, 0.0  ;;  %v1490_v23 = vmul.f32 %v9915_v2, %v9915_v2 }
 0x871   :  { %1497 = vadd.xlane.f32.xlu0 %v1496_v9  ;;  %1474 = vadd.xlane.f32.xlu1 %v1473_v4  ;;  %v7976_v11 = vpop.f32.mrf.mxu1 }
 0x872   :  { %v9924_v54 = vadd.f32 %v1458_v21, %v9358_v32  ;;  %v1499_v43 = vsel %vm154_vm3, %v1490_v23, 0.0 }
 0x873   :  { %v1449_v57 = vpop.f32.mrf.mxu1 }
 0x874   :  { %v1459_v31 = vadd.f32 %v1449_v57, %v9876_v51  ;;  %v1476_v55 = vsel %vm154_vm3, %v9924_v54, 0.0  ;;  %v1491_v13 = vmul.f32 %v9924_v54, %v9924_v54 }
 0x875   :  { %1500 = vadd.xlane.f32.xlu1 %v1499_v43  ;;  %1477 = vadd.xlane.f32.xlu0 %v1476_v55  ;;  %v7979_v60 = vpop.f32.mrf.mxu1 }
 0x876   :  { %v9933_v63 = vadd.f32 %v1459_v31, %v9371_v38  ;;  %v1502_v32 = vsel %vm154_vm3, %v1491_v13, 0.0  ;;  %v8752_v38 = vld [vmem:[%s11612_s1 + $0x98] sm:$0xff]   ;;  %v7062_v31 = vld [vmem:[%s11614_s3 + $0x68] ss:$0 sm:$0xff] }
 0x877   :  { %v1452_v41 = vpop.f32.mrf.mxu1  ;;  %7982 = vmatpush3.bf16.msra.mxu0 %v8752_v38 }
 0x878   :  { %v1479_v51 = vsel %vm154_vm3, %v9933_v63, 0.0  ;;  %v1492_v37 = vmul.f32 %v9933_v63, %v9933_v63  ;;  %7983 = vmatprep.subr.bf16.mxu0 %v9240_v0  ;;  %v7063_v41 = vld [vmem:[%s11614_s3 + $0x88] ss:$0 sm:$0xff] }
 0x879   :  { %1503 = vadd.xlane.f32.xlu0 %v1502_v32  ;;  %1480 = vadd.xlane.f32.xlu1 %v1479_v51  ;;  %v7980_v14 = vpop.f32.mrf.mxu1 }
 0x87a   :  { %v1505_v16 = vsel %vm154_vm3, %v1492_v37, 0.0 }
 0x87b   :  { %7984 = vmatpush3.bf16.msra.mxu0 %v8753_v26 }
 0x87c   :  { %7985 = vmatprep.subr.bf16.mxu0 %v9240_v0 }
 0x87d   :  { %1506 = vadd.xlane.f32.xlu0 %v1505_v16 }
 0x87f   :  { %7986 = vmatpush3.bf16.msra.mxu0 %v8754_v17 }
 0x880   :  { %7987 = vmatprep.subr.bf16.mxu0 %v9240_v0 }
 0x883   :  { %7988 = vmatpush3.bf16.msra.mxu0 %v8755_v18 }
 0x884   :  { %8029 = vmatprep.subr.bf16.mxu0 %v9240_v0 }
 0x8f2   :  { %v1469_v28 = vpop.xlane.xlu1 %1468 }
 0x8f3   :  { %v1483_v6 = vmul.f32 0.015625, %v1469_v28 }
 0x8f5   :  { %v1518_v29 = vmul.f32 %v1483_v6, %v1483_v6  ;;  %v1513_v9 = vsub.f32 %v9898_v58, %v1483_v6 }
 0x8f6   :  { %v1495_v24 = vpop.xlane.xlu1 %1494  ;;  %v1472_v25 = vpop.xlane.xlu0 %1471 }
 0x8f7   :  { %v1508_v27 = vmul.f32 0.015625, %v1495_v24  ;;  %v1484_v36 = vmul.f32 0.015625, %v1472_v25  ;;  %v8761_v24 = vld [vmem:[%s11613_s2 + $0x218] sm:$0xff]   ;;  %v8762_v25 = vld [vmem:[%s11613_s2 + $0x210] sm:$0xff]  }
 0x8f8   :  { %8012 = vmatpush3.bf16.msra.mxu1 %v8761_v24 }
 0x8f9   :  { %v1523_v33 = vsub.f32 %v1508_v27, %v1518_v29  ;;  %v1519_v10 = vmul.f32 %v1484_v36, %v1484_v36  ;;  %v1514_v43 = vsub.f32 %v9906_v12, %v1484_v36  ;;  %8013 = vmatprep.subr.bf16.mxu1 %v9240_v0  ;;  %v8763_v29 = vld [vmem:[%s11613_s2 + $0x208] sm:$0xff]  }
 0x8fa   :  { %v1498_v34 = vpop.xlane.xlu0 %1497  ;;  %v1475_v35 = vpop.xlane.xlu1 %1474  ;;  %v7064_v27 = vld [vmem:[%s11614_s3 + $0xa8] ss:$0 sm:$0xff] }
 0x8fb   :  { %v1528_v40 = vadd.f32 1e-05, %v1523_v33  ;;  %v1509_v45 = vmul.f32 0.015625, %v1498_v34  ;;  %v1485_v8 = vmul.f32 0.015625, %v1475_v35 }
 0x8fc   :  { %8014 = vmatpush3.bf16.msra.mxu1 %v8762_v25 }
 0x8fd   :  { %8958 = vrsqrt.f32 %v1528_v40  ;;  %v1524_v42 = vsub.f32 %v1509_v45, %v1519_v10  ;;  %v1520_v52 = vmul.f32 %v1485_v8, %v1485_v8  ;;  %v1515_v32 = vsub.f32 %v9915_v2, %v1485_v8  ;;  %8015 = vmatprep.subr.bf16.mxu1 %v9240_v0 }
 0x8fe   :  { %v1501_v47 = vpop.xlane.xlu1 %1500  ;;  %v1478_v49 = vpop.xlane.xlu0 %1477 }
 0x8ff   :  { %v1529_v50 = vadd.f32 1e-05, %v1524_v42  ;;  %v1510_v53 = vmul.f32 0.015625, %v1501_v47  ;;  %v1486_v61 = vmul.f32 0.015625, %v1478_v49 }
 0x900   :  { %8016 = vmatpush3.bf16.msra.mxu1 %v8763_v29 }
 0x901   :  { %8960 = vrsqrt.f32 %v1529_v50  ;;  %v1525_v56 = vsub.f32 %v1510_v53, %v1520_v52  ;;  %v1521_v3 = vmul.f32 %v1486_v61, %v1486_v61  ;;  %v1516_v38 = vsub.f32 %v9924_v54, %v1486_v61  ;;  %8049 = vmatprep.subr.bf16.mxu1 %v9240_v0 }
 0x902   :  { %v1504_v39 = vpop.xlane.xlu0 %1503  ;;  %v1481_v1 = vpop.xlane.xlu1 %1480 }
 0x903   :  { %v1530_v62 = vadd.f32 1e-05, %v1525_v56  ;;  %v1511_v30 = vmul.f32 0.015625, %v1504_v39  ;;  %v1487_v20 = vmul.f32 0.015625, %v1481_v1 }
 0x905   :  { %8962 = vrsqrt.f32 %v1530_v62  ;;  %v1526_v46 = vsub.f32 %v1511_v30, %v1521_v3  ;;  %v1522_v48 = vmul.f32 %v1487_v20, %v1487_v20  ;;  %v1517_v2 = vsub.f32 %v9933_v63, %v1487_v20 }
 0x906   :  { %v1507_v15 = vpop.xlane.xlu0 %1506 }
 0x907   :  { %v1531_v5 = vadd.f32 1e-05, %v1526_v46  ;;  %v1512_v21 = vmul.f32 0.015625, %v1507_v15 }
 0x909   :  { %8964 = vrsqrt.f32 %v1531_v5  ;;  %v1527_v4 = vsub.f32 %v1512_v21, %v1522_v48  ;;  %v7072_v48 = vld [vmem:[%s11614_s3 + $0xc8] ss:$0 sm:$0xff] }
 0x90a   :  { %v8959_v23 = vpop.eup %8958 }
 0x90b   :  { %v1538_v11 = vmul.f32 %v8959_v23, %v1513_v9  ;;  %v1532_v57 = vadd.f32 1e-05, %v1527_v4 }
 0x90d   :  { %8966 = vrsqrt.f32 %v1532_v57  ;;  %v1547_v13 = vmul.f32 %v7062_v31, %v1538_v11 }
 0x90e   :  { %v8961_v55 = vpop.eup %8960 }
 0x90f   :  { %v1539_v60 = vmul.f32 %v8961_v55, %v1514_v43  ;;  %v9986_v37 = vadd.f32 %v7063_v41, %v1547_v13 }
 0x911   :  { %v1548_v58 = vmul.f32 %v7062_v31, %v1539_v60 }
 0x912   :  { %v8963_v51 = vpop.eup %8962 }
 0x913   :  { %v9988_v14 = vadd.f32 %v7063_v41, %v1548_v58  ;;  %v1540_v16 = vmul.f32 %v8963_v51, %v1515_v32 }
 0x915   :  { %v1570_v12 = vpack.c.bf16 %v9988_v14, %v9986_v37  ;;  %v1549_v18 = vmul.f32 %v7062_v31, %v1540_v16 }
 0x916   :  { %v8965_v26 = vpop.eup %8964 }
 0x917   :  { %7990 = vmatmul.mubr.msk.bf16.vlgmr.msra.gmra.mxu0 %vm154_vm3, %v1570_v12  ;;  %v1541_v17 = vmul.f32 %v8965_v26, %v1516_v38  ;;  %v9997_v44 = vadd.f32 %v7063_v41, %v1549_v18 }
 0x918   :  { %7993 = vmatprep.mubr.msk.bf16.mxu0 %vm9241_vm1, %v9240_v0 }
 0x919   :  { %v1550_v59 = vmul.f32 %v7062_v31, %v1541_v17 }
 0x91a   :  { %v8967_v19 = vpop.eup %8966 }
 0x91b   :  { %v9999_v22 = vadd.f32 %v7063_v41, %v1550_v59  ;;  %v1542_v54 = vmul.f32 %v8967_v19, %v1517_v2 }
 0x91d   :  { %v1571_v7 = vpack.c.bf16 %v9999_v22, %v9997_v44  ;;  %v1551_v28 = vmul.f32 %v7062_v31, %v1542_v54 }
 0x91f   :  { %7994 = vmatmul.mubr.msk.bf16.gmra.mxu0 %vm154_vm3, %v1571_v7  ;;  %v10006_v6 = vadd.f32 %v7063_v41, %v1551_v28 }
 0x920   :  { %7997 = vmatprep.mubr.msk.bf16.mxu0 %vm9241_vm1, %v9240_v0 }
 0x921   :  { %v1572_v63 = vpack.c.bf16 %v10006_v6, %v10006_v6 }
 0x927   :  { %7998 = vmatmul.mubr.msk.bf16.gmra.mxu0 %vm154_vm3, %v1572_v63 }
 0x928   :  { %8037 = vmatprep.mubr.msk.bf16.mxu0 %vm9241_vm1, %v9240_v0 }
 0x9d7   :  { %v1644_v36 = vpop.f32.mrf.mxu0 }
 0x9d8   :  { %v1645_v34 = vadd.f32 %v7064_v27, %v1644_v36 }
 0x9d9   :  { %v7991_v33 = vpop.f32.mrf.mxu0 }
 0x9da   :  { %v1666_v45 = vmax.f32 %v1645_v34, 0.0  ;;  %v8765_v33 = vld [vmem:[%s11612_s1 + $0x30] sm:$0xff]   ;;  %v8766_v34 = vld [vmem:[%s11612_s1 + $0x28] sm:$0xff]  }
 0x9db   :  { %v1647_v35 = vpop.f32.mrf.mxu0 }
 0x9dc   :  { %v1648_v40 = vadd.f32 %v7064_v27, %v1647_v35  ;;  %v8767_v35 = vld [vmem:[%s11612_s1 + $0x20] sm:$0xff]  }
 0x9dd   :  { %v7992_v10 = vpop.f32.mrf.mxu0 }
 0x9de   :  { %v1667_v8 = vmax.f32 %v1648_v40, 0.0 }
 0x9df   :  { %v1652_v42 = vpop.f32.mrf.mxu0 }
 0x9e0   :  { %v1688_v47 = vpack.c.bf16 %v1667_v8, %v1666_v45  ;;  %v1653_v50 = vadd.f32 %v7064_v27, %v1652_v42 }
 0x9e1   :  { %v7995_v49 = vpop.f32.mrf.mxu0 }
 0x9e2   :  { %8018 = vmatmul.mubr.bf16.vlgmr.msra.gmra.mxu1 %v1688_v47  ;;  %v1668_v56 = vmax.f32 %v1653_v50, 0.0 }
 0x9e3   :  { %v1655_v52 = vpop.f32.mrf.mxu0  ;;  %8021 = vmatprep.mubr.msk.bf16.mxu1 %vm9241_vm1, %v9240_v0 }
 0x9e4   :  { %v1656_v53 = vadd.f32 %v7064_v27, %v1655_v52 }
 0x9e5   :  { %v7996_v61 = vpop.f32.mrf.mxu0 }
 0x9e6   :  { %v1669_v39 = vmax.f32 %v1656_v53, 0.0 }
 0x9e7   :  { %v1660_v1 = vpop.f32.mrf.mxu0 }
 0x9e8   :  { %v1689_v62 = vpack.c.bf16 %v1669_v39, %v1668_v56  ;;  %v1661_v3 = vadd.f32 %v7064_v27, %v1660_v1 }
 0x9e9   :  { %v7999_v30 = vpop.f32.mrf.mxu0 }
 0x9ea   :  { %8022 = vmatmul.mubr.bf16.gmra.mxu1 %v1689_v62  ;;  %v1670_v46 = vmax.f32 %v1661_v3, 0.0 }
 0x9eb   :  { %v1663_v20 = vpop.f32.mrf.mxu0  ;;  %8025 = vmatprep.mubr.msk.bf16.mxu1 %vm9241_vm1, %v9240_v0 }
 0x9ec   :  { %v1690_v5 = vpack.c.bf16 %v1670_v46, %v1670_v46 }
 0x9ed   :  { %v8000_v15 = vpop.f32.mrf.mxu0 }
 0x9f2   :  { %8026 = vmatmul.mubr.bf16.gmra.mxu1 %v1690_v5 }
 0x9f3   :  { %8055 = vmatprep.mubr.msk.bf16.mxu1 %vm9241_vm1, %v9240_v0 }
 0xaa2   :  { %v1777_v21 = vpop.f32.mrf.mxu1 }
 0xaa3   :  { %v1778_v9 = vadd.f32 %v7072_v48, %v1777_v21 }
 0xaa4   :  { %v8019_v4 = vpop.f32.mrf.mxu1 }
 0xaa5   :  { %v10038_v23 = vadd.f32 %v1778_v9, %v9986_v37 }
 0xaa6   :  { %v1780_v11 = vpop.f32.mrf.mxu1 }
 0xaa7   :  { %v1781_v57 = vadd.f32 %v7072_v48, %v1780_v11  ;;  %v1806_v31 = vsel %vm154_vm3, %v10038_v23, 0.0  ;;  %v1826_v43 = vmul.f32 %v10038_v23, %v10038_v23 }
 0xaa8   :  { %1807 = vadd.xlane.f32.xlu1 %v1806_v31  ;;  %v8020_v55 = vpop.f32.mrf.mxu1 }
 0xaa9   :  { %v10045_v13 = vadd.f32 %v1781_v57, %v9988_v14  ;;  %v1831_v58 = vsel %vm154_vm3, %v1826_v43, 0.0 }
 0xaaa   :  { %v1785_v60 = vpop.f32.mrf.mxu1 }
 0xaab   :  { %v1786_v41 = vadd.f32 %v7072_v48, %v1785_v60  ;;  %v1809_v32 = vsel %vm154_vm3, %v10045_v13, 0.0  ;;  %v1827_v51 = vmul.f32 %v10045_v13, %v10045_v13 }
 0xaac   :  { %1832 = vadd.xlane.f32.xlu1 %v1831_v58  ;;  %1810 = vadd.xlane.f32.xlu0 %v1809_v32  ;;  %v8023_v37 = vpop.f32.mrf.mxu1 }
 0xaad   :  { %v10053_v16 = vadd.f32 %v1786_v41, %v9997_v44  ;;  %v1834_v14 = vsel %vm154_vm3, %v1827_v51, 0.0 }
 0xaae   :  { %v1788_v38 = vpop.f32.mrf.mxu1 }
 0xaaf   :  { %v1789_v12 = vadd.f32 %v7072_v48, %v1788_v38  ;;  %v1812_v26 = vsel %vm154_vm3, %v10053_v16, 0.0  ;;  %v1828_v17 = vmul.f32 %v10053_v16, %v10053_v16 }
 0xab0   :  { %1835 = vadd.xlane.f32.xlu0 %v1834_v14  ;;  %1813 = vadd.xlane.f32.xlu1 %v1812_v26  ;;  %v8024_v18 = vpop.f32.mrf.mxu1  ;;  %v7081_v14 = vld [vmem:[%s11614_s3 + $0xe8] ss:$0 sm:$0xff] }
 0xab1   :  { %v10061_v2 = vadd.f32 %v1789_v12, %v9999_v22  ;;  %v1837_v44 = vsel %vm154_vm3, %v1828_v17, 0.0 }
 0xab2   :  { %v1793_v59 = vpop.f32.mrf.mxu1 }
 0xab3   :  { %v1794_v19 = vadd.f32 %v7072_v48, %v1793_v59  ;;  %v1815_v54 = vsel %vm154_vm3, %v10061_v2, 0.0  ;;  %v1829_v7 = vmul.f32 %v10061_v2, %v10061_v2 }
 0xab4   :  { %1838 = vadd.xlane.f32.xlu1 %v1837_v44  ;;  %1816 = vadd.xlane.f32.xlu0 %v1815_v54  ;;  %v8027_v28 = vpop.f32.mrf.mxu1 }
 0xab5   :  { %v10069_v63 = vadd.f32 %v1794_v19, %v10006_v6  ;;  %v1840_v22 = vsel %vm154_vm3, %v1829_v7, 0.0  ;;  %v8764_v6 = vld [vmem:[%s11612_s1 + $0x38] sm:$0xff]   ;;  %v7082_v19 = vld [vmem:[%s11614_s3 + $0x108] ss:$0 sm:$0xff] }
 0xab6   :  { %v1796_v24 = vpop.f32.mrf.mxu1  ;;  %8030 = vmatpush3.bf16.msra.mxu0 %v8764_v6 }
 0xab7   :  { %v1818_v25 = vsel %vm154_vm3, %v10069_v63, 0.0  ;;  %v1830_v29 = vmul.f32 %v10069_v63, %v10069_v63  ;;  %8031 = vmatprep.subr.bf16.mxu0 %v9240_v0 }
 0xab8   :  { %1841 = vadd.xlane.f32.xlu0 %v1840_v22  ;;  %1819 = vadd.xlane.f32.xlu1 %v1818_v25  ;;  %v8028_v27 = vpop.f32.mrf.mxu1 }
 0xab9   :  { %v1843_v36 = vsel %vm154_vm3, %v1830_v29, 0.0 }
 0xaba   :  { %8032 = vmatpush3.bf16.msra.mxu0 %v8765_v33 }
 0xabb   :  { %8033 = vmatprep.subr.bf16.mxu0 %v9240_v0 }
 0xabc   :  { %1844 = vadd.xlane.f32.xlu0 %v1843_v36  ;;  %v8769_v36 = vld [vmem:[%s11613_s2 + $0x98] sm:$0xff]  }
 0xabe   :  { %8034 = vmatpush3.bf16.msra.mxu0 %v8766_v34 }
 0xabf   :  { %8035 = vmatprep.subr.bf16.mxu0 %v9240_v0 }
 0xac2   :  { %8036 = vmatpush3.bf16.msra.mxu0 %v8767_v35 }
 0xac3   :  { %8067 = vmatprep.subr.bf16.mxu0 %v9240_v0 }
 0xb31   :  { %v1808_v40 = vpop.xlane.xlu1 %1807 }
 0xb32   :  { %v1821_v10 = vmul.f32 0.015625, %v1808_v40 }
 0xb34   :  { %v1856_v42 = vmul.f32 %v1821_v10, %v1821_v10  ;;  %v1851_v32 = vsub.f32 %v10038_v23, %v1821_v10  ;;  %v8770_v10 = vld [vmem:[%s11613_s2 + $0x90] sm:$0xff]  }
 0xb35   :  { %v1833_v45 = vpop.xlane.xlu1 %1832  ;;  %v1811_v8 = vpop.xlane.xlu0 %1810 }
 0xb36   :  { %v1846_v47 = vmul.f32 0.015625, %v1833_v45  ;;  %v1822_v49 = vmul.f32 0.015625, %v1811_v8 }
 0xb38   :  { %v1861_v50 = vsub.f32 %v1846_v47, %v1856_v42  ;;  %v1857_v56 = vmul.f32 %v1822_v49, %v1822_v49  ;;  %v1852_v26 = vsub.f32 %v10045_v13, %v1822_v49  ;;  %v8768_v13 = vld [vmem:[%s11613_s2 + $0xa0] sm:$0xff]  }
 0xb39   :  { %v1836_v52 = vpop.xlane.xlu0 %1835  ;;  %v1814_v53 = vpop.xlane.xlu1 %1813 }
 0xb3a   :  { %v1866_v61 = vadd.f32 1e-05, %v1861_v50  ;;  %v1847_v39 = vmul.f32 0.015625, %v1836_v52  ;;  %v1823_v1 = vmul.f32 0.015625, %v1814_v53 }
 0xb3c   :  { %8968 = vrsqrt.f32 %v1866_v61  ;;  %v1862_v62 = vsub.f32 %v1847_v39, %v1857_v56  ;;  %v1858_v46 = vmul.f32 %v1823_v1, %v1823_v1  ;;  %v1853_v44 = vsub.f32 %v10053_v16, %v1823_v1  ;;  %v7083_v39 = vld [vmem:[%s11614_s3 + $0x30] ss:$0 sm:$0xff] }
 0xb3d   :  { %v1839_v3 = vpop.xlane.xlu1 %1838  ;;  %v1817_v30 = vpop.xlane.xlu0 %1816 }
 0xb3e   :  { %v1867_v20 = vadd.f32 1e-05, %v1862_v62  ;;  %v1848_v15 = vmul.f32 0.015625, %v1839_v3  ;;  %v1824_v5 = vmul.f32 0.015625, %v1817_v30 }
 0xb40   :  { %8970 = vrsqrt.f32 %v1867_v20  ;;  %v1863_v48 = vsub.f32 %v1848_v15, %v1858_v46  ;;  %v1859_v11 = vmul.f32 %v1824_v5, %v1824_v5  ;;  %v1854_v22 = vsub.f32 %v10061_v2, %v1824_v5 }
 0xb41   :  { %v1842_v21 = vpop.xlane.xlu0 %1841  ;;  %v1820_v9 = vpop.xlane.xlu1 %1819 }
 0xb42   :  { %v1868_v4 = vadd.f32 1e-05, %v1863_v48  ;;  %v1849_v57 = vmul.f32 0.015625, %v1842_v21  ;;  %v1825_v31 = vmul.f32 0.015625, %v1820_v9 }
 0xb44   :  { %8972 = vrsqrt.f32 %v1868_v4  ;;  %v1864_v43 = vsub.f32 %v1849_v57, %v1859_v11  ;;  %v1860_v41 = vmul.f32 %v1825_v31, %v1825_v31  ;;  %v1855_v2 = vsub.f32 %v10069_v63, %v1825_v31  ;;  %v8771_v63 = vld [vmem:[%s11613_s2 + $0x88] sm:$0xff]  }
 0xb45   :  { %v1845_v55 = vpop.xlane.xlu0 %1844 }
 0xb46   :  { %v1869_v60 = vadd.f32 1e-05, %v1864_v43  ;;  %v1850_v58 = vmul.f32 0.015625, %v1845_v55 }
 0xb48   :  { %8974 = vrsqrt.f32 %v1869_v60  ;;  %v1865_v51 = vsub.f32 %v1850_v58, %v1860_v41 }
 0xb49   :  { %v8969_v37 = vpop.eup %8968 }
 0xb4a   :  { %v1876_v38 = vmul.f32 %v8969_v37, %v1851_v32  ;;  %v1870_v12 = vadd.f32 1e-05, %v1865_v51 }
 0xb4c   :  { %8976 = vrsqrt.f32 %v1870_v12  ;;  %v1885_v18 = vmul.f32 %v7081_v14, %v1876_v38 }
 0xb4d   :  { %v8971_v17 = vpop.eup %8970 }
 0xb4e   :  { %v1877_v59 = vmul.f32 %v8971_v17, %v1852_v26  ;;  %v10102_v7 = vadd.f32 %v7082_v19, %v1885_v18 }
 0xb50   :  { %v1886_v23 = vmul.f32 %v7081_v14, %v1877_v59 }
 0xb51   :  { %v8973_v54 = vpop.eup %8972 }
 0xb52   :  { %v10104_v28 = vadd.f32 %v7082_v19, %v1886_v23  ;;  %v1878_v24 = vmul.f32 %v8973_v54, %v1853_v44 }
 0xb54   :  { %v10112_v25 = vpack.c.bf16 %v10104_v28, %v10102_v7  ;;  %v1887_v27 = vmul.f32 %v7081_v14, %v1878_v24 }
 0xb55   :  { %v8975_v29 = vpop.eup %8974 }
 0xb56   :  { %8038 = vmatmul.mubr.msk.bf16.vlgmr.msra.gmra.mxu0 %vm154_vm3, %v10112_v25  ;;  %v1879_v16 = vmul.f32 %v8975_v29, %v1854_v22  ;;  %v10123_v34 = vadd.f32 %v7082_v19, %v1887_v27 }
 0xb57   :  { %8041 = vmatprep.mubr.msk.bf16.mxu0 %vm9241_vm1, %v9240_v0  ;;  %8068 = vmatpush3.bf16.msra.mxu0 %v8768_v13 }
 0xb58   :  { %v1888_v6 = vmul.f32 %v7081_v14, %v1879_v16  ;;  %8069 = vmatprep.subr.bf16.mxu0 %v9240_v0 }
 0xb59   :  { %v8977_v33 = vpop.eup %8976 }
 0xb5a   :  { %v10125_v35 = vadd.f32 %v7082_v19, %v1888_v6  ;;  %v1880_v40 = vmul.f32 %v8977_v33, %v1855_v2 }
 0xb5b   :  { %8070 = vmatpush3.bf16.msra.mxu0 %v8769_v36 }
 0xb5c   :  { %v10132_v45 = vpack.c.bf16 %v10125_v35, %v10123_v34  ;;  %v1889_v8 = vmul.f32 %v7081_v14, %v1880_v40  ;;  %8071 = vmatprep.subr.bf16.mxu0 %v9240_v0 }
 0xb5e   :  { %8042 = vmatmul.mubr.msk.bf16.gmra.mxu0 %vm154_vm3, %v10132_v45  ;;  %v10142_v42 = vadd.f32 %v7082_v19, %v1889_v8 }
 0xb5f   :  { %8045 = vmatprep.mubr.msk.bf16.mxu0 %vm9241_vm1, %v9240_v0  ;;  %8072 = vmatpush3.bf16.msra.mxu0 %v8770_v10  ;;  %v10228_v10 = vld [vmem:[%s11614_s3 + $0x140] sm:$0xff] }
 0xb60   :  { %8073 = vmatprep.subr.bf16.mxu0 %v9240_v0  ;;  %v10147_v47 = vpack.c.bf16 %v10142_v42, %v10142_v42 }
 0xb63   :  { %8074 = vmatpush3.bf16.msra.mxu0 %v8771_v63 }
 0xb64   :  { %8105 = vmatprep.subr.bf16.mxu0 %v9240_v0 }
 0xb66   :  { %8046 = vmatmul.mubr.msk.bf16.gmra.mxu0 %vm154_vm3, %v10147_v47 }
 0xb67   :  { %8075 = vmatprep.mubr.msk.bf16.mxu0 %vm9241_vm1, %v9240_v0 }
 0xb6e   :  { %8076 = vmatmul.mubr.msk.bf16.vlgmr.msra.gmra.mxu0 %vm154_vm3, %v10112_v25 }
 0xb6f   :  { %8079 = vmatprep.mubr.msk.bf16.mxu0 %vm9241_vm1, %v9240_v0 }
 0xb76   :  { %8080 = vmatmul.mubr.msk.bf16.gmra.mxu0 %vm154_vm3, %v10132_v45 }
 0xb77   :  { %8083 = vmatprep.mubr.msk.bf16.mxu0 %vm9241_vm1, %v9240_v0 }
 0xb7e   :  { %8084 = vmatmul.mubr.msk.bf16.gmra.mxu0 %vm154_vm3, %v10147_v47 }
 0xb7f   :  { %8111 = vmatprep.mubr.msk.bf16.mxu0 %vm9241_vm1, %v9240_v0 }
 0xc16   :  { %v1982_v49 = vpop.f32.mrf.mxu0 }
 0xc17   :  { %v1983_v5 = vadd.f32 %v7083_v39, %v1982_v49 }
 0xc18   :  { %v8039_v50 = vpop.f32.mrf.mxu0 }
 0xc1a   :  { %v1985_v52 = vpop.f32.mrf.mxu0 }
 0xc1b   :  { %v1986_v20 = vadd.f32 %v7083_v39, %v1985_v52  ;;  %v10235_v52 = vld [vmem:[%s11614_s3 + $0x148] sm:$0xff] }
 0xc1c   :  { %v8040_v53 = vpop.f32.mrf.mxu0 }
 0xc1d   :  { %v10173_v9 = vpack.c.bf16 %v1986_v20, %v1983_v5 }
 0xc1e   :  { %v1990_v61 = vpop.f32.mrf.mxu0 }
 0xc1f   :  { %v1991_v62 = vadd.f32 %v7083_v39, %v1990_v61 }
 0xc20   :  { %v8043_v56 = vpop.f32.mrf.mxu0 }
 0xc22   :  { %v1993_v1 = vpop.f32.mrf.mxu0 }
 0xc23   :  { %v1994_v3 = vadd.f32 %v7083_v39, %v1993_v1  ;;  %v10242_v1 = vld [vmem:[%s11614_s3 + $0x150] sm:$0xff] }
 0xc24   :  { %v8044_v30 = vpop.f32.mrf.mxu0 }
 0xc25   :  { %v10169_v46 = vpack.c.bf16 %v1994_v3, %v1991_v62 }
 0xc26   :  { %v1998_v15 = vpop.f32.mrf.mxu0 }
 0xc27   :  { %v1999_v48 = vadd.f32 %v7083_v39, %v1998_v15  ;;  %2013 = vrot.lane.b32.xlu0 %v10169_v46, %s9242_s28  ;;  %v10249_v15 = vld [vmem:[%s11614_s3 + $0x158] sm:$0xff] }
 0xc28   :  { %v8047_v21 = vpop.f32.mrf.mxu0 }
 0xc29   :  { %v10175_v4 = vpack.c.bf16 %v1999_v48, %v1999_v48 }
 0xc2a   :  { %v2001_v11 = vpop.f32.mrf.mxu0 }
 0xc2b   :  { %2323 = vrot.lane.b32.xlu0 %v10173_v9, %s9243_s29  ;;  %2015 = vrot.lane.b32.xlu1 %v10175_v4, %s9242_s28 }
 0xc2c   :  { %v8048_v57 = vpop.f32.mrf.mxu0 }
 0xc2e   :  { %v2212_v31 = vpop.f32.mrf.mxu0 }
 0xc2f   :  { %2319 = vrot.lane.b32.xlu0 %v10169_v46, %s9244_s30  ;;  %2011 = vrot.lane.b32.xlu1 %v10173_v9, %s9242_s28 }
 0xc30   :  { %v8077_v43 = vpop.f32.mrf.mxu0 }
 0xc32   :  { %v2215_v55 = vpop.f32.mrf.mxu0 }
 0xc33   :  { %v2237_v60 = vpack.c.bf16 %v2215_v55, %v2212_v31  ;;  %2325 = vrot.lane.b32.xlu1 %v10169_v46, %s9243_s29  ;;  %v10256_v31 = vld [vmem:[%s11614_s3 + $0x160] sm:$0xff] }
 0xc34   :  { %v8078_v41 = vpop.f32.mrf.mxu0 }
 0xc36   :  { %v2220_v58 = vpop.f32.mrf.mxu0 }
 0xc37   :  { %2317 = vrot.lane.b32.xlu1 %v10173_v9, %s9244_s30 }
 0xc38   :  { %v8081_v32 = vpop.f32.mrf.mxu0 }
 0xc3a   :  { %v2223_v51 = vpop.f32.mrf.mxu0 }
 0xc3b   :  { %v2238_v37 = vpack.c.bf16 %v2223_v51, %v2220_v58  ;;  %2327 = vrot.lane.b32.xlu1 %v10175_v4, %s9243_s29 }
 0xc3c   :  { %v8082_v38 = vpop.f32.mrf.mxu0 }
 0xc3e   :  { %v2228_v12 = vpop.f32.mrf.mxu0 }
 0xc3f   :  { %v2239_v16 = vpack.c.bf16 %v2228_v12, %v2228_v12 }
 0xc40   :  { %v8085_v14 = vpop.f32.mrf.mxu0 }
 0xc41   :  { %v2250_v27 = vsel %vm467_vm5, %v2239_v16, 0 }
 0xc42   :  { %v2231_v26 = vpop.f32.mrf.mxu0 }
 0xc44   :  { %v8086_v17 = vpop.f32.mrf.mxu0 }
 0xc99   :  { %v2014_v23 = vpop.permute.xlu0 %2013 }
 0xc9a   :  { %v2030_v54 = vsel %vm233_vm4, %v2014_v23, 0 }
 0xc9d   :  { %v2016_v18 = vpop.permute.xlu1 %2015  ;;  %v2324_v2 = vpop.permute.xlu0 %2323 }
 0xc9e   :  { %v2033_v59 = vsel %vm233_vm4, %v2016_v18, 0  ;;  %v2339_v6 = vsel %vm233_vm4, %v2324_v2, 0 }
 0xc9f   :  { %8050 = vmatpush3.bf16.xpose.msra.mxu1 %v2033_v59 }
 0xca0   :  { %8051 = vmatprep.subr.bf16.mxu1 %v9240_v0 }
 0xca1   :  { %v2012_v19 = vpop.permute.xlu1 %2011  ;;  %v2320_v33 = vpop.permute.xlu0 %2319 }
 0xca2   :  { %v2027_v22 = vsel %vm233_vm4, %v2012_v19, 0 }
 0xca5   :  { %v2326_v44 = vpop.permute.xlu1 %2325 }
 0xca6   :  { %v2342_v36 = vsel %vm233_vm4, %v2326_v44, 0 }
 0xca7   :  { %8052 = vmatpush3.bf16.xpose.msra.mxu1 %v2030_v54 }
 0xca8   :  { %8053 = vmatprep.subr.bf16.mxu1 %v9240_v0 }
 0xca9   :  { %v2318_v24 = vpop.permute.xlu1 %2317 }
 0xcad   :  { %v2328_v13 = vpop.permute.xlu1 %2327 }
 0xcae   :  { %v2345_v29 = vsel %vm233_vm4, %v2328_v13, 0 }
 0xcaf   :  { %8054 = vmatpush3.bf16.xpose.msra.mxu1 %v2027_v22  ;;  %8106 = vmatpush3.bf16.xpose.msra.mxu0 %v2345_v29 }
 0xcb0   :  { %8087 = vmatprep.subr.bf16.mxu1 %v9240_v0  ;;  %8107 = vmatprep.subr.bf16.mxu0 %v9240_v0 }
 0xcb6   :  { %8056 = vmatmul.mubr.msk.bf16.vlgmr.msra.gmra.mxu1 %vm233_vm4, %v10173_v9 }
 0xcb7   :  { %8088 = vmatpush3.bf16.msra.mxu1 %v2250_v27  ;;  %8108 = vmatpush3.bf16.xpose.msra.mxu0 %v2342_v36 }
 0xcb8   :  { %8089 = vmatprep.subr.bf16.mxu1 %v9240_v0  ;;  %8059 = vmatprep.mubr.msk.bf16.mxu1 %vm9241_vm1, %v9240_v0 }
 0xcb9   :  { %8109 = vmatprep.subr.bf16.mxu0 %v9240_v0 }
 0xcbb   :  { %8090 = vmatpush3.bf16.msra.mxu1 %v2238_v37 }
 0xcbc   :  { %8091 = vmatprep.subr.bf16.mxu1 %v9240_v0 }
 0xcbe   :  { %8060 = vmatmul.mubr.msk.bf16.gmra.mxu1 %vm233_vm4, %v10169_v46 }
 0xcbf   :  { %8092 = vmatpush3.bf16.msra.mxu1 %v2237_v60  ;;  %8110 = vmatpush3.bf16.xpose.msra.mxu0 %v2339_v6 }
 0xcc0   :  { %8063 = vmatprep.mubr.msk.bf16.mxu1 %vm9241_vm1, %v9240_v0  ;;  %8123 = vmatprep.subr.bf16.mxu1 %v9240_v0 }
 0xcc1   :  { %8143 = vmatprep.subr.bf16.mxu0 %v9240_v0 }
 0xcc6   :  { %8064 = vmatmul.mubr.msk.bf16.gmra.mxu1 %vm233_vm4, %v10175_v4  ;;  %8112 = vmatmul.mubr.msk.bf16.vlgmr.msra.gmra.mxu0 %vm233_vm4, %v2318_v24 }
 0xcc7   :  { %8115 = vmatprep.mubr.msk.bf16.mxu0 %vm9241_vm1, %v9240_v0  ;;  %8093 = vmatprep.mubr.msk.bf16.mxu1 %vm9241_vm1, %v9240_v0 }
 0xcce   :  { %8116 = vmatmul.mubr.msk.bf16.gmra.mxu0 %vm233_vm4, %v2320_v33 }
 0xccf   :  { %8119 = vmatprep.mubr.msk.bf16.mxu0 %vm9241_vm1, %v9240_v0 }
 0xd76   :  { %v2069_v40 = vpop.f32.mrf.mxu1 }
 0xd77   :  { %v2070_v8 = vadd.f32 %v10228_v10, %v2069_v40 }
 0xd78   :  { %v8057_v63 = vpop.f32.mrf.mxu1 }
 0xd79   :  { %v2091_v49 = vsel %vm308_vm6, %v2070_v8, -inf }
 0xd7a   :  { %2092 = vmax.xlane.f32.xlu1 %v2091_v49  ;;  %v2072_v50 = vpop.f32.mrf.mxu1 }
 0xd7b   :  { %v2073_v53 = vadd.f32 %v10235_v52, %v2072_v50 }
 0xd7c   :  { %v8058_v61 = vpop.f32.mrf.mxu1 }
 0xd7d   :  { %v2094_v56 = vsel %vm308_vm6, %v2073_v53, -inf }
 0xd7e   :  { %2095 = vmax.xlane.f32.xlu0 %v2094_v56  ;;  %v2077_v39 = vpop.f32.mrf.mxu1 }
 0xd7f   :  { %v2078_v62 = vadd.f32 %v10242_v1, %v2077_v39 }
 0xd80   :  { %v8061_v3 = vpop.f32.mrf.mxu1 }
 0xd81   :  { %v2097_v30 = vsel %vm308_vm6, %v2078_v62, -inf }
 0xd82   :  { %2098 = vmax.xlane.f32.xlu0 %v2097_v30  ;;  %v2080_v20 = vpop.f32.mrf.mxu1 }
 0xd83   :  { %v2081_v5 = vadd.f32 %v10249_v15, %v2080_v20 }
 0xd84   :  { %v8062_v48 = vpop.f32.mrf.mxu1 }
 0xd85   :  { %v2100_v21 = vsel %vm308_vm6, %v2081_v5, -inf }
 0xd86   :  { %2101 = vmax.xlane.f32.xlu0 %v2100_v21  ;;  %v2085_v11 = vpop.f32.mrf.mxu1  ;;  %v2381_v57 = vpop.f32.mrf.mxu0 }
 0xd87   :  { %v2086_v43 = vadd.f32 %v10256_v31, %v2085_v11  ;;  %v10286_v30 = vadd.f32 %v10228_v10, %v2381_v57 }
 0xd88   :  { %v8065_v55 = vpop.f32.mrf.mxu1  ;;  %v8113_v60 = vpop.f32.mrf.mxu0 }
 0xd89   :  { %v2103_v41 = vsel %vm308_vm6, %v2086_v43, -inf }
 0xd8a   :  { %2104 = vmax.xlane.f32.xlu0 %v2103_v41  ;;  %v2088_v58 = vpop.f32.mrf.mxu1  ;;  %v2384_v32 = vpop.f32.mrf.mxu0 }
 0xd8b   :  { %2321 = vrot.lane.b32.xlu1 %v10175_v4, %s9244_s30 }
 0xd8c   :  { %v8066_v51 = vpop.f32.mrf.mxu1  ;;  %v8114_v37 = vpop.f32.mrf.mxu0 }
 0xd8e   :  { %v2389_v38 = vpop.f32.mrf.mxu0 }
 0xd8f   :  { %v10289_v20 = vadd.f32 %v10242_v1, %v2389_v38  ;;  %v8772_v38 = vld [vmem:[%s11613_s2 + $0xc0] sm:$0xff]  }
 0xd90   :  { %v8117_v12 = vpop.f32.mrf.mxu0 }
 0xd91   :  { %v2409_v21 = vsel %vm308_vm6, %v10289_v20, -inf }
 0xd92   :  { %v2392_v14 = vpop.f32.mrf.mxu0 }
 0xd93   :  { %v10294_v48 = vadd.f32 %v10249_v15, %v2392_v14 }
 0xd94   :  { %v8118_v26 = vpop.f32.mrf.mxu0 }
 0xd95   :  { %v2412_v11 = vsel %vm308_vm6, %v10294_v48, -inf  ;;  %v8773_v26 = vld [vmem:[%s11613_s2 + $0xb8] sm:$0xff]  }
 0xe03   :  { %v2093_v17 = vpop.xlane.xlu1 %2092 }
 0xe04   :  { %v2106_v18 = vsub.f32 %v2070_v8, %v2093_v17 }
 0xe06   :  { %v2111_v59 = vmul.f32 1.442695, %v2106_v18 }
 0xe07   :  { %v2096_v19 = vpop.xlane.xlu0 %2095  ;;  %v2322_v23 = vpop.permute.xlu1 %2321 }
 0xe08   :  { %8978 = vpow2.f32 %v2111_v59  ;;  %v2107_v44 = vsub.f32 %v2073_v53, %v2096_v19  ;;  %8120 = vmatmul.mubr.msk.bf16.gmra.mxu0 %vm233_vm4, %v2322_v23  ;;  %v8774_v19 = vld [vmem:[%s11613_s2 + $0xb0] sm:$0xff]  }
 0xe09   :  { %8149 = vmatprep.mubr.msk.bf16.mxu0 %vm9241_vm1, %v9240_v0 }
 0xe0a   :  { %v2113_v54 = vmul.f32 1.442695, %v2107_v44 }
 0xe0b   :  { %v2099_v24 = vpop.xlane.xlu0 %2098 }
 0xe0c   :  { %8980 = vpow2.f32 %v2113_v54  ;;  %v2108_v13 = vsub.f32 %v2078_v62, %v2099_v24  ;;  %v10281_v62 = vadd.f32 %v10235_v52, %v2384_v32  ;;  %v8775_v54 = vld [vmem:[%s11613_s2 + $0xa8] sm:$0xff]  }
 0xe0e   :  { %v2115_v22 = vmul.f32 1.442695, %v2108_v13  ;;  %v2406_v3 = vsel %vm308_vm6, %v10281_v62, -inf }
 0xe0f   :  { %v2102_v29 = vpop.xlane.xlu0 %2101 }
 0xe10   :  { %8982 = vpow2.f32 %v2115_v22  ;;  %v2109_v16 = vsub.f32 %v2081_v5, %v2102_v29  ;;  %v2403_v5 = vsel %vm308_vm6, %v10286_v30, -inf }
 0xe12   :  { %v2117_v27 = vmul.f32 1.442695, %v2109_v16 }
 0xe13   :  { %v2105_v36 = vpop.xlane.xlu0 %2104 }
 0xe14   :  { %8984 = vpow2.f32 %v2117_v27  ;;  %v2110_v2 = vsub.f32 %v2086_v43, %v2105_v36 }
 0xe15   :  { %v8979_v6 = vpop.eup %8978 }
 0xe16   :  { %v2119_v33 = vmul.f32 1.442695, %v2110_v2  ;;  %v2121_v40 = vsel %vm308_vm6, %v8979_v6, 0.0 }
 0xe17   :  { %2122 = vadd.xlane.f32.xlu0 %v2121_v40 }
 0xe18   :  { %8986 = vpow2.f32 %v2119_v33 }
 0xe19   :  { %v8981_v8 = vpop.eup %8980 }
 0xe1a   :  { %v2124_v63 = vsel %vm308_vm6, %v8981_v8, 0.0 }
 0xe1b   :  { %2125 = vadd.xlane.f32.xlu0 %v2124_v63 }
 0xe1d   :  { %v8983_v49 = vpop.eup %8982 }
 0xe1e   :  { %v2127_v50 = vsel %vm308_vm6, %v8983_v49, 0.0 }
 0xe1f   :  { %2128 = vadd.xlane.f32.xlu0 %v2127_v50 }
 0xe21   :  { %v8985_v53 = vpop.eup %8984 }
 0xe22   :  { %v2130_v61 = vsel %vm308_vm6, %v8985_v53, 0.0 }
 0xe23   :  { %2131 = vadd.xlane.f32.xlu1 %v2130_v61 }
 0xe25   :  { %v8987_v56 = vpop.eup %8986 }
 0xe26   :  { %v2133_v39 = vsel %vm308_vm6, %v8987_v56, 0.0 }
 0xe27   :  { %2134 = vadd.xlane.f32.xlu0 %v2133_v39 }
 0xe34   :  { %2625 = vrot.lane.b32.xlu1 %v10173_v9, %s9245_s14 }
 0xe3d   :  { %2635 = vrot.lane.b32.xlu0 %v10175_v4, %s9246_s15 }
 0xe41   :  { %2633 = vrot.lane.b32.xlu0 %v10169_v46, %s9246_s15 }
 0xe45   :  { %2631 = vrot.lane.b32.xlu0 %v10173_v9, %s9246_s15 }
 0xe49   :  { %2627 = vrot.lane.b32.xlu0 %v10169_v46, %s9245_s14 }
 0xe58   :  { %2407 = vmax.xlane.f32.xlu1 %v2406_v3 }
 0xe68   :  { %2404 = vmax.xlane.f32.xlu0 %v2403_v5 }
 0xe6c   :  { %2410 = vmax.xlane.f32.xlu0 %v2409_v21 }
 0xe70   :  { %2413 = vmax.xlane.f32.xlu0 %v2412_v11 }
 0xe86   :  { %2629 = vrot.lane.b32.xlu0 %v10175_v4, %s9245_s14 }
 0xea0   :  { %v2123_v57 = vpop.xlane.xlu0 %2122 }
 0xea1   :  { %8988 = vrcp.f32 %v2123_v57 }
 0xea4   :  { %v2126_v43 = vpop.xlane.xlu0 %2125 }
 0xea5   :  { %8990 = vrcp.f32 %v2126_v43 }
 0xea8   :  { %v2129_v55 = vpop.xlane.xlu0 %2128 }
 0xea9   :  { %8992 = vrcp.f32 %v2129_v55 }
 0xeac   :  { %v2132_v60 = vpop.xlane.xlu1 %2131 }
 0xead   :  { %8994 = vrcp.f32 %v2132_v60 }
 0xeae   :  { %v8989_v41 = vpop.eup %8988 }
 0xeaf   :  { %v2141_v51 = vmul.f32 %v8989_v41, %v8979_v6 }
 0xeb0   :  { %v2135_v58 = vpop.xlane.xlu0 %2134  ;;  %v2626_v50 = vpop.permute.xlu1 %2625 }
 0xeb1   :  { %8996 = vrcp.f32 %v2135_v58 }
 0xeb2   :  { %v8991_v32 = vpop.eup %8990 }
 0xeb3   :  { %v2142_v37 = vmul.f32 %v8991_v32, %v8981_v8 }
 0xeb4   :  { %v2636_v36 = vpop.permute.xlu0 %2635 }
 0xeb5   :  { %v2234_v12 = vpack.c.bf16 %v2142_v37, %v2141_v51  ;;  %v2653_v33 = vsel %vm233_vm4, %v2636_v36, 0 }
 0xeb6   :  { %v8993_v14 = vpop.eup %8992 }
 0xeb7   :  { %8094 = vmatmul.mubr.msk.bf16.vlgmr.msra.gmra.mxu1 %vm308_vm6, %v2234_v12  ;;  %v2143_v18 = vmul.f32 %v8993_v14, %v8983_v49 }
 0xeb8   :  { %8097 = vmatprep.mubr.msk.bf16.mxu1 %vm9241_vm1, %v9240_v0  ;;  %8124 = vmatpush3.bf16.msra.mxu1 %v8772_v38  ;;  %v2634_v40 = vpop.permute.xlu0 %2633 }
 0xeb9   :  { %8125 = vmatprep.subr.bf16.mxu1 %v9240_v0  ;;  %v2650_v8 = vsel %vm233_vm4, %v2634_v40, 0 }
 0xeba   :  { %v8995_v17 = vpop.eup %8994 }
 0xebb   :  { %v2144_v59 = vmul.f32 %v8995_v17, %v8985_v53 }
 0xebc   :  { %8126 = vmatpush3.bf16.msra.mxu1 %v8773_v26  ;;  %v2632_v63 = vpop.permute.xlu0 %2631 }
 0xebd   :  { %v2235_v23 = vpack.c.bf16 %v2144_v59, %v2143_v18  ;;  %8127 = vmatprep.subr.bf16.mxu1 %v9240_v0  ;;  %v2647_v49 = vsel %vm233_vm4, %v2632_v63, 0 }
 0xebe   :  { %v8997_v44 = vpop.eup %8996 }
 0xebf   :  { %8098 = vmatmul.mubr.msk.bf16.gmra.mxu1 %vm308_vm6, %v2235_v23  ;;  %v2145_v24 = vmul.f32 %v8997_v44, %v8987_v56 }
 0xec0   :  { %8101 = vmatprep.mubr.msk.bf16.mxu1 %vm9241_vm1, %v9240_v0  ;;  %8128 = vmatpush3.bf16.msra.mxu1 %v8774_v19  ;;  %v2628_v53 = vpop.permute.xlu0 %2627 }
 0xec1   :  { %8129 = vmatprep.subr.bf16.mxu1 %v9240_v0  ;;  %v2236_v13 = vpack.c.bf16 %v2145_v24, %v2145_v24 }
 0xec4   :  { %8130 = vmatpush3.bf16.msra.mxu1 %v8775_v54 }
 0xec5   :  { %8161 = vmatprep.subr.bf16.mxu1 %v9240_v0 }
 0xec7   :  { %8102 = vmatmul.mubr.msk.bf16.gmra.mxu1 %vm308_vm6, %v2236_v13 }
 0xec8   :  { %v2397_v22 = vpop.f32.mrf.mxu0  ;;  %8131 = vmatprep.mubr.msk.bf16.mxu1 %vm9241_vm1, %v9240_v0 }
 0xec9   :  { %v10328_v29 = vadd.f32 %v10256_v31, %v2397_v22 }
 0xeca   :  { %v8121_v16 = vpop.f32.mrf.mxu0 }
 0xecb   :  { %v2415_v27 = vsel %vm308_vm6, %v10328_v29, -inf }
 0xecc   :  { %2416 = vmax.xlane.f32.xlu1 %v2415_v27  ;;  %v2400_v2 = vpop.f32.mrf.mxu0 }
 0xece   :  { %v8122_v6 = vpop.f32.mrf.mxu0 }
 0xecf   :  { %8132 = vmatmul.mubr.msk.bf16.vlgmr.msra.gmra.mxu1 %vm154_vm3, %v10112_v25 }
 0xed0   :  { %8162 = vmatpush3.bf16.xpose.msra.mxu1 %v2653_v33  ;;  %8135 = vmatprep.mubr.msk.bf16.mxu1 %vm9241_vm1, %v9240_v0 }
 0xed1   :  { %8163 = vmatprep.subr.bf16.mxu1 %v9240_v0 }
 0xed7   :  { %8136 = vmatmul.mubr.msk.bf16.gmra.mxu1 %vm154_vm3, %v10132_v45 }
 0xed8   :  { %8164 = vmatpush3.bf16.xpose.msra.mxu1 %v2650_v8  ;;  %8139 = vmatprep.mubr.msk.bf16.mxu1 %vm9241_vm1, %v9240_v0 }
 0xed9   :  { %8165 = vmatprep.subr.bf16.mxu1 %v9240_v0 }
 0xedf   :  { %8140 = vmatmul.mubr.msk.bf16.gmra.mxu1 %vm154_vm3, %v10147_v47 }
 0xee0   :  { %8166 = vmatpush3.bf16.xpose.msra.mxu1 %v2647_v49  ;;  %8167 = vmatprep.mubr.msk.bf16.mxu1 %vm9241_vm1, %v9240_v0 }
 0xee1   :  { %8199 = vmatprep.subr.bf16.mxu1 %v9240_v0  ;;  %v2408_v61 = vpop.xlane.xlu1 %2407 }
 0xee2   :  { %v2419_v56 = vsub.f32 %v10281_v62, %v2408_v61 }
 0xee4   :  { %v2425_v5 = vmul.f32 1.442695, %v2419_v56 }
 0xee7   :  { %8168 = vmatmul.mubr.msk.bf16.vlgmr.msra.gmra.mxu1 %vm233_vm4, %v2626_v50 }
 0xee8   :  { %8171 = vmatprep.mubr.msk.bf16.mxu1 %vm9241_vm1, %v9240_v0 }
 0xeef   :  { %8172 = vmatmul.mubr.msk.bf16.gmra.mxu1 %vm233_vm4, %v2628_v53 }
 0xef0   :  { %8175 = vmatprep.mubr.msk.bf16.mxu1 %vm9241_vm1, %v9240_v0 }
 0xef1   :  { %v2405_v39 = vpop.xlane.xlu0 %2404 }
 0xef2   :  { %v2418_v3 = vsub.f32 %v10286_v30, %v2405_v39 }
 0xef4   :  { %v2423_v21 = vmul.f32 1.442695, %v2418_v3 }
 0xef5   :  { %v2411_v11 = vpop.xlane.xlu0 %2410 }
 0xef6   :  { %8998 = vpow2.f32 %v2423_v21  ;;  %v2420_v57 = vsub.f32 %v10289_v20, %v2411_v11 }
 0xef7   :  { %9000 = vpow2.f32 %v2425_v5 }
 0xef8   :  { %v2427_v43 = vmul.f32 1.442695, %v2420_v57 }
 0xef9   :  { %v2414_v55 = vpop.xlane.xlu0 %2413 }
 0xefa   :  { %v2421_v60 = vsub.f32 %v10294_v48, %v2414_v55  ;;  %9002 = vpow2.f32 %v2427_v43 }
 0xefc   :  { %v2429_v41 = vmul.f32 1.442695, %v2421_v60 }
 0xefd   :  { %v2630_v62 = vpop.permute.xlu0 %2629 }
 0xefe   :  { %9004 = vpow2.f32 %v2429_v41  ;;  %8176 = vmatmul.mubr.msk.bf16.gmra.mxu1 %vm233_vm4, %v2630_v62 }
 0xeff   :  { %8205 = vmatprep.mubr.msk.bf16.mxu1 %vm9241_vm1, %v9240_v0 }
 0xf03   :  { %v10363_v30 = vpop.eup %8998 }
 0xf04   :  { %v2433_v58 = vsel %vm308_vm6, %v10363_v30, 0.0  ;;  %v10367_v20 = vpop.eup %9000 }
 0xf05   :  { %2434 = vadd.xlane.f32.xlu1 %v2433_v58  ;;  %v2436_v48 = vsel %vm308_vm6, %v10367_v20, 0.0 }
 0xf07   :  { %v10371_v32 = vpop.eup %9002 }
 0xf08   :  { %v2439_v38 = vsel %vm308_vm6, %v10371_v32, 0.0 }
 0xf09   :  { %2437 = vadd.xlane.f32.xlu1 %v2436_v48 }
 0xf0b   :  { %v10373_v51 = vpop.eup %9004 }
 0xf0c   :  { %v2442_v37 = vsel %vm308_vm6, %v10373_v51, 0.0 }
 0xf0d   :  { %2443 = vadd.xlane.f32.xlu0 %v2442_v37  ;;  %2440 = vadd.xlane.f32.xlu1 %v2439_v38 }
 0xf23   :  { %2933 = vrot.lane.b32.xlu0 %v10173_v9, %s9247_s24 }
 0xf55   :  { %v2417_v12 = vpop.xlane.xlu1 %2416 }
 0xf56   :  { %v2422_v14 = vsub.f32 %v10328_v29, %v2417_v12 }
 0xf58   :  { %v2431_v26 = vmul.f32 1.442695, %v2422_v14 }
 0xf5a   :  { %9006 = vpow2.f32 %v2431_v26 }
 0xf67   :  { %v10382_v17 = vpop.eup %9006 }
 0xf68   :  { %v2445_v18 = vsel %vm308_vm6, %v10382_v17, 0.0 }
 0xf69   :  { %2446 = vadd.xlane.f32.xlu1 %v2445_v18 }
 0xf77   :  { %v10386_v59 = vpop.f32.mrf.mxu1 }
 0xf79   :  { %v8095_v19 = vpop.f32.mrf.mxu1 }
 0xf7a   :  { %2943 = vrot.lane.b32.xlu1 %v10175_v4, %s9248_s25 }
 0xf7b   :  { %v10390_v23 = vpop.f32.mrf.mxu1 }
 0xf7d   :  { %v8096_v44 = vpop.f32.mrf.mxu1 }
 0xf7e   :  { %2941 = vrot.lane.b32.xlu1 %v10169_v46, %s9248_s25 }
 0xf7f   :  { %v10394_v54 = vpop.f32.mrf.mxu1 }
 0xf81   :  { %v8099_v24 = vpop.f32.mrf.mxu1 }
 0xf82   :  { %2939 = vrot.lane.b32.xlu1 %v10173_v9, %s9248_s25 }
 0xf83   :  { %v10398_v13 = vpop.f32.mrf.mxu1 }
 0xf85   :  { %v8100_v22 = vpop.f32.mrf.mxu1 }
 0xf86   :  { %2935 = vrot.lane.b32.xlu1 %v10169_v46, %s9247_s24 }
 0xf87   :  { %v10402_v29 = vpop.f32.mrf.mxu1 }
 0xf89   :  { %v8103_v16 = vpop.f32.mrf.mxu1 }
 0xf8b   :  { %v2305_v27 = vpop.f32.mrf.mxu1 }
 0xf8d   :  { %v8104_v36 = vpop.f32.mrf.mxu1 }
 0xf8e   :  { %v2435_v2 = vpop.xlane.xlu1 %2434  ;;  %v8777_v36 = vld [vmem:[%s11613_s2 + $0xd8] sm:$0xff]  }
 0xf8f   :  { %v2524_v6 = vpop.f32.mrf.mxu1 }
 0xf91   :  { %v8133_v33 = vpop.f32.mrf.mxu1 }
 0xf92   :  { %v2438_v8 = vpop.xlane.xlu1 %2437 }
 0xf93   :  { %v2527_v40 = vpop.f32.mrf.mxu1  ;;  %9008 = vrcp.f32 %v2438_v8 }
 0xf94   :  { %9010 = vrcp.f32 %v2435_v2  ;;  %v2549_v58 = vpack.c.bf16 %v2527_v40, %v2524_v6 }
 0xf95   :  { %v8134_v63 = vpop.f32.mrf.mxu1 }
 0xf96   :  { %v2444_v53 = vpop.xlane.xlu0 %2443  ;;  %v2441_v61 = vpop.xlane.xlu1 %2440 }
 0xf97   :  { %v2532_v49 = vpop.f32.mrf.mxu1  ;;  %9012 = vrcp.f32 %v2444_v53 }
 0xf98   :  { %9014 = vrcp.f32 %v2441_v61 }
 0xf99   :  { %v8137_v9 = vpop.f32.mrf.mxu1 }
 0xf9b   :  { %v2535_v50 = vpop.f32.mrf.mxu1 }
 0xf9c   :  { %v2550_v57 = vpack.c.bf16 %v2535_v50, %v2532_v49  ;;  %v8779_v49 = vld [vmem:[%s11613_s2 + $0xc8] sm:$0xff]  }
 0xf9d   :  { %v8138_v56 = vpop.f32.mrf.mxu1 }
 0xf9f   :  { %v2540_v46 = vpop.f32.mrf.mxu1 }
 0xfa0   :  { %v2551_v39 = vpack.c.bf16 %v2540_v46, %v2540_v46  ;;  %v9009_v11 = vpop.eup %9008 }
 0xfa1   :  { %v8141_v3 = vpop.f32.mrf.mxu1  ;;  %v9011_v55 = vpop.eup %9010  ;;  %v2454_v41 = vmul.f32 %v9009_v11, %v10367_v20  ;;  %v8776_v20 = vld [vmem:[%s11613_s2 + $0xe0] sm:$0xff]  }
 0xfa2   :  { %v2562_v5 = vsel %vm467_vm5, %v2551_v39, 0  ;;  %v2453_v37 = vmul.f32 %v9011_v55, %v10363_v30 }
 0xfa3   :  { %v2543_v21 = vpop.f32.mrf.mxu1  ;;  %8144 = vmatpush3.bf16.msra.mxu0 %v2562_v5 }
 0xfa4   :  { %8145 = vmatprep.subr.bf16.mxu0 %v9240_v0  ;;  %v9013_v14 = vpop.eup %9012  ;;  %v2546_v26 = vpack.c.bf16 %v2454_v41, %v2453_v37 }
 0xfa5   :  { %v8142_v43 = vpop.f32.mrf.mxu1  ;;  %v9015_v19 = vpop.eup %9014  ;;  %v2456_v27 = vmul.f32 %v9013_v14, %v10373_v51 }
 0xfa6   :  { %v2455_v16 = vmul.f32 %v9015_v19, %v10371_v32  ;;  %v8778_v32 = vld [vmem:[%s11613_s2 + $0xd0] sm:$0xff]  }
 0xfa7   :  { %8146 = vmatpush3.bf16.msra.mxu0 %v2550_v57  ;;  %v2689_v60 = vpop.f32.mrf.mxu1 }
 0xfa8   :  { %v10408_v62 = vadd.f32 %v10228_v10, %v2689_v60  ;;  %8147 = vmatprep.subr.bf16.mxu0 %v9240_v0  ;;  %v2547_v8 = vpack.c.bf16 %v2456_v27, %v2455_v16  ;;  %v2934_v60 = vpop.permute.xlu0 %2933 }
 0xfa9   :  { %v8169_v48 = vpop.f32.mrf.mxu1 }
 0xfaa   :  { %v2711_v38 = vsel %vm308_vm6, %v10408_v62, -inf }
 0xfab   :  { %8148 = vmatpush3.bf16.msra.mxu0 %v2549_v58  ;;  %v2692_v12 = vpop.f32.mrf.mxu1  ;;  %2712 = vmax.xlane.f32.xlu1 %v2711_v38 }
 0xfac   :  { %v10415_v18 = vadd.f32 %v10235_v52, %v2692_v12  ;;  %8179 = vmatprep.subr.bf16.mxu0 %v9240_v0 }
 0xfad   :  { %v8170_v44 = vpop.f32.mrf.mxu1 }
 0xfae   :  { %8150 = vmatmul.mubr.msk.bf16.vlgmr.msra.gmra.mxu0 %vm308_vm6, %v2546_v26  ;;  %v2714_v30 = vsel %vm308_vm6, %v10415_v18, -inf }
 0xfaf   :  { %v2697_v24 = vpop.f32.mrf.mxu1  ;;  %2715 = vmax.xlane.f32.xlu0 %v2714_v30  ;;  %8153 = vmatprep.mubr.msk.bf16.mxu0 %vm9241_vm1, %v9240_v0 }
 0xfb0   :  { %v10427_v22 = vadd.f32 %v10242_v1, %v2697_v24  ;;  %8180 = vmatpush3.bf16.msra.mxu0 %v8776_v20 }
 0xfb1   :  { %v8173_v2 = vpop.f32.mrf.mxu1  ;;  %8181 = vmatprep.subr.bf16.mxu0 %v9240_v0 }
 0xfb2   :  { %v2717_v6 = vsel %vm308_vm6, %v10427_v22, -inf }
 0xfb3   :  { %v2700_v33 = vpop.f32.mrf.mxu1  ;;  %2718 = vmax.xlane.f32.xlu1 %v2717_v6 }
 0xfb4   :  { %v10438_v40 = vadd.f32 %v10249_v15, %v2700_v33  ;;  %8182 = vmatpush3.bf16.msra.mxu0 %v8777_v36 }
 0xfb5   :  { %v8174_v51 = vpop.f32.mrf.mxu1  ;;  %8183 = vmatprep.subr.bf16.mxu0 %v9240_v0 }
 0xfb6   :  { %8154 = vmatmul.mubr.msk.bf16.gmra.mxu0 %vm308_vm6, %v2547_v8  ;;  %v2720_v63 = vsel %vm308_vm6, %v10438_v40, -inf }
 0xfb7   :  { %2721 = vmax.xlane.f32.xlu1 %v2720_v63  ;;  %8157 = vmatprep.mubr.msk.bf16.mxu0 %vm9241_vm1, %v9240_v0 }
 0xfb8   :  { %8184 = vmatpush3.bf16.msra.mxu0 %v8778_v32 }
 0xfb9   :  { %8185 = vmatprep.subr.bf16.mxu0 %v9240_v0 }
 0xfbc   :  { %8186 = vmatpush3.bf16.msra.mxu0 %v8779_v49  ;;  %v7104_v49 = vld [vmem:[%s11614_s3 + $0x50] ss:$0 sm:$0xff] }
 0xfbd   :  { %8217 = vmatprep.subr.bf16.mxu0 %v9240_v0 }
 0xfbe   :  { %v2705_v9 = vpop.f32.mrf.mxu1 }
 0xfbf   :  { %v10455_v50 = vadd.f32 %v10256_v31, %v2705_v9  ;;  %v2312_v9 = vadd.f32 %v7104_v49, %v10386_v59 }
 0xfc0   :  { %v8177_v53 = vpop.f32.mrf.mxu1 }
 0xfc1   :  { %v2723_v61 = vsel %vm308_vm6, %v10455_v50, -inf }
 0xfc2   :  { %v2708_v56 = vpop.f32.mrf.mxu1  ;;  %2724 = vmax.xlane.f32.xlu1 %v2723_v61 }
 0xfc3   :  { %v2313_v56 = vadd.f32 %v7104_v49, %v10390_v23 }
 0xfc4   :  { %v8178_v46 = vpop.f32.mrf.mxu1 }
 0xfc5   :  { %2937 = vrot.lane.b32.xlu0 %v10175_v4, %s9247_s24 }
 0xff2   :  { %v2447_v39 = vpop.xlane.xlu1 %2446 }
 0xff3   :  { %9016 = vrcp.f32 %v2447_v39 }
 0xff6   :  { %v2944_v11 = vpop.permute.xlu1 %2943 }
 0xff7   :  { %v2961_v57 = vsel %vm233_vm4, %v2944_v11, 0 }
 0xffa   :  { %v2942_v4 = vpop.permute.xlu1 %2941 }
 0xffe   :  { %v2940_v43 = vpop.permute.xlu1 %2939 }
 0xfff   :  { %v2955_v55 = vsel %vm233_vm4, %v2940_v43, 0 }
0x1000   :  { %v9017_v3 = vpop.eup %9016 }
0x1001   :  { %v2457_v5 = vmul.f32 %v9017_v3, %v10382_v17  ;;  %v2958_v17 = vsel %vm233_vm4, %v2942_v4, 0  ;;  %v2315_v4 = vadd.f32 %v7104_v49, %v10398_v13 }
0x1002   :  { %v2936_v41 = vpop.permute.xlu1 %2935 }
0x1003   :  { %v2548_v21 = vpack.c.bf16 %v2457_v5, %v2457_v5  ;;  %v2314_v5 = vadd.f32 %v7104_v49, %v10394_v54 }
0x1005   :  { %8158 = vmatmul.mubr.msk.bf16.gmra.mxu0 %vm308_vm6, %v2548_v21 }
0x1006   :  { %8187 = vmatprep.mubr.msk.bf16.mxu0 %vm9241_vm1, %v9240_v0 }
0x100d   :  { %8188 = vmatmul.mubr.msk.bf16.vlgmr.msra.gmra.mxu0 %vm154_vm3, %v10112_v25 }
0x100e   :  { %8218 = vmatpush3.bf16.xpose.msra.mxu0 %v2961_v57  ;;  %8191 = vmatprep.mubr.msk.bf16.mxu0 %vm9241_vm1, %v9240_v0 }
0x100f   :  { %8219 = vmatprep.subr.bf16.mxu0 %v9240_v0 }
0x1015   :  { %8192 = vmatmul.mubr.msk.bf16.gmra.mxu0 %vm154_vm3, %v10132_v45 }
0x1016   :  { %8220 = vmatpush3.bf16.xpose.msra.mxu0 %v2958_v17  ;;  %8195 = vmatprep.mubr.msk.bf16.mxu0 %vm9241_vm1, %v9240_v0 }
0x1017   :  { %8221 = vmatprep.subr.bf16.mxu0 %v9240_v0 }
0x101d   :  { %8196 = vmatmul.mubr.msk.bf16.gmra.mxu0 %vm154_vm3, %v10147_v47 }
0x101e   :  { %8222 = vmatpush3.bf16.xpose.msra.mxu0 %v2955_v55  ;;  %8223 = vmatprep.mubr.msk.bf16.mxu0 %vm9241_vm1, %v9240_v0  ;;  %v2316_v55 = vadd.f32 %v7104_v49, %v10402_v29 }
0x101f   :  { %8255 = vmatprep.subr.bf16.mxu0 %v9240_v0 }
0x1025   :  { %8224 = vmatmul.mubr.msk.bf16.vlgmr.msra.gmra.mxu0 %vm233_vm4, %v2934_v60 }
0x1026   :  { %8227 = vmatprep.mubr.msk.bf16.mxu0 %vm9241_vm1, %v9240_v0 }
0x102d   :  { %8228 = vmatmul.mubr.msk.bf16.gmra.mxu0 %vm233_vm4, %v2936_v41 }
0x102e   :  { %8231 = vmatprep.mubr.msk.bf16.mxu0 %vm9241_vm1, %v9240_v0 }
0x1034   :  { %v2713_v58 = vpop.xlane.xlu1 %2712 }
0x1035   :  { %v2726_v48 = vsub.f32 %v10408_v62, %v2713_v58 }
0x1037   :  { %v2731_v37 = vmul.f32 1.442695, %v2726_v48 }
0x1038   :  { %v2716_v38 = vpop.xlane.xlu0 %2715 }
0x1039   :  { %9018 = vpow2.f32 %v2731_v37  ;;  %v2727_v12 = vsub.f32 %v10415_v18, %v2716_v38 }
0x103b   :  { %v2733_v14 = vmul.f32 1.442695, %v2727_v12 }
0x103c   :  { %v2938_v26 = vpop.permute.xlu0 %2937  ;;  %v2719_v20 = vpop.xlane.xlu1 %2718 }
0x103d   :  { %9020 = vpow2.f32 %v2733_v14  ;;  %v2728_v19 = vsub.f32 %v10427_v22, %v2719_v20  ;;  %8232 = vmatmul.mubr.msk.bf16.gmra.mxu0 %vm233_vm4, %v2938_v26 }
0x103e   :  { %8261 = vmatprep.mubr.msk.bf16.mxu0 %vm9241_vm1, %v9240_v0 }
0x103f   :  { %v2735_v44 = vmul.f32 1.442695, %v2728_v19 }
0x1040   :  { %v2722_v30 = vpop.xlane.xlu1 %2721 }
0x1041   :  { %9022 = vpow2.f32 %v2735_v44  ;;  %v2729_v62 = vsub.f32 %v10438_v40, %v2722_v30 }
0x1043   :  { %v2737_v24 = vmul.f32 1.442695, %v2729_v62 }
0x1045   :  { %9024 = vpow2.f32 %v2737_v24 }
0x1046   :  { %v10496_v16 = vpop.eup %9018 }
0x1047   :  { %v2741_v18 = vsel %vm308_vm6, %v10496_v16, 0.0 }
0x1048   :  { %2742 = vadd.xlane.f32.xlu1 %v2741_v18 }
0x104a   :  { %v10500_v27 = vpop.eup %9020 }
0x104b   :  { %v2725_v22 = vpop.xlane.xlu1 %2724  ;;  %v2744_v36 = vsel %vm308_vm6, %v10500_v27, 0.0 }
0x104c   :  { %v2730_v2 = vsub.f32 %v10455_v50, %v2725_v22  ;;  %2745 = vadd.xlane.f32.xlu1 %v2744_v36 }
0x104e   :  { %v10505_v6 = vpop.eup %9022  ;;  %v2739_v33 = vmul.f32 1.442695, %v2730_v2 }
0x104f   :  { %v2747_v40 = vsel %vm308_vm6, %v10505_v6, 0.0 }
0x1050   :  { %9026 = vpow2.f32 %v2739_v33  ;;  %2748 = vadd.xlane.f32.xlu1 %v2747_v40 }
0x1052   :  { %v10509_v8 = vpop.eup %9024 }
0x1053   :  { %v2750_v32 = vsel %vm308_vm6, %v10509_v8, 0.0 }
0x1054   :  { %2751 = vadd.xlane.f32.xlu1 %v2750_v32 }
0x105d   :  { %v10513_v51 = vpop.eup %9026 }
0x105e   :  { %v2753_v63 = vsel %vm308_vm6, %v10513_v51, 0.0 }
0x105f   :  { %2754 = vadd.xlane.f32.xlu1 %v2753_v63 }
0x106e   :  { %v2598_v50 = vpop.f32.mrf.mxu0 }
0x106f   :  { %v10521_v53 = vadd.f32 %v2598_v50, %v2312_v9 }
0x1070   :  { %v8151_v61 = vpop.f32.mrf.mxu0 }
0x1072   :  { %v2601_v46 = vpop.f32.mrf.mxu0 }
0x1073   :  { %v10524_v39 = vadd.f32 %v2601_v46, %v2313_v56 }
0x1074   :  { %v8152_v3 = vpop.f32.mrf.mxu0 }
0x1076   :  { %v2606_v21 = vpop.f32.mrf.mxu0 }
0x1077   :  { %v10527_v11 = vadd.f32 %v2606_v21, %v2314_v5 }
0x1078   :  { %v8155_v57 = vpop.f32.mrf.mxu0 }
0x107a   :  { %v2609_v17 = vpop.f32.mrf.mxu0 }
0x107b   :  { %v10530_v59 = vadd.f32 %v2609_v17, %v2315_v4 }
0x107c   :  { %v8156_v43 = vpop.f32.mrf.mxu0 }
0x10c5   :  { %v2614_v60 = vpop.f32.mrf.mxu0 }
0x10c6   :  { %v10533_v23 = vadd.f32 %v2614_v60, %v2316_v55  ;;  %v8781_v60 = vld [vmem:[%s11613_s2 + $0xf8] sm:$0xff]  }
0x10c7   :  { %v8159_v41 = vpop.f32.mrf.mxu0 }
0x10c9   :  { %v2617_v58 = vpop.f32.mrf.mxu0 }
0x10cb   :  { %v8160_v48 = vpop.f32.mrf.mxu0 }
0x10cd   :  { %v2832_v37 = vpop.f32.mrf.mxu0 }
0x10cf   :  { %v8189_v54 = vpop.f32.mrf.mxu0 }
0x10d1   :  { %v2743_v38 = vpop.xlane.xlu1 %2742  ;;  %v2835_v12 = vpop.f32.mrf.mxu0 }
0x10d2   :  { %v2857_v50 = vpack.c.bf16 %v2835_v12, %v2832_v37 }
0x10d3   :  { %v8190_v14 = vpop.f32.mrf.mxu0 }
0x10d5   :  { %v2746_v26 = vpop.xlane.xlu1 %2745  ;;  %v2840_v20 = vpop.f32.mrf.mxu0 }
0x10d6   :  { %9028 = vrcp.f32 %v2746_v26 }
0x10d7   :  { %v8193_v13 = vpop.f32.mrf.mxu0  ;;  %9030 = vrcp.f32 %v2743_v38 }
0x10d9   :  { %v2749_v19 = vpop.xlane.xlu1 %2748  ;;  %v2843_v44 = vpop.f32.mrf.mxu0 }
0x10da   :  { %v2858_v33 = vpack.c.bf16 %v2843_v44, %v2840_v20 }
0x10db   :  { %v8194_v30 = vpop.f32.mrf.mxu0 }
0x10dd   :  { %v2752_v29 = vpop.xlane.xlu1 %2751  ;;  %v2848_v62 = vpop.f32.mrf.mxu0 }
0x10de   :  { %9032 = vrcp.f32 %v2752_v29  ;;  %v2859_v24 = vpack.c.bf16 %v2848_v62, %v2848_v62 }
0x10df   :  { %v8197_v18 = vpop.f32.mrf.mxu0  ;;  %9034 = vrcp.f32 %v2749_v19 }
0x10e0   :  { %v2870_v22 = vsel %vm467_vm5, %v2859_v24, 0 }
0x10e1   :  { %v2851_v36 = vpop.f32.mrf.mxu0  ;;  %8200 = vmatpush3.bf16.msra.mxu1 %v2870_v22 }
0x10e2   :  { %8201 = vmatprep.subr.bf16.mxu1 %v9240_v0 }
0x10e3   :  { %v9029_v2 = vpop.eup %9028  ;;  %v8198_v40 = vpop.f32.mrf.mxu0 }
0x10e4   :  { %v9031_v32 = vpop.eup %9030  ;;  %v2762_v49 = vmul.f32 %v9029_v2, %v10500_v27 }
0x10e5   :  { %8202 = vmatpush3.bf16.msra.mxu1 %v2858_v33  ;;  %v2997_v63 = vpop.f32.mrf.mxu0  ;;  %v2761_v56 = vmul.f32 %v9031_v32, %v10496_v16 }
0x10e6   :  { %v10539_v9 = vadd.f32 %v10228_v10, %v2997_v63  ;;  %8203 = vmatprep.subr.bf16.mxu1 %v9240_v0  ;;  %v8780_v10 = vld [vmem:[%s11613_s2 + $0x100] sm:$0xff]  }
0x10e7   :  { %v8225_v61 = vpop.f32.mrf.mxu0  ;;  %v2854_v21 = vpack.c.bf16 %v2762_v49, %v2761_v56 }
0x10e8   :  { %v2755_v46 = vpop.xlane.xlu1 %2754  ;;  %v3019_v3 = vsel %vm308_vm6, %v10539_v9, -inf }
0x10e9   :  { %9036 = vrcp.f32 %v2755_v46  ;;  %8204 = vmatpush3.bf16.msra.mxu1 %v2857_v50  ;;  %3020 = vmax.xlane.f32.xlu1 %v3019_v3  ;;  %v3000_v5 = vpop.f32.mrf.mxu0 }
0x10ea   :  { %v3001_v27 = vadd.f32 %v10235_v52, %v3000_v5  ;;  %8235 = vmatprep.subr.bf16.mxu1 %v9240_v0 }
0x10eb   :  { %v9033_v57 = vpop.eup %9032  ;;  %v8226_v4 = vpop.f32.mrf.mxu0 }
0x10ec   :  { %8206 = vmatmul.mubr.msk.bf16.vlgmr.msra.gmra.mxu1 %vm308_vm6, %v2854_v21  ;;  %v3022_v16 = vsel %vm308_vm6, %v3001_v27, -inf  ;;  %v9035_v17 = vpop.eup %9034  ;;  %v2764_v55 = vmul.f32 %v9033_v57, %v10509_v8 }
0x10ed   :  { %3023 = vmax.xlane.f32.xlu0 %v3022_v16  ;;  %v3005_v43 = vpop.f32.mrf.mxu0  ;;  %8209 = vmatprep.mubr.msk.bf16.mxu1 %vm9241_vm1, %v9240_v0  ;;  %v2763_v48 = vmul.f32 %v9035_v17, %v10505_v6 }
0x10ee   :  { %v3006_v52 = vadd.f32 %v10242_v1, %v3005_v43  ;;  %8236 = vmatpush3.bf16.msra.mxu1 %v8780_v10  ;;  %v8782_v1 = vld [vmem:[%s11613_s2 + $0xf0] sm:$0xff]  }
0x10ef   :  { %v8229_v41 = vpop.f32.mrf.mxu0  ;;  %8237 = vmatprep.subr.bf16.mxu1 %v9240_v0  ;;  %v2855_v38 = vpack.c.bf16 %v2764_v55, %v2763_v48 }
0x10f0   :  { %v3025_v58 = vsel %vm308_vm6, %v3006_v52, -inf }
0x10f1   :  { %3026 = vmax.xlane.f32.xlu1 %v3025_v58  ;;  %v3008_v37 = vpop.f32.mrf.mxu0 }
0x10f2   :  { %v3009_v54 = vadd.f32 %v10249_v15, %v3008_v37  ;;  %8238 = vmatpush3.bf16.msra.mxu1 %v8781_v60  ;;  %v8783_v15 = vld [vmem:[%s11613_s2 + $0xe8] sm:$0xff]  }
0x10f3   :  { %v8230_v8 = vpop.f32.mrf.mxu0  ;;  %8239 = vmatprep.subr.bf16.mxu1 %v9240_v0 }
0x10f4   :  { %8210 = vmatmul.mubr.msk.bf16.gmra.mxu1 %vm308_vm6, %v2855_v38  ;;  %v3028_v12 = vsel %vm308_vm6, %v3009_v54, -inf }
0x10f5   :  { %3029 = vmax.xlane.f32.xlu1 %v3028_v12  ;;  %8213 = vmatprep.mubr.msk.bf16.mxu1 %vm9241_vm1, %v9240_v0 }
0x10f6   :  { %v9037_v6 = vpop.eup %9036  ;;  %8240 = vmatpush3.bf16.msra.mxu1 %v8782_v1 }
0x10f7   :  { %v2765_v14 = vmul.f32 %v9037_v6, %v10513_v51  ;;  %8241 = vmatprep.subr.bf16.mxu1 %v9240_v0 }
0x10f9   :  { %v2856_v26 = vpack.c.bf16 %v2765_v14, %v2765_v14 }
0x10fa   :  { %8242 = vmatpush3.bf16.msra.mxu1 %v8783_v15 }
0x10fb   :  { %8273 = vmatprep.subr.bf16.mxu1 %v9240_v0 }
0x10fc   :  { %8214 = vmatmul.mubr.msk.bf16.gmra.mxu1 %vm308_vm6, %v2856_v26 }
0x10fd   :  { %v3013_v20 = vpop.f32.mrf.mxu0  ;;  %8243 = vmatprep.mubr.msk.bf16.mxu1 %vm9241_vm1, %v9240_v0 }
0x10fe   :  { %v3014_v13 = vadd.f32 %v10256_v31, %v3013_v20 }
0x10ff   :  { %v8233_v19 = vpop.f32.mrf.mxu0 }
0x1100   :  { %v3031_v44 = vsel %vm308_vm6, %v3014_v13, -inf }
0x1101   :  { %3032 = vmax.xlane.f32.xlu1 %v3031_v44  ;;  %v3016_v30 = vpop.f32.mrf.mxu0 }
0x1103   :  { %v8234_v51 = vpop.f32.mrf.mxu0 }
0x1104   :  { %8244 = vmatmul.mubr.msk.bf16.vlgmr.msra.gmra.mxu1 %vm154_vm3, %v10112_v25 }
0x1105   :  { %8247 = vmatprep.mubr.msk.bf16.mxu1 %vm9241_vm1, %v9240_v0 }
0x110c   :  { %8248 = vmatmul.mubr.msk.bf16.gmra.mxu1 %vm154_vm3, %v10132_v45 }
0x110d   :  { %8251 = vmatprep.mubr.msk.bf16.mxu1 %vm9241_vm1, %v9240_v0 }
0x1114   :  { %8252 = vmatmul.mubr.msk.bf16.gmra.mxu1 %vm154_vm3, %v10147_v47 }
0x1115   :  { %8281 = vmatprep.mubr.msk.bf16.mxu1 %vm9241_vm1, %v9240_v0 }
0x1172   :  { %v3021_v31 = vpop.xlane.xlu1 %3020 }
0x1173   :  { %v3034_v29 = vsub.f32 %v10539_v9, %v3021_v31 }
0x1175   :  { %v3039_v62 = vmul.f32 1.442695, %v3034_v29 }
0x1176   :  { %v3024_v25 = vpop.xlane.xlu0 %3023 }
0x1177   :  { %9038 = vpow2.f32 %v3039_v62  ;;  %v3035_v24 = vsub.f32 %v3001_v27, %v3024_v25 }
0x1179   :  { %v3041_v18 = vmul.f32 1.442695, %v3035_v24 }
0x117a   :  { %v3027_v22 = vpop.xlane.xlu1 %3026 }
0x117b   :  { %9040 = vpow2.f32 %v3041_v18  ;;  %v3036_v45 = vsub.f32 %v3006_v52, %v3027_v22 }
0x117d   :  { %v3043_v36 = vmul.f32 1.442695, %v3036_v45 }
0x117e   :  { %v3030_v2 = vpop.xlane.xlu1 %3029 }
0x117f   :  { %9042 = vpow2.f32 %v3043_v36  ;;  %v3037_v33 = vsub.f32 %v3009_v54, %v3030_v2 }
0x1181   :  { %v3045_v40 = vmul.f32 1.442695, %v3037_v33 }
0x1183   :  { %9044 = vpow2.f32 %v3045_v40 }
0x1184   :  { %v10595_v47 = vpop.eup %9038 }
0x1185   :  { %v3049_v32 = vsel %vm308_vm6, %v10595_v47, 0.0 }
0x1186   :  { %3050 = vadd.xlane.f32.xlu1 %v3049_v32 }
0x1188   :  { %v10599_v63 = vpop.eup %9040 }
0x1189   :  { %v3052_v49 = vsel %vm308_vm6, %v10599_v63, 0.0 }
0x118a   :  { %3053 = vadd.xlane.f32.xlu1 %v3052_v49  ;;  %v3033_v9 = vpop.xlane.xlu1 %3032 }
0x118b   :  { %v3038_v50 = vsub.f32 %v3014_v13, %v3033_v9 }
0x118c   :  { %v10603_v61 = vpop.eup %9042 }
0x118d   :  { %v3047_v56 = vmul.f32 1.442695, %v3038_v50  ;;  %v3055_v46 = vsel %vm308_vm6, %v10603_v61, 0.0 }
0x118e   :  { %3056 = vadd.xlane.f32.xlu1 %v3055_v46 }
0x118f   :  { %9046 = vpow2.f32 %v3047_v56 }
0x1190   :  { %v10607_v3 = vpop.eup %9044 }
0x1191   :  { %v3058_v5 = vsel %vm308_vm6, %v10607_v3, 0.0 }
0x1192   :  { %3059 = vadd.xlane.f32.xlu1 %v3058_v5 }
0x119c   :  { %v10611_v21 = vpop.eup %9046 }
0x119d   :  { %v3061_v27 = vsel %vm308_vm6, %v10611_v21, 0.0 }
0x119e   :  { %3062 = vadd.xlane.f32.xlu1 %v3061_v27 }
0x11ac   :  { %v2906_v10 = vpop.f32.mrf.mxu1 }
0x11ad   :  { %v10616_v57 = vadd.f32 %v2906_v10, %v10521_v53 }
0x11ae   :  { %v8207_v4 = vpop.f32.mrf.mxu1 }
0x11b0   :  { %v2909_v16 = vpop.f32.mrf.mxu1 }
0x11b1   :  { %v10619_v17 = vadd.f32 %v2909_v16, %v10524_v39 }
0x11b2   :  { %v8208_v43 = vpop.f32.mrf.mxu1 }
0x11b4   :  { %v2914_v52 = vpop.f32.mrf.mxu1 }
0x11b5   :  { %v10622_v55 = vadd.f32 %v2914_v52, %v10527_v11 }
0x11b6   :  { %v8211_v60 = vpop.f32.mrf.mxu1 }
0x11b8   :  { %v2917_v41 = vpop.f32.mrf.mxu1 }
0x11b9   :  { %v10625_v58 = vadd.f32 %v2917_v41, %v10530_v59 }
0x11ba   :  { %v8212_v48 = vpop.f32.mrf.mxu1 }
0x11bc   :  { %v2922_v37 = vpop.f32.mrf.mxu1 }
0x11bd   :  { %v10628_v53 = vadd.f32 %v2922_v37, %v10533_v23 }
0x11be   :  { %v8215_v54 = vpop.f32.mrf.mxu1 }
0x11c0   :  { %v2925_v38 = vpop.f32.mrf.mxu1 }
0x11c2   :  { %v8216_v1 = vpop.f32.mrf.mxu1 }
0x11c4   :  { %v3140_v39 = vpop.f32.mrf.mxu1 }
0x11c6   :  { %v8245_v8 = vpop.f32.mrf.mxu1 }
0x11c8   :  { %v3143_v12 = vpop.f32.mrf.mxu1 }
0x11c9   :  { %v3165_v51 = vpack.c.bf16 %v3143_v12, %v3140_v39 }
0x11ca   :  { %v8246_v6 = vpop.f32.mrf.mxu1 }
0x11cc   :  { %v3148_v15 = vpop.f32.mrf.mxu1 }
0x11ce   :  { %v8249_v11 = vpop.f32.mrf.mxu1 }
0x11d0   :  { %v3151_v14 = vpop.f32.mrf.mxu1 }
0x11d1   :  { %v3166_v23 = vpack.c.bf16 %v3151_v14, %v3148_v15 }
0x11d2   :  { %v8250_v26 = vpop.f32.mrf.mxu1 }
0x11d4   :  { %v3156_v20 = vpop.f32.mrf.mxu1 }
0x11d5   :  { %v3167_v13 = vpack.c.bf16 %v3156_v20, %v3156_v20 }
0x11d6   :  { %v8253_v59 = vpop.f32.mrf.mxu1 }
0x11d7   :  { %v3178_v19 = vsel %vm467_vm5, %v3167_v13, 0  ;;  %v8786_v59 = vld [vmem:[%s11612_s1 + $0xa8] sm:$0xff]  }
0x11d8   :  { %v3159_v44 = vpop.f32.mrf.mxu1  ;;  %8256 = vmatpush3.bf16.msra.mxu0 %v3178_v19  ;;  %v8787_v19 = vld [vmem:[%s11612_s1 + $0xa0] sm:$0xff]  }
0x11d9   :  { %8257 = vmatprep.subr.bf16.mxu0 %v9240_v0  ;;  %v8788_v44 = vld [vmem:[%s11613_s2 + $0x280] sm:$0xff]  }
0x11da   :  { %v8254_v30 = vpop.f32.mrf.mxu1 }
0x11db   :  { %v8790_v30 = vld [vmem:[%s11613_s2 + $0x270] sm:$0xff]  }
0x11dc   :  { %8258 = vmatpush3.bf16.msra.mxu0 %v3166_v23  ;;  %v8789_v23 = vld [vmem:[%s11613_s2 + $0x278] sm:$0xff]  }
0x11dd   :  { %8259 = vmatprep.subr.bf16.mxu0 %v9240_v0 }
0x11e0   :  { %8260 = vmatpush3.bf16.msra.mxu0 %v3165_v51  ;;  %v8791_v51 = vld [vmem:[%s11613_s2 + $0x268] sm:$0xff]  }
0x11e1   :  { %8293 = vmatprep.subr.bf16.mxu0 %v9240_v0 }
0x120f   :  { %v3051_v31 = vpop.xlane.xlu1 %3050 }
0x1210   :  { %9048 = vrcp.f32 %v3051_v31  ;;  %v8792_v31 = vld [vmem:[%s11613_s2 + $0x260] sm:$0xff]  }
0x1213   :  { %v3054_v29 = vpop.xlane.xlu1 %3053 }
0x1214   :  { %9050 = vrcp.f32 %v3054_v29 }
0x1217   :  { %v3057_v62 = vpop.xlane.xlu1 %3056 }
0x1218   :  { %9052 = vrcp.f32 %v3057_v62 }
0x121b   :  { %v3060_v25 = vpop.xlane.xlu1 %3059 }
0x121c   :  { %9054 = vrcp.f32 %v3060_v25 }
0x121d   :  { %v9049_v24 = vpop.eup %9048 }
0x121e   :  { %v3069_v22 = vmul.f32 %v9049_v24, %v10595_v47 }
0x1221   :  { %v9051_v18 = vpop.eup %9050 }
0x1222   :  { %v3070_v45 = vmul.f32 %v9051_v18, %v10599_v63 }
0x1224   :  { %v3162_v36 = vpack.c.bf16 %v3070_v45, %v3069_v22 }
0x1225   :  { %v9053_v2 = vpop.eup %9052 }
0x1226   :  { %8262 = vmatmul.mubr.msk.bf16.vlgmr.msra.gmra.mxu0 %vm308_vm6, %v3162_v36  ;;  %v3071_v32 = vmul.f32 %v9053_v2, %v10603_v61 }
0x1227   :  { %v3063_v33 = vpop.xlane.xlu1 %3062  ;;  %8265 = vmatprep.mubr.msk.bf16.mxu0 %vm9241_vm1, %v9240_v0  ;;  %8294 = vmatpush3.bf16.msra.mxu0 %v8788_v44 }
0x1228   :  { %9056 = vrcp.f32 %v3063_v33  ;;  %8295 = vmatprep.subr.bf16.mxu0 %v9240_v0 }
0x1229   :  { %v9055_v40 = vpop.eup %9054 }
0x122a   :  { %v3072_v49 = vmul.f32 %v9055_v40, %v10607_v3 }
0x122b   :  { %8296 = vmatpush3.bf16.msra.mxu0 %v8789_v23 }
0x122c   :  { %v3163_v9 = vpack.c.bf16 %v3072_v49, %v3071_v32  ;;  %8297 = vmatprep.subr.bf16.mxu0 %v9240_v0 }
0x122e   :  { %8266 = vmatmul.mubr.msk.bf16.gmra.mxu0 %vm308_vm6, %v3163_v9 }
0x122f   :  { %8269 = vmatprep.mubr.msk.bf16.mxu0 %vm9241_vm1, %v9240_v0  ;;  %8298 = vmatpush3.bf16.msra.mxu0 %v8790_v30 }
0x1230   :  { %8299 = vmatprep.subr.bf16.mxu0 %v9240_v0 }
0x1233   :  { %8300 = vmatpush3.bf16.msra.mxu0 %v8791_v51 }
0x1234   :  { %8301 = vmatprep.subr.bf16.mxu0 %v9240_v0 }
0x1235   :  { %v9057_v47 = vpop.eup %9056 }
0x1236   :  { %v3073_v63 = vmul.f32 %v9057_v47, %v10611_v21 }
0x1237   :  { %8302 = vmatpush3.bf16.msra.mxu0 %v8792_v31 }
0x1238   :  { %v3164_v50 = vpack.c.bf16 %v3073_v63, %v3073_v63  ;;  %8303 = vmatprep.subr.bf16.mxu0 %v9240_v0 }
0x123a   :  { %8270 = vmatmul.mubr.msk.bf16.gmra.mxu0 %vm308_vm6, %v3164_v50 }
0x123b   :  { %8309 = vmatprep.mubr.msk.bf16.mxu0 %vm9241_vm1, %v9240_v0 }
0x12e6   :  { %v3214_v56 = vpop.f32.mrf.mxu0 }
0x12e7   :  { %v3236_v61 = vadd.f32 %v3214_v56, %v10616_v57 }
0x12e8   :  { %v8263_v46 = vpop.f32.mrf.mxu0 }
0x12e9   :  { %v10650_v3 = vadd.f32 %v3236_v61, %v10102_v7 }
0x12ea   :  { %v3217_v5 = vpop.f32.mrf.mxu0 }
0x12eb   :  { %v3237_v27 = vadd.f32 %v3217_v5, %v10619_v17  ;;  %v3248_v10 = vsel %vm154_vm3, %v10650_v3, 0.0  ;;  %v3268_v21 = vmul.f32 %v10650_v3, %v10650_v3 }
0x12ec   :  { %3249 = vadd.xlane.f32.xlu0 %v3248_v10  ;;  %v8264_v4 = vpop.f32.mrf.mxu0 }
0x12ed   :  { %v10658_v16 = vadd.f32 %v3237_v27, %v10104_v28  ;;  %v3273_v7 = vsel %vm154_vm3, %v3268_v21, 0.0 }
0x12ee   :  { %v3222_v43 = vpop.f32.mrf.mxu0 }
0x12ef   :  { %v3238_v57 = vadd.f32 %v3222_v43, %v10622_v55  ;;  %v3251_v52 = vsel %vm154_vm3, %v10658_v16, 0.0  ;;  %v3269_v17 = vmul.f32 %v10658_v16, %v10658_v16 }
0x12f0   :  { %3274 = vadd.xlane.f32.xlu0 %v3273_v7  ;;  %3252 = vadd.xlane.f32.xlu1 %v3251_v52  ;;  %v8267_v60 = vpop.f32.mrf.mxu0 }
0x12f1   :  { %v10667_v41 = vadd.f32 %v3238_v57, %v10123_v34  ;;  %v3276_v37 = vsel %vm154_vm3, %v3269_v17, 0.0 }
0x12f2   :  { %v3225_v48 = vpop.f32.mrf.mxu0 }
0x12f3   :  { %v3239_v28 = vadd.f32 %v3225_v48, %v10625_v58  ;;  %v3254_v55 = vsel %vm154_vm3, %v10667_v41, 0.0  ;;  %v3270_v54 = vmul.f32 %v10667_v41, %v10667_v41 }
0x12f4   :  { %3277 = vadd.xlane.f32.xlu1 %v3276_v37  ;;  %3255 = vadd.xlane.f32.xlu0 %v3254_v55  ;;  %v8268_v38 = vpop.f32.mrf.mxu0 }
0x12f5   :  { %v10676_v1 = vadd.f32 %v3239_v28, %v10125_v35  ;;  %v3279_v34 = vsel %vm154_vm3, %v3270_v54, 0.0 }
0x12f7   :  { %v3257_v39 = vsel %vm154_vm3, %v10676_v1, 0.0  ;;  %v3271_v58 = vmul.f32 %v10676_v1, %v10676_v1 }
0x12f8   :  { %3280 = vadd.xlane.f32.xlu0 %v3279_v34  ;;  %3258 = vadd.xlane.f32.xlu1 %v3257_v39  ;;  %v7144_v34 = vld [vmem:[%s11614_s3 + $0x70] ss:$0 sm:$0xff] }
0x12f9   :  { %v3282_v6 = vsel %vm154_vm3, %v3271_v58, 0.0 }
0x12fa   :  { %v3230_v8 = vpop.f32.mrf.mxu0 }
0x12fb   :  { %v3240_v12 = vadd.f32 %v3230_v8, %v10628_v53  ;;  %v8784_v53 = vld [vmem:[%s11612_s1 + $0xb8] sm:$0xff]  }
0x12fc   :  { %3283 = vadd.xlane.f32.xlu1 %v3282_v6  ;;  %v8271_v15 = vpop.f32.mrf.mxu0  ;;  %8274 = vmatpush3.bf16.msra.mxu1 %v8784_v53 }
0x12fd   :  { %v10686_v35 = vadd.f32 %v3240_v12, %v10142_v42  ;;  %8275 = vmatprep.subr.bf16.mxu1 %v9240_v0  ;;  %v8785_v42 = vld [vmem:[%s11612_s1 + $0xb0] sm:$0xff]  }
0x12fe   :  { %v3233_v11 = vpop.f32.mrf.mxu0 }
0x12ff   :  { %v3260_v14 = vsel %vm154_vm3, %v10686_v35, 0.0  ;;  %v3272_v26 = vmul.f32 %v10686_v35, %v10686_v35 }
0x1300   :  { %3261 = vadd.xlane.f32.xlu0 %v3260_v14  ;;  %v8272_v20 = vpop.f32.mrf.mxu0  ;;  %8276 = vmatpush3.bf16.msra.mxu1 %v8785_v42 }
0x1301   :  { %v3285_v13 = vsel %vm154_vm3, %v3272_v26, 0.0  ;;  %8277 = vmatprep.subr.bf16.mxu1 %v9240_v0 }
0x1302   :  { %3286 = vadd.xlane.f32.xlu1 %v3285_v13 }
0x1304   :  { %8278 = vmatpush3.bf16.msra.mxu1 %v8786_v59 }
0x1305   :  { %8279 = vmatprep.subr.bf16.mxu1 %v9240_v0 }
0x1308   :  { %8280 = vmatpush3.bf16.msra.mxu1 %v8787_v19 }
0x1375   :  { %v3250_v29 = vpop.xlane.xlu0 %3249 }
0x1376   :  { %v3263_v62 = vmul.f32 0.015625, %v3250_v29 }
0x1378   :  { %v3298_v18 = vmul.f32 %v3263_v62, %v3263_v62  ;;  %v3293_v48 = vsub.f32 %v10650_v3, %v3263_v62  ;;  %v7145_v3 = vld [vmem:[%s11614_s3 + $0x90] ss:$0 sm:$0xff] }
0x1379   :  { %v3275_v25 = vpop.xlane.xlu0 %3274  ;;  %v3253_v24 = vpop.xlane.xlu1 %3252 }
0x137a   :  { %v3288_v22 = vmul.f32 0.015625, %v3275_v25  ;;  %v3264_v45 = vmul.f32 0.015625, %v3253_v24  ;;  %v8794_v24 = vld [vmem:[%s11613_s2 + $0x250] sm:$0xff]  }
0x137c   :  { %v3303_v36 = vsub.f32 %v3288_v22, %v3298_v18  ;;  %v3299_v32 = vmul.f32 %v3264_v45, %v3264_v45  ;;  %v3294_v39 = vsub.f32 %v10658_v16, %v3264_v45  ;;  %v8795_v18 = vld [vmem:[%s11613_s2 + $0x248] sm:$0xff]   ;;  %v7146_v22 = vld [vmem:[%s11614_s3 + $0xb0] ss:$0 sm:$0xff] }
0x137d   :  { %v3278_v2 = vpop.xlane.xlu1 %3277  ;;  %v3256_v33 = vpop.xlane.xlu0 %3255 }
0x137e   :  { %v3308_v40 = vadd.f32 1e-05, %v3303_v36  ;;  %v3289_v49 = vmul.f32 0.015625, %v3278_v2  ;;  %v3265_v9 = vmul.f32 0.015625, %v3256_v33 }
0x1380   :  { %9058 = vrsqrt.f32 %v3308_v40  ;;  %v3304_v47 = vsub.f32 %v3289_v49, %v3299_v32  ;;  %v3300_v61 = vmul.f32 %v3265_v9, %v3265_v9  ;;  %v3295_v11 = vsub.f32 %v10667_v41, %v3265_v9 }
0x1381   :  { %v3281_v63 = vpop.xlane.xlu0 %3280  ;;  %v3259_v50 = vpop.xlane.xlu1 %3258 }
0x1382   :  { %v3309_v56 = vadd.f32 1e-05, %v3304_v47  ;;  %v3290_v46 = vmul.f32 0.015625, %v3281_v63  ;;  %v3266_v5 = vmul.f32 0.015625, %v3259_v50 }
0x1384   :  { %9060 = vrsqrt.f32 %v3309_v56  ;;  %v3305_v27 = vsub.f32 %v3290_v46, %v3300_v61  ;;  %v3301_v4 = vmul.f32 %v3266_v5, %v3266_v5  ;;  %v3296_v16 = vsub.f32 %v10676_v1, %v3266_v5 }
0x1385   :  { %v3284_v10 = vpop.xlane.xlu1 %3283 }
0x1386   :  { %v3310_v21 = vadd.f32 1e-05, %v3305_v27  ;;  %v3291_v43 = vmul.f32 0.015625, %v3284_v10 }
0x1388   :  { %9062 = vrsqrt.f32 %v3310_v21  ;;  %v3306_v57 = vsub.f32 %v3291_v43, %v3301_v4 }
0x1389   :  { %v3262_v7 = vpop.xlane.xlu0 %3261 }
0x138a   :  { %v3311_v52 = vadd.f32 1e-05, %v3306_v57  ;;  %v3267_v17 = vmul.f32 0.015625, %v3262_v7 }
0x138b   :  { %v3287_v60 = vpop.xlane.xlu1 %3286 }
0x138c   :  { %9064 = vrsqrt.f32 %v3311_v52  ;;  %v3302_v28 = vmul.f32 %v3267_v17, %v3267_v17  ;;  %v3292_v37 = vmul.f32 0.015625, %v3287_v60  ;;  %v3297_v44 = vsub.f32 %v10686_v35, %v3267_v17  ;;  %v8793_v35 = vld [vmem:[%s11613_s2 + $0x258] sm:$0xff]  }
0x138d   :  { %v9059_v55 = vpop.eup %9058  ;;  %8304 = vmatpush3.bf16.msra.mxu0 %v8793_v35 }
0x138e   :  { %v3318_v54 = vmul.f32 %v9059_v55, %v3293_v48  ;;  %v3307_v38 = vsub.f32 %v3292_v37, %v3302_v28  ;;  %8305 = vmatprep.subr.bf16.mxu0 %v9240_v0 }
0x1390   :  { %v3312_v58 = vadd.f32 1e-05, %v3307_v38  ;;  %v3327_v12 = vmul.f32 %v7144_v34, %v3318_v54  ;;  %v7154_v54 = vld [vmem:[%s11614_s3 + $0xd0] ss:$0 sm:$0xff] }
0x1391   :  { %v9061_v8 = vpop.eup %9060  ;;  %8306 = vmatpush3.bf16.msra.mxu0 %v8794_v24 }
0x1392   :  { %v3319_v6 = vmul.f32 %v9061_v8, %v3294_v39  ;;  %9066 = vrsqrt.f32 %v3312_v58  ;;  %v10737_v26 = vadd.f32 %v7145_v3, %v3327_v12  ;;  %8307 = vmatprep.subr.bf16.mxu0 %v9240_v0 }
0x1394   :  { %v3328_v15 = vmul.f32 %v7144_v34, %v3319_v6 }
0x1395   :  { %v9063_v14 = vpop.eup %9062  ;;  %8308 = vmatpush3.bf16.msra.mxu0 %v8795_v18 }
0x1396   :  { %v10739_v20 = vadd.f32 %v7145_v3, %v3328_v15  ;;  %v3320_v13 = vmul.f32 %v9063_v14, %v3295_v11 }
0x1398   :  { %v3350_v53 = vpack.c.bf16 %v10739_v20, %v10737_v26  ;;  %v3329_v19 = vmul.f32 %v7144_v34, %v3320_v13 }
0x1399   :  { %v9065_v42 = vpop.eup %9064 }
0x139a   :  { %8282 = vmatmul.mubr.msk.bf16.vlgmr.msra.gmra.mxu1 %vm154_vm3, %v3350_v53  ;;  %v3321_v59 = vmul.f32 %v9065_v42, %v3296_v16  ;;  %v3338_v23 = vadd.f32 %v7145_v3, %v3329_v19 }
0x139b   :  { %8285 = vmatprep.mubr.msk.bf16.mxu1 %vm9241_vm1, %v9240_v0 }
0x139c   :  { %v3330_v41 = vmul.f32 %v7144_v34, %v3321_v59 }
0x139e   :  { %v10748_v30 = vadd.f32 %v7145_v3, %v3330_v41 }
0x139f   :  { %v9067_v51 = vpop.eup %9066 }
0x13a0   :  { %v3351_v1 = vpack.c.bf16 %v10748_v30, %v3338_v23  ;;  %v3322_v31 = vmul.f32 %v9067_v51, %v3297_v44 }
0x13a2   :  { %8286 = vmatmul.mubr.msk.bf16.gmra.mxu1 %vm154_vm3, %v3351_v1  ;;  %v3331_v29 = vmul.f32 %v7144_v34, %v3322_v31 }
0x13a3   :  { %8289 = vmatprep.mubr.msk.bf16.mxu1 %vm9241_vm1, %v9240_v0 }
0x13a4   :  { %v10754_v62 = vadd.f32 %v7145_v3, %v3331_v29 }
0x13a6   :  { %v3352_v25 = vpack.c.bf16 %v10754_v62, %v10754_v62 }
0x13aa   :  { %8290 = vmatmul.mubr.msk.bf16.gmra.mxu1 %vm154_vm3, %v3352_v25 }
0x145a   :  { %v3424_v45 = vpop.f32.mrf.mxu1 }
0x145b   :  { %v3425_v2 = vadd.f32 %v7146_v22, %v3424_v45  ;;  %v8796_v45 = vld [vmem:[%s11613_s2 + $0x328] sm:$0xff]  }
0x145c   :  { %v8283_v36 = vpop.f32.mrf.mxu1 }
0x145d   :  { %v3446_v49 = vmax.f32 %v3425_v2, 0.0 }
0x145e   :  { %v3427_v33 = vpop.f32.mrf.mxu1 }
0x145f   :  { %v3428_v40 = vadd.f32 %v7146_v22, %v3427_v33 }
0x1460   :  { %v8284_v32 = vpop.f32.mrf.mxu1 }
0x1461   :  { %v3447_v9 = vmax.f32 %v3428_v40, 0.0 }
0x1462   :  { %v3432_v47 = vpop.f32.mrf.mxu1 }
0x1463   :  { %v3468_v63 = vpack.c.bf16 %v3447_v9, %v3446_v49  ;;  %v3433_v56 = vadd.f32 %v7146_v22, %v3432_v47 }
0x1464   :  { %v8287_v50 = vpop.f32.mrf.mxu1 }
0x1465   :  { %8310 = vmatmul.mubr.bf16.vlgmr.msra.gmra.mxu0 %v3468_v63  ;;  %v3448_v27 = vmax.f32 %v3433_v56, 0.0 }
0x1466   :  { %v3435_v61 = vpop.f32.mrf.mxu1  ;;  %8313 = vmatprep.mubr.msk.bf16.mxu0 %vm9241_vm1, %v9240_v0 }
0x1467   :  { %v3436_v46 = vadd.f32 %v7146_v22, %v3435_v61 }
0x1468   :  { %v8288_v5 = vpop.f32.mrf.mxu1 }
0x1469   :  { %v3449_v10 = vmax.f32 %v3436_v46, 0.0 }
0x146a   :  { %v3440_v21 = vpop.f32.mrf.mxu1 }
0x146b   :  { %v3469_v4 = vpack.c.bf16 %v3449_v10, %v3448_v27  ;;  %v3441_v43 = vadd.f32 %v7146_v22, %v3440_v21 }
0x146c   :  { %v8291_v57 = vpop.f32.mrf.mxu1 }
0x146d   :  { %8314 = vmatmul.mubr.bf16.gmra.mxu0 %v3469_v4  ;;  %v3450_v52 = vmax.f32 %v3441_v43, 0.0 }
0x146e   :  { %v3443_v7 = vpop.f32.mrf.mxu1  ;;  %8317 = vmatprep.mubr.msk.bf16.mxu0 %vm9241_vm1, %v9240_v0 }
0x146f   :  { %v3470_v60 = vpack.c.bf16 %v3450_v52, %v3450_v52 }
0x1470   :  { %v8292_v17 = vpop.f32.mrf.mxu1 }
0x1475   :  { %8318 = vmatmul.mubr.bf16.gmra.mxu0 %v3470_v60 }
0x1476   :  { %8327 = vmatprep.mubr.msk.bf16.mxu0 %vm308_vm6, %v8796_v45 }
0x1525   :  { %v3557_v48 = vpop.f32.mrf.mxu0 }
0x1526   :  { %v3558_v59 = vadd.f32 %v7154_v54, %v3557_v48 }
0x1527   :  { %v8311_v28 = vpop.f32.mrf.mxu0 }
0x1528   :  { %v10802_v31 = vadd.f32 %v3558_v59, %v10737_v26  ;;  %v7163_v59 = vld [vmem:[%s11614_s3 + $0xf0] ss:$0 sm:$0xff] }
0x1529   :  { %v3560_v37 = vpop.f32.mrf.mxu0 }
0x152a   :  { %v3561_v19 = vadd.f32 %v7154_v54, %v3560_v37  ;;  %v3586_v24 = vsel %vm154_vm3, %v10802_v31, 0.0  ;;  %v3606_v26 = vmul.f32 %v10802_v31, %v10802_v31 }
0x152b   :  { %v8312_v55 = vpop.f32.mrf.mxu0 }
0x152c   :  { %v10805_v29 = vadd.f32 %v3561_v19, %v10739_v20  ;;  %v3611_v22 = vsel %vm154_vm3, %v3606_v26, 0.0 }
0x152d   :  { %v3565_v38 = vpop.f32.mrf.mxu0 }
0x152e   :  { %v3566_v34 = vadd.f32 %v7154_v54, %v3565_v38  ;;  %v3589_v35 = vsel %vm154_vm3, %v10805_v29, 0.0  ;;  %v3607_v18 = vmul.f32 %v10805_v29, %v10805_v29 }
0x152f   :  { %v8315_v39 = vpop.f32.mrf.mxu0 }
0x1530   :  { %v10780_v58 = vadd.f32 %v3566_v34, %v3338_v23  ;;  %v3614_v20 = vsel %vm154_vm3, %v3607_v18, 0.0 }
0x1531   :  { %v3568_v8 = vpop.f32.mrf.mxu0 }
0x1532   :  { %v3569_v12 = vadd.f32 %v7154_v54, %v3568_v8  ;;  %v3592_v6 = vsel %vm154_vm3, %v10780_v58, 0.0  ;;  %v3608_v51 = vmul.f32 %v10780_v58, %v10780_v58 }
0x1533   :  { %3593 = vadd.xlane.f32.xlu0 %v3592_v6  ;;  %v8316_v3 = vpop.f32.mrf.mxu0 }
0x1534   :  { %v10785_v15 = vadd.f32 %v3569_v12, %v10748_v30  ;;  %v3617_v25 = vsel %vm154_vm3, %v3608_v51, 0.0  ;;  %v7164_v51 = vld [vmem:[%s11614_s3 + $0x110] ss:$0 sm:$0xff] }
0x1535   :  { %v3573_v11 = vpop.f32.mrf.mxu0 }
0x1536   :  { %v3574_v14 = vadd.f32 %v7154_v54, %v3573_v11  ;;  %v3595_v13 = vsel %vm154_vm3, %v10785_v15, 0.0  ;;  %v3609_v16 = vmul.f32 %v10785_v15, %v10785_v15 }
0x1537   :  { %3596 = vadd.xlane.f32.xlu1 %v3595_v13  ;;  %v8319_v53 = vpop.f32.mrf.mxu0 }
0x1538   :  { %v10792_v42 = vadd.f32 %v3574_v14, %v10754_v62  ;;  %v3620_v44 = vsel %vm154_vm3, %v3609_v16, 0.0 }
0x1539   :  { %v3576_v41 = vpop.f32.mrf.mxu0 }
0x153a   :  { %v3598_v23 = vsel %vm154_vm3, %v10792_v42, 0.0  ;;  %v3610_v30 = vmul.f32 %v10792_v42, %v10792_v42 }
0x153b   :  { %3621 = vadd.xlane.f32.xlu1 %v3620_v44  ;;  %3599 = vadd.xlane.f32.xlu0 %v3598_v23  ;;  %v8320_v1 = vpop.f32.mrf.mxu0 }
0x153c   :  { %v3623_v62 = vsel %vm154_vm3, %v3610_v30, 0.0 }
0x153f   :  { %3624 = vadd.xlane.f32.xlu1 %v3623_v62  ;;  %3618 = vadd.xlane.f32.xlu0 %v3617_v25 }
0x1543   :  { %3590 = vadd.xlane.f32.xlu1 %v3589_v35  ;;  %3587 = vadd.xlane.f32.xlu0 %v3586_v24 }
0x1547   :  { %3615 = vadd.xlane.f32.xlu1 %v3614_v20  ;;  %3612 = vadd.xlane.f32.xlu0 %v3611_v22 }
0x15bc   :  { %v3594_v36 = vpop.xlane.xlu0 %3593 }
0x15bd   :  { %v3603_v40 = vmul.f32 0.015625, %v3594_v36 }
0x15bf   :  { %v3638_v56 = vmul.f32 %v3603_v40, %v3603_v40  ;;  %v3633_v53 = vsub.f32 %v10780_v58, %v3603_v40 }
0x15c0   :  { %v3597_v2 = vpop.xlane.xlu1 %3596 }
0x15c1   :  { %v3604_v33 = vmul.f32 0.015625, %v3597_v2 }
0x15c3   :  { %v3639_v9 = vmul.f32 %v3604_v33, %v3604_v33  ;;  %v3634_v11 = vsub.f32 %v10785_v15, %v3604_v33 }
0x15c4   :  { %v3622_v32 = vpop.xlane.xlu1 %3621  ;;  %v3600_v49 = vpop.xlane.xlu0 %3599 }
0x15c5   :  { %v3629_v47 = vmul.f32 0.015625, %v3622_v32  ;;  %v3605_v63 = vmul.f32 0.015625, %v3600_v49  ;;  %v8797_v32 = vld [vmem:[%s11613_s2 + $0x330] ss:$0 sps:$4 sm:$0x33]   ;;  %v8799_v49 = vld [vmem:[%s11613_s2 + $0x318] sm:$0xff]  }
0x15c7   :  { %v3644_v50 = vsub.f32 %v3629_v47, %v3639_v9  ;;  %v3640_v27 = vmul.f32 %v3605_v63, %v3605_v63  ;;  %v3635_v14 = vsub.f32 %v10792_v42, %v3605_v63  ;;  %v8800_v9 = vld [vmem:[%s11613_s2 + $0x310] sm:$0xff]   ;;  %v8801_v47 = vld [vmem:[%s11613_s2 + $0x308] sm:$0xff]  }
0x15c8   :  { %v3625_v61 = vpop.xlane.xlu1 %3624  ;;  %v3619_v46 = vpop.xlane.xlu0 %3618 }
0x15c9   :  { %v3649_v5 = vadd.f32 1e-05, %v3644_v50  ;;  %v3630_v10 = vmul.f32 0.015625, %v3625_v61  ;;  %v3628_v21 = vmul.f32 0.015625, %v3619_v46 }
0x15cb   :  { %9068 = vrsqrt.f32 %v3649_v5  ;;  %v3645_v4 = vsub.f32 %v3630_v10, %v3640_v27  ;;  %v3643_v43 = vsub.f32 %v3628_v21, %v3638_v56  ;;  %v8802_v27 = vld [vmem:[%s11612_s1 + $0x58] sm:$0xff]   ;;  %v8803_v10 = vld [vmem:[%s11612_s1 + $0x50] sm:$0xff]   ;;  %v8804_v21 = vld [vmem:[%s11612_s1 + $0x48] sm:$0xff]  }
0x15cc   :  { %v3591_v57 = vpop.xlane.xlu1 %3590  ;;  %v3588_v7 = vpop.xlane.xlu0 %3587  ;;  %8343 = vmatprep.subr.bf16.mxu1 %v8802_v27 }
0x15cd   :  { %v3650_v52 = vadd.f32 1e-05, %v3645_v4  ;;  %v3648_v17 = vadd.f32 1e-05, %v3643_v43  ;;  %v3602_v60 = vmul.f32 0.015625, %v3591_v57  ;;  %v3601_v48 = vmul.f32 0.015625, %v3588_v7  ;;  %8344 = vmatpush3.bf16.msra.mxu1 %v8802_v27 }
0x15ce   :  { %8345 = vmatprep.subr.bf16.mxu1 %v8803_v10  ;;  %v8805_v4 = vld [vmem:[%s11612_s1 + $0x40] sm:$0xff]   ;;  %v7169_v57 = vld [vmem:[%s11614_s3 + $0x128] ss:$0 sm:$0xff] }
0x15cf   :  { %9070 = vrsqrt.f32 %v3650_v52  ;;  %v3637_v55 = vmul.f32 %v3602_v60, %v3602_v60  ;;  %v3636_v54 = vmul.f32 %v3601_v48, %v3601_v48  ;;  %v3632_v62 = vsub.f32 %v10805_v29, %v3602_v60  ;;  %v8806_v43 = vld [vmem:[%s11613_s2 + $0x120] sm:$0xff]  }
0x15d0   :  { %9072 = vrsqrt.f32 %v3648_v17  ;;  %v3616_v28 = vpop.xlane.xlu1 %3615  ;;  %v3613_v37 = vpop.xlane.xlu0 %3612  ;;  %v3631_v24 = vsub.f32 %v10802_v31, %v3601_v48  ;;  %v8798_v31 = vld [vmem:[%s11613_s2 + $0x320] sm:$0xff]  }
0x15d1   :  { %v3627_v38 = vmul.f32 0.015625, %v3616_v28  ;;  %v3626_v34 = vmul.f32 0.015625, %v3613_v37  ;;  %8346 = vmatpush3.bf16.msra.mxu1 %v8803_v10 }
0x15d2   :  { %8347 = vmatprep.subr.bf16.mxu1 %v8804_v21 }
0x15d3   :  { %v3642_v39 = vsub.f32 %v3627_v38, %v3637_v55  ;;  %v3641_v8 = vsub.f32 %v3626_v34, %v3636_v54 }
0x15d5   :  { %v3647_v12 = vadd.f32 1e-05, %v3642_v39  ;;  %v3646_v6 = vadd.f32 1e-05, %v3641_v8  ;;  %8348 = vmatpush3.bf16.msra.mxu1 %v8804_v21  ;;  %v10947_v21 = vld [vmem:[%s11614_s3 + $0x170] sm:$0xff] }
0x15d6   :  { %8349 = vmatprep.subr.bf16.mxu1 %v8805_v4 }
0x15d7   :  { %9074 = vrsqrt.f32 %v3647_v12 }
0x15d8   :  { %v9069_v3 = vpop.eup %9068  ;;  %9076 = vrsqrt.f32 %v3646_v6 }
0x15d9   :  { %v3659_v13 = vmul.f32 %v9069_v3, %v3634_v11  ;;  %8350 = vmatpush3.bf16.msra.mxu1 %v8805_v4 }
0x15da   :  { %8363 = vmatprep.subr.bf16.mxu1 %v8806_v43 }
0x15db   :  { %v3668_v30 = vmul.f32 %v7163_v59, %v3659_v13 }
0x15dc   :  { %v9071_v16 = vpop.eup %9070 }
0x15dd   :  { %v9073_v19 = vpop.eup %9072  ;;  %v3660_v41 = vmul.f32 %v9071_v16, %v3635_v14  ;;  %v3677_v58 = vadd.f32 %v7164_v51, %v3668_v30  ;;  %v8809_v30 = vld [vmem:[%s11613_s2 + $0x108] sm:$0xff]  }
0x15de   :  { %v3658_v44 = vmul.f32 %v9073_v19, %v3633_v53 }
0x15df   :  { %v3669_v23 = vmul.f32 %v7163_v59, %v3660_v41 }
0x15e0   :  { %v3667_v15 = vmul.f32 %v7163_v59, %v3658_v44  ;;  %v8807_v44 = vld [vmem:[%s11613_s2 + $0x118] sm:$0xff]  }
0x15e1   :  { %v3678_v1 = vadd.f32 %v7164_v51, %v3669_v23  ;;  %v8808_v23 = vld [vmem:[%s11613_s2 + $0x110] sm:$0xff]  }
0x15e2   :  { %v3676_v42 = vadd.f32 %v7164_v51, %v3667_v15 }
0x15e3   :  { %v3684_v25 = vpack.c.bf16 %v3678_v1, %v3678_v1 }
0x15e4   :  { %v9075_v35 = vpop.eup %9074  ;;  %v3683_v20 = vpack.c.bf16 %v3677_v58, %v3676_v42 }
0x15e5   :  { %v9077_v18 = vpop.eup %9076  ;;  %8696 = vmatprep.subr.msk.bf16.mxu0 %vm467_vm5, %v3684_v25  ;;  %v3700_v26 = vsel %vm467_vm5, %v3684_v25, 0  ;;  %v3657_v22 = vmul.f32 %v9075_v35, %v3632_v62 }
0x15e6   :  { %8322 = vmatpush3.bf16.msra.mxu0 %v3700_v26  ;;  %v3656_v45 = vmul.f32 %v9077_v18, %v3631_v24 }
0x15e7   :  { %8323 = vmatprep.subr.bf16.mxu0 %v3683_v20  ;;  %v3666_v36 = vmul.f32 %v7163_v59, %v3657_v22 }
0x15e8   :  { %v3665_v2 = vmul.f32 %v7163_v59, %v3656_v45 }
0x15e9   :  { %v3675_v33 = vadd.f32 %v7164_v51, %v3666_v36 }
0x15ea   :  { %8324 = vmatpush3.bf16.msra.mxu0 %v3683_v20  ;;  %v3674_v29 = vadd.f32 %v7164_v51, %v3665_v2  ;;  %v7179_v51 = vld [vmem:[%s11614_s3 + $0x38] ss:$0 sm:$0xff] }
0x15ec   :  { %v3682_v40 = vpack.c.bf16 %v3675_v33, %v3674_v29 }
0x15ee   :  { %8325 = vmatprep.subr.bf16.mxu0 %v3682_v40 }
0x15ef   :  { %8326 = vmatpush3.bf16.msra.mxu0 %v3682_v40 }
0x15f0   :  { %8331 = vmatprep.subr.bf16.mxu0 %v8798_v31 }
0x15f2   :  { %8328 = vmatmul.mubr.msk.bf16.vlgmr.msra.gmra.mxu0 %vm308_vm6, %v8797_v32 }
0x15f3   :  { %8332 = vmatpush3.bf16.msra.mxu0 %v8798_v31 }
0x15f4   :  { %8333 = vmatprep.subr.bf16.mxu0 %v8799_v49 }
0x15f7   :  { %8334 = vmatpush3.bf16.msra.mxu0 %v8799_v49 }
0x15f8   :  { %8335 = vmatprep.subr.bf16.mxu0 %v8800_v9 }
0x15fb   :  { %8336 = vmatpush3.bf16.msra.mxu0 %v8800_v9 }
0x15fc   :  { %8337 = vmatprep.subr.bf16.mxu0 %v8801_v47 }
0x15ff   :  { %8338 = vmatpush3.bf16.msra.mxu0 %v8801_v47 }
0x16b2   :  { %v8329_v63 = vpop.f32.mrf.mxu0 }
0x16b3   :  { %v3760_v5 = vpack.c.bf16 %v8329_v63, %v8329_v63 }
0x16b4   :  { %v3736_v50 = vpop.f32.mrf.mxu0 }
0x16b6   :  { %v8330_v56 = vpop.f32.mrf.mxu0 }
0x16b8   :  { %v3739_v61 = vpop.f32.mrf.mxu0 }
0x16b9   :  { %v3759_v46 = vpack.c.bf16 %v3739_v61, %v3736_v50 }
0x16bb   :  { %8339 = vmatprep.mubr.msk.bf16.mxu0 %vm154_vm3, %v3759_v46  ;;  %v10941_v46 = vld [vmem:[%s11614_s3 + $0x168] sm:$0xff] }
0x16bc   :  { %8340 = vmatmul.mubr.msk.bf16.vlgmr.msra.gmra.mxu0 %vm154_vm3, %v3760_v5 }
0x177c   :  { %v8341_v7 = vpop.f32.mrf.mxu0 }
0x177d   :  { %v3838_v52 = vadd.f32 %v8341_v7, %v7169_v57 }
0x177e   :  { %v3829_v17 = vpop.f32.mrf.mxu0 }
0x177f   :  { %v7178_v60 = vmul.f32 -1.442695, %v3838_v52  ;;  %v3830_v48 = vadd.f32 %v7169_v57, %v3829_v17 }
0x1780   :  { %v8342_v28 = vpop.f32.mrf.mxu0 }
0x1781   :  { %9078 = vpow2.f32 %v7178_v60  ;;  %v7176_v37 = vmul.f32 -1.442695, %v3830_v48 }
0x1782   :  { %v3832_v55 = vpop.f32.mrf.mxu0 }
0x1783   :  { %9080 = vpow2.f32 %v7176_v37  ;;  %v3833_v54 = vadd.f32 %v7169_v57, %v3832_v55 }
0x1785   :  { %v7177_v38 = vmul.f32 -1.442695, %v3833_v54 }
0x1787   :  { %9082 = vpow2.f32 %v7177_v38 }
0x178e   :  { %v9079_v34 = vpop.eup %9078 }
0x178f   :  { %v3854_v8 = vadd.f32 1.0, %v9079_v34 }
0x1790   :  { %v9081_v39 = vpop.eup %9080 }
0x1791   :  { %v3852_v12 = vadd.f32 1.0, %v9081_v39  ;;  %9084 = vrcp.f32 %v3854_v8 }
0x1793   :  { %9086 = vrcp.f32 %v3852_v12 }
0x1794   :  { %v9083_v6 = vpop.eup %9082 }
0x1795   :  { %v3853_v3 = vadd.f32 1.0, %v9083_v6 }
0x1797   :  { %9088 = vrcp.f32 %v3853_v3 }
0x179e   :  { %v9085_v11 = vpop.eup %9084 }
0x179f   :  { %v10872_v16 = vmul.f32 %v9085_v11, %v8329_v63 }
0x17a0   :  { %v9087_v14 = vpop.eup %9086 }
0x17a1   :  { %v10874_v53 = vmul.f32 %v9087_v14, %v3736_v50  ;;  %v10884_v41 = vpack.c.bf16 %v10872_v16, %v10872_v16 }
0x17a4   :  { %v9089_v13 = vpop.eup %9088 }
0x17a5   :  { %v10876_v59 = vmul.f32 %v9089_v13, %v3739_v61 }
0x17a7   :  { %v10880_v19 = vpack.c.bf16 %v10876_v59, %v10874_v53 }
0x17a9   :  { %8351 = vmatprep.mubr.msk.bf16.mxu1 %vm154_vm3, %v10880_v19 }
0x17aa   :  { %8352 = vmatmul.mubr.msk.bf16.vlgmr.msra.gmra.mxu1 %vm154_vm3, %v10884_v41 }
0x17ab   :  { %8364 = vmatpush3.bf16.msra.mxu1 %v8806_v43  ;;  %8371 = vmatprep.mubr.msk.bf16.mxu1 %vm154_vm3, %v10880_v19  ;;  %v10953_v43 = vld [vmem:[%s11614_s3 + $0x178] sm:$0xf] }
0x17ac   :  { %8365 = vmatprep.subr.bf16.mxu1 %v8807_v44 }
0x17af   :  { %8366 = vmatpush3.bf16.msra.mxu1 %v8807_v44 }
0x17b0   :  { %8367 = vmatprep.subr.bf16.mxu1 %v8808_v23 }
0x17b3   :  { %8368 = vmatpush3.bf16.msra.mxu1 %v8808_v23 }
0x17b4   :  { %8369 = vmatprep.subr.bf16.mxu1 %v8809_v30 }
0x17b7   :  { %8370 = vmatpush3.bf16.msra.mxu1 %v8809_v30 }
0x17ba   :  { %8372 = vmatmul.mubr.msk.bf16.vlgmr.msra.gmra.mxu1 %vm154_vm3, %v10884_v41 }
0x186a   :  { %v8353_v15 = vpop.f32.mrf.mxu1 }
0x186b   :  { %v3955_v1 = vadd.f32 %v8353_v15, %v7179_v51 }
0x186c   :  { %v3946_v42 = vpop.f32.mrf.mxu1 }
0x186d   :  { %v10906_v62 = vpack.c.bf16 %v3955_v1, %v3955_v1  ;;  %v3947_v35 = vadd.f32 %v7179_v51, %v3946_v42 }
0x186e   :  { %v8354_v25 = vpop.f32.mrf.mxu1 }
0x186f   :  { %3967 = vrot.lane.b32.xlu0 %v10906_v62, %s9242_s28 }
0x1870   :  { %v3949_v58 = vpop.f32.mrf.mxu1 }
0x1871   :  { %v3950_v24 = vadd.f32 %v7179_v51, %v3949_v58  ;;  %v8810_v51 = vld [vmem:[%s11613_s2 + $0x140] sm:$0xff]  }
0x1873   :  { %v10910_v18 = vpack.c.bf16 %v3950_v24, %v3947_v35 }
0x1875   :  { %4217 = vrot.lane.b32.xlu0 %v10910_v18, %s9243_s29  ;;  %3965 = vrot.lane.b32.xlu1 %v10910_v18, %s9242_s28 }
0x1876   :  { %8359 = vmatprep.mubr.msk.bf16.mxu0 %vm233_vm4, %v10910_v18 }
0x1879   :  { %4215 = vrot.lane.b32.xlu0 %v10906_v62, %s9244_s30  ;;  %4219 = vrot.lane.b32.xlu1 %v10906_v62, %s9243_s29 }
0x187a   :  { %v8373_v26 = vpop.f32.mrf.mxu1 }
0x187b   :  { %v4147_v33 = vpack.c.bf16 %v8373_v26, %v8373_v26 }
0x187c   :  { %v4130_v20 = vpop.f32.mrf.mxu1 }
0x187d   :  { %4213 = vrot.lane.b32.xlu1 %v10910_v18, %s9244_s30  ;;  %v4156_v47 = vsel %vm4154_vm7, %v4147_v33, 0 }
0x187e   :  { %v8374_v22 = vpop.f32.mrf.mxu1 }
0x1880   :  { %v4133_v49 = vpop.f32.mrf.mxu1 }
0x1881   :  { %v4146_v63 = vpack.c.bf16 %v4133_v49, %v4130_v20  ;;  %v8811_v49 = vld [vmem:[%s11613_s2 + $0x138] sm:$0xff]  }
0x18e1   :  { %v3968_v45 = vpop.permute.xlu0 %3967 }
0x18e2   :  { %8697 = vmatprep.subr.msk.bf16.mxu0 %vm233_vm4, %v3968_v45  ;;  %v3979_v36 = vsel %vm233_vm4, %v3968_v45, 0 }
0x18e3   :  { %8356 = vmatpush3.bf16.xpose.msra.mxu0 %v3979_v36 }
0x18e7   :  { %v3966_v2 = vpop.permute.xlu1 %3965  ;;  %v4218_v32 = vpop.permute.xlu0 %4217 }
0x18e8   :  { %8698 = vmatprep.subr.msk.bf16.mxu0 %vm233_vm4, %v3966_v2  ;;  %v3976_v29 = vsel %vm233_vm4, %v3966_v2, 0  ;;  %v4228_v50 = vsel %vm233_vm4, %v4218_v32, 0 }
0x18eb   :  { %8358 = vmatpush3.bf16.xpose.msra.mxu0 %v3976_v29  ;;  %v4220_v40 = vpop.permute.xlu1 %4219  ;;  %v4216_v56 = vpop.permute.xlu0 %4215 }
0x18ec   :  { %v4231_v31 = vsel %vm233_vm4, %v4220_v40, 0  ;;  %8699 = vmatprep.subr.msk.bf16.mxu0 %vm4154_vm7, %v4147_v33  ;;  %8700 = vmatprep.subr.msk.bf16.mxu1 %vm233_vm4, %v4220_v40 }
0x18ed   :  { %8384 = vmatpush3.bf16.xpose.msra.mxu1 %v4231_v31 }
0x18ee   :  { %8701 = vmatprep.subr.msk.bf16.mxu1 %vm233_vm4, %v4218_v32 }
0x18ef   :  { %v4214_v9 = vpop.permute.xlu1 %4213 }
0x18f0   :  { %8387 = vmatprep.mubr.msk.bf16.mxu1 %vm233_vm4, %v4214_v9  ;;  %v8812_v9 = vld [vmem:[%s11613_s2 + $0x130] sm:$0xff]  }
0x18f2   :  { %8360 = vmatmul.mubr.msk.bf16.vlgmr.msra.gmra.mxu0 %vm233_vm4, %v10906_v62 }
0x18f3   :  { %8376 = vmatpush3.bf16.msra.mxu0 %v4156_v47  ;;  %v8813_v47 = vld [vmem:[%s11613_s2 + $0x128] sm:$0xff]  }
0x18f4   :  { %8377 = vmatprep.subr.bf16.mxu0 %v4146_v63 }
0x18f5   :  { %8386 = vmatpush3.bf16.xpose.msra.mxu1 %v4228_v50 }
0x18f7   :  { %8378 = vmatpush3.bf16.msra.mxu0 %v4146_v63 }
0x18f8   :  { %8391 = vmatprep.subr.bf16.mxu0 %v8810_v51 }
0x18fc   :  { %8388 = vmatmul.mubr.msk.bf16.vlgmr.msra.gmra.mxu1 %vm233_vm4, %v4216_v56 }
0x19b2   :  { %v8361_v61 = vpop.f32.mrf.mxu0 }
0x19b3   :  { %v4024_v52 = vadd.f32 %v8361_v61, %v10953_v43 }
0x19b4   :  { %v4015_v5 = vpop.f32.mrf.mxu0 }
0x19b5   :  { %v4016_v27 = vadd.f32 %v4015_v5, %v10941_v46  ;;  %v4037_v28 = vsel %vm4036_vm9, %v4024_v52, -inf }
0x19b6   :  { %v8362_v10 = vpop.f32.mrf.mxu0 }
0x19b7   :  { %v4030_v4 = vsel %vm4029_vm8, %v4016_v27, -inf }
0x19b8   :  { %v4018_v57 = vpop.f32.mrf.mxu0  ;;  %4031 = vmax.xlane.f32.xlu1 %v4030_v4 }
0x19b9   :  { %v4019_v7 = vadd.f32 %v4018_v57, %v10947_v21 }
0x19bb   :  { %v4033_v17 = vsel %vm4029_vm8, %v4019_v7, -inf }
0x19bc   :  { %v8389_v60 = vpop.f32.mrf.mxu1  ;;  %4034 = vmax.xlane.f32.xlu0 %v4033_v17 }
0x19bd   :  { %v4276_v42 = vadd.f32 %v8389_v60, %v10953_v43 }
0x19be   :  { %v4267_v48 = vpop.f32.mrf.mxu1 }
0x19bf   :  { %v4268_v25 = vadd.f32 %v4267_v48, %v10941_v46  ;;  %v4287_v35 = vsel %vm4036_vm9, %v4276_v42, -inf }
0x19c0   :  { %v8390_v37 = vpop.f32.mrf.mxu1  ;;  %4038 = vmax.xlane.f32.xlu0 %v4037_v28 }
0x19c1   :  { %v4281_v24 = vsel %vm4029_vm8, %v4268_v25, -inf }
0x19c2   :  { %v4270_v15 = vpop.f32.mrf.mxu1 }
0x19c3   :  { %v4271_v1 = vadd.f32 %v4270_v15, %v10947_v21 }
0x19c5   :  { %v4284_v58 = vsel %vm4029_vm8, %v4271_v1, -inf }
0x1a41   :  { %v4032_v55 = vpop.xlane.xlu1 %4031 }
0x1a42   :  { %v4040_v54 = vsub.f32 %v4016_v27, %v4032_v55 }
0x1a44   :  { %v4043_v38 = vmul.f32 1.442695, %v4040_v54 }
0x1a45   :  { %v4035_v34 = vpop.xlane.xlu0 %4034 }
0x1a46   :  { %9090 = vpow2.f32 %v4043_v38  ;;  %v4041_v39 = vsub.f32 %v4019_v7, %v4035_v34 }
0x1a48   :  { %v4045_v8 = vmul.f32 1.442695, %v4041_v39 }
0x1a49   :  { %v4039_v12 = vpop.xlane.xlu0 %4038 }
0x1a4a   :  { %9092 = vpow2.f32 %v4045_v8  ;;  %v4042_v6 = vsub.f32 %v4024_v52, %v4039_v12 }
0x1a4c   :  { %v4047_v3 = vmul.f32 1.442695, %v4042_v6 }
0x1a4e   :  { %9094 = vpow2.f32 %v4047_v3 }
0x1a53   :  { %v9091_v11 = vpop.eup %9090 }
0x1a54   :  { %v4049_v14 = vsel %vm4029_vm8, %v9091_v11, 0.0 }
0x1a55   :  { %4050 = vadd.xlane.f32.xlu1 %v4049_v14 }
0x1a57   :  { %v9093_v13 = vpop.eup %9092 }
0x1a58   :  { %v4052_v44 = vsel %vm4029_vm8, %v9093_v13, 0.0 }
0x1a59   :  { %4053 = vadd.xlane.f32.xlu0 %v4052_v44 }
0x1a5b   :  { %v9095_v23 = vpop.eup %9094 }
0x1a5c   :  { %v4055_v30 = vsel %vm4036_vm9, %v9095_v23, 0.0 }
0x1a5d   :  { %4056 = vadd.xlane.f32.xlu1 %v4055_v30 }
0x1a6e   :  { %4462 = vrot.lane.b32.xlu1 %v10910_v18, %s9246_s15 }
0x1a6f   :  { %4464 = vrot.lane.b32.xlu0 %v10906_v62, %s9246_s15 }
0x1a72   :  { %4458 = vrot.lane.b32.xlu1 %v10910_v18, %s9245_s14 }
0x1a73   :  { %4460 = vrot.lane.b32.xlu0 %v10906_v62, %s9245_s14 }
0x1a92   :  { %4285 = vmax.xlane.f32.xlu0 %v4284_v58 }
0x1a96   :  { %4288 = vmax.xlane.f32.xlu0 %v4287_v35  ;;  %4282 = vmax.xlane.f32.xlu1 %v4281_v24 }
0x1ade   :  { %v4051_v26 = vpop.xlane.xlu1 %4050 }
0x1adf   :  { %9096 = vrcp.f32 %v4051_v26 }
0x1ae2   :  { %v4054_v20 = vpop.xlane.xlu0 %4053 }
0x1ae3   :  { %9098 = vrcp.f32 %v4054_v20  ;;  %v8814_v20 = vld [vmem:[%s11613_s2 + $0x160] sm:$0xff]  }
0x1ae6   :  { %v4057_v22 = vpop.xlane.xlu1 %4056  ;;  %v4465_v50 = vpop.permute.xlu0 %4464 }
0x1ae7   :  { %9100 = vrcp.f32 %v4057_v22  ;;  %v4476_v56 = vsel %vm233_vm4, %v4465_v50, 0 }
0x1aea   :  { %v4463_v63 = vpop.permute.xlu1 %4462  ;;  %v4461_v27 = vpop.permute.xlu0 %4460 }
0x1aeb   :  { %v4473_v5 = vsel %vm233_vm4, %v4463_v63, 0 }
0x1aec   :  { %v9097_v45 = vpop.eup %9096 }
0x1aed   :  { %v4061_v2 = vmul.f32 %v9097_v45, %v9091_v11  ;;  %v8815_v45 = vld [vmem:[%s11613_s2 + $0x158] sm:$0xff]  }
0x1aee   :  { %v4459_v61 = vpop.permute.xlu1 %4458 }
0x1af0   :  { %v9099_v36 = vpop.eup %9098 }
0x1af1   :  { %v4062_v33 = vmul.f32 %v9099_v36, %v9093_v13  ;;  %v8816_v36 = vld [vmem:[%s11613_s2 + $0x150] sm:$0xff]  }
0x1af3   :  { %v4144_v29 = vpack.c.bf16 %v4062_v33, %v4061_v2 }
0x1af4   :  { %v9101_v40 = vpop.eup %9100 }
0x1af5   :  { %v4063_v31 = vmul.f32 %v9101_v40, %v9095_v23  ;;  %8379 = vmatprep.mubr.msk.bf16.mxu0 %vm4029_vm8, %v4144_v29  ;;  %v8817_v40 = vld [vmem:[%s11613_s2 + $0x148] sm:$0xff]  }
0x1af7   :  { %v4145_v32 = vpack.c.bf16 %v4063_v31, %v4063_v31 }
0x1af9   :  { %8380 = vmatmul.mubr.msk.bf16.vlgmr.msra.gmra.mxu0 %vm4029_vm8, %v4145_v32 }
0x1afa   :  { %8392 = vmatpush3.bf16.msra.mxu0 %v8810_v51  ;;  %8399 = vmatprep.mubr.msk.bf16.mxu0 %vm154_vm3, %v10880_v19 }
0x1afb   :  { %8393 = vmatprep.subr.bf16.mxu0 %v8811_v49 }
0x1afe   :  { %8394 = vmatpush3.bf16.msra.mxu0 %v8811_v49 }
0x1aff   :  { %8395 = vmatprep.subr.bf16.mxu0 %v8812_v9 }
0x1b02   :  { %8396 = vmatpush3.bf16.msra.mxu0 %v8812_v9 }
0x1b03   :  { %8397 = vmatprep.subr.bf16.mxu0 %v8813_v47 }
0x1b06   :  { %8398 = vmatpush3.bf16.msra.mxu0 %v8813_v47 }
0x1b07   :  { %8703 = vmatprep.subr.msk.bf16.mxu0 %vm233_vm4, %v4465_v50 }
0x1b09   :  { %8400 = vmatmul.mubr.msk.bf16.vlgmr.msra.gmra.mxu0 %vm154_vm3, %v10884_v41 }
0x1b0a   :  { %8412 = vmatpush3.bf16.xpose.msra.mxu0 %v4476_v56  ;;  %8415 = vmatprep.mubr.msk.bf16.mxu0 %vm233_vm4, %v4459_v61 }
0x1b0b   :  { %8704 = vmatprep.subr.msk.bf16.mxu0 %vm233_vm4, %v4463_v63 }
0x1b12   :  { %8414 = vmatpush3.bf16.xpose.msra.mxu0 %v4473_v5 }
0x1b19   :  { %8416 = vmatmul.mubr.msk.bf16.vlgmr.msra.gmra.mxu0 %vm233_vm4, %v4461_v27 }
0x1b1b   :  { %v4286_v10 = vpop.xlane.xlu0 %4285 }
0x1b1c   :  { %v4291_v4 = vsub.f32 %v4271_v1, %v4286_v10 }
0x1b1e   :  { %v4295_v57 = vmul.f32 1.442695, %v4291_v4 }
0x1b1f   :  { %v4289_v7 = vpop.xlane.xlu0 %4288  ;;  %v4283_v52 = vpop.xlane.xlu1 %4282 }
0x1b20   :  { %9102 = vpow2.f32 %v4295_v57  ;;  %v4292_v17 = vsub.f32 %v4276_v42, %v4289_v7  ;;  %v4290_v60 = vsub.f32 %v4268_v25, %v4283_v52 }
0x1b22   :  { %v4293_v48 = vmul.f32 1.442695, %v4290_v60  ;;  %v4297_v28 = vmul.f32 1.442695, %v4292_v17 }
0x1b24   :  { %9104 = vpow2.f32 %v4293_v48 }
0x1b25   :  { %9106 = vpow2.f32 %v4297_v28 }
0x1b2d   :  { %v9103_v37 = vpop.eup %9102 }
0x1b2e   :  { %v4302_v55 = vsel %vm4029_vm8, %v9103_v37, 0.0 }
0x1b2f   :  { %4303 = vadd.xlane.f32.xlu0 %v4302_v55 }
0x1b31   :  { %v9105_v54 = vpop.eup %9104 }
0x1b32   :  { %v4299_v38 = vsel %vm4029_vm8, %v9105_v54, 0.0  ;;  %v9107_v34 = vpop.eup %9106 }
0x1b33   :  { %4300 = vadd.xlane.f32.xlu1 %v4299_v38  ;;  %v4305_v39 = vsel %vm4036_vm9, %v9107_v34, 0.0 }
0x1b37   :  { %4306 = vadd.xlane.f32.xlu1 %v4305_v39 }
0x1b45   :  { %4709 = vrot.lane.b32.xlu0 %v10906_v62, %s9248_s25 }
0x1b48   :  { %4707 = vrot.lane.b32.xlu1 %v10910_v18, %s9248_s25 }
0x1b49   :  { %4705 = vrot.lane.b32.xlu0 %v10906_v62, %s9247_s24 }
0x1b4c   :  { %4703 = vrot.lane.b32.xlu1 %v10910_v18, %s9247_s24 }
0x1bb8   :  { %v4304_v8 = vpop.xlane.xlu0 %4303 }
0x1bb9   :  { %v11011_v12 = vpop.f32.mrf.mxu0  ;;  %9108 = vrcp.f32 %v4304_v8 }
0x1bbb   :  { %v11013_v6 = vpop.f32.mrf.mxu0 }
0x1bbc   :  { %v4301_v3 = vpop.xlane.xlu1 %4300  ;;  %v4710_v56 = vpop.permute.xlu0 %4709 }
0x1bbd   :  { %v8382_v11 = vpop.f32.mrf.mxu0  ;;  %9110 = vrcp.f32 %v4301_v3  ;;  %v4721_v61 = vsel %vm233_vm4, %v4710_v56, 0 }
0x1bbe   :  { %v7196_v11 = vld [vmem:[%s11614_s3 + $0x58] ss:$0 sm:$0xff] }
0x1bbf   :  { %v11015_v13 = vpop.f32.mrf.mxu0 }
0x1bc0   :  { %v4307_v14 = vpop.xlane.xlu1 %4306  ;;  %v4706_v4 = vpop.permute.xlu0 %4705 }
0x1bc1   :  { %9112 = vrcp.f32 %v4307_v14  ;;  %v4212_v14 = vadd.f32 %v11011_v12, %v7196_v11 }
0x1bc4   :  { %v4708_v47 = vpop.permute.xlu1 %4707 }
0x1bc5   :  { %v4718_v10 = vsel %vm233_vm4, %v4708_v47, 0 }
0x1bc6   :  { %v9109_v44 = vpop.eup %9108 }
0x1bc7   :  { %v4312_v1 = vmul.f32 %v9109_v44, %v9103_v37 }
0x1bc8   :  { %v4704_v27 = vpop.permute.xlu1 %4703 }
0x1bc9   :  { %v8401_v23 = vpop.f32.mrf.mxu0 }
0x1bca   :  { %v4397_v30 = vpack.c.bf16 %v8401_v23, %v8401_v23  ;;  %v9111_v62 = vpop.eup %9110  ;;  %v4210_v23 = vadd.f32 %v7196_v11, %v11013_v6 }
0x1bcb   :  { %v4380_v51 = vpop.f32.mrf.mxu0  ;;  %v4311_v15 = vmul.f32 %v9111_v62, %v9105_v54 }
0x1bcc   :  { %v4405_v18 = vsel %vm4154_vm7, %v4397_v30, 0  ;;  %8702 = vmatprep.subr.msk.bf16.mxu1 %vm4154_vm7, %v4397_v30 }
0x1bcd   :  { %v8402_v42 = vpop.f32.mrf.mxu0  ;;  %8404 = vmatpush3.bf16.msra.mxu1 %v4405_v18  ;;  %v4394_v25 = vpack.c.bf16 %v4312_v1, %v4311_v15  ;;  %v4211_v15 = vadd.f32 %v7196_v11, %v11015_v13 }
0x1bce   :  { %v9113_v58 = vpop.eup %9112 }
0x1bcf   :  { %v4383_v35 = vpop.f32.mrf.mxu0  ;;  %v4313_v24 = vmul.f32 %v9113_v58, %v9107_v34  ;;  %8407 = vmatprep.mubr.msk.bf16.mxu1 %vm4029_vm8, %v4394_v25 }
0x1bd0   :  { %v4396_v26 = vpack.c.bf16 %v4383_v35, %v4380_v51 }
0x1bd1   :  { %v4395_v22 = vpack.c.bf16 %v4313_v24, %v4313_v24 }
0x1bd2   :  { %8405 = vmatprep.subr.bf16.mxu1 %v4396_v26 }
0x1bd3   :  { %8406 = vmatpush3.bf16.msra.mxu1 %v4396_v26 }
0x1bd4   :  { %8419 = vmatprep.subr.bf16.mxu1 %v8814_v20 }
0x1bd6   :  { %8408 = vmatmul.mubr.msk.bf16.vlgmr.msra.gmra.mxu1 %vm4029_vm8, %v4395_v22 }
0x1bd7   :  { %8420 = vmatpush3.bf16.msra.mxu1 %v8814_v20  ;;  %8427 = vmatprep.mubr.msk.bf16.mxu1 %vm154_vm3, %v10880_v19  ;;  %v8818_v20 = vld [vmem:[%s11613_s2 + $0x180] sm:$0xff]  }
0x1bd8   :  { %8421 = vmatprep.subr.bf16.mxu1 %v8815_v45 }
0x1bd9   :  { %v8417_v2 = vpop.f32.mrf.mxu0 }
0x1bda   :  { %v4521_v63 = vadd.f32 %v8417_v2, %v10953_v43 }
0x1bdb   :  { %v4512_v33 = vpop.f32.mrf.mxu0  ;;  %8422 = vmatpush3.bf16.msra.mxu1 %v8815_v45 }
0x1bdc   :  { %v4513_v29 = vadd.f32 %v4512_v33, %v10941_v46  ;;  %8423 = vmatprep.subr.bf16.mxu1 %v8816_v36  ;;  %v4532_v5 = vsel %vm4036_vm9, %v4521_v63, -inf }
0x1bdd   :  { %v8418_v31 = vpop.f32.mrf.mxu0 }
0x1bde   :  { %v4526_v32 = vsel %vm4029_vm8, %v4513_v29, -inf }
0x1bdf   :  { %v4515_v49 = vpop.f32.mrf.mxu0  ;;  %4527 = vmax.xlane.f32.xlu1 %v4526_v32  ;;  %8424 = vmatpush3.bf16.msra.mxu1 %v8816_v36 }
0x1be0   :  { %v4516_v9 = vadd.f32 %v4515_v49, %v10947_v21  ;;  %8425 = vmatprep.subr.bf16.mxu1 %v8817_v40 }
0x1be2   :  { %v4529_v50 = vsel %vm4029_vm8, %v4516_v9, -inf }
0x1be3   :  { %4530 = vmax.xlane.f32.xlu0 %v4529_v50  ;;  %8426 = vmatpush3.bf16.msra.mxu1 %v8817_v40 }
0x1be4   :  { %8706 = vmatprep.subr.msk.bf16.mxu1 %vm233_vm4, %v4710_v56 }
0x1be6   :  { %8428 = vmatmul.mubr.msk.bf16.vlgmr.msra.gmra.mxu1 %vm154_vm3, %v10884_v41 }
0x1be7   :  { %4533 = vmax.xlane.f32.xlu0 %v4532_v5  ;;  %8440 = vmatpush3.bf16.xpose.msra.mxu1 %v4721_v61 }
0x1be8   :  { %8443 = vmatprep.mubr.msk.bf16.mxu1 %vm233_vm4, %v4704_v27  ;;  %8707 = vmatprep.subr.msk.bf16.mxu1 %vm233_vm4, %v4708_v47  ;;  %v8819_v27 = vld [vmem:[%s11613_s2 + $0x178] sm:$0xff]  }
0x1bef   :  { %8442 = vmatpush3.bf16.xpose.msra.mxu1 %v4718_v10  ;;  %v8820_v10 = vld [vmem:[%s11613_s2 + $0x170] sm:$0xff]  }
0x1bf6   :  { %8444 = vmatmul.mubr.msk.bf16.vlgmr.msra.gmra.mxu1 %vm233_vm4, %v4706_v4  ;;  %v8821_v4 = vld [vmem:[%s11613_s2 + $0x168] sm:$0xff]  }
0x1c68   :  { %v4528_v57 = vpop.xlane.xlu1 %4527 }
0x1c69   :  { %v4535_v7 = vsub.f32 %v4513_v29, %v4528_v57 }
0x1c6b   :  { %v4538_v52 = vmul.f32 1.442695, %v4535_v7 }
0x1c6c   :  { %v4531_v17 = vpop.xlane.xlu0 %4530 }
0x1c6d   :  { %9114 = vpow2.f32 %v4538_v52  ;;  %v4536_v60 = vsub.f32 %v4516_v9, %v4531_v17 }
0x1c6f   :  { %v4540_v48 = vmul.f32 1.442695, %v4536_v60 }
0x1c70   :  { %v4534_v28 = vpop.xlane.xlu0 %4533 }
0x1c71   :  { %9116 = vpow2.f32 %v4540_v48  ;;  %v4537_v37 = vsub.f32 %v4521_v63, %v4534_v28 }
0x1c73   :  { %v4542_v55 = vmul.f32 1.442695, %v4537_v37 }
0x1c75   :  { %9118 = vpow2.f32 %v4542_v55 }
0x1c7a   :  { %v9115_v54 = vpop.eup %9114 }
0x1c7b   :  { %v4544_v38 = vsel %vm4029_vm8, %v9115_v54, 0.0 }
0x1c7c   :  { %4545 = vadd.xlane.f32.xlu1 %v4544_v38 }
0x1c7e   :  { %v9117_v34 = vpop.eup %9116 }
0x1c7f   :  { %v4547_v39 = vsel %vm4029_vm8, %v9117_v34, 0.0 }
0x1c80   :  { %4548 = vadd.xlane.f32.xlu0 %v4547_v39 }
0x1c82   :  { %v9119_v8 = vpop.eup %9118 }
0x1c83   :  { %v4550_v3 = vsel %vm4036_vm9, %v9119_v8, 0.0 }
0x1c84   :  { %4551 = vadd.xlane.f32.xlu1 %v4550_v3 }
0x1c96   :  { %v8409_v44 = vpop.f32.mrf.mxu1 }
0x1c97   :  { %v11057_v30 = vadd.f32 %v8409_v44, %v4212_v14 }
0x1c98   :  { %v4441_v62 = vpop.f32.mrf.mxu1 }
0x1c99   :  { %v11059_v51 = vadd.f32 %v4441_v62, %v4210_v23 }
0x1c9a   :  { %v8410_v18 = vpop.f32.mrf.mxu1 }
0x1c9c   :  { %v4444_v1 = vpop.f32.mrf.mxu1 }
0x1c9d   :  { %v11062_v42 = vadd.f32 %v4444_v1, %v4211_v15 }
0x1ca6   :  { %v8429_v25 = vpop.f32.mrf.mxu1 }
0x1ca7   :  { %v4642_v58 = vpack.c.bf16 %v8429_v25, %v8429_v25 }
0x1ca8   :  { %v4625_v35 = vpop.f32.mrf.mxu1 }
0x1ca9   :  { %v4650_v24 = vsel %vm4154_vm7, %v4642_v58, 0  ;;  %8705 = vmatprep.subr.msk.bf16.mxu0 %vm4154_vm7, %v4642_v58 }
0x1caa   :  { %v8430_v12 = vpop.f32.mrf.mxu1  ;;  %8432 = vmatpush3.bf16.msra.mxu0 %v4650_v24 }
0x1cac   :  { %v4628_v6 = vpop.f32.mrf.mxu1 }
0x1cad   :  { %v4641_v26 = vpack.c.bf16 %v4628_v6, %v4625_v35 }
0x1caf   :  { %8433 = vmatprep.subr.bf16.mxu0 %v4641_v26 }
0x1cb0   :  { %8434 = vmatpush3.bf16.msra.mxu0 %v4641_v26 }
0x1cb1   :  { %8447 = vmatprep.subr.bf16.mxu0 %v8818_v20 }
0x1cb6   :  { %v8445_v13 = vpop.f32.mrf.mxu1 }
0x1cb7   :  { %v4766_v2 = vadd.f32 %v8445_v13, %v10953_v43 }
0x1cb8   :  { %v4757_v22 = vpop.f32.mrf.mxu1 }
0x1cb9   :  { %v4758_v45 = vadd.f32 %v4757_v22, %v10941_v46  ;;  %v4777_v31 = vsel %vm4036_vm9, %v4766_v2, -inf }
0x1cba   :  { %v8446_v36 = vpop.f32.mrf.mxu1 }
0x1cbb   :  { %v4771_v33 = vsel %vm4029_vm8, %v4758_v45, -inf }
0x1cbc   :  { %v4760_v29 = vpop.f32.mrf.mxu1  ;;  %4772 = vmax.xlane.f32.xlu0 %v4771_v33 }
0x1cbd   :  { %v4761_v40 = vadd.f32 %v4760_v29, %v10947_v21 }
0x1cbf   :  { %v4774_v32 = vsel %vm4029_vm8, %v4761_v40, -inf }
0x1cc0   :  { %4778 = vmax.xlane.f32.xlu0 %v4777_v31  ;;  %4775 = vmax.xlane.f32.xlu1 %v4774_v32 }
0x1d05   :  { %v4546_v49 = vpop.xlane.xlu1 %4545 }
0x1d06   :  { %9120 = vrcp.f32 %v4546_v49 }
0x1d09   :  { %v4549_v9 = vpop.xlane.xlu0 %4548 }
0x1d0a   :  { %9122 = vrcp.f32 %v4549_v9 }
0x1d0d   :  { %v4552_v46 = vpop.xlane.xlu1 %4551 }
0x1d0e   :  { %9124 = vrcp.f32 %v4552_v46 }
0x1d13   :  { %v9121_v47 = vpop.eup %9120 }
0x1d14   :  { %v4556_v63 = vmul.f32 %v9121_v47, %v9115_v54 }
0x1d17   :  { %v9123_v43 = vpop.eup %9122 }
0x1d18   :  { %v4557_v50 = vmul.f32 %v9123_v43, %v9117_v34 }
0x1d1a   :  { %v4639_v56 = vpack.c.bf16 %v4557_v50, %v4556_v63 }
0x1d1b   :  { %v9125_v61 = vpop.eup %9124 }
0x1d1c   :  { %v4558_v5 = vmul.f32 %v9125_v61, %v9119_v8  ;;  %8435 = vmatprep.mubr.msk.bf16.mxu0 %vm4029_vm8, %v4639_v56 }
0x1d1e   :  { %v4640_v21 = vpack.c.bf16 %v4558_v5, %v4558_v5 }
0x1d20   :  { %8436 = vmatmul.mubr.msk.bf16.vlgmr.msra.gmra.mxu0 %vm4029_vm8, %v4640_v21  ;;  %v8822_v21 = vld [vmem:[%s11612_s1 + $0xd8] sm:$0xff]  }
0x1d21   :  { %8448 = vmatpush3.bf16.msra.mxu0 %v8818_v20  ;;  %8455 = vmatprep.mubr.msk.bf16.mxu0 %vm154_vm3, %v10880_v19 }
0x1d22   :  { %8449 = vmatprep.subr.bf16.mxu0 %v8819_v27 }
0x1d25   :  { %8450 = vmatpush3.bf16.msra.mxu0 %v8819_v27  ;;  %v8823_v27 = vld [vmem:[%s11612_s1 + $0xd0] sm:$0xff]  }
0x1d26   :  { %8451 = vmatprep.subr.bf16.mxu0 %v8820_v10 }
0x1d29   :  { %8452 = vmatpush3.bf16.msra.mxu0 %v8820_v10  ;;  %v8824_v10 = vld [vmem:[%s11612_s1 + $0xc8] sm:$0xff]  }
0x1d2a   :  { %8453 = vmatprep.subr.bf16.mxu0 %v8821_v4 }
0x1d2d   :  { %8454 = vmatpush3.bf16.msra.mxu0 %v8821_v4  ;;  %v8825_v4 = vld [vmem:[%s11612_s1 + $0xc0] sm:$0xff]  }
0x1d2e   :  { %8467 = vmatprep.subr.bf16.mxu0 %v8822_v21 }
0x1d30   :  { %8456 = vmatmul.mubr.msk.bf16.vlgmr.msra.gmra.mxu0 %vm154_vm3, %v10884_v41 }
0x1d31   :  { %8468 = vmatpush3.bf16.msra.mxu0 %v8822_v21 }
0x1d32   :  { %8469 = vmatprep.subr.bf16.mxu0 %v8823_v27 }
0x1d35   :  { %8470 = vmatpush3.bf16.msra.mxu0 %v8823_v27 }
0x1d36   :  { %8471 = vmatprep.subr.bf16.mxu0 %v8824_v10 }
0x1d39   :  { %8472 = vmatpush3.bf16.msra.mxu0 %v8824_v10  ;;  %v7236_v10 = vld [vmem:[%s11614_s3 + $0xd8] ss:$0 sm:$0xff] }
0x1d3a   :  { %8473 = vmatprep.subr.bf16.mxu0 %v8825_v4 }
0x1d3d   :  { %8474 = vmatpush3.bf16.msra.mxu0 %v8825_v4 }
0x1d45   :  { %v4773_v57 = vpop.xlane.xlu0 %4772 }
0x1d46   :  { %v4780_v7 = vsub.f32 %v4758_v45, %v4773_v57  ;;  %v8826_v57 = vld [vmem:[%s11613_s2 + $0x2c0] sm:$0xff]  }
0x1d48   :  { %v4783_v19 = vmul.f32 1.442695, %v4780_v7  ;;  %v8827_v7 = vld [vmem:[%s11613_s2 + $0x2b8] sm:$0xff]  }
0x1d49   :  { %v4779_v52 = vpop.xlane.xlu0 %4778  ;;  %v4776_v17 = vpop.xlane.xlu1 %4775 }
0x1d4a   :  { %9126 = vpow2.f32 %v4783_v19  ;;  %v4782_v60 = vsub.f32 %v4766_v2, %v4779_v52  ;;  %v4781_v48 = vsub.f32 %v4761_v40, %v4776_v17  ;;  %v8828_v19 = vld [vmem:[%s11613_s2 + $0x2b0] sm:$0xff]   ;;  %v8829_v52 = vld [vmem:[%s11613_s2 + $0x2a8] sm:$0xff]   ;;  %v8830_v17 = vld [vmem:[%s11613_s2 + $0x2a0] sm:$0xff]  }
0x1d4c   :  { %v4787_v28 = vmul.f32 1.442695, %v4782_v60  ;;  %v4785_v37 = vmul.f32 1.442695, %v4781_v48 }
0x1d4e   :  { %9128 = vpow2.f32 %v4787_v28 }
0x1d4f   :  { %9130 = vpow2.f32 %v4785_v37 }
0x1d57   :  { %v9127_v55 = vpop.eup %9126 }
0x1d58   :  { %v4789_v54 = vsel %vm4029_vm8, %v9127_v55, 0.0 }
0x1d59   :  { %4790 = vadd.xlane.f32.xlu1 %v4789_v54 }
0x1d5b   :  { %v9129_v38 = vpop.eup %9128 }
0x1d5c   :  { %v9131_v34 = vpop.eup %9130  ;;  %v4795_v41 = vsel %vm4036_vm9, %v9129_v38, 0.0 }
0x1d5d   :  { %4796 = vadd.xlane.f32.xlu1 %v4795_v41  ;;  %v4792_v39 = vsel %vm4029_vm8, %v9131_v34, 0.0 }
0x1d5e   :  { %4793 = vadd.xlane.f32.xlu0 %v4792_v39 }
0x1de0   :  { %v8437_v8 = vpop.f32.mrf.mxu0 }
0x1de1   :  { %v4702_v3 = vadd.f32 %v8437_v8, %v11057_v30 }
0x1de2   :  { %v4686_v11 = vpop.f32.mrf.mxu0  ;;  %v4791_v14 = vpop.xlane.xlu1 %4790 }
0x1de3   :  { %v4700_v44 = vadd.f32 %v4686_v11, %v11059_v51  ;;  %9132 = vrcp.f32 %v4791_v14 }
0x1de4   :  { %v8438_v23 = vpop.f32.mrf.mxu0 }
0x1de6   :  { %v4689_v62 = vpop.f32.mrf.mxu0  ;;  %v4797_v18 = vpop.xlane.xlu1 %4796 }
0x1de7   :  { %v4701_v15 = vadd.f32 %v4689_v62, %v11062_v42  ;;  %v4794_v1 = vpop.xlane.xlu0 %4793  ;;  %9134 = vrcp.f32 %v4797_v18 }
0x1de8   :  { %9136 = vrcp.f32 %v4794_v1 }
0x1df0   :  { %v8457_v25 = vpop.f32.mrf.mxu0  ;;  %v9133_v24 = vpop.eup %9132 }
0x1df1   :  { %v4887_v58 = vpack.c.bf16 %v8457_v25, %v8457_v25  ;;  %v4801_v20 = vmul.f32 %v9133_v24, %v9127_v55 }
0x1df2   :  { %v4870_v35 = vpop.f32.mrf.mxu0 }
0x1df3   :  { %v4895_v12 = vsel %vm4154_vm7, %v4887_v58, 0  ;;  %8708 = vmatprep.subr.msk.bf16.mxu1 %vm4154_vm7, %v4887_v58 }
0x1df4   :  { %v9135_v30 = vpop.eup %9134  ;;  %v8458_v6 = vpop.f32.mrf.mxu0  ;;  %8460 = vmatpush3.bf16.msra.mxu1 %v4895_v12  ;;  %v7227_v12 = vld [vmem:[%s11614_s3 + $0x78] ss:$0 sm:$0xff] }
0x1df5   :  { %v9137_v51 = vpop.eup %9136  ;;  %v4803_v22 = vmul.f32 %v9135_v30, %v9129_v38 }
0x1df6   :  { %v4873_v26 = vpop.f32.mrf.mxu0  ;;  %v4802_v13 = vmul.f32 %v9137_v51, %v9131_v34 }
0x1df7   :  { %v4886_v42 = vpack.c.bf16 %v4873_v26, %v4870_v35  ;;  %v4885_v36 = vpack.c.bf16 %v4803_v22, %v4803_v22  ;;  %v7228_v22 = vld [vmem:[%s11614_s3 + $0x98] ss:$0 sm:$0xff] }
0x1df8   :  { %v4884_v45 = vpack.c.bf16 %v4802_v13, %v4801_v20 }
0x1df9   :  { %8461 = vmatprep.subr.bf16.mxu1 %v4886_v42 }
0x1dfa   :  { %8462 = vmatpush3.bf16.msra.mxu1 %v4886_v42  ;;  %8463 = vmatprep.mubr.msk.bf16.mxu1 %vm4029_vm8, %v4884_v45 }
0x1dfb   :  { %8479 = vmatprep.subr.bf16.mxu1 %v8826_v57 }
0x1dfd   :  { %8464 = vmatmul.mubr.msk.bf16.vlgmr.msra.gmra.mxu1 %vm4029_vm8, %v4885_v36 }
0x1dfe   :  { %8480 = vmatpush3.bf16.msra.mxu1 %v8826_v57 }
0x1dff   :  { %8481 = vmatprep.subr.bf16.mxu1 %v8827_v7 }
0x1e02   :  { %8482 = vmatpush3.bf16.msra.mxu1 %v8827_v7 }
0x1e03   :  { %8483 = vmatprep.subr.bf16.mxu1 %v8828_v19 }
0x1e06   :  { %8484 = vmatpush3.bf16.msra.mxu1 %v8828_v19 }
0x1e07   :  { %8485 = vmatprep.subr.bf16.mxu1 %v8829_v52 }
0x1e0a   :  { %8486 = vmatpush3.bf16.msra.mxu1 %v8829_v52 }
0x1e0b   :  { %8487 = vmatprep.subr.bf16.mxu1 %v8830_v17 }
0x1e0e   :  { %8488 = vmatpush3.bf16.msra.mxu1 %v8830_v17 }
0x1ebd   :  { %v8465_v2 = vpop.f32.mrf.mxu1 }
0x1ebe   :  { %v4947_v33 = vadd.f32 %v8465_v2, %v4702_v3 }
0x1ebf   :  { %v4931_v29 = vpop.f32.mrf.mxu1 }
0x1ec0   :  { %v11101_v40 = vadd.f32 %v4947_v33, %v10872_v16  ;;  %v4945_v31 = vadd.f32 %v4931_v29, %v4700_v44 }
0x1ec1   :  { %v8466_v32 = vpop.f32.mrf.mxu1 }
0x1ec2   :  { %v11104_v49 = vadd.f32 %v4945_v31, %v10874_v53  ;;  %v4960_v9 = vsel %vm4959_vm10, %v11101_v40, 0.0  ;;  %v4968_v5 = vmul.f32 %v11101_v40, %v11101_v40 }
0x1ec3   :  { %4961 = vadd.xlane.f32.xlu0 %v4960_v9  ;;  %v4934_v46 = vpop.f32.mrf.mxu1  ;;  %v8833_v9 = vld [vmem:[%s11613_s2 + $0x288] sm:$0xff]  }
0x1ec4   :  { %v4946_v47 = vadd.f32 %v4934_v46, %v4701_v15  ;;  %v4966_v43 = vmul.f32 %v11104_v49, %v11104_v49  ;;  %v4953_v50 = vsel %vm154_vm3, %v11104_v49, 0.0 }
0x1ec6   :  { %v11111_v63 = vadd.f32 %v4946_v47, %v10876_v59  ;;  %v4969_v16 = vsel %vm154_vm3, %v4966_v43, 0.0  ;;  %v4975_v59 = vsel %vm4959_vm10, %v4968_v5, 0.0  ;;  %v7229_v47 = vld [vmem:[%s11614_s3 + $0xb8] ss:$0 sm:$0xff] }
0x1ec7   :  { %4970 = vadd.xlane.f32.xlu1 %v4969_v16  ;;  %4954 = vadd.xlane.f32.xlu0 %v4953_v50 }
0x1ec8   :  { %v4967_v53 = vmul.f32 %v11111_v63, %v11111_v63  ;;  %v4956_v61 = vsel %vm154_vm3, %v11111_v63, 0.0 }
0x1eca   :  { %v4972_v56 = vsel %vm154_vm3, %v4967_v53, 0.0 }
0x1ecb   :  { %4973 = vadd.xlane.f32.xlu0 %v4972_v56  ;;  %4957 = vadd.xlane.f32.xlu1 %v4956_v61 }
0x1ecf   :  { %4976 = vadd.xlane.f32.xlu1 %v4975_v59 }
0x1f4c   :  { %v4962_v60 = vpop.xlane.xlu0 %4961 }
0x1f4d   :  { %v4965_v41 = vmul.f32 0.015625, %v4962_v60 }
0x1f4f   :  { %v4986_v23 = vmul.f32 %v4965_v41, %v4965_v41  ;;  %v4983_v51 = vsub.f32 %v11101_v40, %v4965_v41  ;;  %v8831_v40 = vld [vmem:[%s11613_s2 + $0x298] sm:$0xff]  }
0x1f50   :  { %v4971_v48 = vpop.xlane.xlu1 %4970  ;;  %v4955_v28 = vpop.xlane.xlu0 %4954  ;;  %8489 = vmatprep.subr.bf16.mxu1 %v8831_v40 }
0x1f51   :  { %v4963_v37 = vmul.f32 0.015625, %v4955_v28  ;;  %v4978_v55 = vmul.f32 0.015625, %v4971_v48  ;;  %8490 = vmatpush3.bf16.msra.mxu1 %v8831_v40 }
0x1f53   :  { %v4984_v54 = vmul.f32 %v4963_v37, %v4963_v37  ;;  %v4981_v58 = vsub.f32 %v11104_v49, %v4963_v37  ;;  %v8832_v49 = vld [vmem:[%s11613_s2 + $0x290] sm:$0xff]  }
0x1f54   :  { %v4974_v38 = vpop.xlane.xlu0 %4973  ;;  %v4958_v34 = vpop.xlane.xlu1 %4957  ;;  %8491 = vmatprep.subr.bf16.mxu1 %v8832_v49 }
0x1f55   :  { %v4987_v39 = vsub.f32 %v4978_v55, %v4984_v54  ;;  %v4964_v8 = vmul.f32 0.015625, %v4958_v34  ;;  %v4979_v11 = vmul.f32 0.015625, %v4974_v38  ;;  %8492 = vmatpush3.bf16.msra.mxu1 %v8832_v49 }
0x1f56   :  { %8493 = vmatprep.subr.bf16.mxu1 %v8833_v9 }
0x1f57   :  { %v4990_v3 = vadd.f32 1e-05, %v4987_v39  ;;  %v4985_v14 = vmul.f32 %v4964_v8, %v4964_v8  ;;  %v4982_v30 = vsub.f32 %v11111_v63, %v4964_v8 }
0x1f58   :  { %v4977_v44 = vpop.xlane.xlu1 %4976 }
0x1f59   :  { %9138 = vrsqrt.f32 %v4990_v3  ;;  %v4988_v62 = vsub.f32 %v4979_v11, %v4985_v14  ;;  %v4980_v18 = vmul.f32 0.015625, %v4977_v44  ;;  %8494 = vmatpush3.bf16.msra.mxu1 %v8833_v9  ;;  %v8834_v14 = vld [vmem:[%s11612_s1 + $0x78] sm:$0xff]   ;;  %v8835_v44 = vld [vmem:[%s11613_s2 + $0x1a0] sm:$0xff]  }
0x1f5a   :  { %8499 = vmatprep.subr.bf16.mxu0 %v8834_v14  ;;  %8519 = vmatprep.subr.bf16.mxu1 %v8835_v44 }
0x1f5b   :  { %v4991_v15 = vadd.f32 1e-05, %v4988_v62  ;;  %v4989_v1 = vsub.f32 %v4980_v18, %v4986_v23  ;;  %v8836_v23 = vld [vmem:[%s11612_s1 + $0x70] sm:$0xff]   ;;  %v8837_v62 = vld [vmem:[%s11613_s2 + $0x198] sm:$0xff]   ;;  %v8838_v18 = vld [vmem:[%s11612_s1 + $0x68] sm:$0xff]  }
0x1f5d   :  { %9140 = vrsqrt.f32 %v4991_v15  ;;  %v4992_v25 = vadd.f32 1e-05, %v4989_v1  ;;  %v8839_v15 = vld [vmem:[%s11613_s2 + $0x190] sm:$0xff]   ;;  %v8840_v1 = vld [vmem:[%s11612_s1 + $0x60] sm:$0xff]  }
0x1f5f   :  { %9142 = vrsqrt.f32 %v4992_v25  ;;  %v8841_v25 = vld [vmem:[%s11613_s2 + $0x188] sm:$0xff]  }
0x1f66   :  { %v9139_v35 = vpop.eup %9138 }
0x1f67   :  { %v4996_v24 = vmul.f32 %v9139_v35, %v4981_v58 }
0x1f69   :  { %v5003_v26 = vmul.f32 %v7227_v12, %v4996_v24 }
0x1f6a   :  { %v9141_v6 = vpop.eup %9140 }
0x1f6b   :  { %v4997_v20 = vmul.f32 %v9141_v6, %v4982_v30  ;;  %v5010_v36 = vadd.f32 %v7228_v22, %v5003_v26 }
0x1f6c   :  { %v9143_v13 = vpop.eup %9142 }
0x1f6d   :  { %v5004_v42 = vmul.f32 %v7227_v12, %v4997_v20  ;;  %v4998_v45 = vmul.f32 %v9143_v13, %v4983_v51 }
0x1f6f   :  { %v5011_v2 = vadd.f32 %v7228_v22, %v5004_v42  ;;  %v5005_v33 = vmul.f32 %v7227_v12, %v4998_v45 }
0x1f71   :  { %v5022_v29 = vpack.c.bf16 %v5011_v2, %v5010_v36  ;;  %v5012_v31 = vadd.f32 %v7228_v22, %v5005_v33 }
0x1f73   :  { %8475 = vmatprep.mubr.msk.bf16.mxu0 %vm154_vm3, %v5022_v29  ;;  %v5023_v32 = vpack.c.bf16 %v5012_v31, %v5012_v31 }
0x1f75   :  { %8476 = vmatmul.mubr.msk.bf16.vlgmr.msra.gmra.mxu0 %vm154_vm3, %v5023_v32 }
0x1f76   :  { %8500 = vmatpush3.bf16.msra.mxu0 %v8834_v14 }
0x1f77   :  { %8501 = vmatprep.subr.bf16.mxu0 %v8836_v23 }
0x1f7a   :  { %8502 = vmatpush3.bf16.msra.mxu0 %v8836_v23 }
0x1f7b   :  { %8503 = vmatprep.subr.bf16.mxu0 %v8838_v18 }
0x1f7e   :  { %8504 = vmatpush3.bf16.msra.mxu0 %v8838_v18 }
0x1f7f   :  { %8505 = vmatprep.subr.bf16.mxu0 %v8840_v1 }
0x1f82   :  { %8506 = vmatpush3.bf16.msra.mxu0 %v8840_v1 }
0x2035   :  { %v8477_v46 = vpop.f32.mrf.mxu0 }
0x2036   :  { %v5101_v63 = vadd.f32 %v8477_v46, %v7229_v47 }
0x2037   :  { %v5092_v43 = vpop.f32.mrf.mxu0 }
0x2038   :  { %v5093_v50 = vadd.f32 %v7229_v47, %v5092_v43  ;;  %v5108_v61 = vmax.f32 %v5101_v63, 0.0  ;;  %v7245_v43 = vld [vmem:[%s11614_s3 + $0xf8] ss:$0 sm:$0xff] }
0x2039   :  { %v8478_v16 = vpop.f32.mrf.mxu0 }
0x203a   :  { %v5106_v5 = vmax.f32 %v5093_v50, 0.0  ;;  %v5127_v27 = vpack.c.bf16 %v5108_v61, %v5108_v61 }
0x203b   :  { %v5095_v53 = vpop.f32.mrf.mxu0 }
0x203c   :  { %v5096_v56 = vadd.f32 %v7229_v47, %v5095_v53 }
0x203e   :  { %v5107_v59 = vmax.f32 %v5096_v56, 0.0 }
0x2040   :  { %v5126_v21 = vpack.c.bf16 %v5107_v59, %v5106_v5  ;;  %v7246_v5 = vld [vmem:[%s11614_s3 + $0x118] ss:$0 sm:$0xff] }
0x2042   :  { %8495 = vmatprep.mubr.bf16.mxu1 %v5126_v21 }
0x2043   :  { %8496 = vmatmul.mubr.bf16.vlgmr.msra.gmra.mxu1 %v5127_v27 }
0x2044   :  { %8520 = vmatpush3.bf16.msra.mxu1 %v8835_v44 }
0x2045   :  { %8521 = vmatprep.subr.bf16.mxu1 %v8837_v62 }
0x2048   :  { %8522 = vmatpush3.bf16.msra.mxu1 %v8837_v62 }
0x2049   :  { %8523 = vmatprep.subr.bf16.mxu1 %v8839_v15 }
0x204c   :  { %8524 = vmatpush3.bf16.msra.mxu1 %v8839_v15 }
0x204d   :  { %8525 = vmatprep.subr.bf16.mxu1 %v8841_v25 }
0x2050   :  { %8526 = vmatpush3.bf16.msra.mxu1 %v8841_v25 }
0x2103   :  { %v8497_v4 = vpop.f32.mrf.mxu1 }
0x2104   :  { %v5223_v57 = vadd.f32 %v8497_v4, %v7236_v10 }
0x2105   :  { %v5214_v7 = vpop.f32.mrf.mxu1 }
0x2106   :  { %v11177_v19 = vadd.f32 %v5223_v57, %v5012_v31  ;;  %v5215_v52 = vadd.f32 %v7236_v10, %v5214_v7 }
0x2107   :  { %v8498_v17 = vpop.f32.mrf.mxu1 }
0x2108   :  { %v11179_v60 = vadd.f32 %v5215_v52, %v5010_v36  ;;  %v5239_v48 = vsel %vm4959_vm10, %v11177_v19, 0.0  ;;  %v5247_v3 = vmul.f32 %v11177_v19, %v11177_v19  ;;  %v7247_v52 = vld [vmem:[%s11614_s3 + $0x40] ss:$0 sm:$0xff] }
0x2109   :  { %5240 = vadd.xlane.f32.xlu0 %v5239_v48  ;;  %v5217_v28 = vpop.f32.mrf.mxu1 }
0x210a   :  { %v5218_v37 = vadd.f32 %v7236_v10, %v5217_v28  ;;  %v5245_v55 = vmul.f32 %v11179_v60, %v11179_v60  ;;  %v5233_v34 = vsel %vm154_vm3, %v11179_v60, 0.0  ;;  %v5254_v11 = vsel %vm4959_vm10, %v5247_v3, 0.0 }
0x210c   :  { %v11185_v54 = vadd.f32 %v5218_v37, %v5011_v2  ;;  %v5248_v38 = vsel %vm154_vm3, %v5245_v55, 0.0 }
0x210d   :  { %5249 = vadd.xlane.f32.xlu1 %v5248_v38  ;;  %5234 = vadd.xlane.f32.xlu0 %v5233_v34 }
0x210e   :  { %v5246_v41 = vmul.f32 %v11185_v54, %v11185_v54  ;;  %v5236_v39 = vsel %vm154_vm3, %v11185_v54, 0.0 }
0x2110   :  { %v5251_v8 = vsel %vm154_vm3, %v5246_v41, 0.0 }
0x2111   :  { %5237 = vadd.xlane.f32.xlu1 %v5236_v39  ;;  %5252 = vadd.xlane.f32.xlu0 %v5251_v8 }
0x2115   :  { %5255 = vadd.xlane.f32.xlu1 %v5254_v11 }
0x2192   :  { %v5241_v58 = vpop.xlane.xlu0 %5240 }
0x2193   :  { %v5244_v20 = vmul.f32 0.015625, %v5241_v58 }
0x2195   :  { %v5265_v33 = vmul.f32 %v5244_v20, %v5244_v20  ;;  %v5262_v50 = vsub.f32 %v11177_v19, %v5244_v20 }
0x2196   :  { %v5250_v35 = vpop.xlane.xlu1 %5249  ;;  %v5235_v24 = vpop.xlane.xlu0 %5234 }
0x2197   :  { %v5242_v12 = vmul.f32 0.015625, %v5235_v24  ;;  %v5257_v30 = vmul.f32 0.015625, %v5250_v35 }
0x2199   :  { %v5263_v6 = vmul.f32 %v5242_v12, %v5242_v12  ;;  %v5260_v9 = vsub.f32 %v11179_v60, %v5242_v12 }
0x219a   :  { %v5238_v51 = vpop.xlane.xlu1 %5237  ;;  %v5253_v26 = vpop.xlane.xlu0 %5252 }
0x219b   :  { %v5266_v13 = vsub.f32 %v5257_v30, %v5263_v6  ;;  %v5243_v22 = vmul.f32 0.015625, %v5238_v51  ;;  %v5258_v36 = vmul.f32 0.015625, %v5253_v26  ;;  %v11291_v51 = vld [vmem:[%s11614_s3 + $0x168] sm:$0xff] }
0x219d   :  { %v5269_v42 = vadd.f32 1e-05, %v5266_v13  ;;  %v5264_v45 = vmul.f32 %v5243_v22, %v5243_v22  ;;  %v5261_v63 = vsub.f32 %v11185_v54, %v5243_v22 }
0x219e   :  { %v5256_v2 = vpop.xlane.xlu1 %5255 }
0x219f   :  { %9144 = vrsqrt.f32 %v5269_v42  ;;  %v5267_v29 = vsub.f32 %v5258_v36, %v5264_v45  ;;  %v5259_v31 = vmul.f32 0.015625, %v5256_v2  ;;  %v11298_v42 = vld [vmem:[%s11614_s3 + $0x170] sm:$0xff]  ;;  %v11304_v36 = vld [vmem:[%s11614_s3 + $0x178] sm:$0xf] }
0x21a1   :  { %v5270_v32 = vadd.f32 1e-05, %v5267_v29  ;;  %v5268_v40 = vsub.f32 %v5259_v31, %v5265_v33 }
0x21a3   :  { %9146 = vrsqrt.f32 %v5270_v32  ;;  %v5271_v49 = vadd.f32 1e-05, %v5268_v40 }
0x21a5   :  { %9148 = vrsqrt.f32 %v5271_v49 }
0x21ac   :  { %v9145_v46 = vpop.eup %9144 }
0x21ad   :  { %v5275_v47 = vmul.f32 %v9145_v46, %v5260_v9 }
0x21af   :  { %v5282_v53 = vmul.f32 %v7245_v43, %v5275_v47 }
0x21b0   :  { %v9147_v16 = vpop.eup %9146 }
0x21b1   :  { %v5276_v56 = vmul.f32 %v9147_v16, %v5261_v63  ;;  %v11231_v27 = vadd.f32 %v7246_v5, %v5282_v53 }
0x21b2   :  { %v9149_v61 = vpop.eup %9148 }
0x21b3   :  { %v5277_v59 = vmul.f32 %v9149_v61, %v5262_v50  ;;  %v5283_v21 = vmul.f32 %v7245_v43, %v5276_v56 }
0x21b5   :  { %v5284_v10 = vmul.f32 %v7245_v43, %v5277_v59  ;;  %v11233_v4 = vadd.f32 %v7246_v5, %v5283_v21 }
0x21b7   :  { %v11237_v57 = vpack.c.bf16 %v11233_v4, %v11231_v27  ;;  %v11239_v7 = vadd.f32 %v7246_v5, %v5284_v10 }
0x21b9   :  { %8507 = vmatprep.mubr.msk.bf16.mxu0 %vm154_vm3, %v11237_v57  ;;  %8527 = vmatprep.mubr.msk.bf16.mxu1 %vm154_vm3, %v11237_v57  ;;  %v11247_v19 = vpack.c.bf16 %v11239_v7, %v11239_v7 }
0x21bb   :  { %8508 = vmatmul.mubr.msk.bf16.vlgmr.msra.gmra.mxu0 %vm154_vm3, %v11247_v19  ;;  %8528 = vmatmul.mubr.msk.bf16.vlgmr.msra.gmra.mxu1 %vm154_vm3, %v11247_v19 }
0x227b   :  { %v8509_v17 = vpop.f32.mrf.mxu0  ;;  %v8529_v60 = vpop.f32.mrf.mxu1 }
0x227c   :  { %v5380_v48 = vadd.f32 %v8509_v17, %v7247_v52  ;;  %v5570_v44 = vpack.c.bf16 %v8529_v60, %v8529_v60 }
0x227d   :  { %v5371_v28 = vpop.f32.mrf.mxu0  ;;  %v5553_v37 = vpop.f32.mrf.mxu1 }
0x227e   :  { %v11256_v55 = vpack.c.bf16 %v5380_v48, %v5380_v48  ;;  %v5372_v41 = vadd.f32 %v7247_v52, %v5371_v28  ;;  %v5578_v58 = vsel %vm4154_vm7, %v5570_v44, 0 }
0x227f   :  { %v8510_v54 = vpop.f32.mrf.mxu0  ;;  %v8530_v38 = vpop.f32.mrf.mxu1 }
0x2280   :  { %5392 = vrot.lane.b32.xlu0 %v11256_v55, %s9242_s28 }
0x2281   :  { %v5374_v34 = vpop.f32.mrf.mxu0  ;;  %v5556_v1 = vpop.f32.mrf.mxu1 }
0x2282   :  { %v5375_v39 = vadd.f32 %v7247_v52, %v5374_v34  ;;  %v5569_v35 = vpack.c.bf16 %v5556_v1, %v5553_v37  ;;  %v8842_v52 = vld [vmem:[%s11613_s2 + $0x1c0] sm:$0xff]   ;;  %v8843_v1 = vld [vmem:[%s11613_s2 + $0x1b8] sm:$0xff]  }
0x2284   :  { %v11260_v8 = vpack.c.bf16 %v5375_v39, %v5372_v41 }
0x2286   :  { %5639 = vrot.lane.b32.xlu0 %v11260_v8, %s9243_s29  ;;  %5390 = vrot.lane.b32.xlu1 %v11260_v8, %s9242_s28 }
0x2287   :  { %8515 = vmatprep.mubr.msk.bf16.mxu0 %vm233_vm4, %v11260_v8 }
0x228a   :  { %5637 = vrot.lane.b32.xlu0 %v11256_v55, %s9244_s30  ;;  %5641 = vrot.lane.b32.xlu1 %v11256_v55, %s9243_s29 }
0x228e   :  { %5635 = vrot.lane.b32.xlu1 %v11260_v8, %s9244_s30 }
0x22f2   :  { %v5393_v3 = vpop.permute.xlu0 %5392 }
0x22f3   :  { %v5404_v11 = vsel %vm233_vm4, %v5393_v3, 0  ;;  %8709 = vmatprep.subr.msk.bf16.mxu0 %vm233_vm4, %v5393_v3 }
0x22f4   :  { %8512 = vmatpush3.bf16.xpose.msra.mxu0 %v5404_v11 }
0x22f8   :  { %v5391_v14 = vpop.permute.xlu1 %5390  ;;  %v5640_v15 = vpop.permute.xlu0 %5639 }
0x22f9   :  { %8710 = vmatprep.subr.msk.bf16.mxu0 %vm233_vm4, %v5391_v14  ;;  %v5401_v23 = vsel %vm233_vm4, %v5391_v14, 0  ;;  %v5650_v24 = vsel %vm233_vm4, %v5640_v15, 0 }
0x22fc   :  { %8514 = vmatpush3.bf16.xpose.msra.mxu0 %v5401_v23  ;;  %v5642_v62 = vpop.permute.xlu1 %5641  ;;  %v5638_v12 = vpop.permute.xlu0 %5637 }
0x22fd   :  { %v5653_v18 = vsel %vm233_vm4, %v5642_v62, 0  ;;  %8711 = vmatprep.subr.msk.bf16.mxu0 %vm4154_vm7, %v5570_v44  ;;  %8712 = vmatprep.subr.msk.bf16.mxu1 %vm233_vm4, %v5642_v62 }
0x22fe   :  { %8540 = vmatpush3.bf16.xpose.msra.mxu1 %v5653_v18 }
0x22ff   :  { %8713 = vmatprep.subr.msk.bf16.mxu1 %vm233_vm4, %v5640_v15 }
0x2300   :  { %v5636_v25 = vpop.permute.xlu1 %5635 }
0x2301   :  { %8543 = vmatprep.mubr.msk.bf16.mxu1 %vm233_vm4, %v5636_v25  ;;  %v8844_v25 = vld [vmem:[%s11613_s2 + $0x1b0] sm:$0xff]  }
0x2303   :  { %8516 = vmatmul.mubr.msk.bf16.vlgmr.msra.gmra.mxu0 %vm233_vm4, %v11256_v55 }
0x2304   :  { %8532 = vmatpush3.bf16.msra.mxu0 %v5578_v58  ;;  %v8845_v58 = vld [vmem:[%s11613_s2 + $0x1a8] sm:$0xff]  }
0x2305   :  { %8533 = vmatprep.subr.bf16.mxu0 %v5569_v35 }
0x2306   :  { %8542 = vmatpush3.bf16.xpose.msra.mxu1 %v5650_v24 }
0x2308   :  { %8534 = vmatpush3.bf16.msra.mxu0 %v5569_v35 }
0x2309   :  { %8547 = vmatprep.subr.bf16.mxu0 %v8842_v52 }
0x230d   :  { %8544 = vmatmul.mubr.msk.bf16.vlgmr.msra.gmra.mxu1 %vm233_vm4, %v5638_v12 }
0x23c3   :  { %v8517_v30 = vpop.f32.mrf.mxu0 }
0x23c4   :  { %v5449_v2 = vadd.f32 %v11304_v36, %v8517_v30 }
0x23c5   :  { %v5440_v6 = vpop.f32.mrf.mxu0 }
0x23c6   :  { %v5441_v26 = vadd.f32 %v11291_v51, %v5440_v6  ;;  %v5460_v32 = vsel %vm4036_vm9, %v5449_v2, -inf }
0x23c7   :  { %v8518_v20 = vpop.f32.mrf.mxu0 }
0x23c8   :  { %v5454_v13 = vsel %vm4029_vm8, %v5441_v26, -inf }
0x23c9   :  { %v5443_v22 = vpop.f32.mrf.mxu0  ;;  %5455 = vmax.xlane.f32.xlu1 %v5454_v13 }
0x23ca   :  { %v5444_v45 = vadd.f32 %v11298_v42, %v5443_v22 }
0x23cc   :  { %v5457_v33 = vsel %vm4029_vm8, %v5444_v45, -inf }
0x23cd   :  { %v8545_v29 = vpop.f32.mrf.mxu1  ;;  %5458 = vmax.xlane.f32.xlu0 %v5457_v33 }
0x23ce   :  { %v5698_v48 = vadd.f32 %v11304_v36, %v8545_v29 }
0x23cf   :  { %v5689_v31 = vpop.f32.mrf.mxu1 }
0x23d0   :  { %v5690_v28 = vadd.f32 %v11291_v51, %v5689_v31  ;;  %v5709_v54 = vsel %vm4036_vm9, %v5698_v48, -inf }
0x23d1   :  { %v8546_v40 = vpop.f32.mrf.mxu1  ;;  %5461 = vmax.xlane.f32.xlu0 %v5460_v32 }
0x23d2   :  { %v5703_v38 = vsel %vm4029_vm8, %v5690_v28, -inf }
0x23d3   :  { %v5692_v17 = vpop.f32.mrf.mxu1 }
0x23d4   :  { %v5693_v60 = vadd.f32 %v11298_v42, %v5692_v17 }
0x23d6   :  { %v5706_v37 = vsel %vm4029_vm8, %v5693_v60, -inf }
0x2452   :  { %v5456_v49 = vpop.xlane.xlu1 %5455 }
0x2453   :  { %v5463_v9 = vsub.f32 %v5441_v26, %v5456_v49 }
0x2455   :  { %v5466_v46 = vmul.f32 1.442695, %v5463_v9 }
0x2456   :  { %v5459_v47 = vpop.xlane.xlu0 %5458 }
0x2457   :  { %9150 = vpow2.f32 %v5466_v46  ;;  %v5464_v43 = vsub.f32 %v5444_v45, %v5459_v47 }
0x2459   :  { %v5468_v63 = vmul.f32 1.442695, %v5464_v43 }
0x245a   :  { %v5462_v16 = vpop.xlane.xlu0 %5461 }
0x245b   :  { %9152 = vpow2.f32 %v5468_v63  ;;  %v5465_v50 = vsub.f32 %v5449_v2, %v5462_v16 }
0x245d   :  { %v5470_v53 = vmul.f32 1.442695, %v5465_v50 }
0x245f   :  { %9154 = vpow2.f32 %v5470_v53 }
0x2464   :  { %v9151_v56 = vpop.eup %9150 }
0x2465   :  { %v5472_v61 = vsel %vm4029_vm8, %v9151_v56, 0.0 }
0x2466   :  { %5473 = vadd.xlane.f32.xlu1 %v5472_v61 }
0x2468   :  { %v9153_v5 = vpop.eup %9152 }
0x2469   :  { %v5475_v59 = vsel %vm4029_vm8, %v9153_v5, 0.0 }
0x246a   :  { %5476 = vadd.xlane.f32.xlu0 %v5475_v59 }
0x246c   :  { %v9155_v21 = vpop.eup %9154 }
0x246d   :  { %v5478_v10 = vsel %vm4036_vm9, %v9155_v21, 0.0 }
0x246e   :  { %5479 = vadd.xlane.f32.xlu1 %v5478_v10 }
0x247f   :  { %5884 = vrot.lane.b32.xlu1 %v11260_v8, %s9246_s15 }
0x2480   :  { %5886 = vrot.lane.b32.xlu0 %v11256_v55, %s9246_s15 }
0x2483   :  { %5880 = vrot.lane.b32.xlu1 %v11260_v8, %s9245_s14 }
0x2484   :  { %5882 = vrot.lane.b32.xlu0 %v11256_v55, %s9245_s14 }
0x24a3   :  { %5707 = vmax.xlane.f32.xlu0 %v5706_v37 }
0x24a7   :  { %5710 = vmax.xlane.f32.xlu0 %v5709_v54  ;;  %5704 = vmax.xlane.f32.xlu1 %v5703_v38 }
0x24ef   :  { %v5474_v34 = vpop.xlane.xlu1 %5473 }
0x24f0   :  { %9156 = vrcp.f32 %v5474_v34 }
0x24f3   :  { %v5477_v41 = vpop.xlane.xlu0 %5476 }
0x24f4   :  { %9158 = vrcp.f32 %v5477_v41  ;;  %v8846_v41 = vld [vmem:[%s11613_s2 + $0x1e0] sm:$0xff]  }
0x24f7   :  { %v5480_v39 = vpop.xlane.xlu1 %5479  ;;  %v5887_v24 = vpop.permute.xlu0 %5886 }
0x24f8   :  { %9160 = vrcp.f32 %v5480_v39  ;;  %v5898_v12 = vsel %vm233_vm4, %v5887_v24, 0 }
0x24fb   :  { %v5885_v35 = vpop.permute.xlu1 %5884  ;;  %v5883_v26 = vpop.permute.xlu0 %5882 }
0x24fc   :  { %v5895_v6 = vsel %vm233_vm4, %v5885_v35, 0 }
0x24fd   :  { %v9157_v3 = vpop.eup %9156 }
0x24fe   :  { %v5484_v14 = vmul.f32 %v9157_v3, %v9151_v56  ;;  %v8847_v3 = vld [vmem:[%s11613_s2 + $0x1d8] sm:$0xff]  }
0x24ff   :  { %v5881_v30 = vpop.permute.xlu1 %5880 }
0x2501   :  { %v9159_v11 = vpop.eup %9158 }
0x2502   :  { %v5485_v44 = vmul.f32 %v9159_v11, %v9153_v5  ;;  %v8848_v11 = vld [vmem:[%s11613_s2 + $0x1d0] sm:$0xff]  }
0x2504   :  { %v5567_v23 = vpack.c.bf16 %v5485_v44, %v5484_v14 }
0x2505   :  { %v9161_v62 = vpop.eup %9160 }
0x2506   :  { %v5486_v18 = vmul.f32 %v9161_v62, %v9155_v21  ;;  %8535 = vmatprep.mubr.msk.bf16.mxu0 %vm4029_vm8, %v5567_v23  ;;  %v8849_v62 = vld [vmem:[%s11613_s2 + $0x1c8] sm:$0xff]  }
0x2508   :  { %v5568_v15 = vpack.c.bf16 %v5486_v18, %v5486_v18 }
0x250a   :  { %8536 = vmatmul.mubr.msk.bf16.vlgmr.msra.gmra.mxu0 %vm4029_vm8, %v5568_v15 }
0x250b   :  { %8548 = vmatpush3.bf16.msra.mxu0 %v8842_v52  ;;  %8555 = vmatprep.mubr.msk.bf16.mxu0 %vm154_vm3, %v11237_v57 }
0x250c   :  { %8549 = vmatprep.subr.bf16.mxu0 %v8843_v1 }
0x250f   :  { %8550 = vmatpush3.bf16.msra.mxu0 %v8843_v1 }
0x2510   :  { %8551 = vmatprep.subr.bf16.mxu0 %v8844_v25 }
0x2513   :  { %8552 = vmatpush3.bf16.msra.mxu0 %v8844_v25 }
0x2514   :  { %8553 = vmatprep.subr.bf16.mxu0 %v8845_v58 }
0x2517   :  { %8554 = vmatpush3.bf16.msra.mxu0 %v8845_v58 }
0x2518   :  { %8715 = vmatprep.subr.msk.bf16.mxu0 %vm233_vm4, %v5887_v24 }
0x251a   :  { %8556 = vmatmul.mubr.msk.bf16.vlgmr.msra.gmra.mxu0 %vm154_vm3, %v11247_v19 }
0x251b   :  { %8568 = vmatpush3.bf16.xpose.msra.mxu0 %v5898_v12  ;;  %8571 = vmatprep.mubr.msk.bf16.mxu0 %vm233_vm4, %v5881_v30 }
0x251c   :  { %8716 = vmatprep.subr.msk.bf16.mxu0 %vm233_vm4, %v5885_v35 }
0x2523   :  { %8570 = vmatpush3.bf16.xpose.msra.mxu0 %v5895_v6 }
0x252a   :  { %8572 = vmatmul.mubr.msk.bf16.vlgmr.msra.gmra.mxu0 %vm233_vm4, %v5883_v26 }
0x252c   :  { %v5708_v20 = vpop.xlane.xlu0 %5707 }
0x252d   :  { %v5713_v13 = vsub.f32 %v5693_v60, %v5708_v20 }
0x252f   :  { %v5717_v22 = vmul.f32 1.442695, %v5713_v13 }
0x2530   :  { %v5711_v45 = vpop.xlane.xlu0 %5710  ;;  %v5705_v2 = vpop.xlane.xlu1 %5704 }
0x2531   :  { %9162 = vpow2.f32 %v5717_v22  ;;  %v5714_v33 = vsub.f32 %v5698_v48, %v5711_v45  ;;  %v5712_v29 = vsub.f32 %v5690_v28, %v5705_v2 }
0x2533   :  { %v5715_v31 = vmul.f32 1.442695, %v5712_v29  ;;  %v5719_v32 = vmul.f32 1.442695, %v5714_v33 }
0x2535   :  { %9164 = vpow2.f32 %v5715_v31 }
0x2536   :  { %9166 = vpow2.f32 %v5719_v32 }
0x253e   :  { %v9163_v40 = vpop.eup %9162 }
0x253f   :  { %v5724_v49 = vsel %vm4029_vm8, %v9163_v40, 0.0 }
0x2540   :  { %5725 = vadd.xlane.f32.xlu0 %v5724_v49 }
0x2542   :  { %v9165_v9 = vpop.eup %9164 }
0x2543   :  { %v5721_v46 = vsel %vm4029_vm8, %v9165_v9, 0.0  ;;  %v9167_v47 = vpop.eup %9166 }
0x2544   :  { %5722 = vadd.xlane.f32.xlu1 %v5721_v46  ;;  %v5727_v43 = vsel %vm4036_vm9, %v9167_v47, 0.0 }
0x2548   :  { %5728 = vadd.xlane.f32.xlu1 %v5727_v43 }
0x2556   :  { %6131 = vrot.lane.b32.xlu0 %v11256_v55, %s9248_s25 }
0x2559   :  { %6129 = vrot.lane.b32.xlu1 %v11260_v8, %s9248_s25  ;;  %s9249_s25 = smov [#allocation2]  }
0x255a   :  { %6127 = vrot.lane.b32.xlu0 %v11256_v55, %s9247_s24  ;;  %s6989_s13 = sshll.u32 %s9249_s25, 4  ;;  %s6990_s13 = int_to_ptr.vmem [resolvable:$true] %s6989_s13 }
0x255b   :  { %p9223_p1 = scmp.lt.s32.totalorder %s6990_s13, %s6990_s13 }
0x255d   :  { %6125 = vrot.lane.b32.xlu1 %v11260_v8, %s9247_s24 }
0x25c9   :  { %v5726_v63 = vpop.xlane.xlu0 %5725 }
0x25ca   :  { %v11361_v16 = vpop.f32.mrf.mxu0  ;;  %9168 = vrcp.f32 %v5726_v63 }
0x25cc   :  { %v11363_v50 = vpop.f32.mrf.mxu0 }
0x25cd   :  { %v5723_v53 = vpop.xlane.xlu1 %5722  ;;  %v6132_v12 = vpop.permute.xlu0 %6131 }
0x25ce   :  { %v8538_v56 = vpop.f32.mrf.mxu0  ;;  %9170 = vrcp.f32 %v5723_v53  ;;  %v6143_v30 = vsel %vm233_vm4, %v6132_v12, 0 }
0x25cf   :  { %v7264_v56 = vld [vmem:[%s11614_s3 + $0x60] ss:$0 sm:$0xff] }
0x25d0   :  { %v11365_v5 = vpop.f32.mrf.mxu0 }
0x25d1   :  { %v5729_v61 = vpop.xlane.xlu1 %5728  ;;  %v6128_v13 = vpop.permute.xlu0 %6127 }
0x25d2   :  { %9172 = vrcp.f32 %v5729_v61  ;;  %v5634_v61 = vadd.f32 %v11361_v16, %v7264_v56 }
0x25d5   :  { %v6130_v58 = vpop.permute.xlu1 %6129 }
0x25d6   :  { %v6140_v20 = vsel %vm233_vm4, %v6130_v58, 0 }
0x25d7   :  { %v9169_v59 = vpop.eup %9168 }
0x25d8   :  { %v5734_v60 = vmul.f32 %v9169_v59, %v9163_v40 }
0x25d9   :  { %v6126_v26 = vpop.permute.xlu1 %6125 }
0x25da   :  { %v8557_v21 = vpop.f32.mrf.mxu0 }
0x25db   :  { %v5819_v10 = vpack.c.bf16 %v8557_v21, %v8557_v21  ;;  %v9171_v55 = vpop.eup %9170  ;;  %v5632_v21 = vadd.f32 %v7264_v56, %v11363_v50 }
0x25dc   :  { %v5802_v52 = vpop.f32.mrf.mxu0  ;;  %v5733_v17 = vmul.f32 %v9171_v55, %v9165_v9 }
0x25dd   :  { %v5827_v8 = vsel %vm4154_vm7, %v5819_v10, 0  ;;  %8714 = vmatprep.subr.msk.bf16.mxu1 %vm4154_vm7, %v5819_v10 }
0x25de   :  { %v8558_v48 = vpop.f32.mrf.mxu0  ;;  %8560 = vmatpush3.bf16.msra.mxu1 %v5827_v8  ;;  %v5816_v28 = vpack.c.bf16 %v5734_v60, %v5733_v17  ;;  %v5633_v17 = vadd.f32 %v7264_v56, %v11365_v5 }
0x25df   :  { %v9173_v37 = vpop.eup %9172 }
0x25e0   :  { %v5805_v54 = vpop.f32.mrf.mxu0  ;;  %v5735_v38 = vmul.f32 %v9173_v37, %v9167_v47  ;;  %8563 = vmatprep.mubr.msk.bf16.mxu1 %vm4029_vm8, %v5816_v28 }
0x25e1   :  { %v5818_v34 = vpack.c.bf16 %v5805_v54, %v5802_v52 }
0x25e2   :  { %v5817_v39 = vpack.c.bf16 %v5735_v38, %v5735_v38 }
0x25e3   :  { %8561 = vmatprep.subr.bf16.mxu1 %v5818_v34 }
0x25e4   :  { %8562 = vmatpush3.bf16.msra.mxu1 %v5818_v34 }
0x25e5   :  { %8575 = vmatprep.subr.bf16.mxu1 %v8846_v41 }
0x25e7   :  { %8564 = vmatmul.mubr.msk.bf16.vlgmr.msra.gmra.mxu1 %vm4029_vm8, %v5817_v39 }
0x25e8   :  { %8576 = vmatpush3.bf16.msra.mxu1 %v8846_v41  ;;  %8583 = vmatprep.mubr.msk.bf16.mxu1 %vm154_vm3, %v11237_v57  ;;  %v8850_v41 = vld [vmem:[%s11613_s2 + $0x200] sm:$0xff]  }
0x25e9   :  { %8577 = vmatprep.subr.bf16.mxu1 %v8847_v3 }
0x25ea   :  { %v8573_v14 = vpop.f32.mrf.mxu0 }
0x25eb   :  { %v5943_v35 = vadd.f32 %v11304_v36, %v8573_v14 }
0x25ec   :  { %v5934_v44 = vpop.f32.mrf.mxu0  ;;  %8578 = vmatpush3.bf16.msra.mxu1 %v8847_v3 }
0x25ed   :  { %v5935_v23 = vadd.f32 %v11291_v51, %v5934_v44  ;;  %8579 = vmatprep.subr.bf16.mxu1 %v8848_v11  ;;  %v5954_v6 = vsel %vm4036_vm9, %v5943_v35, -inf }
0x25ee   :  { %v8574_v18 = vpop.f32.mrf.mxu0 }
0x25ef   :  { %v5948_v15 = vsel %vm4029_vm8, %v5935_v23, -inf }
0x25f0   :  { %v5937_v1 = vpop.f32.mrf.mxu0  ;;  %5949 = vmax.xlane.f32.xlu1 %v5948_v15  ;;  %8580 = vmatpush3.bf16.msra.mxu1 %v8848_v11 }
0x25f1   :  { %v5938_v25 = vadd.f32 %v11298_v42, %v5937_v1  ;;  %8581 = vmatprep.subr.bf16.mxu1 %v8849_v62 }
0x25f3   :  { %v5951_v24 = vsel %vm4029_vm8, %v5938_v25, -inf }
0x25f4   :  { %5952 = vmax.xlane.f32.xlu0 %v5951_v24  ;;  %8582 = vmatpush3.bf16.msra.mxu1 %v8849_v62 }
0x25f5   :  { %8718 = vmatprep.subr.msk.bf16.mxu1 %vm233_vm4, %v6132_v12 }
0x25f7   :  { %8584 = vmatmul.mubr.msk.bf16.vlgmr.msra.gmra.mxu1 %vm154_vm3, %v11247_v19 }
0x25f8   :  { %5955 = vmax.xlane.f32.xlu0 %v5954_v6  ;;  %8596 = vmatpush3.bf16.xpose.msra.mxu1 %v6143_v30 }
0x25f9   :  { %8599 = vmatprep.mubr.msk.bf16.mxu1 %vm233_vm4, %v6126_v26  ;;  %8719 = vmatprep.subr.msk.bf16.mxu1 %vm233_vm4, %v6130_v58  ;;  %v8851_v26 = vld [vmem:[%s11613_s2 + $0x1f8] sm:$0xff]  }
0x2600   :  { %8598 = vmatpush3.bf16.xpose.msra.mxu1 %v6140_v20  ;;  %v8852_v20 = vld [vmem:[%s11613_s2 + $0x1f0] sm:$0xff]  }
0x2607   :  { %8600 = vmatmul.mubr.msk.bf16.vlgmr.msra.gmra.mxu1 %vm233_vm4, %v6128_v13  ;;  %v8853_v13 = vld [vmem:[%s11613_s2 + $0x1e8] sm:$0xff]  }
0x2679   :  { %v5950_v22 = vpop.xlane.xlu1 %5949 }
0x267a   :  { %v5957_v45 = vsub.f32 %v5935_v23, %v5950_v22 }
0x267c   :  { %v5960_v2 = vmul.f32 1.442695, %v5957_v45 }
0x267d   :  { %v5953_v33 = vpop.xlane.xlu0 %5952 }
0x267e   :  { %9174 = vpow2.f32 %v5960_v2  ;;  %v5958_v29 = vsub.f32 %v5938_v25, %v5953_v33 }
0x2680   :  { %v5962_v31 = vmul.f32 1.442695, %v5958_v29 }
0x2681   :  { %v5956_v32 = vpop.xlane.xlu0 %5955 }
0x2682   :  { %9176 = vpow2.f32 %v5962_v31  ;;  %v5959_v40 = vsub.f32 %v5943_v35, %v5956_v32 }
0x2684   :  { %v5964_v49 = vmul.f32 1.442695, %v5959_v40 }
0x2686   :  { %9178 = vpow2.f32 %v5964_v49 }
0x268b   :  { %v9175_v9 = vpop.eup %9174 }
0x268c   :  { %v5966_v46 = vsel %vm4029_vm8, %v9175_v9, 0.0 }
0x268d   :  { %5967 = vadd.xlane.f32.xlu1 %v5966_v46 }
0x268f   :  { %v9177_v47 = vpop.eup %9176 }
0x2690   :  { %v5969_v43 = vsel %vm4029_vm8, %v9177_v47, 0.0 }
0x2691   :  { %5970 = vadd.xlane.f32.xlu0 %v5969_v43 }
0x2693   :  { %v9179_v63 = vpop.eup %9178 }
0x2694   :  { %v5972_v53 = vsel %vm4036_vm9, %v9179_v63, 0.0 }
0x2695   :  { %5973 = vadd.xlane.f32.xlu1 %v5972_v53 }
0x26a7   :  { %v8565_v59 = vpop.f32.mrf.mxu1 }
0x26a8   :  { %v11407_v10 = vadd.f32 %v8565_v59, %v5634_v61 }
0x26a9   :  { %v5863_v55 = vpop.f32.mrf.mxu1 }
0x26aa   :  { %v11409_v52 = vadd.f32 %v5863_v55, %v5632_v21 }
0x26ab   :  { %v8566_v8 = vpop.f32.mrf.mxu1 }
0x26ad   :  { %v5866_v60 = vpop.f32.mrf.mxu1 }
0x26ae   :  { %v11412_v48 = vadd.f32 %v5866_v60, %v5633_v17 }
0x26b7   :  { %v8585_v28 = vpop.f32.mrf.mxu1 }
0x26b8   :  { %v6064_v37 = vpack.c.bf16 %v8585_v28, %v8585_v28 }
0x26b9   :  { %v6047_v54 = vpop.f32.mrf.mxu1 }
0x26ba   :  { %v6072_v38 = vsel %vm4154_vm7, %v6064_v37, 0  ;;  %8717 = vmatprep.subr.msk.bf16.mxu0 %vm4154_vm7, %v6064_v37 }
0x26bb   :  { %v8586_v16 = vpop.f32.mrf.mxu1  ;;  %8588 = vmatpush3.bf16.msra.mxu0 %v6072_v38 }
0x26bd   :  { %v6050_v50 = vpop.f32.mrf.mxu1 }
0x26be   :  { %v6063_v34 = vpack.c.bf16 %v6050_v50, %v6047_v54 }
0x26c0   :  { %8589 = vmatprep.subr.bf16.mxu0 %v6063_v34 }
0x26c1   :  { %8590 = vmatpush3.bf16.msra.mxu0 %v6063_v34 }
0x26c2   :  { %8603 = vmatprep.subr.bf16.mxu0 %v8850_v41 }
0x26c7   :  { %v8601_v5 = vpop.f32.mrf.mxu1 }
0x26c8   :  { %v6188_v14 = vadd.f32 %v11304_v36, %v8601_v5 }
0x26c9   :  { %v6179_v39 = vpop.f32.mrf.mxu1 }
0x26ca   :  { %v6180_v3 = vadd.f32 %v11291_v51, %v6179_v39  ;;  %v6199_v18 = vsel %vm4036_vm9, %v6188_v14, -inf }
0x26cb   :  { %v8602_v11 = vpop.f32.mrf.mxu1 }
0x26cc   :  { %v6193_v44 = vsel %vm4029_vm8, %v6180_v3, -inf }
0x26cd   :  { %v6182_v23 = vpop.f32.mrf.mxu1  ;;  %6194 = vmax.xlane.f32.xlu0 %v6193_v44 }
0x26ce   :  { %v6183_v62 = vadd.f32 %v11298_v42, %v6182_v23 }
0x26d0   :  { %v6196_v15 = vsel %vm4029_vm8, %v6183_v62, -inf }
0x26d1   :  { %6200 = vmax.xlane.f32.xlu0 %v6199_v18  ;;  %6197 = vmax.xlane.f32.xlu1 %v6196_v15 }
0x2716   :  { %v5968_v1 = vpop.xlane.xlu1 %5967 }
0x2717   :  { %9180 = vrcp.f32 %v5968_v1 }
0x271a   :  { %v5971_v25 = vpop.xlane.xlu0 %5970 }
0x271b   :  { %9182 = vrcp.f32 %v5971_v25 }
0x271e   :  { %v5974_v51 = vpop.xlane.xlu1 %5973 }
0x271f   :  { %9184 = vrcp.f32 %v5974_v51 }
0x2724   :  { %v9181_v58 = vpop.eup %9180 }
0x2725   :  { %v5978_v35 = vmul.f32 %v9181_v58, %v9175_v9 }
0x2728   :  { %v9183_v36 = vpop.eup %9182 }
0x2729   :  { %v5979_v24 = vmul.f32 %v9183_v36, %v9177_v47 }
0x272b   :  { %v6061_v12 = vpack.c.bf16 %v5979_v24, %v5978_v35 }
0x272c   :  { %v9185_v30 = vpop.eup %9184 }
0x272d   :  { %v5980_v6 = vmul.f32 %v9185_v30, %v9179_v63  ;;  %8591 = vmatprep.mubr.msk.bf16.mxu0 %vm4029_vm8, %v6061_v12 }
0x272f   :  { %v6062_v42 = vpack.c.bf16 %v5980_v6, %v5980_v6 }
0x2731   :  { %8592 = vmatmul.mubr.msk.bf16.vlgmr.msra.gmra.mxu0 %vm4029_vm8, %v6062_v42  ;;  %v8854_v42 = vld [vmem:[%s11612_s1 + $0xf8] sm:$0xff]  }
0x2732   :  { %8604 = vmatpush3.bf16.msra.mxu0 %v8850_v41  ;;  %8611 = vmatprep.mubr.msk.bf16.mxu0 %vm154_vm3, %v11237_v57 }
0x2733   :  { %8605 = vmatprep.subr.bf16.mxu0 %v8851_v26 }
0x2736   :  { %8606 = vmatpush3.bf16.msra.mxu0 %v8851_v26  ;;  %v8855_v26 = vld [vmem:[%s11612_s1 + $0xf0] sm:$0xff]  }
0x2737   :  { %8607 = vmatprep.subr.bf16.mxu0 %v8852_v20 }
0x273a   :  { %8608 = vmatpush3.bf16.msra.mxu0 %v8852_v20  ;;  %v8856_v20 = vld [vmem:[%s11612_s1 + $0xe8] sm:$0xff]  }
0x273b   :  { %8609 = vmatprep.subr.bf16.mxu0 %v8853_v13 }
0x273e   :  { %8610 = vmatpush3.bf16.msra.mxu0 %v8853_v13  ;;  %v8857_v13 = vld [vmem:[%s11612_s1 + $0xe0] sm:$0xff]  }
0x273f   :  { %8623 = vmatprep.subr.bf16.mxu0 %v8854_v42 }
0x2741   :  { %8612 = vmatmul.mubr.msk.bf16.vlgmr.msra.gmra.mxu0 %vm154_vm3, %v11247_v19 }
0x2742   :  { %8624 = vmatpush3.bf16.msra.mxu0 %v8854_v42 }
0x2743   :  { %8625 = vmatprep.subr.bf16.mxu0 %v8855_v26 }
0x2746   :  { %8626 = vmatpush3.bf16.msra.mxu0 %v8855_v26 }
0x2747   :  { %8627 = vmatprep.subr.bf16.mxu0 %v8856_v20 }
0x274a   :  { %8628 = vmatpush3.bf16.msra.mxu0 %v8856_v20  ;;  %v7304_v20 = vld [vmem:[%s11614_s3 + $0xe0] ss:$0 sm:$0xff] }
0x274b   :  { %8629 = vmatprep.subr.bf16.mxu0 %v8857_v13 }
0x274e   :  { %8630 = vmatpush3.bf16.msra.mxu0 %v8857_v13 }
0x274f   :  { %8655 = vmatprep.subr.mxu0 %v9240_v0 }
0x2756   :  { %v6195_v22 = vpop.xlane.xlu0 %6194 }
0x2757   :  { %v6202_v45 = vsub.f32 %v6180_v3, %v6195_v22  ;;  %v8858_v22 = vld [vmem:[%s11613_s2 + $0x300] sm:$0xff]  }
0x2759   :  { %v6205_v57 = vmul.f32 1.442695, %v6202_v45  ;;  %v8859_v45 = vld [vmem:[%s11613_s2 + $0x2f8] sm:$0xff]  }
0x275a   :  { %v6201_v2 = vpop.xlane.xlu0 %6200  ;;  %v6198_v33 = vpop.xlane.xlu1 %6197 }
0x275b   :  { %9186 = vpow2.f32 %v6205_v57  ;;  %v6204_v29 = vsub.f32 %v6188_v14, %v6201_v2  ;;  %v6203_v31 = vsub.f32 %v6183_v62, %v6198_v33  ;;  %v8860_v57 = vld [vmem:[%s11613_s2 + $0x2f0] sm:$0xff]   ;;  %v8861_v2 = vld [vmem:[%s11613_s2 + $0x2e8] sm:$0xff]   ;;  %v8862_v33 = vld [vmem:[%s11613_s2 + $0x2e0] sm:$0xff]  }
0x275d   :  { %v6209_v32 = vmul.f32 1.442695, %v6204_v29  ;;  %v6207_v40 = vmul.f32 1.442695, %v6203_v31 }
0x275f   :  { %9188 = vpow2.f32 %v6209_v32 }
0x2760   :  { %9190 = vpow2.f32 %v6207_v40 }
0x2768   :  { %v9187_v49 = vpop.eup %9186 }
0x2769   :  { %v6211_v9 = vsel %vm4029_vm8, %v9187_v49, 0.0 }
0x276a   :  { %6212 = vadd.xlane.f32.xlu1 %v6211_v9 }
0x276c   :  { %v9189_v46 = vpop.eup %9188 }
0x276d   :  { %v9191_v47 = vpop.eup %9190  ;;  %v6217_v19 = vsel %vm4036_vm9, %v9189_v46, 0.0 }
0x276e   :  { %6218 = vadd.xlane.f32.xlu1 %v6217_v19  ;;  %v6214_v43 = vsel %vm4029_vm8, %v9191_v47, 0.0 }
0x276f   :  { %6215 = vadd.xlane.f32.xlu0 %v6214_v43 }
0x27f1   :  { %v8593_v63 = vpop.f32.mrf.mxu0 }
0x27f2   :  { %v6124_v53 = vadd.f32 %v8593_v63, %v11407_v10 }
0x27f3   :  { %v6108_v56 = vpop.f32.mrf.mxu0  ;;  %v6213_v61 = vpop.xlane.xlu1 %6212 }
0x27f4   :  { %v6122_v59 = vadd.f32 %v6108_v56, %v11409_v52  ;;  %9192 = vrcp.f32 %v6213_v61 }
0x27f5   :  { %v8594_v21 = vpop.f32.mrf.mxu0 }
0x27f7   :  { %v6111_v55 = vpop.f32.mrf.mxu0  ;;  %v6219_v8 = vpop.xlane.xlu1 %6218 }
0x27f8   :  { %v6123_v17 = vadd.f32 %v6111_v55, %v11412_v48  ;;  %v6216_v60 = vpop.xlane.xlu0 %6215  ;;  %9194 = vrcp.f32 %v6219_v8 }
0x27f9   :  { %9196 = vrcp.f32 %v6216_v60 }
0x2801   :  { %v8613_v28 = vpop.f32.mrf.mxu0  ;;  %v9193_v38 = vpop.eup %9192 }
0x2802   :  { %v6309_v37 = vpack.c.bf16 %v8613_v28, %v8613_v28  ;;  %v6223_v41 = vmul.f32 %v9193_v38, %v9187_v49 }
0x2803   :  { %v6292_v54 = vpop.f32.mrf.mxu0 }
0x2804   :  { %v6317_v16 = vsel %vm4154_vm7, %v6309_v37, 0  ;;  %8720 = vmatprep.subr.msk.bf16.mxu1 %vm4154_vm7, %v6309_v37 }
0x2805   :  { %v9195_v10 = vpop.eup %9194  ;;  %v8614_v50 = vpop.f32.mrf.mxu0  ;;  %8616 = vmatpush3.bf16.msra.mxu1 %v6317_v16  ;;  %v7295_v16 = vld [vmem:[%s11614_s3 + $0x80] ss:$0 sm:$0xff] }
0x2806   :  { %v9197_v52 = vpop.eup %9196  ;;  %v6225_v39 = vmul.f32 %v9195_v10, %v9189_v46 }
0x2807   :  { %v6295_v34 = vpop.f32.mrf.mxu0  ;;  %v6224_v5 = vmul.f32 %v9197_v52, %v9191_v47 }
0x2808   :  { %v6308_v48 = vpack.c.bf16 %v6295_v34, %v6292_v54  ;;  %v6307_v11 = vpack.c.bf16 %v6225_v39, %v6225_v39  ;;  %v7296_v39 = vld [vmem:[%s11614_s3 + $0xa0] ss:$0 sm:$0xff] }
0x2809   :  { %v6306_v3 = vpack.c.bf16 %v6224_v5, %v6223_v41 }
0x280a   :  { %8617 = vmatprep.subr.bf16.mxu1 %v6308_v48 }
0x280b   :  { %8618 = vmatpush3.bf16.msra.mxu1 %v6308_v48  ;;  %8619 = vmatprep.mubr.msk.bf16.mxu1 %vm4029_vm8, %v6306_v3 }
0x280c   :  { %8635 = vmatprep.subr.bf16.mxu1 %v8858_v22 }
0x280e   :  { %8620 = vmatmul.mubr.msk.bf16.vlgmr.msra.gmra.mxu1 %vm4029_vm8, %v6307_v11 }
0x280f   :  { %8636 = vmatpush3.bf16.msra.mxu1 %v8858_v22 }
0x2810   :  { %8637 = vmatprep.subr.bf16.mxu1 %v8859_v45 }
0x2813   :  { %8638 = vmatpush3.bf16.msra.mxu1 %v8859_v45 }
0x2814   :  { %8639 = vmatprep.subr.bf16.mxu1 %v8860_v57 }
0x2817   :  { %8640 = vmatpush3.bf16.msra.mxu1 %v8860_v57 }
0x2818   :  { %8641 = vmatprep.subr.bf16.mxu1 %v8861_v2 }
0x281b   :  { %8642 = vmatpush3.bf16.msra.mxu1 %v8861_v2 }
0x281c   :  { %8643 = vmatprep.subr.bf16.mxu1 %v8862_v33 }
0x281f   :  { %8644 = vmatpush3.bf16.msra.mxu1 %v8862_v33 }
0x28ce   :  { %v8621_v14 = vpop.f32.mrf.mxu1 }
0x28cf   :  { %v6369_v44 = vadd.f32 %v8621_v14, %v6124_v53 }
0x28d0   :  { %v6353_v23 = vpop.f32.mrf.mxu1 }
0x28d1   :  { %v11451_v62 = vadd.f32 %v6369_v44, %v11239_v7  ;;  %v6367_v18 = vadd.f32 %v6353_v23, %v6122_v59 }
0x28d2   :  { %v8622_v15 = vpop.f32.mrf.mxu1 }
0x28d3   :  { %v11454_v1 = vadd.f32 %v6367_v18, %v11231_v27  ;;  %v6381_v25 = vsel %vm4959_vm10, %v11451_v62, 0.0  ;;  %v6389_v6 = vmul.f32 %v11451_v62, %v11451_v62 }
0x28d4   :  { %6382 = vadd.xlane.f32.xlu0 %v6381_v25  ;;  %v6356_v51 = vpop.f32.mrf.mxu1  ;;  %v8865_v25 = vld [vmem:[%s11613_s2 + $0x2c8] sm:$0xff]  }
0x28d5   :  { %v6368_v58 = vadd.f32 %v6356_v51, %v6123_v17  ;;  %v6387_v36 = vmul.f32 %v11454_v1, %v11454_v1  ;;  %v6375_v24 = vsel %vm154_vm3, %v11454_v1, 0.0 }
0x28d7   :  { %v11461_v35 = vadd.f32 %v6368_v58, %v11233_v4  ;;  %v6390_v7 = vsel %vm154_vm3, %v6387_v36, 0.0  ;;  %v6396_v4 = vsel %vm4959_vm10, %v6389_v6, 0.0  ;;  %v7297_v58 = vld [vmem:[%s11614_s3 + $0xc0] ss:$0 sm:$0xff] }
0x28d8   :  { %6391 = vadd.xlane.f32.xlu1 %v6390_v7  ;;  %6376 = vadd.xlane.f32.xlu0 %v6375_v24 }
0x28d9   :  { %v6388_v27 = vmul.f32 %v11461_v35, %v11461_v35  ;;  %v6378_v30 = vsel %vm154_vm3, %v11461_v35, 0.0 }
0x28db   :  { %v6393_v12 = vsel %vm154_vm3, %v6388_v27, 0.0 }
0x28dc   :  { %6394 = vadd.xlane.f32.xlu0 %v6393_v12  ;;  %6379 = vadd.xlane.f32.xlu1 %v6378_v30 }
0x28e0   :  { %6397 = vadd.xlane.f32.xlu1 %v6396_v4 }
0x295d   :  { %v6383_v29 = vpop.xlane.xlu0 %6382 }
0x295e   :  { %v6386_v19 = vmul.f32 0.015625, %v6383_v29 }
0x2960   :  { %v6407_v21 = vmul.f32 %v6386_v19, %v6386_v19  ;;  %v6404_v52 = vsub.f32 %v11451_v62, %v6386_v19  ;;  %v8863_v62 = vld [vmem:[%s11613_s2 + $0x2d8] sm:$0xff]  }
0x2961   :  { %v6392_v31 = vpop.xlane.xlu1 %6391  ;;  %v6377_v32 = vpop.xlane.xlu0 %6376  ;;  %8645 = vmatprep.subr.bf16.mxu1 %v8863_v62 }
0x2962   :  { %v6384_v40 = vmul.f32 0.015625, %v6377_v32  ;;  %v6399_v49 = vmul.f32 0.015625, %v6392_v31  ;;  %8646 = vmatpush3.bf16.msra.mxu1 %v8863_v62 }
0x2964   :  { %v6405_v9 = vmul.f32 %v6384_v40, %v6384_v40  ;;  %v6402_v37 = vsub.f32 %v11454_v1, %v6384_v40  ;;  %v8864_v1 = vld [vmem:[%s11613_s2 + $0x2d0] sm:$0xff]  }
0x2965   :  { %v6395_v46 = vpop.xlane.xlu0 %6394  ;;  %v6380_v47 = vpop.xlane.xlu1 %6379  ;;  %8647 = vmatprep.subr.bf16.mxu1 %v8864_v1 }
0x2966   :  { %v6408_v43 = vsub.f32 %v6399_v49, %v6405_v9  ;;  %v6385_v63 = vmul.f32 0.015625, %v6380_v47  ;;  %v6400_v56 = vmul.f32 0.015625, %v6395_v46  ;;  %8648 = vmatpush3.bf16.msra.mxu1 %v8864_v1 }
0x2967   :  { %8649 = vmatprep.subr.bf16.mxu1 %v8865_v25 }
0x2968   :  { %v6411_v53 = vadd.f32 1e-05, %v6408_v43  ;;  %v6406_v61 = vmul.f32 %v6385_v63, %v6385_v63  ;;  %v6403_v10 = vsub.f32 %v11461_v35, %v6385_v63 }
0x2969   :  { %v6398_v59 = vpop.xlane.xlu1 %6397 }
0x296a   :  { %9198 = vrsqrt.f32 %v6411_v53  ;;  %v6409_v55 = vsub.f32 %v6400_v56, %v6406_v61  ;;  %v6401_v8 = vmul.f32 0.015625, %v6398_v59  ;;  %8650 = vmatpush3.bf16.msra.mxu1 %v8865_v25 }
0x296b   :  { %8676 = vmatprep.subr.bf16.mxu1 %v9240_v0 }
0x296c   :  { %v6412_v17 = vadd.f32 1e-05, %v6409_v55  ;;  %v6410_v60 = vsub.f32 %v6401_v8, %v6407_v21 }
0x296e   :  { %9200 = vrsqrt.f32 %v6412_v17  ;;  %v6413_v28 = vadd.f32 1e-05, %v6410_v60 }
0x2970   :  { %9202 = vrsqrt.f32 %v6413_v28 }
0x2977   :  { %v9199_v54 = vpop.eup %9198 }
0x2978   :  { %v6417_v38 = vmul.f32 %v9199_v54, %v6402_v37 }
0x297a   :  { %v6424_v34 = vmul.f32 %v7295_v16, %v6417_v38 }
0x297b   :  { %v9201_v50 = vpop.eup %9200 }
0x297c   :  { %v6418_v41 = vmul.f32 %v9201_v50, %v6403_v10  ;;  %v6431_v11 = vadd.f32 %v7296_v39, %v6424_v34 }
0x297d   :  { %v9203_v5 = vpop.eup %9202 }
0x297e   :  { %v6425_v48 = vmul.f32 %v7295_v16, %v6418_v41  ;;  %v6419_v3 = vmul.f32 %v9203_v5, %v6404_v52 }
0x2980   :  { %v6432_v14 = vadd.f32 %v7296_v39, %v6425_v48  ;;  %v6426_v44 = vmul.f32 %v7295_v16, %v6419_v3 }
0x2982   :  { %v6443_v23 = vpack.c.bf16 %v6432_v14, %v6431_v11  ;;  %v6433_v18 = vadd.f32 %v7296_v39, %v6426_v44  ;;  %v7313_v44 = vld [vmem:[%s11614_s3 + $0x100] ss:$0 sm:$0xff] }
0x2984   :  { %8631 = vmatprep.mubr.msk.bf16.mxu0 %vm154_vm3, %v6443_v23  ;;  %v6444_v15 = vpack.c.bf16 %v6433_v18, %v6433_v18 }
0x2986   :  { %8632 = vmatmul.mubr.msk.bf16.vlgmr.msra.gmra.mxu0 %vm154_vm3, %v6444_v15 }
0x2987   :  { %8661 = vmatprep.mubr.msk.f32.mxu0 %vm9241_vm1, %v9240_v0 }
0x2a46   :  { %v8633_v51 = vpop.f32.mrf.mxu0 }
0x2a47   :  { %v6522_v35 = vadd.f32 %v8633_v51, %v7297_v58 }
0x2a48   :  { %v6513_v36 = vpop.f32.mrf.mxu0 }
0x2a49   :  { %v6514_v24 = vadd.f32 %v7297_v58, %v6513_v36  ;;  %v6529_v30 = vmax.f32 %v6522_v35, 0.0 }
0x2a4a   :  { %v8634_v7 = vpop.f32.mrf.mxu0 }
0x2a4b   :  { %v6527_v6 = vmax.f32 %v6514_v24, 0.0  ;;  %v6548_v26 = vpack.c.bf16 %v6529_v30, %v6529_v30  ;;  %v6713_v30 = vld [vmem:[%s11614_s3 + $0x180] sm:$0x3] }
0x2a4c   :  { %v6516_v27 = vpop.f32.mrf.mxu0 }
0x2a4d   :  { %v6517_v12 = vadd.f32 %v7297_v58, %v6516_v27 }
0x2a4f   :  { %v6528_v4 = vmax.f32 %v6517_v12, 0.0 }
0x2a51   :  { %v6547_v42 = vpack.c.bf16 %v6528_v4, %v6527_v6  ;;  %v8866_v6 = vld [vmem:[%s11612_s1 + $0x118] sm:$0xff]   ;;  %v8867_v4 = vld [vmem:[%s11612_s1 + $0x110] sm:$0xff]  }
0x2a53   :  { %8651 = vmatprep.mubr.bf16.mxu1 %v6547_v42  ;;  %v8868_v42 = vld [vmem:[%s11612_s1 + $0x108] sm:$0xff]  }
0x2a54   :  { %8652 = vmatmul.mubr.bf16.vlgmr.msra.gmra.mxu1 %v6548_v26  ;;  %v8869_v26 = vld [vmem:[%s11612_s1 + $0x100] sm:$0xff]  }
0x2a55   :  { %8692 = vmatprep.mubr.msk.bf16.mxu1 %vm9241_vm1, %v9240_v0 }
0x2b14   :  { %v8653_v13 = vpop.f32.mrf.mxu1 }
0x2b15   :  { %v6644_v22 = vadd.f32 %v8653_v13, %v7304_v20  ;;  %v8871_v13 = vld [vmem:[%s11612_s1 + $0x150] sm:$0xff]  }
0x2b16   :  { %v6635_v45 = vpop.f32.mrf.mxu1 }
0x2b17   :  { %v6651_v57 = vadd.f32 %v6644_v22, %v6433_v18  ;;  %v6636_v2 = vadd.f32 %v7304_v20, %v6635_v45  ;;  %v7314_v18 = vld [vmem:[%s11614_s3 + $0x120] ss:$0 sm:$0xff]  ;;  %v8872_v22 = vld [vmem:[%s11612_s1 + $0x148] sm:$0xff]  }
0x2b18   :  { %v8654_v33 = vpop.f32.mrf.mxu1  ;;  %v8873_v45 = vld [vmem:[%s11612_s1 + $0x140] sm:$0xff]  }
0x2b19   :  { %v6649_v29 = vadd.f32 %v6636_v2, %v6431_v11  ;;  %v6660_v31 = vsel %vm4959_vm10, %v6651_v57, 0.0  ;;  %v6668_v32 = vmul.f32 %v6651_v57, %v6651_v57  ;;  %v8875_v2 = vld [vmem:[%s11612_s1 + $0x130] sm:$0xff]  }
0x2b1a   :  { %6661 = vadd.xlane.f32.xlu0 %v6660_v31  ;;  %v6638_v40 = vpop.f32.mrf.mxu1 }
0x2b1b   :  { %v6639_v49 = vadd.f32 %v7304_v20, %v6638_v40  ;;  %v6654_v9 = vsel %vm154_vm3, %v6649_v29, 0.0  ;;  %v6675_v47 = vsel %vm4959_vm10, %v6668_v32, 0.0  ;;  %v6666_v63 = vmul.f32 %v6649_v29, %v6649_v29  ;;  %v8870_v20 = vld [vmem:[%s11612_s1 + $0x158] sm:$0xff]   ;;  %v8876_v32 = vld [vmem:[%s11612_s1 + $0x128] sm:$0xff]   ;;  %v8877_v40 = vld [vmem:[%s11612_s1 + $0x120] sm:$0xff]  }
0x2b1c   :  { %6655 = vadd.xlane.f32.xlu1 %v6654_v9  ;;  %8677 = vmatpush3.bf16.msra.mxu1 %v8870_v20 }
0x2b1d   :  { %v6650_v46 = vadd.f32 %v6639_v49, %v6432_v14  ;;  %v6669_v56 = vsel %vm154_vm3, %v6666_v63, 0.0  ;;  %8678 = vmatprep.subr.bf16.mxu1 %v9240_v0  ;;  %v7317_v49 = vld [vmem:[%s11614_s3 + $0x130] ss:$0 sm:$0xff] }
0x2b1e   :  { %6676 = vadd.xlane.f32.xlu0 %v6675_v47 }
0x2b1f   :  { %v6657_v19 = vsel %vm154_vm3, %v6650_v46, 0.0  ;;  %v6667_v43 = vmul.f32 %v6650_v46, %v6650_v46 }
0x2b20   :  { %6658 = vadd.xlane.f32.xlu1 %v6657_v19  ;;  %8679 = vmatpush3.bf16.msra.mxu1 %v8871_v13 }
0x2b21   :  { %v6672_v53 = vsel %vm154_vm3, %v6667_v43, 0.0  ;;  %8680 = vmatprep.subr.bf16.mxu1 %v9240_v0 }
0x2b22   :  { %6673 = vadd.xlane.f32.xlu0 %v6672_v53 }
0x2b24   :  { %6670 = vadd.xlane.f32.xlu1 %v6669_v56  ;;  %8681 = vmatpush3.bf16.msra.mxu1 %v8872_v22 }
0x2b25   :  { %8682 = vmatprep.subr.bf16.mxu1 %v9240_v0 }
0x2b28   :  { %8683 = vmatpush3.bf16.msra.mxu1 %v8873_v45 }
0x2b29   :  { %8684 = vmatprep.subr.bf16.mxu1 %v9240_v0 }
0x2ba3   :  { %v6662_v61 = vpop.xlane.xlu0 %6661 }
0x2ba4   :  { %v6665_v59 = vmul.f32 0.015625, %v6662_v61 }
0x2ba5   :  { %v6656_v21 = vpop.xlane.xlu1 %6655 }
0x2ba6   :  { %v6686_v8 = vmul.f32 %v6665_v59, %v6665_v59  ;;  %v6663_v28 = vmul.f32 0.015625, %v6656_v21  ;;  %v6683_v11 = vsub.f32 %v6651_v57, %v6665_v59  ;;  %v8874_v57 = vld [vmem:[%s11612_s1 + $0x138] sm:$0xff]   ;;  %s9218_s1 = scalar_lea.vmem %s6990_s13, 32 }
0x2ba7   :  { %v6677_v55 = vpop.xlane.xlu0 %6676  ;;  %8685 = vmatpush3.bf16.msra.mxu1 %v8874_v57  ;;  %p9219_p0 = scmp.ne.s32.totalorder %s6990_s13, %s9218_s1  ;;  %p9224_p2 = scmp.lt.s32.totalorder %s9218_s1, %s9218_s1 }
0x2ba8   :  { %v6680_v17 = vmul.f32 0.015625, %v6677_v55  ;;  %v6684_v34 = vmul.f32 %v6663_v28, %v6663_v28  ;;  %v6681_v25 = vsub.f32 %v6649_v29, %v6663_v28  ;;  %8686 = vmatprep.subr.bf16.mxu1 %v9240_v0 }
0x2ba9   :  { %v6659_v60 = vpop.xlane.xlu1 %6658  ;;  %p9225_p3 = por %p9224_p2, %p9223_p1 }
0x2baa   :  { %v6689_v37 = vsub.f32 %v6680_v17, %v6686_v8  ;;  %v6664_v54 = vmul.f32 0.015625, %v6659_v60 }
0x2bab   :  { %v6674_v38 = vpop.xlane.xlu0 %6673  ;;  %8687 = vmatpush3.bf16.msra.mxu1 %v8875_v2  ;;  %p9226_p4 = pnand %p9225_p3, %p9219_p0 }
0x2bac   :  { %v6692_v16 = vadd.f32 1e-05, %v6689_v37  ;;  %v6685_v10 = vmul.f32 %v6664_v54, %v6664_v54  ;;  %v6679_v50 = vmul.f32 0.015625, %v6674_v38  ;;  %v6682_v15 = vsub.f32 %v6650_v46, %v6664_v54  ;;  %8688 = vmatprep.subr.bf16.mxu1 %v9240_v0 }
0x2bad   :  { %v6671_v52 = vpop.xlane.xlu1 %6670 }
0x2bae   :  { %9204 = vrsqrt.f32 %v6692_v16  ;;  %v6688_v41 = vsub.f32 %v6679_v50, %v6685_v10  ;;  %v6678_v5 = vmul.f32 0.015625, %v6671_v52 }
0x2baf   :  { %8689 = vmatpush3.bf16.msra.mxu1 %v8876_v32 }
0x2bb0   :  { %v6691_v39 = vadd.f32 1e-05, %v6688_v41  ;;  %v6687_v48 = vsub.f32 %v6678_v5, %v6684_v34  ;;  %8690 = vmatprep.subr.bf16.mxu1 %v9240_v0 }
0x2bb2   :  { %9206 = vrsqrt.f32 %v6691_v39  ;;  %v6690_v3 = vadd.f32 1e-05, %v6687_v48 }
0x2bb3   :  { %8691 = vmatpush3.bf16.msra.mxu1 %v8877_v40 }
0x2bb4   :  { %9208 = vrsqrt.f32 %v6690_v3 }
0x2bbb   :  { %v9205_v14 = vpop.eup %9204 }
0x2bbc   :  { %v6698_v23 = vmul.f32 %v9205_v14, %v6683_v11 }
0x2bbe   :  { %v6705_v62 = vmul.f32 %v7313_v44, %v6698_v23 }
0x2bbf   :  { %v9207_v1 = vpop.eup %9206 }
0x2bc0   :  { %v6712_v51 = vadd.f32 %v7314_v18, %v6705_v62  ;;  %v6697_v58 = vmul.f32 %v9207_v1, %v6682_v15 }
0x2bc1   :  { %v9209_v36 = vpop.eup %9208 }
0x2bc2   :  { %8656 = vmatpush3.msk.msra.mxu0 %vm467_vm5, %v6712_v51  ;;  %v6704_v35 = vmul.f32 %v7313_v44, %v6697_v58  ;;  %v6696_v7 = vmul.f32 %v9209_v36, %v6681_v25 }
0x2bc3   :  { %8657 = vmatprep.subr.mxu0 %v9240_v0 }
0x2bc4   :  { %v6711_v24 = vadd.f32 %v7314_v18, %v6704_v35  ;;  %v6703_v27 = vmul.f32 %v7313_v44, %v6696_v7 }
0x2bc6   :  { %8658 = vmatpush3.msra.mxu0 %v6711_v24  ;;  %v6710_v12 = vadd.f32 %v7314_v18, %v6703_v27 }
0x2bc7   :  { %8659 = vmatprep.subr.mxu0 %v9240_v0 }
0x2bc8   :  { %8660 = vmatpush3.msra.mxu0 %v6710_v12 }
0x2bc9   :  { %8662 = vmatmul.mubr.msk.f32.vlgmr.msra.gmra.mxu0 %vm4029_vm8, %v6713_v30  ;;  %8664 = vmatprep.subr.bf16.mxu0 %v9240_v0 }
0x2bca   :  { %8665 = vmatpush3.bf16.msra.mxu0 %v8866_v6  ;;  %8672 = vmatprep.mubr.msk.bf16.mxu0 %vm9241_vm1, %v9240_v0 }
0x2bcb   :  { %8666 = vmatprep.subr.bf16.mxu0 %v9240_v0 }
0x2bce   :  { %8667 = vmatpush3.bf16.msra.mxu0 %v8867_v4 }
0x2bcf   :  { %8668 = vmatprep.subr.bf16.mxu0 %v9240_v0 }
0x2bd2   :  { %8669 = vmatpush3.bf16.msra.mxu0 %v8868_v42 }
0x2bd3   :  { %8670 = vmatprep.subr.bf16.mxu0 %v9240_v0  ;;  %v7323_v0 = vld [vmem:[%s11614_s3 + $0x138] ss:$0 sm:$0xff] }
0x2bd6   :  { %8671 = vmatpush3.bf16.msra.mxu0 %v8869_v26 }
0x2c89   :  { %v6786_v33 = vpop.f32.mrf.mxu0 }
0x2c8a   :  { %v6799_v29 = vpack.c.bf16 %v6786_v33, %v6786_v33 }
0x2c8b   :  { %v8663_v31 = vpop.f32.mrf.mxu0 }
0x2c8c   :  { %8673 = vmatmul.mubr.msk.bf16.vlgmr.msra.gmra.mxu0 %vm154_vm3, %v6799_v29 }
0x2d4c   :  { %v6865_v9 = vpop.f32.mrf.mxu0 }
0x2d4d   :  { %v6866_v46 = vadd.f32 %v7317_v49, %v6865_v9 }
0x2d4e   :  { %v8674_v47 = vpop.f32.mrf.mxu0 }
0x2d4f   :  { %v6871_v19 = vmax.f32 %v6866_v46, 0.0 }
0x2d50   :  { %v6868_v43 = vpop.f32.mrf.mxu0 }
0x2d51   :  { %v6889_v63 = vpack.c.bf16 %v6871_v19, %v6871_v19 }
0x2d52   :  { %v8675_v53 = vpop.f32.mrf.mxu0 }
0x2d53   :  { %8693 = vmatmul.mubr.bf16.vlgmr.msra.gmra.mxu1 %v6889_v63 }
0x2e13   :  { %v6976_v56 = vpop.f32.mrf.mxu1 }
0x2e14   :  { %v6977_v61 = vadd.f32 %v7323_v0, %v6976_v56 }
0x2e15   :  { %v8694_v59 = vpop.f32.mrf.mxu1 }
0x2e16   :  { %6982 = vst [vmem:[#allocation2] sm:$0x3] %v6977_v61 }
0x2e17   :  { %v6979_v21 = vpop.f32.mrf.mxu1 }
0x2e18   :  { %9229 = shalt.err (!%p9226_p4)
}
0x2e19   :  { %6992 = dma.vmem_to_hbm [thread:$0]  %s6990_s13, 32, %s11615_s4, [#allocation3]   ;;  %v8695_v55 = vpop.f32.mrf.mxu1 }
0x2e1a   :  { %9238 = dma.done.wait [#allocation3], 32  }
0x2e1b   :  { %9239 = vsyncadd [#allocation3], 4294967264 }
0x2e1c   :  { %6996 = vsyncpa [#allocation3], 1 }

</bundles_post_ra>
